<compile_context>
chip_gen: v7x
topology: tpu7x:2x2x1
jax: 0.10.0
libtpu: 0.0.40
codegen_flags: <defaults>
</compile_context>

<pallas_src>
import functools

import jax
import jax.numpy as jnp
from jax.experimental import pallas as pl
from jax.experimental.pallas import tpu as pltpu

EPS = 1e-5
LANE = 128                       # channel dims padded to a multiple of this
ACC_TILE_ELEMS = 64 * 1024       # ~256 KiB f32 conv accumulator per row tile
EW_TILE_BYTES = 2 * 1024 * 1024  # target elementwise block size


def _round_up(x, m):
    return (x + m - 1) // m * m


def _largest_divisor_leq(n, cap):
    cap = int(max(1, min(n, cap)))
    for d in range(cap, 0, -1):
        if n % d == 0:
            return d
    return 1


@functools.lru_cache(maxsize=None)
def _vmem_limit_bytes():
    """Scoped-VMEM request derived per generation (v7x: 64 MiB/TC, else 128)."""
    try:
        cap = int(pltpu.get_tpu_info().vmem_capacity_bytes)
    except Exception:
        cap = 128 * 1024 * 1024
    # v7x (64 MiB): 48 MiB; v5e/v6e (128 MiB): 96 MiB.
    return max(32 * 1024 * 1024, min(cap - 16 * 1024 * 1024, 96 * 1024 * 1024))


def _conv_row_tile(ho, wo, cp):
    return _largest_divisor_leq(ho, max(1, ACC_TILE_ELEMS // (wo * cp)))


def _ew_row_tile(h, w, c, itemsize):
    return _largest_divisor_leq(h, max(1, EW_TILE_BYTES // (w * c * itemsize)))


# ---------------------------------------------------------------------------
# Pallas kernels
# ---------------------------------------------------------------------------
def _conv3x3_kernel(x_ref, w_ref, out_ref, sum_ref, sq_ref, *, stride):
    """3x3 conv (pad=1) row tile: im2col + one MXU matmul, bf16 in / f32 acc.

    x_ref  : stride 1 -> (1, Ho+2, Wo+2, Cin) whole zero-padded image
             stride 2 -> (4, Ho+1, Wo+1, Cin) space-to-depth phases
             (block index ignores the row-tile axis -> stays resident in VMEM)
    w_ref  : (9*Cin, Cp) bf16 im2col layout (Cin lane-aligned), or
             (9, Cin, Cp) bf16 per-tap layout (small / unaligned Cin fallback)
    out_ref: (1, th, Wo, Cp) bf16 row tile (Cp = Cout padded to 128 lanes)
    sum/sq : (1, 1, Cp) f32, resident across the row-tile axis; accumulate the
             per-channel sum / sum-of-squares for BatchNorm batch statistics.
    """
    r = pl.program_id(1)
    th, wo, cp = out_ref.shape[1], out_ref.shape[2], out_ref.shape[3]
    cin = x_ref.shape[3]

    taps = []
    for dy in range(3):
        for dx in range(3):
            if stride == 1:
                tap = x_ref[0, pl.ds(r * th + dy, th), dx:dx + wo, :]
            else:  # phase ph holds xpad[2a + dy%2, 2b + dx%2, :]
                ph = 2 * (dy % 2) + (dx % 2)
                tap = x_ref[ph, pl.ds(r * th + dy // 2, th),
                            dx // 2:dx // 2 + wo, :]
            taps.append(tap.reshape(th * wo, cin))

    if len(w_ref.shape) == 2:
        # im2col: single (M, 9*Cin) x (9*Cin, Cp) MXU matmul.
        patch = jnp.concatenate(taps, axis=1)
        acc = jnp.dot(patch, w_ref[...], preferred_element_type=jnp.float32)
    else:
        # TODO(synk): lane-unaligned Cin keeps per-tap dots for robustness.
        acc = jnp.zeros((th * wo, cp), jnp.float32)
        for t, tap in enumerate(taps):
            acc = acc + jnp.dot(tap, w_ref[t],
                                preferred_element_type=jnp.float32)

    out_ref[...] = acc.reshape(1, th, wo, cp).astype(out_ref.dtype)

    @pl.when(r == 0)
    def _():
        sum_ref[...] = jnp.zeros_like(sum_ref)
        sq_ref[...] = jnp.zeros_like(sq_ref)

    sum_ref[...] += jnp.sum(acc, axis=0).reshape(1, 1, cp)
    sq_ref[...] += jnp.sum(acc * acc, axis=0).reshape(1, 1, cp)


def _conv1x1_kernel(x_ref, w_ref, out_ref, sum_ref, sq_ref):
    """1x1 conv row tile (input already strided) + BN sum/sumsq emission."""
    r = pl.program_id(1)
    th, wo, cin = x_ref.shape[1], x_ref.shape[2], x_ref.shape[3]
    cp = w_ref.shape[1]
    y = jnp.dot(x_ref[0].reshape(th * wo, cin), w_ref[...],
                preferred_element_type=jnp.float32)
    out_ref[...] = y.reshape(1, th, wo, cp).astype(out_ref.dtype)

    @pl.when(r == 0)
    def _():
        sum_ref[...] = jnp.zeros_like(sum_ref)
        sq_ref[...] = jnp.zeros_like(sq_ref)

    sum_ref[...] += jnp.sum(y, axis=0).reshape(1, 1, cp)
    sq_ref[...] += jnp.sum(y * y, axis=0).reshape(1, 1, cp)


def _bn_act_kernel(y_ref, scale_ref, shift_ref, out_ref):
    """out = relu(y * scale + shift); scale/shift fold the BN batch stats."""
    cp = y_ref.shape[3]
    s = scale_ref[...].reshape(1, 1, 1, cp)
    b = shift_ref[...].reshape(1, 1, 1, cp)
    y = y_ref[...].astype(jnp.float32)
    out_ref[...] = jnp.maximum(y * s + b, 0.0).astype(out_ref.dtype)


def _residual_epilogue_kernel(y_ref, sc_ref, scale_ref, shift_ref,
                              sc_scale_ref, sc_shift_ref, out_ref):
    """out = relu(bn2(y) + bn_sc(shortcut)); both BNs folded to scale/shift."""
    cp = y_ref.shape[3]
    s2 = scale_ref[...].reshape(1, 1, 1, cp)
    b2 = shift_ref[...].reshape(1, 1, 1, cp)
    ss = sc_scale_ref[...].reshape(1, 1, 1, cp)
    bs = sc_shift_ref[...].reshape(1, 1, 1, cp)
    y = y_ref[...].astype(jnp.float32)
    sc = sc_ref[...].astype(jnp.float32)
    out_ref[...] = jnp.maximum(y * s2 + b2 + sc * ss + bs,
                               0.0).astype(out_ref.dtype)


# ---------------------------------------------------------------------------
# pallas_call wrappers
# ---------------------------------------------------------------------------
def conv3x3(x_in, w_packed, *, stride, n, ho, wo, cp):
    cin = x_in.shape[-1]
    assert w_packed.shape[-1] == cp and w_packed.size == 9 * cin * cp
    th = _conv_row_tile(ho, wo, cp)
    rt = ho // th

    if stride == 1:
        hp, wp = x_in.shape[1], x_in.shape[2]
        in_spec_x = pl.BlockSpec((1, hp, wp, cin), lambda b, r: (b, 0, 0, 0))
    else:  # (4*N, Ho+1, Wo+1, Cin) space-to-depth phase layout
        hh, wh = x_in.shape[1], x_in.shape[2]
        in_spec_x = pl.BlockSpec((4, hh, wh, cin), lambda b, r: (b, 0, 0, 0))
    w_spec = pl.BlockSpec(w_packed.shape, lambda b, r: (0,) * w_packed.ndim)

    flops = 2 * n * ho * wo * 9 * cin * cp
    bytes_accessed = (x_in.size * x_in.dtype.itemsize
                      + w_packed.size * w_packed.dtype.itemsize
                      + n * ho * wo * cp * 2 + 2 * n * cp * 4)
    return pl.pallas_call(
        functools.partial(_conv3x3_kernel, stride=stride),
        out_shape=(jax.ShapeDtypeStruct((n, ho, wo, cp), jnp.bfloat16),
                   jax.ShapeDtypeStruct((n, 1, cp), jnp.float32),
                   jax.ShapeDtypeStruct((n, 1, cp), jnp.float32)),
        grid=(n, rt),
        in_specs=[in_spec_x, w_spec],
        out_specs=(pl.BlockSpec((1, th, wo, cp), lambda b, r: (b, r, 0, 0)),
                   pl.BlockSpec((1, 1, cp), lambda b, r: (b, 0, 0)),
                   pl.BlockSpec((1, 1, cp), lambda b, r: (b, 0, 0))),
        compiler_params=pltpu.CompilerParams(
            dimension_semantics=("parallel", "arbitrary"),
            vmem_limit_bytes=_vmem_limit_bytes()),
        cost_estimate=pl.CostEstimate(flops=flops, transcendentals=0,
                                      bytes_accessed=bytes_accessed),
    )(x_in, w_packed)


def conv1x1(x, w2d, *, cp):
    n, ho, wo, cin = x.shape
    assert w2d.shape == (cin, cp)
    th = _conv_row_tile(ho, wo, cp)
    rt = ho // th
    flops = 2 * n * ho * wo * cin * cp
    bytes_accessed = (x.size * x.dtype.itemsize + w2d.size * w2d.dtype.itemsize
                      + n * ho * wo * cp * 2 + 2 * n * cp * 4)
    return pl.pallas_call(
        _conv1x1_kernel,
        out_shape=(jax.ShapeDtypeStruct((n, ho, wo, cp), jnp.bfloat16),
                   jax.ShapeDtypeStruct((n, 1, cp), jnp.float32),
                   jax.ShapeDtypeStruct((n, 1, cp), jnp.float32)),
        grid=(n, rt),
        in_specs=[pl.BlockSpec((1, th, wo, cin), lambda b, r: (b, r, 0, 0)),
                  pl.BlockSpec((cin, cp), lambda b, r: (0, 0))],
        out_specs=(pl.BlockSpec((1, th, wo, cp), lambda b, r: (b, r, 0, 0)),
                   pl.BlockSpec((1, 1, cp), lambda b, r: (b, 0, 0)),
                   pl.BlockSpec((1, 1, cp), lambda b, r: (b, 0, 0))),
        compiler_params=pltpu.CompilerParams(
            dimension_semantics=("parallel", "arbitrary"),
            vmem_limit_bytes=_vmem_limit_bytes()),
        cost_estimate=pl.CostEstimate(flops=flops, transcendentals=0,
                                      bytes_accessed=bytes_accessed),
    )(x, w2d)


def bn_act(y, scale, shift, *, out_dtype):
    """relu(y*scale + shift), tiled over (batch, row-tiles); lane-dense C."""
    n, h, w, c = y.shape
    th = _ew_row_tile(h, w, c, y.dtype.itemsize)
    tile = pl.BlockSpec((1, th, w, c), lambda b, r: (b, r, 0, 0))
    vec = pl.BlockSpec((1, c), lambda b, r: (0, 0))
    return pl.pallas_call(
        _bn_act_kernel,
        out_shape=jax.ShapeDtypeStruct((n, h, w, c), out_dtype),
        grid=(n, h // th),
        in_specs=[tile, vec, vec],
        out_specs=tile,
        compiler_params=pltpu.CompilerParams(
            dimension_semantics=("parallel", "parallel"),
            vmem_limit_bytes=_vmem_limit_bytes()),
    )(y, scale, shift)


def residual_epilogue(y, sc, scale2, shift2, sc_scale, sc_shift):
    """relu(bn2(y) + bn_sc(sc)), tiled over (batch, row-tiles)."""
    n, h, w, c = y.shape
    th = _ew_row_tile(h, w, c, 4)   # size by the f32 output tile
    tile = pl.BlockSpec((1, th, w, c), lambda b, r: (b, r, 0, 0))
    vec = pl.BlockSpec((1, c), lambda b, r: (0, 0))
    return pl.pallas_call(
        _residual_epilogue_kernel,
        out_shape=jax.ShapeDtypeStruct((n, h, w, c), jnp.float32),
        grid=(n, h // th),
        in_specs=[tile, tile, vec, vec, vec, vec],
        out_specs=tile,
        compiler_params=pltpu.CompilerParams(
            dimension_semantics=("parallel", "parallel"),
            vmem_limit_bytes=_vmem_limit_bytes()),
    )(y, sc, scale2, shift2, sc_scale, sc_shift)


# ---------------------------------------------------------------------------
# BasicBlock forward (layout glue in JAX, compute in Pallas)
# ---------------------------------------------------------------------------
def _pack_w3x3(w_hwio, cp_in, cp_out):
    """(3,3,Cin,Cout) -> lane-padded bf16 weight in im2col or per-tap layout."""
    kh, kw, cin, cout = w_hwio.shape
    w = jnp.pad(w_hwio, ((0, 0), (0, 0), (0, cp_in - cin), (0, cp_out - cout)))
    w = w.astype(jnp.bfloat16)
    if cp_in % LANE == 0:
        return w.reshape(kh * kw * cp_in, cp_out)      # im2col (tap-major) rows
    return w.reshape(kh * kw, cp_in, cp_out)           # per-tap fallback layout


def _pad_vec(v, cp):
    return jnp.pad(v.astype(jnp.float32), ((0, 0), (0, cp - v.shape[-1])))


def _bn_scale_shift(sums, sqs, count, gamma, beta):
    """Fold training-mode (batch-stat) BN into a per-channel scale/shift."""
    tot = jnp.sum(sums, axis=0).reshape(1, -1)
    tot2 = jnp.sum(sqs, axis=0).reshape(1, -1)
    mean = tot / count
    # clamp: E[x^2]-E[x]^2 in f32 can go slightly negative by cancellation.
    var = jnp.maximum(tot2 / count - mean * mean, 0.0)
    scale = gamma * jax.lax.rsqrt(var + EPS)
    shift = beta - mean * scale
    return scale, shift


def basic_block_forward(x_nchw, params, *, in_planes, planes, stride=1):
    assert stride in (1, 2), "BasicBlock kernels support stride 1 or 2"
    x = jnp.transpose(x_nchw, (0, 2, 3, 1))            # NCHW -> NHWC
    N, H, W, _ = x.shape
    assert H % stride == 0 and W % stride == 0
    Ho, Wo = H // stride, W // stride
    cnt = N * Ho * Wo
    Cp = _round_up(planes, LANE)                        # lane-dense channel pad

    x_bf = x.astype(jnp.bfloat16)
    # TODO(synk): fold the 1-pixel halo + stride-2 phase split into the conv
    #             kernels' DMA instead of these wrapper-side layout passes.
    xpad = jnp.pad(x_bf, ((0, 0), (1, 1), (1, 1), (0, 0)))
    if stride == 2:
        Hh, Wh = Ho + 1, Wo + 1
        x_c1 = (xpad.reshape(N, Hh, 2, Wh, 2, in_planes)
                .transpose(0, 2, 4, 1, 3, 5)
                .reshape(N * 4, Hh, Wh, in_planes))
    else:
        x_c1 = xpad

    # conv1 (+ BN batch stats for free) -> bn1 + relu as folded scale/shift.
    w1 = _pack_w3x3(params["conv1_w"], in_planes, Cp)
    c1, s1, q1 = conv3x3(x_c1, w1, stride=stride, n=N, ho=Ho, wo=Wo, cp=Cp)
    scale1, shift1 = _bn_scale_shift(
        s1, q1, cnt, _pad_vec(params["bn1_gamma"], Cp),
        _pad_vec(params["bn1_beta"], Cp))
    o1 = bn_act(c1, scale1, shift1, out_dtype=jnp.bfloat16)   # bf16 for conv2

    # conv2 consumes the channel-padded activation; its weight has zero rows
    # for the padded input channels (and zero cols for padded output channels).
    o1pad = jnp.pad(o1, ((0, 0), (1, 1), (1, 1), (0, 0)))
    w2 = _pack_w3x3(params["conv2_w"], Cp, Cp)
    c2, s2, q2 = conv3x3(o1pad, w2, stride=1, n=N, ho=Ho, wo=Wo, cp=Cp)
    scale2, shift2 = _bn_scale_shift(
        s2, q2, cnt, _pad_vec(params["bn2_gamma"], Cp),
        _pad_vec(params["bn2_beta"], Cp))

    # Shortcut: identity (bf16, channel-padded) or 1x1 conv + folded BN.
    if stride != 1 or in_planes != planes:
        xs = x_bf[:, ::stride, ::stride, :]
        wsc = jnp.pad(params["sc_conv_w"],
                      ((0, 0), (0, Cp - planes))).astype(jnp.bfloat16)
        sc, ss, qs = conv1x1(xs, wsc, cp=Cp)
        sc_scale, sc_shift = _bn_scale_shift(
            ss, qs, cnt, _pad_vec(params["sc_bn_gamma"], Cp),
            _pad_vec(params["sc_bn_beta"], Cp))
    else:
        sc = jnp.pad(x_bf, ((0, 0), (0, 0), (0, 0), (0, Cp - in_planes)))
        sc_scale = jnp.ones((1, Cp), jnp.float32)
        sc_shift = jnp.zeros((1, Cp), jnp.float32)

    # relu(bn2(conv2) + shortcut) in one tiled epilogue pass.
    out = residual_epilogue(c2, sc, scale2, shift2, sc_scale, sc_shift)
    out = out[..., :planes]                              # drop lane padding
    return jnp.transpose(out, (0, 3, 1, 2))              # NHWC -> NCHW


def init_params(key, in_planes, planes, stride):
    """Deterministic parameter init (PyTorch-default-like, HWIO layout)."""
    k1, k2, k3 = jax.random.split(key, 3)

    def conv_init(k, shape, fan_in):
        bound = (1.0 / fan_in) ** 0.5
        return jax.random.uniform(k, shape, jnp.float32, -bound, bound)

    p = {
        "conv1_w": conv_init(k1, (3, 3, in_planes, planes), 9 * in_planes),
        "bn1_gamma": jnp.ones((1, planes), jnp.float32),
        "bn1_beta": jnp.zeros((1, planes), jnp.float32),
        "conv2_w": conv_init(k2, (3, 3, planes, planes), 9 * planes),
        "bn2_gamma": jnp.ones((1, planes), jnp.float32),
        "bn2_beta": jnp.zeros((1, planes), jnp.float32),
    }
    if stride != 1 or in_planes != planes:
        p["sc_conv_w"] = conv_init(k3, (in_planes, planes), in_planes)
        p["sc_bn_gamma"] = jnp.ones((1, planes), jnp.float32)
        p["sc_bn_beta"] = jnp.zeros((1, planes), jnp.float32)
    return p


# ---------------------------------------------------------------------------
# Pure-JAX reference (correctness check only; pure f32 math)
# ---------------------------------------------------------------------------
def reference_forward(x_nchw, params, *, in_planes, planes, stride=1):
    def conv3(x, w, s):
        return jax.lax.conv_general_dilated(
            x, w, (s, s), ((1, 1), (1, 1)),
            dimension_numbers=("NHWC", "HWIO", "NHWC"))

    def bn(y, g, b):
        mean = jnp.mean(y, axis=(0, 1, 2), keepdims=True)
        var = jnp.mean((y - mean) ** 2, axis=(0, 1, 2), keepdims=True)
        return (y - mean) * jax.lax.rsqrt(var + EPS) * g.reshape(1, 1, 1, -1) \
            + b.reshape(1, 1, 1, -1)

    x = jnp.transpose(x_nchw, (0, 2, 3, 1)).astype(jnp.float32)
    o = jax.nn.relu(bn(conv3(x, params["conv1_w"], stride),
                       params["bn1_gamma"], params["bn1_beta"]))
    o = bn(conv3(o, params["conv2_w"], 1),
           params["bn2_gamma"], params["bn2_beta"])
    if stride != 1 or in_planes != planes:
        w = params["sc_conv_w"].reshape(1, 1, in_planes, planes)
        sc = jax.lax.conv_general_dilated(
            x, w, (stride, stride), "VALID",
            dimension_numbers=("NHWC", "HWIO", "NHWC"))
        sc = bn(sc, params["sc_bn_gamma"], params["sc_bn_beta"])
    else:
        sc = x
    return jnp.transpose(jax.nn.relu(o + sc), (0, 3, 1, 2))


if __name__ == "__main__":
    key = jax.random.PRNGKey(0)
    kx, kp = jax.random.split(key)

    planes = 8
    N, H, W = 2, 16, 16
    # (in_planes, stride): conv-shortcut at both strides + identity shortcut.
    configs = [(4, 1), (4, 2), (8, 1)]

    ok = True
    for in_planes, stride in configs:
        x = jax.random.normal(kx, (N, in_planes, H, W), jnp.float32)
        params = init_params(kp, in_planes, planes, stride)
        fwd = jax.jit(functools.partial(basic_block_forward,
                                        in_planes=in_planes, planes=planes,
                                        stride=stride))
        out = jax.block_until_ready(fwd(x, params))
        ref = reference_forward(x, params, in_planes=in_planes, planes=planes,
                                stride=stride)
        # bf16 MXU inputs + bf16 activation storage vs. the pure-f32 reference.
        ok = ok and bool(jnp.allclose(out, ref, rtol=1e-1, atol=1e-1))

    print("KERNEL_OK" if ok else "KERNEL_MISMATCH")
</pallas_src>

<mosaic_0001>
module attributes {stable_mosaic.version = 11 : i64} {
  func.func @_conv3x3_kernel(%arg0: i32, %arg1: i32, %arg2: memref<1x18x18x4xbf16, #tpu.memory_space<vmem>>, %arg3: memref<9x4x128xbf16, #tpu.memory_space<vmem>>, %arg4: memref<1x16x16x128xbf16, #tpu.memory_space<vmem>>, %arg5: memref<1x1x128xf32, #tpu.memory_space<vmem>>, %arg6: memref<1x1x128xf32, #tpu.memory_space<vmem>>) attributes {dimension_semantics = [#tpu.dimension_semantics<parallel>, #tpu.dimension_semantics<arbitrary>], iteration_bounds = array<i64: 2, 1>, scalar_prefetch = 0 : i64, scratch_operands = 0 : i64, tpu.core_type = #tpu.core_type<tc>, window_params = [{transform_indices = @transform_0, window_bounds = array<i64: 1, 18, 18, 4>}, {pipeline_mode = #tpu.pipeline_mode<synchronous>, transform_indices = @transform_1, window_bounds = array<i64: 9, 4, 128>}, {transform_indices = @transform_2, window_bounds = array<i64: 1, 16, 16, 128>}, {transform_indices = @transform_3, window_bounds = array<i64: 1, 1, 128>}, {transform_indices = @transform_4, window_bounds = array<i64: 1, 1, 128>}]} {
    %c16_i32 = arith.constant 16 : i32
    %0 = arith.muli %arg1, %c16_i32 : i32
    %c0_i32 = arith.constant 0 : i32
    %1 = arith.addi %0, %c0_i32 : i32
    %c0 = arith.constant 0 : index
    %2 = arith.index_cast %1 : i32 to index
    %c0_0 = arith.constant 0 : index
    %c0_1 = arith.constant 0 : index
    %3 = vector.load %arg2[%c0, %2, %c0_0, %c0_1] : memref<1x18x18x4xbf16, #tpu.memory_space<vmem>>, vector<1x16x16x4xbf16>
    %4 = vector.shape_cast %3 : vector<1x16x16x4xbf16> to vector<16x16x4xbf16>
    %5 = vector.shape_cast %4 : vector<16x16x4xbf16> to vector<256x4xbf16>
    %c16_i32_2 = arith.constant 16 : i32
    %6 = arith.muli %arg1, %c16_i32_2 : i32
    %c0_i32_3 = arith.constant 0 : i32
    %7 = arith.addi %6, %c0_i32_3 : i32
    %c0_4 = arith.constant 0 : index
    %8 = arith.index_cast %7 : i32 to index
    %c1 = arith.constant 1 : index
    %c0_5 = arith.constant 0 : index
    %9 = vector.load %arg2[%c0_4, %8, %c1, %c0_5] : memref<1x18x18x4xbf16, #tpu.memory_space<vmem>>, vector<1x16x16x4xbf16>
    %10 = vector.shape_cast %9 : vector<1x16x16x4xbf16> to vector<16x16x4xbf16>
    %11 = vector.shape_cast %10 : vector<16x16x4xbf16> to vector<256x4xbf16>
    %c16_i32_6 = arith.constant 16 : i32
    %12 = arith.muli %arg1, %c16_i32_6 : i32
    %c0_i32_7 = arith.constant 0 : i32
    %13 = arith.addi %12, %c0_i32_7 : i32
    %c0_8 = arith.constant 0 : index
    %14 = arith.index_cast %13 : i32 to index
    %c2 = arith.constant 2 : index
    %c0_9 = arith.constant 0 : index
    %15 = vector.load %arg2[%c0_8, %14, %c2, %c0_9] : memref<1x18x18x4xbf16, #tpu.memory_space<vmem>>, vector<1x16x16x4xbf16>
    %16 = vector.shape_cast %15 : vector<1x16x16x4xbf16> to vector<16x16x4xbf16>
    %17 = vector.shape_cast %16 : vector<16x16x4xbf16> to vector<256x4xbf16>
    %c16_i32_10 = arith.constant 16 : i32
    %18 = arith.muli %arg1, %c16_i32_10 : i32
    %c1_i32 = arith.constant 1 : i32
    %19 = arith.addi %18, %c1_i32 : i32
    %c0_11 = arith.constant 0 : index
    %20 = arith.index_cast %19 : i32 to index
    %c0_12 = arith.constant 0 : index
    %c0_13 = arith.constant 0 : index
    %21 = vector.load %arg2[%c0_11, %20, %c0_12, %c0_13] : memref<1x18x18x4xbf16, #tpu.memory_space<vmem>>, vector<1x16x16x4xbf16>
    %22 = vector.shape_cast %21 : vector<1x16x16x4xbf16> to vector<16x16x4xbf16>
    %23 = vector.shape_cast %22 : vector<16x16x4xbf16> to vector<256x4xbf16>
    %c16_i32_14 = arith.constant 16 : i32
    %24 = arith.muli %arg1, %c16_i32_14 : i32
    %c1_i32_15 = arith.constant 1 : i32
    %25 = arith.addi %24, %c1_i32_15 : i32
    %c0_16 = arith.constant 0 : index
    %26 = arith.index_cast %25 : i32 to index
    %c1_17 = arith.constant 1 : index
    %c0_18 = arith.constant 0 : index
    %27 = vector.load %arg2[%c0_16, %26, %c1_17, %c0_18] : memref<1x18x18x4xbf16, #tpu.memory_space<vmem>>, vector<1x16x16x4xbf16>
    %28 = vector.shape_cast %27 : vector<1x16x16x4xbf16> to vector<16x16x4xbf16>
    %29 = vector.shape_cast %28 : vector<16x16x4xbf16> to vector<256x4xbf16>
    %c16_i32_19 = arith.constant 16 : i32
    %30 = arith.muli %arg1, %c16_i32_19 : i32
    %c1_i32_20 = arith.constant 1 : i32
    %31 = arith.addi %30, %c1_i32_20 : i32
    %c0_21 = arith.constant 0 : index
    %32 = arith.index_cast %31 : i32 to index
    %c2_22 = arith.constant 2 : index
    %c0_23 = arith.constant 0 : index
    %33 = vector.load %arg2[%c0_21, %32, %c2_22, %c0_23] : memref<1x18x18x4xbf16, #tpu.memory_space<vmem>>, vector<1x16x16x4xbf16>
    %34 = vector.shape_cast %33 : vector<1x16x16x4xbf16> to vector<16x16x4xbf16>
    %35 = vector.shape_cast %34 : vector<16x16x4xbf16> to vector<256x4xbf16>
    %c16_i32_24 = arith.constant 16 : i32
    %36 = arith.muli %arg1, %c16_i32_24 : i32
    %c2_i32 = arith.constant 2 : i32
    %37 = arith.addi %36, %c2_i32 : i32
    %c0_25 = arith.constant 0 : index
    %38 = arith.index_cast %37 : i32 to index
    %c0_26 = arith.constant 0 : index
    %c0_27 = arith.constant 0 : index
    %39 = vector.load %arg2[%c0_25, %38, %c0_26, %c0_27] : memref<1x18x18x4xbf16, #tpu.memory_space<vmem>>, vector<1x16x16x4xbf16>
    %40 = vector.shape_cast %39 : vector<1x16x16x4xbf16> to vector<16x16x4xbf16>
    %41 = vector.shape_cast %40 : vector<16x16x4xbf16> to vector<256x4xbf16>
    %c16_i32_28 = arith.constant 16 : i32
    %42 = arith.muli %arg1, %c16_i32_28 : i32
    %c2_i32_29 = arith.constant 2 : i32
    %43 = arith.addi %42, %c2_i32_29 : i32
    %c0_30 = arith.constant 0 : index
    %44 = arith.index_cast %43 : i32 to index
    %c1_31 = arith.constant 1 : index
    %c0_32 = arith.constant 0 : index
    %45 = vector.load %arg2[%c0_30, %44, %c1_31, %c0_32] : memref<1x18x18x4xbf16, #tpu.memory_space<vmem>>, vector<1x16x16x4xbf16>
    %46 = vector.shape_cast %45 : vector<1x16x16x4xbf16> to vector<16x16x4xbf16>
    %47 = vector.shape_cast %46 : vector<16x16x4xbf16> to vector<256x4xbf16>
    %c16_i32_33 = arith.constant 16 : i32
    %48 = arith.muli %arg1, %c16_i32_33 : i32
    %c2_i32_34 = arith.constant 2 : i32
    %49 = arith.addi %48, %c2_i32_34 : i32
    %c0_35 = arith.constant 0 : index
    %50 = arith.index_cast %49 : i32 to index
    %c2_36 = arith.constant 2 : index
    %c0_37 = arith.constant 0 : index
    %51 = vector.load %arg2[%c0_35, %50, %c2_36, %c0_37] : memref<1x18x18x4xbf16, #tpu.memory_space<vmem>>, vector<1x16x16x4xbf16>
    %52 = vector.shape_cast %51 : vector<1x16x16x4xbf16> to vector<16x16x4xbf16>
    %53 = vector.shape_cast %52 : vector<16x16x4xbf16> to vector<256x4xbf16>
    %cst = arith.constant 0.000000e+00 : f32
    %54 = vector.broadcast %cst : f32 to vector<256x128xf32>
    %c0_38 = arith.constant 0 : index
    %c0_39 = arith.constant 0 : index
    %c0_40 = arith.constant 0 : index
    %55 = vector.load %arg3[%c0_38, %c0_39, %c0_40] : memref<9x4x128xbf16, #tpu.memory_space<vmem>>, vector<1x4x128xbf16>
    %56 = vector.shape_cast %55 : vector<1x4x128xbf16> to vector<4x128xbf16>
    %cst_41 = arith.constant dense<0.000000e+00> : vector<256x128xf32>
    %57 = tpu.matmul %5, %56, %cst_41 {dimension_numbers = #tpu.dot_dimension_numbers<[1], [0], [0], [1], [0, 0, 1, 1], [], []>} : vector<256x4xbf16>, vector<4x128xbf16>, vector<256x128xf32> -> vector<256x128xf32>
    %58 = arith.addf %54, %57 : vector<256x128xf32>
    %c1_42 = arith.constant 1 : index
    %c0_43 = arith.constant 0 : index
    %c0_44 = arith.constant 0 : index
    %59 = vector.load %arg3[%c1_42, %c0_43, %c0_44] : memref<9x4x128xbf16, #tpu.memory_space<vmem>>, vector<1x4x128xbf16>
    %60 = vector.shape_cast %59 : vector<1x4x128xbf16> to vector<4x128xbf16>
    %cst_45 = arith.constant dense<0.000000e+00> : vector<256x128xf32>
    %61 = tpu.matmul %11, %60, %cst_45 {dimension_numbers = #tpu.dot_dimension_numbers<[1], [0], [0], [1], [0, 0, 1, 1], [], []>} : vector<256x4xbf16>, vector<4x128xbf16>, vector<256x128xf32> -> vector<256x128xf32>
    %62 = arith.addf %58, %61 : vector<256x128xf32>
    %c2_46 = arith.constant 2 : index
    %c0_47 = arith.constant 0 : index
    %c0_48 = arith.constant 0 : index
    %63 = vector.load %arg3[%c2_46, %c0_47, %c0_48] : memref<9x4x128xbf16, #tpu.memory_space<vmem>>, vector<1x4x128xbf16>
    %64 = vector.shape_cast %63 : vector<1x4x128xbf16> to vector<4x128xbf16>
    %cst_49 = arith.constant dense<0.000000e+00> : vector<256x128xf32>
    %65 = tpu.matmul %17, %64, %cst_49 {dimension_numbers = #tpu.dot_dimension_numbers<[1], [0], [0], [1], [0, 0, 1, 1], [], []>} : vector<256x4xbf16>, vector<4x128xbf16>, vector<256x128xf32> -> vector<256x128xf32>
    %66 = arith.addf %62, %65 : vector<256x128xf32>
    %c3 = arith.constant 3 : index
    %c0_50 = arith.constant 0 : index
    %c0_51 = arith.constant 0 : index
    %67 = vector.load %arg3[%c3, %c0_50, %c0_51] : memref<9x4x128xbf16, #tpu.memory_space<vmem>>, vector<1x4x128xbf16>
    %68 = vector.shape_cast %67 : vector<1x4x128xbf16> to vector<4x128xbf16>
    %cst_52 = arith.constant dense<0.000000e+00> : vector<256x128xf32>
    %69 = tpu.matmul %23, %68, %cst_52 {dimension_numbers = #tpu.dot_dimension_numbers<[1], [0], [0], [1], [0, 0, 1, 1], [], []>} : vector<256x4xbf16>, vector<4x128xbf16>, vector<256x128xf32> -> vector<256x128xf32>
    %70 = arith.addf %66, %69 : vector<256x128xf32>
    %c4 = arith.constant 4 : index
    %c0_53 = arith.constant 0 : index
    %c0_54 = arith.constant 0 : index
    %71 = vector.load %arg3[%c4, %c0_53, %c0_54] : memref<9x4x128xbf16, #tpu.memory_space<vmem>>, vector<1x4x128xbf16>
    %72 = vector.shape_cast %71 : vector<1x4x128xbf16> to vector<4x128xbf16>
    %cst_55 = arith.constant dense<0.000000e+00> : vector<256x128xf32>
    %73 = tpu.matmul %29, %72, %cst_55 {dimension_numbers = #tpu.dot_dimension_numbers<[1], [0], [0], [1], [0, 0, 1, 1], [], []>} : vector<256x4xbf16>, vector<4x128xbf16>, vector<256x128xf32> -> vector<256x128xf32>
    %74 = arith.addf %70, %73 : vector<256x128xf32>
    %c5 = arith.constant 5 : index
    %c0_56 = arith.constant 0 : index
    %c0_57 = arith.constant 0 : index
    %75 = vector.load %arg3[%c5, %c0_56, %c0_57] : memref<9x4x128xbf16, #tpu.memory_space<vmem>>, vector<1x4x128xbf16>
    %76 = vector.shape_cast %75 : vector<1x4x128xbf16> to vector<4x128xbf16>
    %cst_58 = arith.constant dense<0.000000e+00> : vector<256x128xf32>
    %77 = tpu.matmul %35, %76, %cst_58 {dimension_numbers = #tpu.dot_dimension_numbers<[1], [0], [0], [1], [0, 0, 1, 1], [], []>} : vector<256x4xbf16>, vector<4x128xbf16>, vector<256x128xf32> -> vector<256x128xf32>
    %78 = arith.addf %74, %77 : vector<256x128xf32>
    %c6 = arith.constant 6 : index
    %c0_59 = arith.constant 0 : index
    %c0_60 = arith.constant 0 : index
    %79 = vector.load %arg3[%c6, %c0_59, %c0_60] : memref<9x4x128xbf16, #tpu.memory_space<vmem>>, vector<1x4x128xbf16>
    %80 = vector.shape_cast %79 : vector<1x4x128xbf16> to vector<4x128xbf16>
    %cst_61 = arith.constant dense<0.000000e+00> : vector<256x128xf32>
    %81 = tpu.matmul %41, %80, %cst_61 {dimension_numbers = #tpu.dot_dimension_numbers<[1], [0], [0], [1], [0, 0, 1, 1], [], []>} : vector<256x4xbf16>, vector<4x128xbf16>, vector<256x128xf32> -> vector<256x128xf32>
    %82 = arith.addf %78, %81 : vector<256x128xf32>
    %c7 = arith.constant 7 : index
    %c0_62 = arith.constant 0 : index
    %c0_63 = arith.constant 0 : index
    %83 = vector.load %arg3[%c7, %c0_62, %c0_63] : memref<9x4x128xbf16, #tpu.memory_space<vmem>>, vector<1x4x128xbf16>
    %84 = vector.shape_cast %83 : vector<1x4x128xbf16> to vector<4x128xbf16>
    %cst_64 = arith.constant dense<0.000000e+00> : vector<256x128xf32>
    %85 = tpu.matmul %47, %84, %cst_64 {dimension_numbers = #tpu.dot_dimension_numbers<[1], [0], [0], [1], [0, 0, 1, 1], [], []>} : vector<256x4xbf16>, vector<4x128xbf16>, vector<256x128xf32> -> vector<256x128xf32>
    %86 = arith.addf %82, %85 : vector<256x128xf32>
    %c8 = arith.constant 8 : index
    %c0_65 = arith.constant 0 : index
    %c0_66 = arith.constant 0 : index
    %87 = vector.load %arg3[%c8, %c0_65, %c0_66] : memref<9x4x128xbf16, #tpu.memory_space<vmem>>, vector<1x4x128xbf16>
    %88 = vector.shape_cast %87 : vector<1x4x128xbf16> to vector<4x128xbf16>
    %cst_67 = arith.constant dense<0.000000e+00> : vector<256x128xf32>
    %89 = tpu.matmul %53, %88, %cst_67 {dimension_numbers = #tpu.dot_dimension_numbers<[1], [0], [0], [1], [0, 0, 1, 1], [], []>} : vector<256x4xbf16>, vector<4x128xbf16>, vector<256x128xf32> -> vector<256x128xf32>
    %90 = arith.addf %86, %89 : vector<256x128xf32>
    %91 = vector.shape_cast %90 : vector<256x128xf32> to vector<1x16x16x128xf32>
    %92 = arith.truncf %91 : vector<1x16x16x128xf32> to vector<1x16x16x128xbf16>
    %c0_68 = arith.constant 0 : index
    %c0_69 = arith.constant 0 : index
    %c0_70 = arith.constant 0 : index
    %c0_71 = arith.constant 0 : index
    %93 = vector.load %arg4[%c0_68, %c0_69, %c0_70, %c0_71] : memref<1x16x16x128xbf16, #tpu.memory_space<vmem>>, vector<1x16x16x128xbf16>
    tpu.vector_store %arg4[%c0_68, %c0_69, %c0_70, %c0_71], %92 {strides = array<i32>} : memref<1x16x16x128xbf16, #tpu.memory_space<vmem>>, vector<1x16x16x128xbf16>,
    %c0_i32_72 = arith.constant 0 : i32
    %94 = arith.cmpi eq, %arg1, %c0_i32_72 : i32
    %95 = arith.extui %94 : i1 to i32
    %c0_i32_73 = arith.constant 0 : i32
    %96 = arith.cmpi ne, %95, %c0_i32_73 : i32
    scf.if %96 {
      %cst_88 = arith.constant 0.000000e+00 : f32
      %108 = vector.broadcast %cst_88 : f32 to vector<1x1x128xf32>
      %c0_89 = arith.constant 0 : index
      %c0_90 = arith.constant 0 : index
      %c0_91 = arith.constant 0 : index
      %109 = vector.load %arg5[%c0_89, %c0_90, %c0_91] : memref<1x1x128xf32, #tpu.memory_space<vmem>>, vector<1x1x128xf32>
      tpu.vector_store %arg5[%c0_89, %c0_90, %c0_91], %108 {strides = array<i32>} : memref<1x1x128xf32, #tpu.memory_space<vmem>>, vector<1x1x128xf32>,
      %cst_92 = arith.constant 0.000000e+00 : f32
      %110 = vector.broadcast %cst_92 : f32 to vector<1x1x128xf32>
      %c0_93 = arith.constant 0 : index
      %c0_94 = arith.constant 0 : index
      %c0_95 = arith.constant 0 : index
      %111 = vector.load %arg6[%c0_93, %c0_94, %c0_95] : memref<1x1x128xf32, #tpu.memory_space<vmem>>, vector<1x1x128xf32>
      tpu.vector_store %arg6[%c0_93, %c0_94, %c0_95], %110 {strides = array<i32>} : memref<1x1x128xf32, #tpu.memory_space<vmem>>, vector<1x1x128xf32>,
    } else {
    }
    %c0_74 = arith.constant 0 : index
    %c0_75 = arith.constant 0 : index
    %c0_76 = arith.constant 0 : index
    %97 = vector.load %arg5[%c0_74, %c0_75, %c0_76] : memref<1x1x128xf32, #tpu.memory_space<vmem>>, vector<1x1x128xf32>
    %cst_77 = arith.constant dense<0.000000e+00> : vector<128xf32>
    %98 = vector.multi_reduction <add>, %90, %cst_77 [0] : vector<256x128xf32> to vector<128xf32>
    %99 = vector.shape_cast %98 : vector<128xf32> to vector<1x1x128xf32>
    %100 = arith.addf %97, %99 : vector<1x1x128xf32>
    %c0_78 = arith.constant 0 : index
    %c0_79 = arith.constant 0 : index
    %c0_80 = arith.constant 0 : index
    %101 = vector.load %arg5[%c0_78, %c0_79, %c0_80] : memref<1x1x128xf32, #tpu.memory_space<vmem>>, vector<1x1x128xf32>
    tpu.vector_store %arg5[%c0_78, %c0_79, %c0_80], %100 {strides = array<i32>} : memref<1x1x128xf32, #tpu.memory_space<vmem>>, vector<1x1x128xf32>,
    %c0_81 = arith.constant 0 : index
    %c0_82 = arith.constant 0 : index
    %c0_83 = arith.constant 0 : index
    %102 = vector.load %arg6[%c0_81, %c0_82, %c0_83] : memref<1x1x128xf32, #tpu.memory_space<vmem>>, vector<1x1x128xf32>
    %103 = arith.mulf %90, %90 : vector<256x128xf32>
    %cst_84 = arith.constant dense<0.000000e+00> : vector<128xf32>
    %104 = vector.multi_reduction <add>, %103, %cst_84 [0] : vector<256x128xf32> to vector<128xf32>
    %105 = vector.shape_cast %104 : vector<128xf32> to vector<1x1x128xf32>
    %106 = arith.addf %102, %105 : vector<1x1x128xf32>
    %c0_85 = arith.constant 0 : index
    %c0_86 = arith.constant 0 : index
    %c0_87 = arith.constant 0 : index
    %107 = vector.load %arg6[%c0_85, %c0_86, %c0_87] : memref<1x1x128xf32, #tpu.memory_space<vmem>>, vector<1x1x128xf32>
    tpu.vector_store %arg6[%c0_85, %c0_86, %c0_87], %106 {strides = array<i32>} : memref<1x1x128xf32, #tpu.memory_space<vmem>>, vector<1x1x128xf32>,
    return
  }
  func.func @transform_0(%arg0: i32, %arg1: i32) -> (i32, i32, i32, i32) {
    %c0_i32 = arith.constant 0 : i32
    %c0_i32_0 = arith.constant 0 : i32
    %c0_i32_1 = arith.constant 0 : i32
    %c0_i32_2 = arith.constant 0 : i32
    return %arg0, %c0_i32, %c0_i32_0, %c0_i32_1 : i32, i32, i32, i32
  }
  func.func @transform_1(%arg0: i32, %arg1: i32) -> (i32, i32, i32) {
    %c0_i32 = arith.constant 0 : i32
    %c0_i32_0 = arith.constant 0 : i32
    %c0_i32_1 = arith.constant 0 : i32
    %c0_i32_2 = arith.constant 0 : i32
    return %c0_i32, %c0_i32_0, %c0_i32_1 : i32, i32, i32
  }
  func.func @transform_2(%arg0: i32, %arg1: i32) -> (i32, i32, i32, i32) {
    %c0_i32 = arith.constant 0 : i32
    %c0_i32_0 = arith.constant 0 : i32
    %c0_i32_1 = arith.constant 0 : i32
    return %arg0, %arg1, %c0_i32, %c0_i32_0 : i32, i32, i32, i32
  }
  func.func @transform_3(%arg0: i32, %arg1: i32) -> (i32, i32, i32) {
    %c0_i32 = arith.constant 0 : i32
    %c0_i32_0 = arith.constant 0 : i32
    %c0_i32_1 = arith.constant 0 : i32
    return %arg0, %c0_i32, %c0_i32_0 : i32, i32, i32
  }
  func.func @transform_4(%arg0: i32, %arg1: i32) -> (i32, i32, i32) {
    %c0_i32 = arith.constant 0 : i32
    %c0_i32_0 = arith.constant 0 : i32
    %c0_i32_1 = arith.constant 0 : i32
    return %arg0, %c0_i32, %c0_i32_0 : i32, i32, i32
  }
}

module attributes {stable_mosaic.version = 11 : i64} {
  func.func @_bn_act_kernel(%arg0: i32, %arg1: i32, %arg2: memref<1x16x16x128xbf16, #tpu.memory_space<vmem>>, %arg3: memref<1x128xf32, #tpu.memory_space<vmem>>, %arg4: memref<1x128xf32, #tpu.memory_space<vmem>>, %arg5: memref<1x16x16x128xbf16, #tpu.memory_space<vmem>>) attributes {dimension_semantics = [#tpu.dimension_semantics<parallel>, #tpu.dimension_semantics<parallel>], iteration_bounds = array<i64: 2, 1>, scalar_prefetch = 0 : i64, scratch_operands = 0 : i64, tpu.core_type = #tpu.core_type<tc>, window_params = [{transform_indices = @transform_0, window_bounds = array<i64: 1, 16, 16, 128>}, {pipeline_mode = #tpu.pipeline_mode<synchronous>, transform_indices = @transform_1, window_bounds = array<i64: 1, 128>}, {pipeline_mode = #tpu.pipeline_mode<synchronous>, transform_indices = @transform_2, window_bounds = array<i64: 1, 128>}, {transform_indices = @transform_3, window_bounds = array<i64: 1, 16, 16, 128>}]} {
    %c0 = arith.constant 0 : index
    %c0_0 = arith.constant 0 : index
    %0 = vector.load %arg3[%c0, %c0_0] : memref<1x128xf32, #tpu.memory_space<vmem>>, vector<1x128xf32>
    %1 = vector.shape_cast %0 : vector<1x128xf32> to vector<1x1x1x128xf32>
    %c0_1 = arith.constant 0 : index
    %c0_2 = arith.constant 0 : index
    %2 = vector.load %arg4[%c0_1, %c0_2] : memref<1x128xf32, #tpu.memory_space<vmem>>, vector<1x128xf32>
    %3 = vector.shape_cast %2 : vector<1x128xf32> to vector<1x1x1x128xf32>
    %c0_3 = arith.constant 0 : index
    %c0_4 = arith.constant 0 : index
    %c0_5 = arith.constant 0 : index
    %c0_6 = arith.constant 0 : index
    %4 = vector.load %arg2[%c0_3, %c0_4, %c0_5, %c0_6] : memref<1x16x16x128xbf16, #tpu.memory_space<vmem>>, vector<1x16x16x128xbf16>
    %5 = arith.extf %4 : vector<1x16x16x128xbf16> to vector<1x16x16x128xf32>
    %6 = vector.broadcast %1 : vector<1x1x1x128xf32> to vector<1x16x16x128xf32>
    %7 = arith.mulf %5, %6 : vector<1x16x16x128xf32>
    %8 = vector.broadcast %3 : vector<1x1x1x128xf32> to vector<1x16x16x128xf32>
    %9 = arith.addf %7, %8 : vector<1x16x16x128xf32>
    %cst = arith.constant 0.000000e+00 : f32
    %10 = vector.broadcast %cst : f32 to vector<1x16x16x128xf32>
    %11 = arith.maximumf %9, %10 : vector<1x16x16x128xf32>
    %12 = arith.truncf %11 : vector<1x16x16x128xf32> to vector<1x16x16x128xbf16>
    %c0_7 = arith.constant 0 : index
    %c0_8 = arith.constant 0 : index
    %c0_9 = arith.constant 0 : index
    %c0_10 = arith.constant 0 : index
    %13 = vector.load %arg5[%c0_7, %c0_8, %c0_9, %c0_10] : memref<1x16x16x128xbf16, #tpu.memory_space<vmem>>, vector<1x16x16x128xbf16>
    tpu.vector_store %arg5[%c0_7, %c0_8, %c0_9, %c0_10], %12 {strides = array<i32>} : memref<1x16x16x128xbf16, #tpu.memory_space<vmem>>, vector<1x16x16x128xbf16>,
    return
  }
  func.func @transform_0(%arg0: i32, %arg1: i32) -> (i32, i32, i32, i32) {
    %c0_i32 = arith.constant 0 : i32
    %c0_i32_0 = arith.constant 0 : i32
    %c0_i32_1 = arith.constant 0 : i32
    return %arg0, %arg1, %c0_i32, %c0_i32_0 : i32, i32, i32, i32
  }
  func.func @transform_1(%arg0: i32, %arg1: i32) -> (i32, i32) {
    %c0_i32 = arith.constant 0 : i32
    %c0_i32_0 = arith.constant 0 : i32
    %c0_i32_1 = arith.constant 0 : i32
    return %c0_i32, %c0_i32_0 : i32, i32
  }
  func.func @transform_2(%arg0: i32, %arg1: i32) -> (i32, i32) {
    %c0_i32 = arith.constant 0 : i32
    %c0_i32_0 = arith.constant 0 : i32
    %c0_i32_1 = arith.constant 0 : i32
    return %c0_i32, %c0_i32_0 : i32, i32
  }
  func.func @transform_3(%arg0: i32, %arg1: i32) -> (i32, i32, i32, i32) {
    %c0_i32 = arith.constant 0 : i32
    %c0_i32_0 = arith.constant 0 : i32
    %c0_i32_1 = arith.constant 0 : i32
    return %arg0, %arg1, %c0_i32, %c0_i32_0 : i32, i32, i32, i32
  }
}

module attributes {stable_mosaic.version = 11 : i64} {
  func.func @_conv3x3_kernel(%arg0: i32, %arg1: i32, %arg2: memref<1x18x18x128xbf16, #tpu.memory_space<vmem>>, %arg3: memref<1152x128xbf16, #tpu.memory_space<vmem>>, %arg4: memref<1x16x16x128xbf16, #tpu.memory_space<vmem>>, %arg5: memref<1x1x128xf32, #tpu.memory_space<vmem>>, %arg6: memref<1x1x128xf32, #tpu.memory_space<vmem>>) attributes {dimension_semantics = [#tpu.dimension_semantics<parallel>, #tpu.dimension_semantics<arbitrary>], iteration_bounds = array<i64: 2, 1>, scalar_prefetch = 0 : i64, scratch_operands = 0 : i64, tpu.core_type = #tpu.core_type<tc>, window_params = [{transform_indices = @transform_0, window_bounds = array<i64: 1, 18, 18, 128>}, {pipeline_mode = #tpu.pipeline_mode<synchronous>, transform_indices = @transform_1, window_bounds = array<i64: 1152, 128>}, {transform_indices = @transform_2, window_bounds = array<i64: 1, 16, 16, 128>}, {transform_indices = @transform_3, window_bounds = array<i64: 1, 1, 128>}, {transform_indices = @transform_4, window_bounds = array<i64: 1, 1, 128>}]} {
    %c16_i32 = arith.constant 16 : i32
    %0 = arith.muli %arg1, %c16_i32 : i32
    %c0_i32 = arith.constant 0 : i32
    %1 = arith.addi %0, %c0_i32 : i32
    %c0 = arith.constant 0 : index
    %2 = arith.index_cast %1 : i32 to index
    %c0_0 = arith.constant 0 : index
    %c0_1 = arith.constant 0 : index
    %3 = vector.load %arg2[%c0, %2, %c0_0, %c0_1] : memref<1x18x18x128xbf16, #tpu.memory_space<vmem>>, vector<1x16x16x128xbf16>
    %4 = vector.shape_cast %3 : vector<1x16x16x128xbf16> to vector<16x16x128xbf16>
    %5 = vector.shape_cast %4 : vector<16x16x128xbf16> to vector<256x128xbf16>
    %c16_i32_2 = arith.constant 16 : i32
    %6 = arith.muli %arg1, %c16_i32_2 : i32
    %c0_i32_3 = arith.constant 0 : i32
    %7 = arith.addi %6, %c0_i32_3 : i32
    %c0_4 = arith.constant 0 : index
    %8 = arith.index_cast %7 : i32 to index
    %c1 = arith.constant 1 : index
    %c0_5 = arith.constant 0 : index
    %9 = vector.load %arg2[%c0_4, %8, %c1, %c0_5] : memref<1x18x18x128xbf16, #tpu.memory_space<vmem>>, vector<1x16x16x128xbf16>
    %10 = vector.shape_cast %9 : vector<1x16x16x128xbf16> to vector<16x16x128xbf16>
    %11 = vector.shape_cast %10 : vector<16x16x128xbf16> to vector<256x128xbf16>
    %c16_i32_6 = arith.constant 16 : i32
    %12 = arith.muli %arg1, %c16_i32_6 : i32
    %c0_i32_7 = arith.constant 0 : i32
    %13 = arith.addi %12, %c0_i32_7 : i32
    %c0_8 = arith.constant 0 : index
    %14 = arith.index_cast %13 : i32 to index
    %c2 = arith.constant 2 : index
    %c0_9 = arith.constant 0 : index
    %15 = vector.load %arg2[%c0_8, %14, %c2, %c0_9] : memref<1x18x18x128xbf16, #tpu.memory_space<vmem>>, vector<1x16x16x128xbf16>
    %16 = vector.shape_cast %15 : vector<1x16x16x128xbf16> to vector<16x16x128xbf16>
    %17 = vector.shape_cast %16 : vector<16x16x128xbf16> to vector<256x128xbf16>
    %c16_i32_10 = arith.constant 16 : i32
    %18 = arith.muli %arg1, %c16_i32_10 : i32
    %c1_i32 = arith.constant 1 : i32
    %19 = arith.addi %18, %c1_i32 : i32
    %c0_11 = arith.constant 0 : index
    %20 = arith.index_cast %19 : i32 to index
    %c0_12 = arith.constant 0 : index
    %c0_13 = arith.constant 0 : index
    %21 = vector.load %arg2[%c0_11, %20, %c0_12, %c0_13] : memref<1x18x18x128xbf16, #tpu.memory_space<vmem>>, vector<1x16x16x128xbf16>
    %22 = vector.shape_cast %21 : vector<1x16x16x128xbf16> to vector<16x16x128xbf16>
    %23 = vector.shape_cast %22 : vector<16x16x128xbf16> to vector<256x128xbf16>
    %c16_i32_14 = arith.constant 16 : i32
    %24 = arith.muli %arg1, %c16_i32_14 : i32
    %c1_i32_15 = arith.constant 1 : i32
    %25 = arith.addi %24, %c1_i32_15 : i32
    %c0_16 = arith.constant 0 : index
    %26 = arith.index_cast %25 : i32 to index
    %c1_17 = arith.constant 1 : index
    %c0_18 = arith.constant 0 : index
    %27 = vector.load %arg2[%c0_16, %26, %c1_17, %c0_18] : memref<1x18x18x128xbf16, #tpu.memory_space<vmem>>, vector<1x16x16x128xbf16>
    %28 = vector.shape_cast %27 : vector<1x16x16x128xbf16> to vector<16x16x128xbf16>
    %29 = vector.shape_cast %28 : vector<16x16x128xbf16> to vector<256x128xbf16>
    %c16_i32_19 = arith.constant 16 : i32
    %30 = arith.muli %arg1, %c16_i32_19 : i32
    %c1_i32_20 = arith.constant 1 : i32
    %31 = arith.addi %30, %c1_i32_20 : i32
    %c0_21 = arith.constant 0 : index
    %32 = arith.index_cast %31 : i32 to index
    %c2_22 = arith.constant 2 : index
    %c0_23 = arith.constant 0 : index
    %33 = vector.load %arg2[%c0_21, %32, %c2_22, %c0_23] : memref<1x18x18x128xbf16, #tpu.memory_space<vmem>>, vector<1x16x16x128xbf16>
    %34 = vector.shape_cast %33 : vector<1x16x16x128xbf16> to vector<16x16x128xbf16>
    %35 = vector.shape_cast %34 : vector<16x16x128xbf16> to vector<256x128xbf16>
    %c16_i32_24 = arith.constant 16 : i32
    %36 = arith.muli %arg1, %c16_i32_24 : i32
    %c2_i32 = arith.constant 2 : i32
    %37 = arith.addi %36, %c2_i32 : i32
    %c0_25 = arith.constant 0 : index
    %38 = arith.index_cast %37 : i32 to index
    %c0_26 = arith.constant 0 : index
    %c0_27 = arith.constant 0 : index
    %39 = vector.load %arg2[%c0_25, %38, %c0_26, %c0_27] : memref<1x18x18x128xbf16, #tpu.memory_space<vmem>>, vector<1x16x16x128xbf16>
    %40 = vector.shape_cast %39 : vector<1x16x16x128xbf16> to vector<16x16x128xbf16>
    %41 = vector.shape_cast %40 : vector<16x16x128xbf16> to vector<256x128xbf16>
    %c16_i32_28 = arith.constant 16 : i32
    %42 = arith.muli %arg1, %c16_i32_28 : i32
    %c2_i32_29 = arith.constant 2 : i32
    %43 = arith.addi %42, %c2_i32_29 : i32
    %c0_30 = arith.constant 0 : index
    %44 = arith.index_cast %43 : i32 to index
    %c1_31 = arith.constant 1 : index
    %c0_32 = arith.constant 0 : index
    %45 = vector.load %arg2[%c0_30, %44, %c1_31, %c0_32] : memref<1x18x18x128xbf16, #tpu.memory_space<vmem>>, vector<1x16x16x128xbf16>
    %46 = vector.shape_cast %45 : vector<1x16x16x128xbf16> to vector<16x16x128xbf16>
    %47 = vector.shape_cast %46 : vector<16x16x128xbf16> to vector<256x128xbf16>
    %c16_i32_33 = arith.constant 16 : i32
    %48 = arith.muli %arg1, %c16_i32_33 : i32
    %c2_i32_34 = arith.constant 2 : i32
    %49 = arith.addi %48, %c2_i32_34 : i32
    %c0_35 = arith.constant 0 : index
    %50 = arith.index_cast %49 : i32 to index
    %c2_36 = arith.constant 2 : index
    %c0_37 = arith.constant 0 : index
    %51 = vector.load %arg2[%c0_35, %50, %c2_36, %c0_37] : memref<1x18x18x128xbf16, #tpu.memory_space<vmem>>, vector<1x16x16x128xbf16>
    %52 = vector.shape_cast %51 : vector<1x16x16x128xbf16> to vector<16x16x128xbf16>
    %53 = vector.shape_cast %52 : vector<16x16x128xbf16> to vector<256x128xbf16>
    %54 = tpu.concatenate %5, %11, %17, %23, %29, %35, %41, %47, %53 in 1 : vector<256x128xbf16>, vector<256x128xbf16>, vector<256x128xbf16>, vector<256x128xbf16>, vector<256x128xbf16>, vector<256x128xbf16>, vector<256x128xbf16>, vector<256x128xbf16>, vector<256x128xbf16> -> vector<256x1152xbf16>
    %c0_38 = arith.constant 0 : index
    %c0_39 = arith.constant 0 : index
    %55 = vector.load %arg3[%c0_38, %c0_39] : memref<1152x128xbf16, #tpu.memory_space<vmem>>, vector<1152x128xbf16>
    %cst = arith.constant dense<0.000000e+00> : vector<256x128xf32>
    %56 = tpu.matmul %54, %55, %cst {dimension_numbers = #tpu.dot_dimension_numbers<[1], [0], [0], [1], [0, 0, 1, 1], [], []>} : vector<256x1152xbf16>, vector<1152x128xbf16>, vector<256x128xf32> -> vector<256x128xf32>
    %57 = vector.shape_cast %56 : vector<256x128xf32> to vector<1x16x16x128xf32>
    %58 = arith.truncf %57 : vector<1x16x16x128xf32> to vector<1x16x16x128xbf16>
    %c0_40 = arith.constant 0 : index
    %c0_41 = arith.constant 0 : index
    %c0_42 = arith.constant 0 : index
    %c0_43 = arith.constant 0 : index
    %59 = vector.load %arg4[%c0_40, %c0_41, %c0_42, %c0_43] : memref<1x16x16x128xbf16, #tpu.memory_space<vmem>>, vector<1x16x16x128xbf16>
    tpu.vector_store %arg4[%c0_40, %c0_41, %c0_42, %c0_43], %58 {strides = array<i32>} : memref<1x16x16x128xbf16, #tpu.memory_space<vmem>>, vector<1x16x16x128xbf16>,
    %c0_i32_44 = arith.constant 0 : i32
    %60 = arith.cmpi eq, %arg1, %c0_i32_44 : i32
    %61 = arith.extui %60 : i1 to i32
    %c0_i32_45 = arith.constant 0 : i32
    %62 = arith.cmpi ne, %61, %c0_i32_45 : i32
    scf.if %62 {
      %cst_60 = arith.constant 0.000000e+00 : f32
      %74 = vector.broadcast %cst_60 : f32 to vector<1x1x128xf32>
      %c0_61 = arith.constant 0 : index
      %c0_62 = arith.constant 0 : index
      %c0_63 = arith.constant 0 : index
      %75 = vector.load %arg5[%c0_61, %c0_62, %c0_63] : memref<1x1x128xf32, #tpu.memory_space<vmem>>, vector<1x1x128xf32>
      tpu.vector_store %arg5[%c0_61, %c0_62, %c0_63], %74 {strides = array<i32>} : memref<1x1x128xf32, #tpu.memory_space<vmem>>, vector<1x1x128xf32>,
      %cst_64 = arith.constant 0.000000e+00 : f32
      %76 = vector.broadcast %cst_64 : f32 to vector<1x1x128xf32>
      %c0_65 = arith.constant 0 : index
      %c0_66 = arith.constant 0 : index
      %c0_67 = arith.constant 0 : index
      %77 = vector.load %arg6[%c0_65, %c0_66, %c0_67] : memref<1x1x128xf32, #tpu.memory_space<vmem>>, vector<1x1x128xf32>
      tpu.vector_store %arg6[%c0_65, %c0_66, %c0_67], %76 {strides = array<i32>} : memref<1x1x128xf32, #tpu.memory_space<vmem>>, vector<1x1x128xf32>,
    } else {
    }
    %c0_46 = arith.constant 0 : index
    %c0_47 = arith.constant 0 : index
    %c0_48 = arith.constant 0 : index
    %63 = vector.load %arg5[%c0_46, %c0_47, %c0_48] : memref<1x1x128xf32, #tpu.memory_space<vmem>>, vector<1x1x128xf32>
    %cst_49 = arith.constant dense<0.000000e+00> : vector<128xf32>
    %64 = vector.multi_reduction <add>, %56, %cst_49 [0] : vector<256x128xf32> to vector<128xf32>
    %65 = vector.shape_cast %64 : vector<128xf32> to vector<1x1x128xf32>
    %66 = arith.addf %63, %65 : vector<1x1x128xf32>
    %c0_50 = arith.constant 0 : index
    %c0_51 = arith.constant 0 : index
    %c0_52 = arith.constant 0 : index
    %67 = vector.load %arg5[%c0_50, %c0_51, %c0_52] : memref<1x1x128xf32, #tpu.memory_space<vmem>>, vector<1x1x128xf32>
    tpu.vector_store %arg5[%c0_50, %c0_51, %c0_52], %66 {strides = array<i32>} : memref<1x1x128xf32, #tpu.memory_space<vmem>>, vector<1x1x128xf32>,
    %c0_53 = arith.constant 0 : index
    %c0_54 = arith.constant 0 : index
    %c0_55 = arith.constant 0 : index
    %68 = vector.load %arg6[%c0_53, %c0_54, %c0_55] : memref<1x1x128xf32, #tpu.memory_space<vmem>>, vector<1x1x128xf32>
    %69 = arith.mulf %56, %56 : vector<256x128xf32>
    %cst_56 = arith.constant dense<0.000000e+00> : vector<128xf32>
    %70 = vector.multi_reduction <add>, %69, %cst_56 [0] : vector<256x128xf32> to vector<128xf32>
    %71 = vector.shape_cast %70 : vector<128xf32> to vector<1x1x128xf32>
    %72 = arith.addf %68, %71 : vector<1x1x128xf32>
    %c0_57 = arith.constant 0 : index
    %c0_58 = arith.constant 0 : index
    %c0_59 = arith.constant 0 : index
    %73 = vector.load %arg6[%c0_57, %c0_58, %c0_59] : memref<1x1x128xf32, #tpu.memory_space<vmem>>, vector<1x1x128xf32>
    tpu.vector_store %arg6[%c0_57, %c0_58, %c0_59], %72 {strides = array<i32>} : memref<1x1x128xf32, #tpu.memory_space<vmem>>, vector<1x1x128xf32>,
    return
  }
  func.func @transform_0(%arg0: i32, %arg1: i32) -> (i32, i32, i32, i32) {
    %c0_i32 = arith.constant 0 : i32
    %c0_i32_0 = arith.constant 0 : i32
    %c0_i32_1 = arith.constant 0 : i32
    %c0_i32_2 = arith.constant 0 : i32
    return %arg0, %c0_i32, %c0_i32_0, %c0_i32_1 : i32, i32, i32, i32
  }
  func.func @transform_1(%arg0: i32, %arg1: i32) -> (i32, i32) {
    %c0_i32 = arith.constant 0 : i32
    %c0_i32_0 = arith.constant 0 : i32
    %c0_i32_1 = arith.constant 0 : i32
    return %c0_i32, %c0_i32_0 : i32, i32
  }
  func.func @transform_2(%arg0: i32, %arg1: i32) -> (i32, i32, i32, i32) {
    %c0_i32 = arith.constant 0 : i32
    %c0_i32_0 = arith.constant 0 : i32
    %c0_i32_1 = arith.constant 0 : i32
    return %arg0, %arg1, %c0_i32, %c0_i32_0 : i32, i32, i32, i32
  }
  func.func @transform_3(%arg0: i32, %arg1: i32) -> (i32, i32, i32) {
    %c0_i32 = arith.constant 0 : i32
    %c0_i32_0 = arith.constant 0 : i32
    %c0_i32_1 = arith.constant 0 : i32
    return %arg0, %c0_i32, %c0_i32_0 : i32, i32, i32
  }
  func.func @transform_4(%arg0: i32, %arg1: i32) -> (i32, i32, i32) {
    %c0_i32 = arith.constant 0 : i32
    %c0_i32_0 = arith.constant 0 : i32
    %c0_i32_1 = arith.constant 0 : i32
    return %arg0, %c0_i32, %c0_i32_0 : i32, i32, i32
  }
}

module attributes {stable_mosaic.version = 11 : i64} {
  func.func @_conv1x1_kernel(%arg0: i32, %arg1: i32, %arg2: memref<1x16x16x4xbf16, #tpu.memory_space<vmem>>, %arg3: memref<4x128xbf16, #tpu.memory_space<vmem>>, %arg4: memref<1x16x16x128xbf16, #tpu.memory_space<vmem>>, %arg5: memref<1x1x128xf32, #tpu.memory_space<vmem>>, %arg6: memref<1x1x128xf32, #tpu.memory_space<vmem>>) attributes {dimension_semantics = [#tpu.dimension_semantics<parallel>, #tpu.dimension_semantics<arbitrary>], iteration_bounds = array<i64: 2, 1>, scalar_prefetch = 0 : i64, scratch_operands = 0 : i64, tpu.core_type = #tpu.core_type<tc>, window_params = [{transform_indices = @transform_0, window_bounds = array<i64: 1, 16, 16, 4>}, {pipeline_mode = #tpu.pipeline_mode<synchronous>, transform_indices = @transform_1, window_bounds = array<i64: 4, 128>}, {transform_indices = @transform_2, window_bounds = array<i64: 1, 16, 16, 128>}, {transform_indices = @transform_3, window_bounds = array<i64: 1, 1, 128>}, {transform_indices = @transform_4, window_bounds = array<i64: 1, 1, 128>}]} {
    %c0 = arith.constant 0 : index
    %c0_0 = arith.constant 0 : index
    %c0_1 = arith.constant 0 : index
    %c0_2 = arith.constant 0 : index
    %0 = vector.load %arg2[%c0, %c0_0, %c0_1, %c0_2] : memref<1x16x16x4xbf16, #tpu.memory_space<vmem>>, vector<1x16x16x4xbf16>
    %1 = vector.shape_cast %0 : vector<1x16x16x4xbf16> to vector<16x16x4xbf16>
    %2 = vector.shape_cast %1 : vector<16x16x4xbf16> to vector<256x4xbf16>
    %c0_3 = arith.constant 0 : index
    %c0_4 = arith.constant 0 : index
    %3 = vector.load %arg3[%c0_3, %c0_4] : memref<4x128xbf16, #tpu.memory_space<vmem>>, vector<4x128xbf16>
    %cst = arith.constant dense<0.000000e+00> : vector<256x128xf32>
    %4 = tpu.matmul %2, %3, %cst {dimension_numbers = #tpu.dot_dimension_numbers<[1], [0], [0], [1], [0, 0, 1, 1], [], []>} : vector<256x4xbf16>, vector<4x128xbf16>, vector<256x128xf32> -> vector<256x128xf32>
    %5 = vector.shape_cast %4 : vector<256x128xf32> to vector<1x16x16x128xf32>
    %6 = arith.truncf %5 : vector<1x16x16x128xf32> to vector<1x16x16x128xbf16>
    %c0_5 = arith.constant 0 : index
    %c0_6 = arith.constant 0 : index
    %c0_7 = arith.constant 0 : index
    %c0_8 = arith.constant 0 : index
    %7 = vector.load %arg4[%c0_5, %c0_6, %c0_7, %c0_8] : memref<1x16x16x128xbf16, #tpu.memory_space<vmem>>, vector<1x16x16x128xbf16>
    tpu.vector_store %arg4[%c0_5, %c0_6, %c0_7, %c0_8], %6 {strides = array<i32>} : memref<1x16x16x128xbf16, #tpu.memory_space<vmem>>, vector<1x16x16x128xbf16>,
    %c0_i32 = arith.constant 0 : i32
    %8 = arith.cmpi eq, %arg1, %c0_i32 : i32
    %9 = arith.extui %8 : i1 to i32
    %c0_i32_9 = arith.constant 0 : i32
    %10 = arith.cmpi ne, %9, %c0_i32_9 : i32
    scf.if %10 {
      %cst_24 = arith.constant 0.000000e+00 : f32
      %22 = vector.broadcast %cst_24 : f32 to vector<1x1x128xf32>
      %c0_25 = arith.constant 0 : index
      %c0_26 = arith.constant 0 : index
      %c0_27 = arith.constant 0 : index
      %23 = vector.load %arg5[%c0_25, %c0_26, %c0_27] : memref<1x1x128xf32, #tpu.memory_space<vmem>>, vector<1x1x128xf32>
      tpu.vector_store %arg5[%c0_25, %c0_26, %c0_27], %22 {strides = array<i32>} : memref<1x1x128xf32, #tpu.memory_space<vmem>>, vector<1x1x128xf32>,
      %cst_28 = arith.constant 0.000000e+00 : f32
      %24 = vector.broadcast %cst_28 : f32 to vector<1x1x128xf32>
      %c0_29 = arith.constant 0 : index
      %c0_30 = arith.constant 0 : index
      %c0_31 = arith.constant 0 : index
      %25 = vector.load %arg6[%c0_29, %c0_30, %c0_31] : memref<1x1x128xf32, #tpu.memory_space<vmem>>, vector<1x1x128xf32>
      tpu.vector_store %arg6[%c0_29, %c0_30, %c0_31], %24 {strides = array<i32>} : memref<1x1x128xf32, #tpu.memory_space<vmem>>, vector<1x1x128xf32>,
    } else {
    }
    %c0_10 = arith.constant 0 : index
    %c0_11 = arith.constant 0 : index
    %c0_12 = arith.constant 0 : index
    %11 = vector.load %arg5[%c0_10, %c0_11, %c0_12] : memref<1x1x128xf32, #tpu.memory_space<vmem>>, vector<1x1x128xf32>
    %cst_13 = arith.constant dense<0.000000e+00> : vector<128xf32>
    %12 = vector.multi_reduction <add>, %4, %cst_13 [0] : vector<256x128xf32> to vector<128xf32>
    %13 = vector.shape_cast %12 : vector<128xf32> to vector<1x1x128xf32>
    %14 = arith.addf %11, %13 : vector<1x1x128xf32>
    %c0_14 = arith.constant 0 : index
    %c0_15 = arith.constant 0 : index
    %c0_16 = arith.constant 0 : index
    %15 = vector.load %arg5[%c0_14, %c0_15, %c0_16] : memref<1x1x128xf32, #tpu.memory_space<vmem>>, vector<1x1x128xf32>
    tpu.vector_store %arg5[%c0_14, %c0_15, %c0_16], %14 {strides = array<i32>} : memref<1x1x128xf32, #tpu.memory_space<vmem>>, vector<1x1x128xf32>,
    %c0_17 = arith.constant 0 : index
    %c0_18 = arith.constant 0 : index
    %c0_19 = arith.constant 0 : index
    %16 = vector.load %arg6[%c0_17, %c0_18, %c0_19] : memref<1x1x128xf32, #tpu.memory_space<vmem>>, vector<1x1x128xf32>
    %17 = arith.mulf %4, %4 : vector<256x128xf32>
    %cst_20 = arith.constant dense<0.000000e+00> : vector<128xf32>
    %18 = vector.multi_reduction <add>, %17, %cst_20 [0] : vector<256x128xf32> to vector<128xf32>
    %19 = vector.shape_cast %18 : vector<128xf32> to vector<1x1x128xf32>
    %20 = arith.addf %16, %19 : vector<1x1x128xf32>
    %c0_21 = arith.constant 0 : index
    %c0_22 = arith.constant 0 : index
    %c0_23 = arith.constant 0 : index
    %21 = vector.load %arg6[%c0_21, %c0_22, %c0_23] : memref<1x1x128xf32, #tpu.memory_space<vmem>>, vector<1x1x128xf32>
    tpu.vector_store %arg6[%c0_21, %c0_22, %c0_23], %20 {strides = array<i32>} : memref<1x1x128xf32, #tpu.memory_space<vmem>>, vector<1x1x128xf32>,
    return
  }
  func.func @transform_0(%arg0: i32, %arg1: i32) -> (i32, i32, i32, i32) {
    %c0_i32 = arith.constant 0 : i32
    %c0_i32_0 = arith.constant 0 : i32
    %c0_i32_1 = arith.constant 0 : i32
    return %arg0, %arg1, %c0_i32, %c0_i32_0 : i32, i32, i32, i32
  }
  func.func @transform_1(%arg0: i32, %arg1: i32) -> (i32, i32) {
    %c0_i32 = arith.constant 0 : i32
    %c0_i32_0 = arith.constant 0 : i32
    %c0_i32_1 = arith.constant 0 : i32
    return %c0_i32, %c0_i32_0 : i32, i32
  }
  func.func @transform_2(%arg0: i32, %arg1: i32) -> (i32, i32, i32, i32) {
    %c0_i32 = arith.constant 0 : i32
    %c0_i32_0 = arith.constant 0 : i32
    %c0_i32_1 = arith.constant 0 : i32
    return %arg0, %arg1, %c0_i32, %c0_i32_0 : i32, i32, i32, i32
  }
  func.func @transform_3(%arg0: i32, %arg1: i32) -> (i32, i32, i32) {
    %c0_i32 = arith.constant 0 : i32
    %c0_i32_0 = arith.constant 0 : i32
    %c0_i32_1 = arith.constant 0 : i32
    return %arg0, %c0_i32, %c0_i32_0 : i32, i32, i32
  }
  func.func @transform_4(%arg0: i32, %arg1: i32) -> (i32, i32, i32) {
    %c0_i32 = arith.constant 0 : i32
    %c0_i32_0 = arith.constant 0 : i32
    %c0_i32_1 = arith.constant 0 : i32
    return %arg0, %c0_i32, %c0_i32_0 : i32, i32, i32
  }
}

module attributes {stable_mosaic.version = 11 : i64} {
  func.func @_residual_epilogue_kernel(%arg0: i32, %arg1: i32, %arg2: memref<1x16x16x128xbf16, #tpu.memory_space<vmem>>, %arg3: memref<1x16x16x128xbf16, #tpu.memory_space<vmem>>, %arg4: memref<1x128xf32, #tpu.memory_space<vmem>>, %arg5: memref<1x128xf32, #tpu.memory_space<vmem>>, %arg6: memref<1x128xf32, #tpu.memory_space<vmem>>, %arg7: memref<1x128xf32, #tpu.memory_space<vmem>>, %arg8: memref<1x16x16x128xf32, #tpu.memory_space<vmem>>) attributes {dimension_semantics = [#tpu.dimension_semantics<parallel>, #tpu.dimension_semantics<parallel>], iteration_bounds = array<i64: 2, 1>, scalar_prefetch = 0 : i64, scratch_operands = 0 : i64, tpu.core_type = #tpu.core_type<tc>, window_params = [{transform_indices = @transform_0, window_bounds = array<i64: 1, 16, 16, 128>}, {transform_indices = @transform_1, window_bounds = array<i64: 1, 16, 16, 128>}, {pipeline_mode = #tpu.pipeline_mode<synchronous>, transform_indices = @transform_2, window_bounds = array<i64: 1, 128>}, {pipeline_mode = #tpu.pipeline_mode<synchronous>, transform_indices = @transform_3, window_bounds = array<i64: 1, 128>}, {pipeline_mode = #tpu.pipeline_mode<synchronous>, transform_indices = @transform_4, window_bounds = array<i64: 1, 128>}, {pipeline_mode = #tpu.pipeline_mode<synchronous>, transform_indices = @transform_5, window_bounds = array<i64: 1, 128>}, {transform_indices = @transform_6, window_bounds = array<i64: 1, 16, 16, 128>}]} {
    %c0 = arith.constant 0 : index
    %c0_0 = arith.constant 0 : index
    %0 = vector.load %arg4[%c0, %c0_0] : memref<1x128xf32, #tpu.memory_space<vmem>>, vector<1x128xf32>
    %1 = vector.shape_cast %0 : vector<1x128xf32> to vector<1x1x1x128xf32>
    %c0_1 = arith.constant 0 : index
    %c0_2 = arith.constant 0 : index
    %2 = vector.load %arg5[%c0_1, %c0_2] : memref<1x128xf32, #tpu.memory_space<vmem>>, vector<1x128xf32>
    %3 = vector.shape_cast %2 : vector<1x128xf32> to vector<1x1x1x128xf32>
    %c0_3 = arith.constant 0 : index
    %c0_4 = arith.constant 0 : index
    %4 = vector.load %arg6[%c0_3, %c0_4] : memref<1x128xf32, #tpu.memory_space<vmem>>, vector<1x128xf32>
    %5 = vector.shape_cast %4 : vector<1x128xf32> to vector<1x1x1x128xf32>
    %c0_5 = arith.constant 0 : index
    %c0_6 = arith.constant 0 : index
    %6 = vector.load %arg7[%c0_5, %c0_6] : memref<1x128xf32, #tpu.memory_space<vmem>>, vector<1x128xf32>
    %7 = vector.shape_cast %6 : vector<1x128xf32> to vector<1x1x1x128xf32>
    %c0_7 = arith.constant 0 : index
    %c0_8 = arith.constant 0 : index
    %c0_9 = arith.constant 0 : index
    %c0_10 = arith.constant 0 : index
    %8 = vector.load %arg2[%c0_7, %c0_8, %c0_9, %c0_10] : memref<1x16x16x128xbf16, #tpu.memory_space<vmem>>, vector<1x16x16x128xbf16>
    %9 = arith.extf %8 : vector<1x16x16x128xbf16> to vector<1x16x16x128xf32>
    %c0_11 = arith.constant 0 : index
    %c0_12 = arith.constant 0 : index
    %c0_13 = arith.constant 0 : index
    %c0_14 = arith.constant 0 : index
    %10 = vector.load %arg3[%c0_11, %c0_12, %c0_13, %c0_14] : memref<1x16x16x128xbf16, #tpu.memory_space<vmem>>, vector<1x16x16x128xbf16>
    %11 = arith.extf %10 : vector<1x16x16x128xbf16> to vector<1x16x16x128xf32>
    %12 = vector.broadcast %1 : vector<1x1x1x128xf32> to vector<1x16x16x128xf32>
    %13 = arith.mulf %9, %12 : vector<1x16x16x128xf32>
    %14 = vector.broadcast %3 : vector<1x1x1x128xf32> to vector<1x16x16x128xf32>
    %15 = arith.addf %13, %14 : vector<1x16x16x128xf32>
    %16 = vector.broadcast %5 : vector<1x1x1x128xf32> to vector<1x16x16x128xf32>
    %17 = arith.mulf %11, %16 : vector<1x16x16x128xf32>
    %18 = arith.addf %15, %17 : vector<1x16x16x128xf32>
    %19 = vector.broadcast %7 : vector<1x1x1x128xf32> to vector<1x16x16x128xf32>
    %20 = arith.addf %18, %19 : vector<1x16x16x128xf32>
    %cst = arith.constant 0.000000e+00 : f32
    %21 = vector.broadcast %cst : f32 to vector<1x16x16x128xf32>
    %22 = arith.maximumf %20, %21 : vector<1x16x16x128xf32>
    %c0_15 = arith.constant 0 : index
    %c0_16 = arith.constant 0 : index
    %c0_17 = arith.constant 0 : index
    %c0_18 = arith.constant 0 : index
    %23 = vector.load %arg8[%c0_15, %c0_16, %c0_17, %c0_18] : memref<1x16x16x128xf32, #tpu.memory_space<vmem>>, vector<1x16x16x128xf32>
    tpu.vector_store %arg8[%c0_15, %c0_16, %c0_17, %c0_18], %22 {strides = array<i32>} : memref<1x16x16x128xf32, #tpu.memory_space<vmem>>, vector<1x16x16x128xf32>,
    return
  }
  func.func @transform_0(%arg0: i32, %arg1: i32) -> (i32, i32, i32, i32) {
    %c0_i32 = arith.constant 0 : i32
    %c0_i32_0 = arith.constant 0 : i32
    %c0_i32_1 = arith.constant 0 : i32
    return %arg0, %arg1, %c0_i32, %c0_i32_0 : i32, i32, i32, i32
  }
  func.func @transform_1(%arg0: i32, %arg1: i32) -> (i32, i32, i32, i32) {
    %c0_i32 = arith.constant 0 : i32
    %c0_i32_0 = arith.constant 0 : i32
    %c0_i32_1 = arith.constant 0 : i32
    return %arg0, %arg1, %c0_i32, %c0_i32_0 : i32, i32, i32, i32
  }
  func.func @transform_2(%arg0: i32, %arg1: i32) -> (i32, i32) {
    %c0_i32 = arith.constant 0 : i32
    %c0_i32_0 = arith.constant 0 : i32
    %c0_i32_1 = arith.constant 0 : i32
    return %c0_i32, %c0_i32_0 : i32, i32
  }
  func.func @transform_3(%arg0: i32, %arg1: i32) -> (i32, i32) {
    %c0_i32 = arith.constant 0 : i32
    %c0_i32_0 = arith.constant 0 : i32
    %c0_i32_1 = arith.constant 0 : i32
    return %c0_i32, %c0_i32_0 : i32, i32
  }
  func.func @transform_4(%arg0: i32, %arg1: i32) -> (i32, i32) {
    %c0_i32 = arith.constant 0 : i32
    %c0_i32_0 = arith.constant 0 : i32
    %c0_i32_1 = arith.constant 0 : i32
    return %c0_i32, %c0_i32_0 : i32, i32
  }
  func.func @transform_5(%arg0: i32, %arg1: i32) -> (i32, i32) {
    %c0_i32 = arith.constant 0 : i32
    %c0_i32_0 = arith.constant 0 : i32
    %c0_i32_1 = arith.constant 0 : i32
    return %c0_i32, %c0_i32_0 : i32, i32
  }
  func.func @transform_6(%arg0: i32, %arg1: i32) -> (i32, i32, i32, i32) {
    %c0_i32 = arith.constant 0 : i32
    %c0_i32_0 = arith.constant 0 : i32
    %c0_i32_1 = arith.constant 0 : i32
    return %arg0, %arg1, %c0_i32, %c0_i32_0 : i32, i32, i32, i32
  }
}

</mosaic_0001>

<bundles_post_ra>
// kernel: basic_block_forward.6
= control target key start
LH: loop header
LB: loop body
LE: loop exit
PB: predicated region body
PF: predicated region fallthrough
CT: control target
= control target key end

     0   :  { %8 = vsyncpa [#allocation3], 0  ;;  %s1600_s0 = inlined_call_operand.hbm [shape: bf16[2,16,16,128], index: 0, kind: input, shape index: {}]   ;;  %s1601_s1 = inlined_call_operand.hbm [shape: f32[1,128], index: 1, kind: input, shape index: {}]   ;;  %s1602_s2 = inlined_call_operand.hbm [shape: f32[1,128], index: 2, kind: input, shape index: {}]   ;;  %s1603_s3 = inlined_call_operand.hbm [shape: bf16[2,16,16,128], index: 3, kind: output, shape index: {}]  }
   0x1   :  { %10 = vsyncpa [#allocation3 + $0x1], 0 }
   0x2   :  { %11 = vsyncpa [#allocation6], 0 }
   0x3   :  { %12 = vsyncpa [#allocation4], 0 }
   0x4   :  { %14 = vsyncpa [#allocation4 + $0x1], 0  ;;  %s1242_s12 = smov 0   ;;  %s1244_s13 = smov 0  }
   0x5   :  { %s1246_s14 = smov 0   ;;  %s1248_s15 = smov 0  }
   0x6   :  { %s1250_s16 = smov 0   ;;  %s1252_s17 = smov 0  }
   0x7 LB: > { %s692_s18 = sadd.s32 4294967295, %s1212_s17   ;;  %s693_s19 = sadd.s32 4294967294, %s1212_s17   ;;  %s1212_s17 = sphi %s1252_s17, %s20_s17   ;;  %s1208_s16 = sphi %s1250_s16, %s1629_s16   ;;  %s1204_s15 = sphi %s1248_s15, %s1628_s15   ;;  %s1200_s14 = sphi %s1246_s14, %s1627_s14   ;;  %s1196_s13 = sphi %s1244_s13, %s1626_s13   ;;  %s1192_s12 = sphi %s1242_s12, %s1625_s12  }
   0x8   : > { %s41_s20 = sadd.s32 1, %s1200_s14  ;;  %p48_p0 = scmp.ne.s32.totalorder %s1200_s14, %s1196_s13 }
   0x9   : > { %p49_p1 = scmp.eq.s32.totalorder %s1212_s17, 0  ;;  %p54_p2 = scmp.ne.s32.totalorder %s1196_s13, %s1192_s12 }
   0xa   : > { %p1280_p3 = scmp.eq.s32.totalorder %s692_s18, 0  ;;  %p122_p4 = scmp.eq.s32.totalorder %s692_s18, 1 }
   0xb   : > { %p1284_p5 = por %p49_p1, %p48_p0  ;;  %p128_p6 = scmp.eq.s32.totalorder %s693_s19, 1 }
   0xc   : > { %s1610_s21 = scalar_select %p1280_p3, 1, 0 }
   0xd   : > { %p1290_p7 = por %p1280_p3, %p54_p2  ;;  %p1294_p8 = por %p122_p4, %p48_p0 }
   0xe   : > { %p1298_p9 = por %p128_p6, %p54_p2  ;;  %p694_p10 = scmp.ge.s32.totalorder %s1212_s17, 1 }
   0xf   : > { %s1612_s23 = scalar_select %p1290_p7, 1, 0 }
  0x10   : > { %s1613_s24 = scalar_select %p1294_p8, 1, 0 }
  0x11   : > { %s1614_s25 = scalar_select %p1298_p9, 1, 0 }
  0x12   : > { %p135_p11 = scmp.lt.s32.totalorder %s1212_s17, 3  ;;  %s1214_s27 = smov [#allocation5]  }
  0x13   : > { %s148_s28 = sshll.u32 %s1214_s27, 4  ;;  %p982_p1 = scmp.lt.s32.totalorder %s1212_s17, 2  ;;  %s149_s28 = int_to_ptr.vmem [resolvable:$true] %s148_s28 }
  0x14   : > { %p1305_p13 = pnand %p694_p10, %p135_p11  ;;  %s1215_s30 = smov [#allocation7]  }
  0x15   : > { %p1314_p4 = pnand %p982_p1, %p1284_p5  ;;  %s159_s4 = sshll.u32 %s1215_s30, 4  ;;  %s1324_s4 = int_to_ptr.vmem [resolvable:$true] %s159_s4 }
  0x16   : > { %s1615_s26 = scalar_select %p1305_p13, 1, 0 }
  0x17   : > { %p965_p0 = pneg %p1305_p13  ;;  %s1040_s8 = scalar_lea.hbm %s1601_s1, 16 }
  0x18   : > { %s1616_s29 = scalar_select %p1314_p4, 1, 0 }
  0x19   : > { %p1320_p2 = pnand %p965_p0, %p1280_p3  ;;  %p1041_p5 = scmp.ne.s32.totalorder %s1601_s1, %s1040_s8 }
  0x1a   : > { %p1047_p1 = scmp.lt.u32.totalorder %s1040_s8, %s1601_s1 }
  0x1b   : > { %p1042_p6 = pneg %p1320_p2 }
  0x1d   : > { %p1043_p10 = pnand %p1042_p6, %p1041_p5 }
  0x1f   : > { %p1044_p11 = pneg %p1043_p10 }
  0x21   : > { %p1049_p0 = pnand %p1047_p1, %p1044_p11 }
  0x23   : > { %1052 = shalt.err (!%p1049_p0)
}
  0x24   : > { %s1053_s19 = scalar_lea.vmem %s149_s28, 16  ;;  %s1060_s22 = scalar_lea.vmem %s149_s28, 32 }
  0x25   : > { %p1054_p12 = scmp.ne.s32.totalorder %s149_s28, %s1053_s19  ;;  %p1061_p3 = scmp.lt.s32.totalorder %s149_s28, %s149_s28 }
  0x26   : > { %p1062_p7 = scmp.lt.s32.totalorder %s1060_s22, %s1053_s19 }
  0x27   : > { %p1056_p9 = pnand %p1054_p12, %p1042_p6 }
  0x28   : > { %p1063_p13 = por %p1062_p7, %p1061_p3 }
  0x29   : > { %p1057_p8 = pneg %p1056_p9 }
  0x2b   : > { %p1064_p4 = pnand %p1063_p13, %p1057_p8 }
  0x2d   : > { %1067 = shalt.err (!%p1064_p4)
}
  0x2e   : > { %968 = dma.hbm_to_vmem [thread:$0]  (!%p1320_p2), %s1601_s1, 16, %s149_s28, [#allocation6]  }
  0x2f   : > { %s1068_s8 = scalar_lea.hbm %s1602_s2, 16 }
  0x30   : > { %p1069_p9 = scmp.ne.s32.totalorder %s1602_s2, %s1068_s8  ;;  %p1075_p8 = scmp.lt.u32.totalorder %s1068_s8, %s1602_s2 }
  0x32   : > { %p1071_p3 = pnand %p1069_p9, %p1042_p6 }
  0x34   : > { %p1072_p7 = pneg %p1071_p3 }
  0x36   : > { %p1077_p12 = pnand %p1075_p8, %p1072_p7 }
  0x38   : > { %1080 = shalt.err (!%p1077_p12)
}
  0x39   : > { %s1081_s28 = scalar_lea.vmem %s1324_s4, 16  ;;  %s1088_s19 = scalar_lea.vmem %s1324_s4, 32 }
  0x3a   : > { %p1082_p13 = scmp.ne.s32.totalorder %s1324_s4, %s1081_s28  ;;  %p1089_p10 = scmp.lt.s32.totalorder %s1324_s4, %s1324_s4 }
  0x3b   : > { %p1090_p11 = scmp.lt.s32.totalorder %s1088_s19, %s1081_s28 }
  0x3c   : > { %p1084_p4 = pnand %p1082_p13, %p1042_p6 }
  0x3d   : > { %p1091_p1 = por %p1090_p11, %p1089_p10 }
  0x3e   : > { %p1085_p5 = pneg %p1084_p4 }
  0x40   : > { %p1092_p0 = pnand %p1091_p1, %p1085_p5 }
  0x42   : > { %1095 = shalt.err (!%p1092_p0)
}
  0x43   : > { %971 = dma.hbm_to_vmem [thread:$0]  (!%p1320_p2), %s1602_s2, 16, %s1324_s4, [#allocation6]  }
  0x44   : > { %s32_s30 = sadd.s32 1, %s1208_s16  ;;  %s170_s6 = sand.u32 1, %s1200_s14  }
  0x45   : > { %p34_p6 = scmp.ge.s32.totalorder %s32_s30, 2  ;;  %s698_s7 = sshll.u32 %s170_s6, 7 }
  0x46   : > { %s745_s8 = sshll.u32 %s1208_s16, 11  ;;  %s174_s4 = scalar_lea.vmem [#allocation2], %s698_s7 }
  0x47   : > { %s1631_s30 = smov (%p34_p6, %s32_s30), 0  ;;  %s1382_s10 = scalar_lea.hbm %s1600_s0, %s745_s8 }
  0x48   : > { %s36_s11 = ssub.s32 %s1208_s16, %s1631_s30  ;;  %s184_s18 = sshll.u32 %s174_s4, 4  ;;  %s1386_s18 = int_to_ptr.vmem [resolvable:$true] %s184_s18 }
  0x49   : > { %p39_p2 = scmp.eq.s32.totalorder %s36_s11, 0  ;;  %s1393_s19 = scalar_lea.sflag [#allocation3], %s170_s6 }
  0x4a   : > { %s1096_s22 = scalar_lea.hbm %s1382_s10, 2048  ;;  %p1618_p3 = scmp.ne.s32.totalorder %s1616_s29, 0 }
  0x4b   : > { %s1391_s28 = scalar_select %p39_p2, %s1200_s14, %s41_s20  }
  0x4c   : > { %p1097_p9 = scmp.ne.s32.totalorder %s1382_s10, %s1096_s22  ;;  %p1098_p7 = pneg %p1618_p3 }
  0x4d   : > { %s1101_s7 = scalar_lea.hbm %s1600_s0, 4096  ;;  %p1102_p13 = scmp.lt.u32.totalorder %s1382_s10, %s1600_s0 }
  0x4e   : > { %p1099_p8 = pnand %p1098_p7, %p1097_p9  ;;  %p1103_p4 = scmp.lt.u32.totalorder %s1101_s7, %s1096_s22 }
  0x4f   : > { %p1105_p10 = scmp.lt.u32.totalorder %s1096_s22, %s1382_s10 }
  0x50   : > { %p1100_p12 = pneg %p1099_p8  ;;  %p1104_p5 = por %p1103_p4, %p1102_p13 }
  0x52   : > { %p1106_p11 = por %p1105_p10, %p1104_p5 }
  0x54   : > { %p1107_p1 = pnand %p1106_p11, %p1100_p12 }
  0x56   : > { %1110 = shalt.err (!%p1107_p1)
}
  0x57   : > { %s1111_s20 = scalar_lea.vmem %s1386_s18, 2048  ;;  %s1216_s6 = smov [#allocation2]  }
  0x58   : > { %p1112_p0 = scmp.ne.s32.totalorder %s1386_s18, %s1111_s20  ;;  %s1116_s11 = sshll.u32 %s1216_s6, 4  ;;  %s1117_s11 = int_to_ptr.vmem [resolvable:$false] %s1116_s11 }
  0x59   : > { %s1118_s4 = scalar_lea.vmem %s1117_s11, 4096  ;;  %p1119_p9 = scmp.lt.s32.totalorder %s1386_s18, %s1117_s11 }
  0x5a   : > { %p1114_p6 = pnand %p1112_p0, %p1098_p7  ;;  %p1120_p8 = scmp.lt.s32.totalorder %s1118_s4, %s1111_s20 }
  0x5c   : > { %p1115_p2 = pneg %p1114_p6  ;;  %p1121_p13 = por %p1120_p8, %p1119_p9 }
  0x5e   : > { %p1122_p4 = pnand %p1121_p13, %p1115_p2 }
  0x60   : > { %1125 = shalt.err (!%p1122_p4)
}
  0x61   : > { %s1217_s22 = smov 64   ;;  %s1218_s27 = smov 4  }
  0x62   : > { %975 = dma.hbm_to_vmem [thread:$0]  (!%p1618_p3), %s1382_s10, 2048, %s1386_s18, %s1393_s19, %s1217_s22, %s1217_s22, %s1218_s27  }
  0x63   : > { %p1619_p7 = scmp.ne.s32.totalorder %s1615_s26, 0 }
  0x64   : > { %s1424_s8 = sand.u32 (!%p1619_p7), 1, %s1196_s13   ;;  %p1620_p12 = scmp.ne.s32.totalorder (!%p1619_p7), %s1612_s23, 0 }
  0x65   : > { %196 = sbr.rel (%p1619_p7) target bundleno = 170 (0xaa), region = 32  ;;  %s702_s7 = sshll.u32 (!%p1619_p7), %s1424_s8, 7 }
  0x66   : > { %s199_s5 = scalar_lea.sflag (!%p1619_p7), [#allocation3], %s1424_s8  ;;  %s1430_s9 = scalar_lea.vmem (!%p1619_p7), [#allocation2], %s702_s7 }
  0x6c   : > { %1179 = dma.done.wait (%p1620_p12), %s199_s5, 2048  }
  0x6d   : > { %1181 = vsyncadd (%p1620_p12), %s199_s5, 4294965248  ;;  %p1621_p3 = scmp.ne.s32.totalorder %s1610_s21, 0 }
  0x6f   : > { %1183 = dma.done.wait (%p1621_p3), [#allocation6], 32  }
  0x70   : > { %1185 = vsyncadd (%p1621_p3), [#allocation6], 4294967264  ;;  %v1440_v0 = vld [vmem:[#allocation5] ss:$0 sm:$0xff]  ;;  %v923_v4 = vld [vmem:[%s1430_s9 + $0x8] sm:$0xff]   ;;  %s1470_s21 = scalar_lea.vmem [#allocation8], %s702_s7 }
  0x71   : > { %v780_v1 = vld [vmem:[%s1430_s9] sm:$0xff]   ;;  %v924_v5 = vld [vmem:[%s1430_s9 + $0x10] sm:$0xff]   ;;  %v925_v6 = vld [vmem:[%s1430_s9 + $0x18] sm:$0xff]   ;;  %v785_v8 = vunpack.c.l.bf16 %v923_v4  ;;  %v786_v9 = vunpack.c.h.bf16 %v923_v4  ;;  %s778_s23 = sshll.u32 %s1204_s15, 11  ;;  %s586_s26 = sshll.u32 %s1470_s21, 4  ;;  %s1550_s26 = int_to_ptr.vmem [resolvable:$true] %s586_s26 }
  0x72   : > { %v781_v2 = vunpack.c.l.bf16 %v780_v1  ;;  %v782_v3 = vunpack.c.h.bf16 %v780_v1  ;;  %v1446_v7 = vld [vmem:[#allocation7] ss:$0 sm:$0xff]  ;;  %v789_v10 = vunpack.c.l.bf16 %v924_v5  ;;  %v790_v11 = vunpack.c.h.bf16 %v924_v5  ;;  %v927_v33 = vld [vmem:[%s1430_s9 + $0x28] sm:$0xff]   ;;  %v928_v38 = vld [vmem:[%s1430_s9 + $0x30] sm:$0xff]   ;;  %s1548_s18 = scalar_lea.hbm %s1603_s3, %s778_s23  ;;  %s570_s19 = scalar_lea.sflag [#allocation4], %s1424_s8 }
  0x73   : > { %v793_v14 = vunpack.c.l.bf16 %v925_v6  ;;  %v794_v15 = vunpack.c.h.bf16 %v925_v6  ;;  %v309_v16 = vmul.f32 %v785_v8, %v1440_v0  ;;  %v310_v17 = vmul.f32 %v786_v9, %v1440_v0  ;;  %v926_v28 = vld [vmem:[%s1430_s9 + $0x20] sm:$0xff]   ;;  %v929_v43 = vld [vmem:[%s1430_s9 + $0x38] sm:$0xff]   ;;  %s1126_s20 = scalar_lea.vmem %s1550_s26, 2048  ;;  %p1622_p10 = scmp.ne.s32.totalorder %s1613_s24, 0 }
  0x74   : > { %v307_v12 = vmul.f32 %v781_v2, %v1440_v0  ;;  %v308_v13 = vmul.f32 %v782_v3, %v1440_v0  ;;  %v311_v18 = vmul.f32 %v789_v10, %v1440_v0  ;;  %v312_v19 = vmul.f32 %v790_v11, %v1440_v0  ;;  %v930_v1 = vld [vmem:[%s1430_s9 + $0x40] sm:$0xff]   ;;  %v931_v11 = vld [vmem:[%s1430_s9 + $0x48] sm:$0xff]   ;;  %p1127_p5 = scmp.ne.s32.totalorder %s1550_s26, %s1126_s20  ;;  %s1219_s15 = smov [#allocation8]  }
  0x75   : > { %v313_v22 = vmul.f32 %v793_v14, %v1440_v0  ;;  %v314_v23 = vmul.f32 %v794_v15, %v1440_v0  ;;  %v347_v24 = vadd.f32 %v1446_v7, %v309_v16  ;;  %v348_v25 = vadd.f32 %v1446_v7, %v310_v17  ;;  %v932_v16 = vld [vmem:[%s1430_s9 + $0x50] sm:$0xff]   ;;  %s1130_s6 = sshll.u32 %s1219_s15, 4  ;;  %s1131_s6 = int_to_ptr.vmem [resolvable:$false] %s1130_s6 }
  0x76   : > { %v345_v20 = vadd.f32 %v1446_v7, %v307_v12  ;;  %v346_v21 = vadd.f32 %v1446_v7, %v308_v13  ;;  %v349_v26 = vadd.f32 %v1446_v7, %v311_v18  ;;  %v350_v27 = vadd.f32 %v1446_v7, %v312_v19  ;;  %p1128_p11 = pnand %p1127_p5, %p1622_p10  ;;  %s1132_s11 = scalar_lea.vmem %s1131_s6, 4096 }
  0x77   : > { %v351_v31 = vadd.f32 %v1446_v7, %v313_v22  ;;  %v352_v32 = vadd.f32 %v1446_v7, %v314_v23  ;;  %v379_v34 = vmax.f32 %v347_v24, 0.0  ;;  %v380_v35 = vmax.f32 %v348_v25, 0.0  ;;  %v933_v25 = vld [vmem:[%s1430_s9 + $0x58] sm:$0xff]   ;;  %p1133_p0 = scmp.lt.s32.totalorder %s1550_s26, %s1131_s6  ;;  %p1134_p6 = scmp.lt.s32.totalorder %s1132_s11, %s1126_s20 }
  0x78   : > { %v377_v29 = vmax.f32 %v345_v20, 0.0  ;;  %v378_v30 = vmax.f32 %v346_v21, 0.0  ;;  %v381_v36 = vmax.f32 %v349_v26, 0.0  ;;  %v382_v37 = vmax.f32 %v350_v27, 0.0  ;;  %p1129_p1 = pneg %p1128_p11 }
  0x79   : > { %v383_v40 = vmax.f32 %v351_v31, 0.0  ;;  %v384_v41 = vmax.f32 %v352_v32, 0.0  ;;  %v797_v42 = vunpack.c.l.bf16 %v926_v28  ;;  %v851_v44 = vpack.c.bf16 %v380_v35, %v379_v34  ;;  %p1135_p2 = por %p1134_p6, %p1133_p0 }
  0x7a   : > { %v846_v39 = vpack.c.bf16 %v378_v30, %v377_v29  ;;  %v856_v45 = vpack.c.bf16 %v382_v37, %v381_v36  ;;  %v798_v46 = vunpack.c.h.bf16 %v926_v28  ;;  %v801_v47 = vunpack.c.l.bf16 %v927_v33 }
  0x7b   : > { %v861_v48 = vpack.c.bf16 %v384_v41, %v383_v40  ;;  %v315_v49 = vmul.f32 %v797_v42, %v1440_v0  ;;  %v802_v50 = vunpack.c.h.bf16 %v927_v33  ;;  %v805_v51 = vunpack.c.l.bf16 %v928_v38  ;;  %938 = vst [vmem:[%s1470_s21 + $0x8] sm:$0xff] %v851_v44   ;;  %p1136_p9 = pnand %p1135_p2, %p1129_p1 }
  0x7c   : > { %847 = vst [vmem:[%s1470_s21] sm:$0xff] %v846_v39   ;;  %939 = vst [vmem:[%s1470_s21 + $0x10] sm:$0xff] %v856_v45   ;;  %v316_v52 = vmul.f32 %v798_v46, %v1440_v0  ;;  %v317_v53 = vmul.f32 %v801_v47, %v1440_v0  ;;  %v806_v54 = vunpack.c.h.bf16 %v928_v38  ;;  %v809_v55 = vunpack.c.l.bf16 %v929_v43  ;;  %v934_v38 = vld [vmem:[%s1430_s9 + $0x60] sm:$0xff]  }
  0x7d   : > { %940 = vst [vmem:[%s1470_s21 + $0x18] sm:$0xff] %v861_v48   ;;  %v353_v56 = vadd.f32 %v1446_v7, %v315_v49  ;;  %v318_v57 = vmul.f32 %v802_v50, %v1440_v0  ;;  %v319_v58 = vmul.f32 %v805_v51, %v1440_v0  ;;  %v810_v59 = vunpack.c.h.bf16 %v929_v43  ;;  %v935_v51 = vld [vmem:[%s1430_s9 + $0x68] sm:$0xff]  }
  0x7e   : > { %v354_v60 = vadd.f32 %v1446_v7, %v316_v52  ;;  %v355_v61 = vadd.f32 %v1446_v7, %v317_v53  ;;  %v320_v62 = vmul.f32 %v806_v54, %v1440_v0  ;;  %v321_v63 = vmul.f32 %v809_v55, %v1440_v0 }
  0x7f   : > { %v385_v2 = vmax.f32 %v353_v56, 0.0  ;;  %v356_v3 = vadd.f32 %v1446_v7, %v318_v57  ;;  %v357_v4 = vadd.f32 %v1446_v7, %v319_v58  ;;  %v322_v5 = vmul.f32 %v810_v59, %v1440_v0 }
  0x80   : > { %v386_v6 = vmax.f32 %v354_v60, 0.0  ;;  %v387_v8 = vmax.f32 %v355_v61, 0.0  ;;  %v358_v9 = vadd.f32 %v1446_v7, %v320_v62  ;;  %v359_v10 = vadd.f32 %v1446_v7, %v321_v63  ;;  %v936_v60 = vld [vmem:[%s1430_s9 + $0x70] sm:$0xff]  }
  0x81   : > { %v388_v12 = vmax.f32 %v356_v3, 0.0  ;;  %v389_v13 = vmax.f32 %v357_v4, 0.0  ;;  %v360_v14 = vadd.f32 %v1446_v7, %v322_v5  ;;  %v813_v15 = vunpack.c.l.bf16 %v930_v1 }
  0x82   : > { %v866_v17 = vpack.c.bf16 %v386_v6, %v385_v2  ;;  %v390_v18 = vmax.f32 %v358_v9, 0.0  ;;  %v391_v19 = vmax.f32 %v359_v10, 0.0  ;;  %v814_v20 = vunpack.c.h.bf16 %v930_v1  ;;  %v937_v2 = vld [vmem:[%s1430_s9 + $0x78] sm:$0xff]  }
  0x83   : > { %v871_v21 = vpack.c.bf16 %v388_v12, %v387_v8  ;;  %v392_v22 = vmax.f32 %v360_v14, 0.0  ;;  %v323_v23 = vmul.f32 %v813_v15, %v1440_v0  ;;  %v817_v24 = vunpack.c.l.bf16 %v931_v11 }
  0x84   : > { %941 = vst [vmem:[%s1470_s21 + $0x20] sm:$0xff] %v866_v17   ;;  %v876_v26 = vpack.c.bf16 %v390_v18, %v389_v13  ;;  %v324_v27 = vmul.f32 %v814_v20, %v1440_v0  ;;  %v818_v28 = vunpack.c.h.bf16 %v931_v11  ;;  %v821_v29 = vunpack.c.l.bf16 %v932_v16 }
  0x85   : > { %942 = vst [vmem:[%s1470_s21 + $0x28] sm:$0xff] %v871_v21   ;;  %v881_v30 = vpack.c.bf16 %v392_v22, %v391_v19  ;;  %v361_v31 = vadd.f32 %v1446_v7, %v323_v23  ;;  %v325_v32 = vmul.f32 %v817_v24, %v1440_v0  ;;  %v822_v33 = vunpack.c.h.bf16 %v932_v16 }
  0x86   : > { %943 = vst [vmem:[%s1470_s21 + $0x30] sm:$0xff] %v876_v26   ;;  %v362_v34 = vadd.f32 %v1446_v7, %v324_v27  ;;  %v326_v35 = vmul.f32 %v818_v28, %v1440_v0  ;;  %v327_v36 = vmul.f32 %v821_v29, %v1440_v0  ;;  %v825_v37 = vunpack.c.l.bf16 %v933_v25 }
  0x87   : > { %944 = vst [vmem:[%s1470_s21 + $0x38] sm:$0xff] %v881_v30   ;;  %v393_v39 = vmax.f32 %v361_v31, 0.0  ;;  %v363_v40 = vadd.f32 %v1446_v7, %v325_v32  ;;  %v328_v41 = vmul.f32 %v822_v33, %v1440_v0  ;;  %v826_v42 = vunpack.c.h.bf16 %v933_v25 }
  0x88   : > { %v394_v43 = vmax.f32 %v362_v34, 0.0  ;;  %v364_v44 = vadd.f32 %v1446_v7, %v326_v35  ;;  %v365_v45 = vadd.f32 %v1446_v7, %v327_v36  ;;  %v329_v46 = vmul.f32 %v825_v37, %v1440_v0 }
  0x89   : > { %v395_v47 = vmax.f32 %v363_v40, 0.0  ;;  %v366_v48 = vadd.f32 %v1446_v7, %v328_v41  ;;  %v330_v49 = vmul.f32 %v826_v42, %v1440_v0  ;;  %v829_v50 = vunpack.c.l.bf16 %v934_v38 }
  0x8a   : > { %v886_v52 = vpack.c.bf16 %v394_v43, %v393_v39  ;;  %v396_v53 = vmax.f32 %v364_v44, 0.0  ;;  %v397_v54 = vmax.f32 %v365_v45, 0.0  ;;  %v367_v55 = vadd.f32 %v1446_v7, %v329_v46 }
  0x8b   : > { %v398_v56 = vmax.f32 %v366_v48, 0.0  ;;  %v368_v57 = vadd.f32 %v1446_v7, %v330_v49  ;;  %v830_v58 = vunpack.c.h.bf16 %v934_v38  ;;  %v331_v59 = vmul.f32 %v829_v50, %v1440_v0 }
  0x8c   : > { %945 = vst [vmem:[%s1470_s21 + $0x40] sm:$0xff] %v886_v52   ;;  %v891_v61 = vpack.c.bf16 %v396_v53, %v395_v47  ;;  %v399_v62 = vmax.f32 %v367_v55, 0.0  ;;  %v833_v63 = vunpack.c.l.bf16 %v935_v51  ;;  %v834_v1 = vunpack.c.h.bf16 %v935_v51 }
  0x8d   : > { %v896_v3 = vpack.c.bf16 %v398_v56, %v397_v54  ;;  %v400_v4 = vmax.f32 %v368_v57, 0.0  ;;  %v332_v5 = vmul.f32 %v830_v58, %v1440_v0  ;;  %v369_v6 = vadd.f32 %v1446_v7, %v331_v59 }
  0x8e   : > { %946 = vst [vmem:[%s1470_s21 + $0x48] sm:$0xff] %v891_v61   ;;  %v333_v8 = vmul.f32 %v833_v63, %v1440_v0  ;;  %v334_v9 = vmul.f32 %v834_v1, %v1440_v0  ;;  %v837_v10 = vunpack.c.l.bf16 %v936_v60  ;;  %v838_v11 = vunpack.c.h.bf16 %v936_v60 }
  0x8f   : > { %947 = vst [vmem:[%s1470_s21 + $0x50] sm:$0xff] %v896_v3   ;;  %v901_v12 = vpack.c.bf16 %v400_v4, %v399_v62  ;;  %v370_v13 = vadd.f32 %v1446_v7, %v332_v5  ;;  %v401_v14 = vmax.f32 %v369_v6, 0.0  ;;  %v841_v15 = vunpack.c.l.bf16 %v937_v2 }
  0x90   : > { %v371_v16 = vadd.f32 %v1446_v7, %v333_v8  ;;  %v372_v17 = vadd.f32 %v1446_v7, %v334_v9  ;;  %v335_v18 = vmul.f32 %v837_v10, %v1440_v0  ;;  %v336_v19 = vmul.f32 %v838_v11, %v1440_v0 }
  0x91   : > { %948 = vst [vmem:[%s1470_s21 + $0x58] sm:$0xff] %v901_v12   ;;  %v402_v20 = vmax.f32 %v370_v13, 0.0  ;;  %v842_v21 = vunpack.c.h.bf16 %v937_v2  ;;  %v337_v22 = vmul.f32 %v841_v15, %v1440_v0 }
  0x92   : > { %v403_v23 = vmax.f32 %v371_v16, 0.0  ;;  %v404_v24 = vmax.f32 %v372_v17, 0.0  ;;  %v373_v25 = vadd.f32 %v1446_v7, %v335_v18  ;;  %v374_v26 = vadd.f32 %v1446_v7, %v336_v19 }
  0x93   : > { %v906_v27 = vpack.c.bf16 %v402_v20, %v401_v14  ;;  %v338_v28 = vmul.f32 %v842_v21, %v1440_v0  ;;  %v375_v29 = vadd.f32 %v1446_v7, %v337_v22 }
  0x94   : > { %v911_v30 = vpack.c.bf16 %v404_v24, %v403_v23  ;;  %v405_v31 = vmax.f32 %v373_v25, 0.0  ;;  %v406_v32 = vmax.f32 %v374_v26, 0.0 }
  0x95   : > { %949 = vst [vmem:[%s1470_s21 + $0x60] sm:$0xff] %v906_v27   ;;  %v376_v33 = vadd.f32 %v1446_v7, %v338_v28  ;;  %v407_v34 = vmax.f32 %v375_v29, 0.0 }
  0x96   : > { %950 = vst [vmem:[%s1470_s21 + $0x68] sm:$0xff] %v911_v30   ;;  %v916_v35 = vpack.c.bf16 %v406_v32, %v405_v31 }
  0x97   : > { %v408_v36 = vmax.f32 %v376_v33, 0.0 }
  0x98   : > { %951 = vst [vmem:[%s1470_s21 + $0x70] sm:$0xff] %v916_v35  }
  0x99   : > { %v921_v0 = vpack.c.bf16 %v408_v36, %v407_v34 }
  0x9b   : > { %952 = vst [vmem:[%s1470_s21 + $0x78] sm:$0xff] %v921_v0  }
  0x9c   : > { %1139 = shalt.err (!%p1136_p9)
}
  0x9d   : > { %s1140_s4 = scalar_lea.hbm %s1548_s18, 2048  ;;  %s1144_s7 = scalar_lea.hbm %s1603_s3, 4096 }
  0x9e   : > { %p1141_p8 = scmp.ne.s32.totalorder %s1548_s18, %s1140_s4  ;;  %p1145_p7 = scmp.lt.u32.totalorder %s1548_s18, %s1603_s3 }
  0x9f   : > { %p1146_p12 = scmp.lt.u32.totalorder %s1144_s7, %s1140_s4  ;;  %p1148_p5 = scmp.lt.u32.totalorder %s1140_s4, %s1548_s18 }
  0xa0   : > { %p1142_p13 = pnand %p1141_p8, %p1622_p10 }
  0xa1   : > { %p1147_p3 = por %p1146_p12, %p1145_p7 }
  0xa2   : > { %p1143_p4 = pneg %p1142_p13 }
  0xa3   : > { %p1149_p11 = por %p1148_p5, %p1147_p3 }
  0xa5   : > { %p1150_p1 = pnand %p1149_p11, %p1143_p4 }
  0xa7   : > { %1153 = shalt.err (!%p1150_p1)
}
  0xa8   : > { %s1220_s21 = smov 64   ;;  %s1221_s23 = smov 4  }
  0xa9   : > { %963 = dma.vmem_to_hbm [thread:$0]  (%p1622_p10), %s1550_s26, 2048, %s1548_s18, %s570_s19, %s1220_s21, %s1220_s21, %s1221_s23  }
  0xaa PF: > { %s601_s29 = sand.u32 1, %s1192_s12   ;;  %p1623_p0 = scmp.ne.s32.totalorder %s1614_s25, 0 }
  0xab   : > { %p1624_p6 = scmp.ge.s32.totalorder %s1212_s17, 2  ;;  %s602_s10 = scalar_lea.sflag [#allocation4], %s601_s29 }
  0xad   : > { %p977_p2 = pnand %p1624_p6, %p1623_p0 }
  0xaf   : > { %1187 = dma.done.wait (!%p977_p2), %s602_s10, 2048  }
  0xb0   : > { %1189 = vsyncadd (!%p977_p2), %s602_s10, 4294965248  ;;  %s20_s17 = sadd.s32 1, %s1212_s17   ;;  %s1625_s12 = smov %s1196_s13 }
  0xb1   : > { %p17_p9 = scmp.ge.s32.totalorder %s20_s17, 4   ;;  %s1626_s13 = smov %s1200_s14 }
  0xb2   : > { %s1627_s14 = smov %s1391_s28  ;;  %s1628_s15 = smov %s1208_s16 }
  0xb3   : > { %s1629_s16 = smov %s1631_s30  ;;  %19 = sbr.rel (!%p17_p9) target bundleno = 7 (0x7), region = 85 }
  0xba   :  { %607 = vsyncpa [#allocation3], 1 }
  0xbb   :  { %609 = vsyncpa [#allocation3 + $0x1], 1 }
  0xbc   :  { %610 = vsyncpa [#allocation6], 1 }
  0xbd   :  { %611 = vsyncpa [#allocation4], 1 }
  0xbe   :  { %613 = vsyncpa [#allocation4 + $0x1], 1 }

// kernel: basic_block_forward.8
= control target key start
LH: loop header
LB: loop body
LE: loop exit
PB: predicated region body
PF: predicated region fallthrough
CT: control target
= control target key end

     0   :  { %10 = vsyncpa [#allocation3], 0  ;;  %s2139_s0 = inlined_call_operand.hbm [shape: bf16[2,16,16,4], index: 0, kind: input, shape index: {}]   ;;  %s2140_s1 = inlined_call_operand.hbm [shape: bf16[4,128], index: 1, kind: input, shape index: {}]   ;;  %s2141_s2 = inlined_call_operand.hbm [shape: bf16[2,16,16,128], index: 2, kind: output, shape index: {0}]   ;;  %s2142_s3 = inlined_call_operand.hbm [shape: f32[2,1,128], index: 3, kind: output, shape index: {1}]   ;;  %s2143_s4 = inlined_call_operand.hbm [shape: f32[2,1,128], index: 4, kind: output, shape index: {2}]  }
   0x1   :  { %12 = vsyncpa [#allocation3 + $0x1], 0 }
   0x2   :  { %13 = vsyncpa [#allocation6], 0 }
   0x3   :  { %14 = vsyncpa [#allocation4], 0 }
   0x4   :  { %16 = vsyncpa [#allocation4 + $0x1], 0 }
   0x5   :  { %17 = vsyncpa [#allocation9], 0 }
   0x6   :  { %19 = vsyncpa [#allocation9 + $0x1], 0  ;;  %s1685_s15 = smov 0   ;;  %s1687_s16 = smov 0  }
   0x7   :  { %s1689_s17 = smov 0   ;;  %s1691_s18 = smov 0  }
   0x8   :  { %s1693_s19 = smov 0   ;;  %s1695_s20 = smov 0  }
   0x9 LB: > { %s1716_s21 = sadd.s32 4294967295, %s1648_s20   ;;  %s2144_s22 = sadd.s32 4294967294, %s1648_s20   ;;  %s1648_s20 = sphi %s1695_s20, %s25_s20   ;;  %s1644_s19 = sphi %s1693_s19, %s2172_s19   ;;  %s1640_s18 = sphi %s1691_s18, %s2171_s18   ;;  %s1636_s17 = sphi %s1689_s17, %s2170_s17   ;;  %s1632_s16 = sphi %s1687_s16, %s2169_s16   ;;  %s1628_s15 = sphi %s1685_s15, %s2168_s15  }
   0xa   : > { %s46_s23 = sadd.s32 1, %s1636_s17  ;;  %p53_p0 = scmp.ne.s32.totalorder %s1636_s17, %s1632_s16 }
   0xb   : > { %p54_p1 = scmp.eq.s32.totalorder %s1648_s20, 0  ;;  %p59_p2 = scmp.ne.s32.totalorder %s1632_s16, %s1628_s15 }
   0xc   : > { %p2145_p3 = scmp.eq.s32.totalorder %s1716_s21, 0  ;;  %p106_p4 = scmp.eq.s32.totalorder %s1716_s21, 1 }
   0xd   : > { %p1727_p5 = por %p54_p1, %p53_p0  ;;  %p112_p6 = scmp.eq.s32.totalorder %s2144_s22, 1 }
   0xe   : > { %p1735_p7 = por %p2145_p3, %p59_p2  ;;  %p1739_p8 = por %p106_p4, %p53_p0 }
   0xf   : > { %p1743_p9 = por %p112_p6, %p59_p2  ;;  %p1075_p10 = scmp.ge.s32.totalorder %s1648_s20, 1 }
  0x10   : > { %s2151_s25 = scalar_select %p1735_p7, 1, 0 }
  0x11   : > { %s2152_s26 = scalar_select %p1739_p8, 1, 0 }
  0x12   : > { %s2153_s27 = scalar_select %p1743_p9, 1, 0 }
  0x13   : > { %p171_p11 = scmp.lt.s32.totalorder %s1648_s20, 3  ;;  %s1650_s29 = smov [#allocation5]  }
  0x14   : > { %s184_s30 = sshll.u32 %s1650_s29, 4  ;;  %p1371_p1 = scmp.lt.s32.totalorder %s1648_s20, 2  ;;  %s185_s30 = int_to_ptr.vmem [resolvable:$true] %s184_s30 }
  0x15   : > { %p1750_p13 = pnand %p1075_p10, %p171_p11  ;;  %s37_s7 = sadd.s32 1, %s1644_s19 }
  0x16   : > { %p1759_p4 = pnand %p1371_p1, %p1727_p5  ;;  %p1770_p6 = scmp.ge.s32.totalorder %s37_s7, 2 }
  0x17   : > { %s2154_s28 = scalar_select %p1750_p13, 1, 0 }
  0x18   : > { %p1352_p0 = pneg %p1750_p13  ;;  %s195_s9 = sand.u32 1, %s1636_s17  }
  0x19   : > { %s2155_s5 = scalar_select %p1759_p4, 1, 0 }
  0x1a   : > { %p1765_p2 = pnand %p1352_p0, %p2145_p3  ;;  %s1444_s12 = scalar_lea.hbm %s2140_s1, 32 }
  0x1b   : > { %s2157_s8 = scalar_select %p1770_p6, 1, 0 }
  0x1c   : > { %p1445_p5 = scmp.ne.s32.totalorder %s2140_s1, %s1444_s12  ;;  %p1446_p10 = pneg %p1765_p2 }
  0x1d   : > { %p1451_p0 = scmp.lt.u32.totalorder %s1444_s12, %s2140_s1 }
  0x1e   : > { %p1447_p11 = pnand %p1446_p10, %p1445_p5 }
  0x20   : > { %p1448_p1 = pneg %p1447_p11 }
  0x22   : > { %p1453_p12 = pnand %p1451_p0, %p1448_p1 }
  0x24   : > { %1456 = shalt.err (!%p1453_p12)
}
  0x25   : > { %s1457_s22 = scalar_lea.vmem %s185_s30, 32  ;;  %p1465_p7 = scmp.lt.s32.totalorder %s185_s30, %s185_s30 }
  0x26   : > { %p1458_p3 = scmp.ne.s32.totalorder %s185_s30, %s1457_s22  ;;  %p1466_p13 = scmp.lt.s32.totalorder %s1457_s22, %s1457_s22 }
  0x28   : > { %p1460_p9 = pnand %p1458_p3, %p1446_p10  ;;  %p1467_p4 = por %p1466_p13, %p1465_p7 }
  0x2a   : > { %p1461_p8 = pneg %p1460_p9 }
  0x2c   : > { %p1468_p6 = pnand %p1467_p4, %p1461_p8 }
  0x2e   : > { %1471 = shalt.err (!%p1468_p6)
}
  0x2f   : > { %1355 = dma.hbm_to_vmem [thread:$0]  (!%p1765_p2), %s2140_s1, 32, %s185_s30, [#allocation6]  }
  0x30   : > { %p2158_p3 = scmp.ne.s32.totalorder %s2157_s8, 0  ;;  %s1078_s22 = sshll.u32 %s195_s9, 7 }
  0x31   : > { %s1156_s13 = sshll.u32 %s1644_s19, 11  ;;  %s199_s29 = scalar_lea.vmem [#allocation2], %s1078_s22 }
  0x32   : > { %s2174_s7 = smov (%p2158_p3, %s37_s7), 0  ;;  %s1801_s24 = scalar_lea.hbm %s2139_s0, %s1156_s13 }
  0x33   : > { %s41_s12 = ssub.s32 %s1644_s19, %s2174_s7  ;;  %s209_s10 = sshll.u32 %s199_s29, 4  ;;  %s1808_s10 = int_to_ptr.vmem [resolvable:$true] %s209_s10 }
  0x34   : > { %p44_p7 = scmp.eq.s32.totalorder %s41_s12, 0  ;;  %s1810_s8 = scalar_lea.sflag [#allocation3], %s195_s9 }
  0x35   : > { %s1472_s11 = scalar_lea.hbm %s1801_s24, 2048  ;;  %p2159_p9 = scmp.ne.s32.totalorder %s2155_s5, 0 }
  0x36   : > { %s1806_s30 = scalar_select %p44_p7, %s1636_s17, %s46_s23  }
  0x37   : > { %p1473_p8 = scmp.ne.s32.totalorder %s1801_s24, %s1472_s11  ;;  %p1474_p12 = pneg %p2159_p9 }
  0x38   : > { %s1477_s22 = scalar_lea.hbm %s2139_s0, 4096  ;;  %p1478_p2 = scmp.lt.u32.totalorder %s1801_s24, %s2139_s0 }
  0x39   : > { %p1475_p13 = pnand %p1474_p12, %p1473_p8  ;;  %p1479_p6 = scmp.lt.u32.totalorder %s1477_s22, %s1472_s11 }
  0x3a   : > { %p1481_p10 = scmp.lt.u32.totalorder %s1472_s11, %s1801_s24 }
  0x3b   : > { %p1476_p4 = pneg %p1475_p13  ;;  %p1480_p5 = por %p1479_p6, %p1478_p2 }
  0x3d   : > { %p1482_p11 = por %p1481_p10, %p1480_p5 }
  0x3f   : > { %p1483_p1 = pnand %p1482_p11, %p1476_p4 }
  0x41   : > { %1486 = shalt.err (!%p1483_p1)
}
  0x42   : > { %s1487_s23 = scalar_lea.vmem %s1808_s10, 2048  ;;  %s1651_s9 = smov [#allocation2]  }
  0x43   : > { %p1488_p0 = scmp.ne.s32.totalorder %s1808_s10, %s1487_s23  ;;  %s1492_s29 = sshll.u32 %s1651_s9, 4  ;;  %s1493_s29 = int_to_ptr.vmem [resolvable:$false] %s1492_s29 }
  0x44   : > { %s1494_s12 = scalar_lea.vmem %s1493_s29, 4096  ;;  %p1495_p8 = scmp.lt.s32.totalorder %s1808_s10, %s1493_s29 }
  0x45   : > { %p1490_p3 = pnand %p1488_p0, %p1474_p12  ;;  %p1496_p13 = scmp.lt.s32.totalorder %s1494_s12, %s1487_s23 }
  0x47   : > { %p1491_p7 = pneg %p1490_p3  ;;  %p1497_p2 = por %p1496_p13, %p1495_p8 }
  0x49   : > { %p1498_p6 = pnand %p1497_p2, %p1491_p7 }
  0x4b   : > { %1501 = shalt.err (!%p1498_p6)
}
  0x4c   : > { %s1652_s11 = smov 64   ;;  %s1653_s13 = smov 4  }
  0x4d   : > { %1359 = dma.hbm_to_vmem [thread:$0]  (!%p2159_p9), %s1801_s24, 2048, %s1808_s10, %s1810_s8, %s1652_s11, %s1652_s11, %s1653_s13  }
  0x4e   : > { %p2160_p12 = scmp.ne.s32.totalorder %s2154_s28, 0 }
  0x4f   : > { %s1841_s22 = sand.u32 (!%p2160_p12), 1, %s1632_s16   ;;  %p2161_p4 = scmp.ne.s32.totalorder (!%p2160_p12), %s2151_s25, 0 }
  0x50   : > { %221 = sbr.rel (%p2160_p12) target bundleno = 434 (0x1b2), region = 28  ;;  %s1082_s6 = sshll.u32 (!%p2160_p12), %s1841_s22, 7 }
  0x51   : > { %s224_s14 = scalar_lea.sflag (!%p2160_p12), [#allocation3], %s1841_s22  ;;  %s1847_s23 = scalar_lea.vmem (!%p2160_p12), [#allocation2], %s1082_s6 }
  0x57   : > { %1611 = dma.done.wait (%p2161_p4), %s224_s14, 2048  }
  0x58   : > { %1613 = vsyncadd (%p2161_p4), %s224_s14, 4294965248  ;;  %p2162_p9 = scmp.eq.s32.totalorder %s1716_s21, 0 }
  0x5a   : > { %1615 = dma.done.wait (%p2162_p9), [#allocation6], 32   ;;  %p2163_p5 = pmov %p2162_p9 }
  0x5b   : > { %vm429_vm0 = vcmask 1041408   ;;  %vm380_vm1 = vcmask 31744   ;;  %v299_v0 = vld [vmem:[#allocation5] sm:$0x3]  ;;  %v1429_v3 = vld [vmem:[%s1847_s23 + $0x8] sm:$0xff]   ;;  %v1430_v4 = vld [vmem:[%s1847_s23 + $0x10] sm:$0xff]  }
  0x5c   : > { %1617 = vsyncadd (%p2163_p5), [#allocation6], 4294967264  ;;  %1338 = vmatprep.subr.msk.bf16.mxu0 %vm429_vm0, %v299_v0  ;;  %v431_v1 = vsel %vm429_vm0, %v299_v0, 0  ;;  %v1428_v2 = vld [vmem:[%s1847_s23] sm:$0xff]   ;;  %1339 = vmatprep.subr.msk.bf16.mxu1 %vm429_vm0, %v299_v0  ;;  %v1431_v5 = vld [vmem:[%s1847_s23 + $0x18] sm:$0xff]   ;;  %s1890_s25 = scalar_lea.vmem [#allocation8], %s1841_s22 }
  0x5d   : > { %1303 = vmatpush3.bf16.msra.mxu0 %v431_v1  ;;  %1337 = vmatpush3.bf16.msra.mxu1 %v431_v1  ;;  %v1432_v6 = vld [vmem:[%s1847_s23 + $0x20] sm:$0xff]   ;;  %v1437_v8 = vld [vmem:[%s1847_s23 + $0x48] sm:$0xff]   ;;  %v1438_v9 = vld [vmem:[%s1847_s23 + $0x50] sm:$0xff]   ;;  %v1654_v18 = vmov 0.0   ;;  %s1894_s28 = scalar_lea.vmem [#allocation10], %s1841_s22  ;;  %s1899_s5 = scalar_lea.vmem [#allocation7], %s1082_s6 }
  0x5e   : > { %1304 = vmatprep.mubr.msk.bf16.mxu0 %vm380_vm1, %v1428_v2  ;;  %v1436_v7 = vld [vmem:[%s1847_s23 + $0x40] sm:$0xff]   ;;  %v1439_v10 = vld [vmem:[%s1847_s23 + $0x58] sm:$0xff]   ;;  %v1433_v11 = vld [vmem:[%s1847_s23 + $0x28] sm:$0xff]   ;;  %758 = vst [vmem:[%s1890_s25] sm:$0x1] %v1654_v18  ;;  %s1189_s24 = sshll.u32 %s1640_s18, 11  ;;  %s897_s10 = sshll.u32 %s1899_s5, 4  ;;  %s1971_s10 = int_to_ptr.vmem [resolvable:$true] %s897_s10 }
  0x5f   : > { %1320 = vmatprep.mubr.msk.bf16.mxu1 %vm380_vm1, %v1436_v7  ;;  %v1440_v12 = vld [vmem:[%s1847_s23 + $0x60] sm:$0xff]   ;;  %v1434_v13 = vld [vmem:[%s1847_s23 + $0x30] sm:$0xff]   ;;  %v1441_v14 = vld [vmem:[%s1847_s23 + $0x68] sm:$0xff]   ;;  %759 = vst [vmem:[%s1894_s28] sm:$0x1] %v1654_v18  ;;  %s1969_s29 = scalar_lea.hbm %s2141_s2, %s1189_s24  ;;  %s873_s12 = scalar_lea.sflag [#allocation4], %s1841_s22 }
  0x60   : > { %1305 = vmatmul.mubr.msk.bf16.vlgmr.msra.gmra.mrb[0].mxu0 %vm380_vm1, %v1429_v3  ;;  %1321 = vmatmul.mubr.msk.bf16.vlgmr.msra.gmra.mrb[0].mxu1 %vm380_vm1, %v1437_v8  ;;  %v1435_v15 = vld [vmem:[%s1847_s23 + $0x38] sm:$0xff]   ;;  %v1442_v16 = vld [vmem:[%s1847_s23 + $0x70] sm:$0xff]   ;;  %s1502_s11 = scalar_lea.vmem %s1971_s10, 2048  ;;  %p2164_p11 = scmp.ne.s32.totalorder %s2152_s26, 0 }
  0x61   : > { %1308 = vmatprep.mubr.msk.bf16.mxu0 %vm380_vm1, %v1430_v4  ;;  %1324 = vmatprep.mubr.msk.bf16.mxu1 %vm380_vm1, %v1438_v9  ;;  %v1443_v17 = vld [vmem:[%s1847_s23 + $0x78] sm:$0xff]   ;;  %p1503_p10 = scmp.ne.s32.totalorder %s1971_s10, %s1502_s11  ;;  %s1655_s13 = smov [#allocation7]  }
  0x62   : > { %s1506_s6 = sshll.u32 %s1655_s13, 4  ;;  %s1507_s6 = int_to_ptr.vmem [resolvable:$false] %s1506_s6 }
  0x63   : > { %p1504_p1 = pnand %p1503_p10, %p2164_p11  ;;  %s1508_s14 = scalar_lea.vmem %s1507_s6, 4096 }
  0x64   : > { %p1509_p3 = scmp.lt.s32.totalorder %s1971_s10, %s1507_s6  ;;  %p1510_p7 = scmp.lt.s32.totalorder %s1508_s14, %s1502_s11 }
  0x65   : > { %p1505_p0 = pneg %p1504_p1 }
  0x66   : > { %p1511_p8 = por %p1510_p7, %p1509_p3 }
  0x68   : > { %1309 = vmatmul.mubr.msk.bf16.gmra.mrb[4].mxu0 %vm380_vm1, %v1431_v5  ;;  %1325 = vmatmul.mubr.msk.bf16.gmra.mrb[4].mxu1 %vm380_vm1, %v1439_v10  ;;  %p1512_p13 = pnand %p1511_p8, %p1505_p0 }
  0x69   : > { %1312 = vmatprep.mubr.msk.bf16.mxu0 %vm380_vm1, %v1432_v6  ;;  %1328 = vmatprep.mubr.msk.bf16.mxu1 %vm380_vm1, %v1440_v12 }
  0x70   : > { %1313 = vmatmul.mubr.msk.bf16.gmra.mrb[8].mxu0 %vm380_vm1, %v1433_v11  ;;  %1329 = vmatmul.mubr.msk.bf16.gmra.mrb[8].mxu1 %vm380_vm1, %v1441_v14 }
  0x71   : > { %1316 = vmatprep.mubr.msk.bf16.mxu0 %vm380_vm1, %v1434_v13  ;;  %1332 = vmatprep.mubr.msk.bf16.mxu1 %vm380_vm1, %v1442_v16 }
  0x78   : > { %1317 = vmatmul.mubr.msk.bf16.gmra.mrb[12].mxu0 %vm380_vm1, %v1435_v15  ;;  %1333 = vmatmul.mubr.msk.bf16.gmra.mrb[12].mxu1 %vm380_vm1, %v1443_v17 }
 0x133   : > { %v1306_v19 = vpop.f32.mrb[0].mxu0  ;;  %v1903_v31 = vpop.f32.mrb[0].mxu1 }
 0x134   : > { %v467_v20 = vpop.f32.mrb[1].mxu0  ;;  %v803_v28 = vmul.f32 %v1306_v19, %v1306_v19  ;;  %v1905_v36 = vpop.f32.mrb[1].mxu1 }
 0x135   : > { %v1307_v21 = vpop.f32.mrb[2].mxu0  ;;  %v801_v24 = vmul.f32 %v467_v20, %v467_v20  ;;  %v1907_v38 = vpop.f32.mrb[2].mxu1 }
 0x136   : > { %v1198_v22 = vpack.c.bf16 %v1307_v21, %v1306_v19  ;;  %v470_v23 = vpop.f32.mrb[3].mxu0  ;;  %v804_v32 = vmul.f32 %v1307_v21, %v1307_v21  ;;  %v1238_v43 = vpack.c.bf16 %v1907_v38, %v1903_v31  ;;  %v1911_v44 = vpop.f32.mrb[3].mxu1 }
 0x137   : > { %v1193_v25 = vpack.c.bf16 %v470_v23, %v467_v20  ;;  %v761_v26 = vadd.f32 %v470_v23, %v467_v20  ;;  %v802_v27 = vmul.f32 %v470_v23, %v470_v23  ;;  %v1233_v47 = vpack.c.bf16 %v1911_v44, %v1905_v36 }
 0x138   : > { %1270 = vst [vmem:[%s1899_s5 + $0x8] sm:$0xff] %v1198_v22   ;;  %1278 = vst [vmem:[%s1899_s5 + $0x48] sm:$0xff] %v1238_v43  }
 0x139   : > { %1194 = vst [vmem:[%s1899_s5] sm:$0xff] %v1193_v25   ;;  %v762_v29 = vadd.f32 %v1306_v19, %v761_v26  ;;  %v833_v30 = vadd.f32 %v802_v27, %v801_v24  ;;  %1277 = vst [vmem:[%s1899_s5 + $0x40] sm:$0xff] %v1233_v47   ;;  %v817_v47 = vmul.f32 %v1905_v36, %v1905_v36 }
 0x13b   : > { %v834_v33 = vadd.f32 %v833_v30, %v803_v28  ;;  %v1310_v34 = vpop.f32.mrb[4].mxu0  ;;  %v763_v35 = vadd.f32 %v1307_v21, %v762_v29  ;;  %v1919_v55 = vpop.f32.mrb[4].mxu1 }
 0x13c   : > { %v483_v37 = vpop.f32.mrb[5].mxu0  ;;  %v807_v52 = vmul.f32 %v1310_v34, %v1310_v34  ;;  %v1921_v60 = vpop.f32.mrb[5].mxu1 }
 0x13d   : > { %v764_v39 = vadd.f32 %v763_v35, %v483_v37  ;;  %v805_v40 = vmul.f32 %v483_v37, %v483_v37  ;;  %v835_v41 = vadd.f32 %v834_v33, %v804_v32  ;;  %v1311_v42 = vpop.f32.mrb[6].mxu0  ;;  %v1923_v62 = vpop.f32.mrb[6].mxu1 }
 0x13e   : > { %v1208_v45 = vpack.c.bf16 %v1311_v42, %v1310_v34  ;;  %v486_v46 = vpop.f32.mrb[7].mxu0  ;;  %v808_v56 = vmul.f32 %v1311_v42, %v1311_v42  ;;  %v1248_v3 = vpack.c.bf16 %v1923_v62, %v1919_v55  ;;  %v1927_v4 = vpop.f32.mrb[7].mxu1 }
 0x13f   : > { %v836_v48 = vadd.f32 %v835_v41, %v805_v40  ;;  %v1203_v49 = vpack.c.bf16 %v486_v46, %v483_v37  ;;  %v765_v50 = vadd.f32 %v764_v39, %v486_v46  ;;  %v806_v51 = vmul.f32 %v486_v46, %v486_v46 }
 0x140   : > { %1272 = vst [vmem:[%s1899_s5 + $0x18] sm:$0xff] %v1208_v45   ;;  %v1243_v7 = vpack.c.bf16 %v1927_v4, %v1921_v60  ;;  %1280 = vst [vmem:[%s1899_s5 + $0x58] sm:$0xff] %v1248_v3  }
 0x141   : > { %1271 = vst [vmem:[%s1899_s5 + $0x10] sm:$0xff] %v1203_v49   ;;  %v766_v53 = vadd.f32 %v1310_v34, %v765_v50  ;;  %v837_v54 = vadd.f32 %v836_v48, %v806_v51 }
 0x142   : > { %1279 = vst [vmem:[%s1899_s5 + $0x50] sm:$0xff] %v1243_v7  }
 0x143   : > { %v838_v57 = vadd.f32 %v837_v54, %v807_v52  ;;  %v1314_v58 = vpop.f32.mrb[8].mxu0  ;;  %v767_v59 = vadd.f32 %v1311_v42, %v766_v53  ;;  %v1935_v15 = vpop.f32.mrb[8].mxu1 }
 0x144   : > { %v499_v61 = vpop.f32.mrb[9].mxu0  ;;  %v811_v12 = vmul.f32 %v1314_v58, %v1314_v58  ;;  %v1937_v20 = vpop.f32.mrb[9].mxu1 }
 0x145   : > { %v768_v63 = vadd.f32 %v767_v59, %v499_v61  ;;  %v809_v0 = vmul.f32 %v499_v61, %v499_v61  ;;  %v839_v1 = vadd.f32 %v838_v57, %v808_v56  ;;  %v1315_v2 = vpop.f32.mrb[10].mxu0  ;;  %v1939_v22 = vpop.f32.mrb[10].mxu1  ;;  %v818_v57 = vmul.f32 %v1911_v44, %v1911_v44 }
 0x146   : > { %v1218_v5 = vpack.c.bf16 %v1315_v2, %v1314_v58  ;;  %v502_v6 = vpop.f32.mrb[11].mxu0  ;;  %v812_v16 = vmul.f32 %v1315_v2, %v1315_v2  ;;  %v1258_v27 = vpack.c.bf16 %v1939_v22, %v1935_v15  ;;  %v1943_v28 = vpop.f32.mrb[11].mxu1 }
 0x147   : > { %v840_v8 = vadd.f32 %v839_v1, %v809_v0  ;;  %v1213_v9 = vpack.c.bf16 %v502_v6, %v499_v61  ;;  %v769_v10 = vadd.f32 %v768_v63, %v502_v6  ;;  %v810_v11 = vmul.f32 %v502_v6, %v502_v6 }
 0x148   : > { %1274 = vst [vmem:[%s1899_s5 + $0x28] sm:$0xff] %v1218_v5   ;;  %v1253_v32 = vpack.c.bf16 %v1943_v28, %v1937_v20  ;;  %1282 = vst [vmem:[%s1899_s5 + $0x68] sm:$0xff] %v1258_v27  }
 0x149   : > { %1273 = vst [vmem:[%s1899_s5 + $0x20] sm:$0xff] %v1213_v9   ;;  %v770_v13 = vadd.f32 %v1314_v58, %v769_v10  ;;  %v841_v14 = vadd.f32 %v840_v8, %v810_v11  ;;  %v819_v58 = vmul.f32 %v1903_v31, %v1903_v31 }
 0x14a   : > { %1281 = vst [vmem:[%s1899_s5 + $0x60] sm:$0xff] %v1253_v32  }
 0x14b   : > { %v842_v17 = vadd.f32 %v841_v14, %v811_v12  ;;  %v1318_v18 = vpop.f32.mrb[12].mxu0  ;;  %v771_v19 = vadd.f32 %v1315_v2, %v770_v13  ;;  %v1951_v42 = vpop.f32.mrb[12].mxu1 }
 0x14c   : > { %v515_v21 = vpop.f32.mrb[13].mxu0  ;;  %v815_v39 = vmul.f32 %v1318_v18, %v1318_v18  ;;  %v1957_v48 = vpop.f32.mrb[13].mxu1 }
 0x14d   : > { %v772_v23 = vadd.f32 %v771_v19, %v515_v21  ;;  %v813_v24 = vmul.f32 %v515_v21, %v515_v21  ;;  %v843_v25 = vadd.f32 %v842_v17, %v812_v16  ;;  %v1319_v26 = vpop.f32.mrb[14].mxu0  ;;  %v1959_v49 = vpop.f32.mrb[14].mxu1 }
 0x14e   : > { %v1228_v29 = vpack.c.bf16 %v1319_v26, %v1318_v18  ;;  %v518_v30 = vpop.f32.mrb[15].mxu0  ;;  %v816_v43 = vmul.f32 %v1319_v26, %v1319_v26  ;;  %v1268_v52 = vpack.c.bf16 %v1959_v49, %v1951_v42  ;;  %v1964_v53 = vpop.f32.mrb[15].mxu1 }
 0x14f   : > { %v844_v33 = vadd.f32 %v843_v25, %v813_v24  ;;  %v1223_v34 = vpack.c.bf16 %v518_v30, %v515_v21  ;;  %v773_v35 = vadd.f32 %v772_v23, %v518_v30  ;;  %v814_v37 = vmul.f32 %v518_v30, %v518_v30 }
 0x150   : > { %1276 = vst [vmem:[%s1899_s5 + $0x38] sm:$0xff] %v1228_v29   ;;  %v1263_v54 = vpack.c.bf16 %v1964_v53, %v1957_v48  ;;  %1284 = vst [vmem:[%s1899_s5 + $0x78] sm:$0xff] %v1268_v52  }
 0x151   : > { %1275 = vst [vmem:[%s1899_s5 + $0x30] sm:$0xff] %v1223_v34   ;;  %v774_v40 = vadd.f32 %v1318_v18, %v773_v35  ;;  %v845_v41 = vadd.f32 %v844_v33, %v814_v37 }
 0x152   : > { %1283 = vst [vmem:[%s1899_s5 + $0x70] sm:$0xff] %v1263_v54  }
 0x153   : > { %v846_v45 = vadd.f32 %v845_v41, %v815_v39  ;;  %v775_v46 = vadd.f32 %v1319_v26, %v774_v40 }
 0x155   : > { %v776_v50 = vadd.f32 %v775_v46, %v1905_v36  ;;  %v847_v51 = vadd.f32 %v846_v45, %v816_v43 }
 0x157   : > { %v848_v36 = vadd.f32 %v847_v51, %v817_v47  ;;  %v777_v56 = vadd.f32 %v776_v50, %v1911_v44 }
 0x159   : > { %v778_v59 = vadd.f32 %v1903_v31, %v777_v56  ;;  %v849_v61 = vadd.f32 %v848_v36, %v818_v57 }
 0x15a   : > { %1515 = shalt.err (!%p1512_p13)
}
 0x15b   : > { %s1516_s23 = scalar_lea.hbm %s1969_s29, 2048  ;;  %s1520_s8 = scalar_lea.hbm %s2141_s2, 4096 }
 0x15c   : > { %p1517_p2 = scmp.ne.s32.totalorder %s1969_s29, %s1516_s23  ;;  %p1521_p4 = scmp.lt.u32.totalorder %s1969_s29, %s2141_s2 }
 0x15d   : > { %p1522_p9 = scmp.lt.u32.totalorder %s1520_s8, %s1516_s23  ;;  %p1524_p10 = scmp.lt.u32.totalorder %s1516_s23, %s1969_s29 }
 0x15e   : > { %p1518_p6 = pnand %p1517_p2, %p2164_p11 }
 0x15f   : > { %p1523_p5 = por %p1522_p9, %p1521_p4 }
 0x160   : > { %p1519_p12 = pneg %p1518_p6 }
 0x161   : > { %p1525_p1 = por %p1524_p10, %p1523_p5 }
 0x163   : > { %p1526_p0 = pnand %p1525_p1, %p1519_p12 }
 0x165   : > { %1529 = shalt.err (!%p1526_p0)
}
 0x166   : > { %s1656_s11 = smov 64   ;;  %s1657_s6 = smov 4   ;;  %v820_v31 = vmul.f32 %v1907_v38, %v1907_v38  ;;  %v850_v44 = vadd.f32 %v849_v61, %v819_v58  ;;  %v779_v63 = vadd.f32 %v1907_v38, %v778_v59  ;;  %v821_v0 = vmul.f32 %v1921_v60, %v1921_v60  ;;  %v760_v46 = vld [vmem:[%s1890_s25] sm:$0x1] }
 0x167   : > { %1346 = dma.vmem_to_hbm [thread:$0]  (%p2164_p11), %s1971_s10, 2048, %s1969_s29, %s873_s12, %s1656_s11, %s1656_s11, %s1657_s6   ;;  %v822_v6 = vmul.f32 %v1927_v4, %v1927_v4  ;;  %v823_v7 = vmul.f32 %v1919_v55, %v1919_v55  ;;  %v824_v38 = vmul.f32 %v1923_v62, %v1923_v62  ;;  %v826_v16 = vmul.f32 %v1943_v28, %v1943_v28 }
 0x168   : > { %v780_v1 = vadd.f32 %v779_v63, %v1921_v60  ;;  %v851_v2 = vadd.f32 %v850_v44, %v820_v31  ;;  %v825_v60 = vmul.f32 %v1937_v20, %v1937_v20  ;;  %v830_v27 = vmul.f32 %v1964_v53, %v1964_v53  ;;  %s877_s22 = sand.u32 1, %s1716_s21   ;;  %s1152_s10 = sshll.u32 %s1640_s18, 4 }
 0x169   : > { %v832_v29 = vmul.f32 %v1959_v49, %v1959_v49  ;;  %s913_s29 = sshll.u32 %s1890_s25, 4  ;;  %s926_s12 = sshll.u32 %s1894_s28, 4  ;;  %s2057_s29 = int_to_ptr.vmem [resolvable:$true] %s913_s29  ;;  %s2065_s12 = int_to_ptr.vmem [resolvable:$true] %s926_s12 }
 0x16a   : > { %v852_v3 = vadd.f32 %v851_v2, %v821_v0  ;;  %v781_v5 = vadd.f32 %v780_v1, %v1927_v4  ;;  %s2055_s5 = scalar_lea.hbm %s2142_s3, %s1152_s10  ;;  %s2063_s24 = scalar_lea.hbm %s2143_s4, %s1152_s10 }
 0x16b   : > { %s2067_s8 = scalar_lea.sflag [#allocation9], %s877_s22  ;;  %s1530_s9 = scalar_lea.vmem %s2057_s29, 16 }
 0x16c   : > { %v782_v8 = vadd.f32 %v1919_v55, %v781_v5  ;;  %v853_v9 = vadd.f32 %v852_v3, %v822_v6  ;;  %v827_v55 = vmul.f32 %v1935_v15, %v1935_v15  ;;  %p1531_p3 = scmp.ne.s32.totalorder %s2057_s29, %s1530_s9  ;;  %s1658_s13 = smov [#allocation8]  }
 0x16d   : > { %s1534_s11 = sshll.u32 %s1658_s13, 4  ;;  %s1535_s11 = int_to_ptr.vmem [resolvable:$false] %s1534_s11 }
 0x16e   : > { %v854_v10 = vadd.f32 %v853_v9, %v823_v7  ;;  %v783_v11 = vadd.f32 %v1923_v62, %v782_v8  ;;  %v828_v62 = vmul.f32 %v1939_v22, %v1939_v22  ;;  %p1532_p7 = pnand %p1531_p3, %p2164_p11  ;;  %s1536_s6 = scalar_lea.vmem %s1535_s11, 32 }
 0x16f   : > { %p1537_p13 = scmp.lt.s32.totalorder %s2057_s29, %s1535_s11  ;;  %p1538_p2 = scmp.lt.s32.totalorder %s1536_s6, %s1530_s9 }
 0x170   : > { %v784_v12 = vadd.f32 %v783_v11, %v1937_v20  ;;  %v855_v13 = vadd.f32 %v854_v10, %v824_v38  ;;  %v829_v20 = vmul.f32 %v1957_v48, %v1957_v48  ;;  %p1533_p8 = pneg %p1532_p7 }
 0x171   : > { %p1539_p6 = por %p1538_p2, %p1537_p13 }
 0x172   : > { %v856_v14 = vadd.f32 %v855_v13, %v825_v60  ;;  %v785_v4 = vadd.f32 %v784_v12, %v1943_v28 }
 0x173   : > { %p1540_p12 = pnand %p1539_p6, %p1533_p8 }
 0x174   : > { %v786_v17 = vadd.f32 %v1935_v15, %v785_v4  ;;  %v857_v18 = vadd.f32 %v856_v14, %v826_v16  ;;  %v831_v15 = vmul.f32 %v1951_v42, %v1951_v42 }
 0x176   : > { %v858_v19 = vadd.f32 %v857_v18, %v827_v55  ;;  %v787_v21 = vadd.f32 %v1939_v22, %v786_v17 }
 0x178   : > { %v788_v23 = vadd.f32 %v787_v21, %v1957_v48  ;;  %v859_v24 = vadd.f32 %v858_v19, %v828_v62 }
 0x17a   : > { %v860_v25 = vadd.f32 %v859_v24, %v829_v20  ;;  %v789_v26 = vadd.f32 %v788_v23, %v1964_v53 }
 0x17c   : > { %v790_v28 = vadd.f32 %v1951_v42, %v789_v26  ;;  %v861_v22 = vadd.f32 %v860_v25, %v830_v27 }
 0x17e   : > { %v791_v30 = vadd.f32 %v1959_v49, %v790_v28  ;;  %v862_v32 = vadd.f32 %v861_v22, %v831_v15  ;;  %v800_v49 = vld [vmem:[%s1894_s28] sm:$0x1] }
 0x180   : > { %v792_v33 = vrot.slane %v791_v30, 4  ;;  %v863_v34 = vadd.f32 %v862_v32, %v832_v29 }
 0x182   : > { %v793_v35 = vadd.f32 %v792_v33, %v791_v30  ;;  %v864_v37 = vrot.slane %v863_v34, 4 }
 0x184   : > { %v794_v39 = vrot.slane %v793_v35, 2  ;;  %v865_v40 = vadd.f32 %v864_v37, %v863_v34 }
 0x186   : > { %v795_v41 = vadd.f32 %v794_v39, %v793_v35  ;;  %v866_v42 = vrot.slane %v865_v40, 2 }
 0x188   : > { %v796_v43 = vrot.slane %v795_v41, 1  ;;  %v867_v45 = vadd.f32 %v866_v42, %v865_v40 }
 0x18a   : > { %v797_v47 = vadd.f32 %v796_v43, %v795_v41  ;;  %v868_v48 = vrot.slane %v867_v45, 1 }
 0x18c   : > { %v869_v50 = vadd.f32 %v868_v48, %v867_v45  ;;  %v798_v51 = vadd.f32 %v797_v47, %v760_v46 }
 0x18e   : > { %799 = vst [vmem:[%s1890_s25] sm:$0x1] %v798_v51  ;;  %v870_v52 = vadd.f32 %v869_v50, %v800_v49 }
 0x18f   : > { %1543 = shalt.err (!%p1540_p12)
}
 0x190   : > { %s1544_s25 = scalar_lea.hbm %s2055_s5, 16  ;;  %s1548_s14 = scalar_lea.hbm %s2142_s3, 32 }
 0x191   : > { %p1545_p4 = scmp.ne.s32.totalorder %s2055_s5, %s1544_s25  ;;  %p1549_p10 = scmp.lt.u32.totalorder %s2055_s5, %s2142_s3 }
 0x192   : > { %p1550_p1 = scmp.lt.u32.totalorder %s1548_s14, %s1544_s25  ;;  %p1552_p3 = scmp.lt.u32.totalorder %s1544_s25, %s2055_s5 }
 0x193   : > { %p1546_p9 = pnand %p1545_p4, %p2164_p11 }
 0x194   : > { %p1551_p0 = por %p1550_p1, %p1549_p10 }
 0x195   : > { %p1547_p5 = pneg %p1546_p9 }
 0x196   : > { %p1553_p7 = por %p1552_p3, %p1551_p0 }
 0x198   : > { %p1554_p8 = pnand %p1553_p7, %p1547_p5 }
 0x19a   : > { %1557 = shalt.err (!%p1554_p8)
}
 0x19b   : > { %1347 = dma.vmem_to_hbm [thread:$0]  (%p2164_p11), %s2057_s29, 16, %s2055_s5, %s2067_s8   ;;  %871 = vst [vmem:[%s1894_s28] sm:$0x1] %v870_v52 }
 0x19c   : > { %s1558_s21 = scalar_lea.vmem %s2065_s12, 16  ;;  %s1659_s9 = smov [#allocation10]  }
 0x19d   : > { %p1559_p13 = scmp.ne.s32.totalorder %s2065_s12, %s1558_s21  ;;  %s1562_s13 = sshll.u32 %s1659_s9, 4  ;;  %s1563_s13 = int_to_ptr.vmem [resolvable:$false] %s1562_s13 }
 0x19e   : > { %s1564_s11 = scalar_lea.vmem %s1563_s13, 32  ;;  %p1565_p12 = scmp.lt.s32.totalorder %s2065_s12, %s1563_s13 }
 0x19f   : > { %p1560_p2 = pnand %p1559_p13, %p2164_p11  ;;  %p1566_p4 = scmp.lt.s32.totalorder %s1564_s11, %s1558_s21 }
 0x1a1   : > { %p1561_p6 = pneg %p1560_p2  ;;  %p1567_p9 = por %p1566_p4, %p1565_p12 }
 0x1a3   : > { %p1568_p5 = pnand %p1567_p9, %p1561_p6 }
 0x1a5   : > { %1571 = shalt.err (!%p1568_p5)
}
 0x1a6   : > { %s1572_s28 = scalar_lea.hbm %s2063_s24, 16  ;;  %s1576_s6 = scalar_lea.hbm %s2143_s4, 32 }
 0x1a7   : > { %p1573_p10 = scmp.ne.s32.totalorder %s2063_s24, %s1572_s28  ;;  %p1577_p3 = scmp.lt.u32.totalorder %s2063_s24, %s2143_s4 }
 0x1a8   : > { %p1578_p7 = scmp.lt.u32.totalorder %s1576_s6, %s1572_s28  ;;  %p1580_p13 = scmp.lt.u32.totalorder %s1572_s28, %s2063_s24 }
 0x1a9   : > { %p1574_p1 = pnand %p1573_p10, %p2164_p11 }
 0x1aa   : > { %p1579_p8 = por %p1578_p7, %p1577_p3 }
 0x1ab   : > { %p1575_p0 = pneg %p1574_p1 }
 0x1ac   : > { %p1581_p2 = por %p1580_p13, %p1579_p8 }
 0x1ae   : > { %p1582_p6 = pnand %p1581_p2, %p1575_p0 }
 0x1b0   : > { %1585 = shalt.err (!%p1582_p6)
}
 0x1b1   : > { %1348 = dma.vmem_to_hbm [thread:$0]  (%p2164_p11), %s2065_s12, 16, %s2063_s24, %s2067_s8  }
 0x1b2 PF: > { %s938_s10 = sand.u32 1, %s1628_s15   ;;  %p2165_p12 = scmp.ne.s32.totalorder %s2153_s27, 0 }
 0x1b3   : > { %p2166_p4 = scmp.ge.s32.totalorder %s1648_s20, 2  ;;  %s939_s14 = scalar_lea.sflag [#allocation4], %s938_s10 }
 0x1b5   : > { %p1361_p9 = pnand %p2166_p4, %p2165_p12 }
 0x1b7   : > { %1619 = dma.done.wait (!%p1361_p9), %s939_s14, 2048  }
 0x1b8   : > { %1621 = vsyncadd (!%p1361_p9), %s939_s14, 4294965248  ;;  %s2167_s23 = sadd.s32 4294967294, %s1648_s20  }
 0x1b9   : > { %s947_s18 = sand.u32 1, %s2167_s23  }
 0x1ba   : > { %s948_s21 = scalar_lea.sflag [#allocation9], %s947_s18 }
 0x1bb   : > { %1623 = dma.done.wait (!%p1361_p9), %s948_s21, 32  }
 0x1bc   : > { %1625 = vsyncadd (!%p1361_p9), %s948_s21, 4294967264  ;;  %s25_s20 = sadd.s32 1, %s1648_s20   ;;  %s2168_s15 = smov %s1632_s16 }
 0x1bd   : > { %p22_p11 = scmp.ge.s32.totalorder %s25_s20, 4   ;;  %s2169_s16 = smov %s1636_s17 }
 0x1be   : > { %s2170_s17 = smov %s1806_s30  ;;  %s2171_s18 = smov %s1644_s19 }
 0x1bf   : > { %s2172_s19 = smov %s2174_s7  ;;  %24 = sbr.rel (!%p22_p11) target bundleno = 9 (0x9), region = 113 }
 0x1c6   :  { %960 = vsyncpa [#allocation3], 1 }
 0x1c7   :  { %962 = vsyncpa [#allocation3 + $0x1], 1 }
 0x1c8   :  { %963 = vsyncpa [#allocation6], 1 }
 0x1c9   :  { %964 = vsyncpa [#allocation4], 1 }
 0x1ca   :  { %966 = vsyncpa [#allocation4 + $0x1], 1 }
 0x1cb   :  { %967 = vsyncpa [#allocation9], 1 }
 0x1cc   :  { %969 = vsyncpa [#allocation9 + $0x1], 1 }

// kernel: basic_block_forward.9
= control target key start
LH: loop header
LB: loop body
LE: loop exit
PB: predicated region body
PF: predicated region fallthrough
CT: control target
= control target key end

     0   :  { %s2115_s0 = inlined_call_operand.hbm [shape: bf16[2,16,16,128], index: 0, kind: input, shape index: {}]   ;;  %s2116_s1 = inlined_call_operand.hbm [shape: bf16[2,16,16,128], index: 1, kind: input, shape index: {}]   ;;  %s2117_s2 = inlined_call_operand.hbm [shape: f32[1,128], index: 2, kind: input, shape index: {}]   ;;  %s2118_s3 = inlined_call_operand.hbm [shape: f32[1,128], index: 3, kind: input, shape index: {}]   ;;  %s2119_s4 = inlined_call_operand.hbm [shape: f32[1,128], index: 4, kind: input, shape index: {}]   ;;  %s2120_s5 = inlined_call_operand.hbm [shape: f32[1,128], index: 5, kind: input, shape index: {}]   ;;  %s2121_s6 = inlined_call_operand.hbm [shape: f32[2,16,16,128], index: 6, kind: output, shape index: {}]  }
   0x1   :  { %2126 = sst [smem:[#allocation20_spill]] %s2115_s0 }
   0x2   :  { %2127 = sst [smem:[#allocation21_spill]] %s2117_s2 }
   0x3   :  { %2128 = sst [smem:[#allocation22_spill]] %s2118_s3 }
   0x4   :  { %2129 = sst [smem:[#allocation23_spill]] %s2119_s4 }
   0x5   :  { %2130 = sst [smem:[#allocation24_spill]] %s2120_s5 }
   0x6   :  { %11 = vsyncpa [#allocation3], 0 }
   0x7   :  { %13 = vsyncpa [#allocation3 + $0x1], 0 }
   0x8   :  { %14 = vsyncpa [#allocation6], 0 }
   0x9   :  { %16 = vsyncpa [#allocation6 + $0x1], 0 }
   0xa   :  { %17 = vsyncpa [#allocation9], 0 }
   0xb   :  { %18 = vsyncpa [#allocation12], 0 }
   0xc   :  { %19 = vsyncpa [#allocation4], 0 }
   0xd   :  { %21 = vsyncpa [#allocation4 + $0x1], 0  ;;  %s1557_s21 = smov 0   ;;  %s1559_s22 = smov 0  }
   0xe   :  { %s1561_s23 = smov 0   ;;  %s1563_s24 = smov 0  }
   0xf   :  { %s1565_s25 = smov 0   ;;  %s1567_s26 = smov 0  }
  0x10 LB: > { %s1588_s27 = sadd.s32 4294967295, %s1509_s26   ;;  %s936_s28 = sadd.s32 4294967294, %s1509_s26   ;;  %s1509_s26 = sphi %s1567_s26, %s27_s26   ;;  %s1505_s25 = sphi %s1565_s25, %s2159_s25   ;;  %s1501_s24 = sphi %s1563_s24, %s2158_s24   ;;  %s1497_s23 = sphi %s1561_s23, %s2157_s23   ;;  %s1493_s22 = sphi %s1559_s22, %s2156_s22   ;;  %s1489_s21 = sphi %s1557_s21, %s2155_s21  }
  0x11   : > { %p61_p0 = scmp.ne.s32.totalorder %s1493_s22, %s1489_s21  ;;  %p2122_p1 = scmp.eq.s32.totalorder %s1588_s27, 0 }
  0x12   : > { %p205_p3 = scmp.eq.s32.totalorder %s936_s28, 1  ;;  %p937_p5 = scmp.ge.s32.totalorder %s1509_s26, 1 }
  0x13   : > { %p1597_p4 = por %p2122_p1, %p61_p0  ;;  %p212_p7 = scmp.lt.s32.totalorder %s1509_s26, 3 }
  0x14   : > { %p1602_p6 = por %p205_p3, %p61_p0  ;;  %s1511_s8 = smov [#allocation7]  }
  0x15   : > { %s2131_s29 = scalar_select %p1597_p4, 1, 0 }
  0x16   : > { %s2132_s30 = scalar_select %p1602_p6, 1, 0 }
  0x17   : > { %p1607_p8 = pnand %p937_p5, %p212_p7  ;;  %s225_s9 = sshll.u32 %s1511_s8, 4  ;;  %s226_s9 = int_to_ptr.vmem [resolvable:$true] %s225_s9 }
  0x18   : > { %s1512_s10 = smov [#allocation8]   ;;  %s1513_s13 = smov [#allocation10]  }
  0x19   : > { %s2133_s7 = scalar_select %p1607_p8, 1, 0 }
  0x1a   : > { %p1149_p10 = pneg %p1607_p8  ;;  %s236_s11 = sshll.u32 %s1512_s10, 4  ;;  %s1620_s11 = int_to_ptr.vmem [resolvable:$true] %s236_s11 }
  0x1b   : > { %s247_s14 = sshll.u32 %s1513_s13, 4  ;;  %s2135_s2 = sld [smem:[#allocation21_spill]]  ;;  %s1622_s14 = int_to_ptr.vmem [resolvable:$true] %s247_s14 }
  0x1c   : > { %p1616_p11 = pnand %p1149_p10, %p2122_p1 }
  0x1e   : > { %p1632_p13 = pneg %p1616_p11 }
  0x21   : > { %s1239_s17 = scalar_lea.hbm %s2135_s2, 16 }
  0x22   : > { %p1240_p12 = scmp.ne.s32.totalorder %s2135_s2, %s1239_s17  ;;  %p1246_p5 = scmp.lt.u32.totalorder %s1239_s17, %s2135_s2 }
  0x24   : > { %p1242_p0 = pnand %p1632_p13, %p1240_p12 }
  0x26   : > { %p1243_p3 = pneg %p1242_p0 }
  0x28   : > { %p1248_p7 = pnand %p1246_p5, %p1243_p3 }
  0x2a   : > { %1251 = shalt.err (!%p1248_p7)
}
  0x2b   : > { %s1252_s10 = scalar_lea.vmem %s226_s9, 16  ;;  %s1259_s13 = scalar_lea.vmem %s226_s9, 32 }
  0x2c   : > { %p1253_p10 = scmp.ne.s32.totalorder %s226_s9, %s1252_s10  ;;  %p1260_p2 = scmp.lt.s32.totalorder %s226_s9, %s226_s9 }
  0x2d   : > { %p1261_p6 = scmp.lt.s32.totalorder %s1259_s13, %s1252_s10 }
  0x2e   : > { %p1255_p9 = pnand %p1253_p10, %p1632_p13 }
  0x2f   : > { %p1262_p4 = por %p1261_p6, %p1260_p2 }
  0x30   : > { %p1256_p1 = pneg %p1255_p9 }
  0x32   : > { %p1263_p8 = pnand %p1262_p4, %p1256_p1 }
  0x34   : > { %1266 = shalt.err (!%p1263_p8)
}
  0x35   : > { %1152 = dma.hbm_to_vmem [thread:$0]  (!%p1616_p11), %s2135_s2, 16, %s226_s9, [#allocation6]  }
  0x36   : > { %s2137_s3 = sld [smem:[#allocation22_spill]] }
  0x3c   : > { %s1267_s19 = scalar_lea.hbm %s2137_s3, 16 }
  0x3d   : > { %p1268_p9 = scmp.ne.s32.totalorder %s2137_s3, %s1267_s19  ;;  %p1274_p1 = scmp.lt.u32.totalorder %s1267_s19, %s2137_s3 }
  0x3f   : > { %p1270_p12 = pnand %p1268_p9, %p1632_p13 }
  0x41   : > { %p1271_p2 = pneg %p1270_p12 }
  0x43   : > { %p1276_p4 = pnand %p1274_p1, %p1271_p2 }
  0x45   : > { %1279 = shalt.err (!%p1276_p4)
}
  0x46   : > { %s1280_s9 = scalar_lea.vmem %s1620_s11, 16  ;;  %s1287_s15 = scalar_lea.vmem %s1620_s11, 32 }
  0x47   : > { %p1281_p6 = scmp.ne.s32.totalorder %s1620_s11, %s1280_s9  ;;  %p1288_p3 = scmp.lt.s32.totalorder %s1620_s11, %s1620_s11 }
  0x48   : > { %p1289_p5 = scmp.lt.s32.totalorder %s1287_s15, %s1280_s9 }
  0x49   : > { %p1283_p8 = pnand %p1281_p6, %p1632_p13 }
  0x4a   : > { %p1290_p7 = por %p1289_p5, %p1288_p3 }
  0x4b   : > { %p1284_p0 = pneg %p1283_p8 }
  0x4d   : > { %p1291_p10 = pnand %p1290_p7, %p1284_p0 }
  0x4f   : > { %1294 = shalt.err (!%p1291_p10)
}
  0x50   : > { %1155 = dma.hbm_to_vmem [thread:$0]  (!%p1616_p11), %s2137_s3, 16, %s1620_s11, [#allocation9]  }
  0x51   : > { %s2138_s4 = sld [smem:[#allocation23_spill]] }
  0x57   : > { %s1295_s28 = scalar_lea.hbm %s2138_s4, 16 }
  0x58   : > { %p1296_p9 = scmp.ne.s32.totalorder %s2138_s4, %s1295_s28  ;;  %p1302_p1 = scmp.lt.u32.totalorder %s1295_s28, %s2138_s4 }
  0x5a   : > { %p1298_p12 = pnand %p1296_p9, %p1632_p13 }
  0x5c   : > { %p1299_p2 = pneg %p1298_p12 }
  0x5e   : > { %p1304_p4 = pnand %p1302_p1, %p1299_p2 }
  0x60   : > { %1307 = shalt.err (!%p1304_p4)
}
  0x61   : > { %s1308_s11 = scalar_lea.vmem %s1622_s14, 16  ;;  %s1315_s15 = scalar_lea.vmem %s1622_s14, 32 }
  0x62   : > { %p1309_p6 = scmp.ne.s32.totalorder %s1622_s14, %s1308_s11  ;;  %p1316_p3 = scmp.lt.s32.totalorder %s1622_s14, %s1622_s14 }
  0x63   : > { %p1317_p5 = scmp.lt.s32.totalorder %s1315_s15, %s1308_s11 }
  0x64   : > { %p1311_p8 = pnand %p1309_p6, %p1632_p13 }
  0x65   : > { %p1318_p7 = por %p1317_p5, %p1316_p3 }
  0x66   : > { %p1312_p0 = pneg %p1311_p8 }
  0x68   : > { %p1319_p10 = pnand %p1318_p7, %p1312_p0 }
  0x6a   : > { %1322 = shalt.err (!%p1319_p10)
}
  0x6b   : > { %1158 = dma.hbm_to_vmem [thread:$0]  (!%p1616_p11), %s2138_s4, 16, %s1622_s14, [#allocation9]  }
  0x6c   : > { %s1514_s18 = smov [#allocation11]   ;;  %s2139_s5 = sld [smem:[#allocation24_spill]] }
  0x6d   : > { %s258_s19 = sshll.u32 %s1514_s18, 4  ;;  %s259_s19 = int_to_ptr.vmem [resolvable:$true] %s258_s19 }
  0x72   : > { %s1323_s10 = scalar_lea.hbm %s2139_s5, 16 }
  0x73   : > { %p1324_p9 = scmp.ne.s32.totalorder %s2139_s5, %s1323_s10  ;;  %p1330_p1 = scmp.lt.u32.totalorder %s1323_s10, %s2139_s5 }
  0x75   : > { %p1326_p12 = pnand %p1324_p9, %p1632_p13 }
  0x77   : > { %p1327_p2 = pneg %p1326_p12 }
  0x79   : > { %p1332_p4 = pnand %p1330_p1, %p1327_p2 }
  0x7b   : > { %1335 = shalt.err (!%p1332_p4)
}
  0x7c   : > { %s1336_s14 = scalar_lea.vmem %s259_s19, 16  ;;  %s1343_s16 = scalar_lea.vmem %s259_s19, 32 }
  0x7d   : > { %p1337_p6 = scmp.ne.s32.totalorder %s259_s19, %s1336_s14  ;;  %p1344_p3 = scmp.lt.s32.totalorder %s259_s19, %s259_s19 }
  0x7e   : > { %p1345_p5 = scmp.lt.s32.totalorder %s1343_s16, %s1336_s14 }
  0x7f   : > { %p1339_p8 = pnand %p1337_p6, %p1632_p13 }
  0x80   : > { %p1346_p7 = por %p1345_p5, %p1344_p3 }
  0x81   : > { %p1340_p0 = pneg %p1339_p8 }
  0x83   : > { %p1347_p10 = pnand %p1346_p7, %p1340_p0 }
  0x85   : > { %1350 = shalt.err (!%p1347_p10)
}
  0x86   : > { %1161 = dma.hbm_to_vmem [thread:$0]  (!%p1616_p11), %s2139_s5, 16, %s259_s19, [#allocation12]  }
  0x87   : > { %s39_s20 = sadd.s32 1, %s1505_s25  ;;  %s48_s28 = sadd.s32 1, %s1497_s23 }
  0x88   : > { %p41_p13 = scmp.ge.s32.totalorder %s39_s20, 2  ;;  %p55_p9 = scmp.ne.s32.totalorder %s1497_s23, %s1493_s22 }
  0x89   : > { %p56_p12 = scmp.eq.s32.totalorder %s1509_s26, 0  ;;  %p1177_p2 = scmp.lt.s32.totalorder %s1509_s26, 2 }
  0x8a   : > { %s2161_s20 = smov (%p41_p13, %s39_s20), 0  ;;  %p2140_p4 = scmp.eq.s32.totalorder %s1588_s27, 1 }
  0x8b   : > { %p57_p1 = por %p56_p12, %p55_p9  ;;  %s43_s8 = ssub.s32 %s1505_s25, %s2161_s20 }
  0x8c   : > { %p1724_p6 = por %p2140_p4, %p55_p9  ;;  %s269_s10 = sand.u32 1, %s1497_s23  }
  0x8d   : > { %p46_p11 = scmp.eq.s32.totalorder %s43_s8, 0  ;;  %s1731_s19 = sshll.u32 %s269_s10, 7 }
  0x8e   : > { %s2125_s13 = sshll.u32 %s1505_s25, 11  ;;  %s2142_s0 = sld [smem:[#allocation20_spill]] }
  0x8f   : > { %s1735_s9 = scalar_select %p46_p11, %s1497_s23, %s48_s28  }
  0x90   : > { %s273_s16 = scalar_lea.vmem [#allocation2], %s1731_s19  ;;  %p1747_p8 = pnand %p1177_p2, %p57_p1 }
  0x91   : > { %s283_s17 = sshll.u32 %s273_s16, 4  ;;  %s1753_s28 = scalar_lea.sflag [#allocation3], %s269_s10  ;;  %s1751_s17 = int_to_ptr.vmem [resolvable:$true] %s283_s17 }
  0x92   : > { %p1353_p3 = pneg %p1747_p8 }
  0x94   : > { %s1742_s14 = scalar_lea.hbm %s2142_s0, %s2125_s13  ;;  %s1356_s16 = scalar_lea.hbm %s2142_s0, 4096 }
  0x95   : > { %s1351_s8 = scalar_lea.hbm %s1742_s14, 2048  ;;  %p1357_p10 = scmp.lt.u32.totalorder %s1742_s14, %s2142_s0 }
  0x96   : > { %p1352_p0 = scmp.ne.s32.totalorder %s1742_s14, %s1351_s8  ;;  %p1358_p13 = scmp.lt.u32.totalorder %s1356_s16, %s1351_s8 }
  0x97   : > { %p1360_p12 = scmp.lt.u32.totalorder %s1351_s8, %s1742_s14 }
  0x98   : > { %p1354_p5 = pnand %p1353_p3, %p1352_p0  ;;  %p1359_p9 = por %p1358_p13, %p1357_p10 }
  0x9a   : > { %p1355_p7 = pneg %p1354_p5  ;;  %p1361_p2 = por %p1360_p12, %p1359_p9 }
  0x9c   : > { %p1362_p1 = pnand %p1361_p2, %p1355_p7 }
  0x9e   : > { %1365 = shalt.err (!%p1362_p1)
}
  0x9f   : > { %s1366_s10 = scalar_lea.vmem %s1751_s17, 2048  ;;  %s1515_s11 = smov [#allocation2]  }
  0xa0   : > { %p1367_p4 = scmp.ne.s32.totalorder %s1751_s17, %s1366_s10  ;;  %s1371_s15 = sshll.u32 %s1515_s11, 4  ;;  %s1372_s15 = int_to_ptr.vmem [resolvable:$false] %s1371_s15 }
  0xa1   : > { %s1373_s2 = scalar_lea.vmem %s1372_s15, 4096  ;;  %p1374_p5 = scmp.lt.s32.totalorder %s1751_s17, %s1372_s15 }
  0xa2   : > { %p1369_p11 = pnand %p1367_p4, %p1353_p3  ;;  %p1375_p10 = scmp.lt.s32.totalorder %s1373_s2, %s1366_s10 }
  0xa4   : > { %p1370_p0 = pneg %p1369_p11  ;;  %p1376_p13 = por %p1375_p10, %p1374_p5 }
  0xa6   : > { %p1377_p9 = pnand %p1376_p13, %p1370_p0 }
  0xa8   : > { %1380 = shalt.err (!%p1377_p9)
}
  0xa9   : > { %s1516_s13 = smov 64   ;;  %s1517_s8 = smov 4  }
  0xaa   : > { %1165 = dma.hbm_to_vmem [thread:$0]  (!%p1747_p8), %s1742_s14, 2048, %s1751_s17, %s1753_s28, %s1516_s13, %s1516_s13, %s1517_s8  }
  0xab   : > { %s2144_s16 = sshll.u32 %s1505_s25, 11  ;;  %s297_s2 = scalar_lea.vmem [#allocation5], %s1731_s19 }
  0xac   : > { %s1789_s15 = scalar_lea.hbm %s2116_s1, %s2144_s16  ;;  %s307_s0 = sshll.u32 %s297_s2, 4  ;;  %s1793_s0 = int_to_ptr.vmem [resolvable:$true] %s307_s0 }
  0xad   : > { %s293_s3 = sand.u32 1, %s1509_s26   ;;  %s1381_s5 = scalar_lea.hbm %s1789_s15, 2048 }
  0xae   : > { %s1795_s4 = scalar_lea.sflag [#allocation6], %s293_s3  ;;  %p1382_p7 = scmp.ne.s32.totalorder %s1789_s15, %s1381_s5 }
  0xaf   : > { %s1386_s28 = scalar_lea.hbm %s2116_s1, 4096  ;;  %p1387_p1 = scmp.lt.u32.totalorder %s1789_s15, %s2116_s1 }
  0xb0   : > { %p1384_p12 = pnand %p1382_p7, %p1353_p3  ;;  %p1388_p4 = scmp.lt.u32.totalorder %s1386_s28, %s1381_s5 }
  0xb1   : > { %p1390_p0 = scmp.lt.u32.totalorder %s1381_s5, %s1789_s15 }
  0xb2   : > { %p1385_p2 = pneg %p1384_p12  ;;  %p1389_p11 = por %p1388_p4, %p1387_p1 }
  0xb4   : > { %p1391_p5 = por %p1390_p0, %p1389_p11 }
  0xb6   : > { %p1392_p10 = pnand %p1391_p5, %p1385_p2 }
  0xb8   : > { %1395 = shalt.err (!%p1392_p10)
}
  0xb9   : > { %s1396_s3 = scalar_lea.vmem %s1793_s0, 2048  ;;  %s1518_s19 = smov [#allocation5]  }
  0xba   : > { %p1397_p13 = scmp.ne.s32.totalorder %s1793_s0, %s1396_s3  ;;  %s1401_s11 = sshll.u32 %s1518_s19, 4  ;;  %s1402_s11 = int_to_ptr.vmem [resolvable:$false] %s1401_s11 }
  0xbb   : > { %s1403_s2 = scalar_lea.vmem %s1402_s11, 4096  ;;  %p1404_p12 = scmp.lt.s32.totalorder %s1793_s0, %s1402_s11 }
  0xbc   : > { %p1399_p9 = pnand %p1397_p13, %p1353_p3  ;;  %p1405_p1 = scmp.lt.s32.totalorder %s1403_s2, %s1396_s3 }
  0xbe   : > { %p1400_p7 = pneg %p1399_p9  ;;  %p1406_p4 = por %p1405_p1, %p1404_p12 }
  0xc0   : > { %p1407_p11 = pnand %p1406_p4, %p1400_p7 }
  0xc2   : > { %1410 = shalt.err (!%p1407_p11)
}
  0xc3   : > { %1168 = dma.hbm_to_vmem [thread:$0]  (!%p1747_p8), %s1789_s15, 2048, %s1793_s0, %s1795_s4, %s1516_s13, %s1516_s13, %s1517_s8  }
  0xc4   : > { %p2145_p3 = scmp.ne.s32.totalorder %s2133_s7, 0 }
  0xc5   : > { %s1827_s5 = sand.u32 (!%p2145_p3), 1, %s1493_s22   ;;  %p2146_p2 = scmp.ne.s32.totalorder (!%p2145_p3), %s2131_s29, 0 }
  0xc6   : > { %319 = sbr.rel (%p2145_p3) target bundleno = 307 (0x133), region = 44  ;;  %s950_s14 = sshll.u32 (!%p2145_p3), %s1827_s5, 7 }
  0xc7   : > { %s322_s17 = scalar_lea.sflag (!%p2145_p3), [#allocation3], %s1827_s5  ;;  %s1831_s28 = scalar_lea.vmem (!%p2145_p3), [#allocation2], %s950_s14 }
  0xcd   : > { %1464 = dma.done.wait (%p2146_p2), %s322_s17, 2048  }
  0xce   : > { %1466 = vsyncadd (%p2146_p2), %s322_s17, 4294965248  ;;  %s330_s0 = sand.u32 1, %s1588_s27   ;;  %s1838_s7 = scalar_lea.vmem [#allocation5], %s950_s14 }
  0xcf   : > { %s331_s4 = scalar_lea.sflag [#allocation6], %s330_s0 }
  0xd0   : > { %1468 = dma.done.wait (%p2146_p2), %s331_s4, 2048  }
  0xd1   : > { %1470 = vsyncadd (%p2146_p2), %s331_s4, 4294965248  ;;  %p2147_p8 = scmp.eq.s32.totalorder %s1588_s27, 0 }
  0xd3   : > { %1472 = dma.done.wait (%p2147_p8), [#allocation6], 16   ;;  %p2148_p0 = pmov %p2147_p8 }
  0xd5   : > { %1474 = vsyncadd (%p2148_p0), [#allocation6], 4294967280  ;;  %p2149_p5 = pmov %p2148_p0 }
  0xd6   : > { %p2150_p10 = pmov %p2148_p0 }
  0xd7   : > { %1476 = dma.done.wait (%p2149_p5), [#allocation9], 32  }
  0xd8   : > { %1478 = vsyncadd (%p2150_p10), [#allocation9], 4294967264  ;;  %p2151_p13 = pmov %p2148_p0 }
  0xd9   : > { %p2152_p9 = pmov %p2148_p0 }
  0xda   : > { %1480 = dma.done.wait (%p2151_p13), [#allocation12], 16  }
  0xdb   : > { %1482 = vsyncadd (%p2152_p9), [#allocation12], 4294967280  ;;  %v1856_v0 = vld [vmem:[#allocation7] ss:$0 sm:$0xff]  ;;  %v1858_v1 = vld [vmem:[#allocation10] ss:$0 sm:$0xff] }
  0xdc   : > { %v970_v2 = vld [vmem:[%s1831_s28] sm:$0xff]   ;;  %v1097_v8 = vld [vmem:[%s1831_s28 + $0x8] sm:$0xff]   ;;  %v1098_v15 = vld [vmem:[%s1831_s28 + $0x10] sm:$0xff]   ;;  %s956_s27 = sshll.u32 %s1827_s5, 8  ;;  %s968_s18 = sshll.u32 %s1501_s24, 12 }
  0xdd   : > { %v1034_v3 = vld [vmem:[%s1838_s7] sm:$0xff]   ;;  %v971_v4 = vunpack.c.l.bf16 %v970_v2  ;;  %v972_v6 = vunpack.c.h.bf16 %v970_v2  ;;  %v1112_v9 = vld [vmem:[%s1838_s7 + $0x8] sm:$0xff]   ;;  %v975_v11 = vunpack.c.l.bf16 %v1097_v8  ;;  %v976_v13 = vunpack.c.h.bf16 %v1097_v8  ;;  %v1113_v16 = vld [vmem:[%s1838_s7 + $0x10] sm:$0xff]   ;;  %s1899_s29 = scalar_lea.vmem [#allocation13], %s956_s27  ;;  %s2063_s16 = scalar_lea.hbm %s2121_s6, %s968_s18 }
  0xde   : > { %v1035_v5 = vunpack.c.l.bf16 %v1034_v3  ;;  %v1036_v7 = vunpack.c.h.bf16 %v1034_v3  ;;  %v1864_v10 = vld [vmem:[#allocation8] ss:$0 sm:$0xff]  ;;  %v1039_v12 = vunpack.c.l.bf16 %v1112_v9  ;;  %v1040_v14 = vunpack.c.h.bf16 %v1112_v9  ;;  %v1878_v29 = vld [vmem:[#allocation11] ss:$0 sm:$0xff]  ;;  %v1099_v34 = vld [vmem:[%s1831_s28 + $0x18] sm:$0xff]   ;;  %s784_s13 = sshll.u32 %s1899_s29, 4  ;;  %s2065_s13 = int_to_ptr.vmem [resolvable:$true] %s784_s13 }
  0xdf   : > { %v525_v17 = vmul.f32 %v971_v4, %v1856_v0  ;;  %v526_v19 = vmul.f32 %v972_v6, %v1856_v0  ;;  %v527_v21 = vmul.f32 %v975_v11, %v1856_v0  ;;  %v528_v23 = vmul.f32 %v976_v13, %v1856_v0  ;;  %v1114_v39 = vld [vmem:[%s1838_s7 + $0x18] sm:$0xff]   ;;  %v1100_v56 = vld [vmem:[%s1831_s28 + $0x20] sm:$0xff]   ;;  %v1101_v8 = vld [vmem:[%s1831_s28 + $0x28] sm:$0xff]   ;;  %s768_s10 = scalar_lea.sflag [#allocation4], %s1827_s5  ;;  %s1411_s24 = scalar_lea.vmem %s2065_s13, 4096 }
  0xe0   : > { %v601_v18 = vmul.f32 %v1035_v5, %v1858_v1  ;;  %v602_v20 = vmul.f32 %v1036_v7, %v1858_v1  ;;  %v603_v22 = vmul.f32 %v1039_v12, %v1858_v1  ;;  %v604_v24 = vmul.f32 %v1040_v14, %v1858_v1  ;;  %v1115_v57 = vld [vmem:[%s1838_s7 + $0x20] sm:$0xff]   ;;  %v1116_v14 = vld [vmem:[%s1838_s7 + $0x28] sm:$0xff]   ;;  %p1412_p7 = scmp.ne.s32.totalorder %s2065_s13, %s1411_s24  ;;  %s1519_s3 = smov [#allocation13]  }
  0xe1   : > { %v563_v25 = vadd.f32 %v1864_v10, %v525_v17  ;;  %v564_v26 = vadd.f32 %v1864_v10, %v526_v19  ;;  %v979_v27 = vunpack.c.l.bf16 %v1098_v15  ;;  %v1043_v28 = vunpack.c.l.bf16 %v1113_v16  ;;  %s1415_s19 = sshll.u32 %s1519_s3, 4  ;;  %s1416_s19 = int_to_ptr.vmem [resolvable:$false] %s1415_s19 }
  0xe2   : > { %v565_v30 = vadd.f32 %v1864_v10, %v527_v21  ;;  %v566_v31 = vadd.f32 %v1864_v10, %v528_v23  ;;  %v980_v32 = vunpack.c.h.bf16 %v1098_v15  ;;  %v1044_v33 = vunpack.c.h.bf16 %v1113_v16  ;;  %p1413_p12 = pnand %p1412_p7, %p1724_p6  ;;  %s1417_s11 = scalar_lea.vmem %s1416_s19, 8192 }
  0xe3   : > { %v633_v35 = vadd.f32 %v601_v18, %v563_v25  ;;  %v634_v36 = vadd.f32 %v602_v20, %v564_v26  ;;  %v529_v37 = vmul.f32 %v979_v27, %v1856_v0  ;;  %v605_v38 = vmul.f32 %v1043_v28, %v1858_v1  ;;  %v1102_v27 = vld [vmem:[%s1831_s28 + $0x30] sm:$0xff]   ;;  %p1418_p4 = scmp.lt.s32.totalorder %s2065_s13, %s1416_s19  ;;  %p1419_p11 = scmp.lt.s32.totalorder %s1417_s11, %s1411_s24 }
  0xe4   : > { %v635_v40 = vadd.f32 %v603_v22, %v565_v30  ;;  %v636_v41 = vadd.f32 %v604_v24, %v566_v31  ;;  %v530_v42 = vmul.f32 %v980_v32, %v1856_v0  ;;  %v606_v43 = vmul.f32 %v1044_v33, %v1858_v1  ;;  %v1117_v33 = vld [vmem:[%s1838_s7 + $0x30] sm:$0xff]   ;;  %p1414_p1 = pneg %p1413_p12 }
  0xe5   : > { %v671_v44 = vadd.f32 %v1878_v29, %v633_v35  ;;  %v672_v45 = vadd.f32 %v1878_v29, %v634_v36  ;;  %v567_v46 = vadd.f32 %v1864_v10, %v529_v37  ;;  %v983_v47 = vunpack.c.l.bf16 %v1099_v34  ;;  %p1420_p3 = por %p1419_p11, %p1418_p4 }
  0xe6   : > { %v673_v48 = vadd.f32 %v1878_v29, %v635_v40  ;;  %v674_v49 = vadd.f32 %v1878_v29, %v636_v41  ;;  %v568_v50 = vadd.f32 %v1864_v10, %v530_v42  ;;  %v1047_v51 = vunpack.c.l.bf16 %v1114_v39 }
  0xe7   : > { %v703_v52 = vmax.f32 %v671_v44, 0.0  ;;  %v704_v53 = vmax.f32 %v672_v45, 0.0  ;;  %v637_v54 = vadd.f32 %v605_v38, %v567_v46  ;;  %v531_v55 = vmul.f32 %v983_v47, %v1856_v0  ;;  %p1421_p2 = pnand %p1420_p3, %p1414_p1 }
  0xe8   : > { %v705_v58 = vmax.f32 %v673_v48, 0.0  ;;  %v706_v59 = vmax.f32 %v674_v49, 0.0  ;;  %v638_v60 = vadd.f32 %v606_v43, %v568_v50  ;;  %v607_v61 = vmul.f32 %v1047_v51, %v1858_v1  ;;  %v1103_v50 = vld [vmem:[%s1831_s28 + $0x38] sm:$0xff]  }
  0xe9   : > { %735 = vst [vmem:[%s1899_s29] sm:$0xff] %v703_v52  ;;  %736 = vst [vmem:[%s1899_s29 + $0x8] sm:$0xff] %v704_v53  ;;  %v675_v62 = vadd.f32 %v1878_v29, %v637_v54  ;;  %v569_v63 = vadd.f32 %v1864_v10, %v531_v55  ;;  %v984_v2 = vunpack.c.h.bf16 %v1099_v34  ;;  %v1048_v3 = vunpack.c.h.bf16 %v1114_v39  ;;  %v1118_v51 = vld [vmem:[%s1838_s7 + $0x38] sm:$0xff]  }
  0xea   : > { %737 = vst [vmem:[%s1899_s29 + $0x10] sm:$0xff] %v705_v58  ;;  %738 = vst [vmem:[%s1899_s29 + $0x18] sm:$0xff] %v706_v59  ;;  %v676_v4 = vadd.f32 %v1878_v29, %v638_v60  ;;  %v987_v5 = vunpack.c.l.bf16 %v1100_v56  ;;  %v1051_v6 = vunpack.c.l.bf16 %v1115_v57  ;;  %v988_v7 = vunpack.c.h.bf16 %v1100_v56 }
  0xeb   : > { %v707_v9 = vmax.f32 %v675_v62, 0.0  ;;  %v639_v11 = vadd.f32 %v607_v61, %v569_v63  ;;  %v532_v12 = vmul.f32 %v984_v2, %v1856_v0  ;;  %v608_v13 = vmul.f32 %v1048_v3, %v1858_v1  ;;  %v1104_v2 = vld [vmem:[%s1831_s28 + $0x40] sm:$0xff]  }
  0xec   : > { %v708_v15 = vmax.f32 %v676_v4, 0.0  ;;  %v533_v16 = vmul.f32 %v987_v5, %v1856_v0  ;;  %v609_v17 = vmul.f32 %v1051_v6, %v1858_v1  ;;  %v1052_v18 = vunpack.c.h.bf16 %v1115_v57 }
  0xed   : > { %739 = vst [vmem:[%s1899_s29 + $0x20] sm:$0xff] %v707_v9  ;;  %v677_v19 = vadd.f32 %v1878_v29, %v639_v11  ;;  %v570_v20 = vadd.f32 %v1864_v10, %v532_v12  ;;  %v534_v21 = vmul.f32 %v988_v7, %v1856_v0  ;;  %v991_v22 = vunpack.c.l.bf16 %v1101_v8  ;;  %v1119_v7 = vld [vmem:[%s1838_s7 + $0x40] sm:$0xff]  }
  0xee   : > { %740 = vst [vmem:[%s1899_s29 + $0x28] sm:$0xff] %v708_v15  ;;  %v571_v23 = vadd.f32 %v1864_v10, %v533_v16  ;;  %v610_v24 = vmul.f32 %v1052_v18, %v1858_v1  ;;  %v1055_v25 = vunpack.c.l.bf16 %v1116_v14  ;;  %v992_v26 = vunpack.c.h.bf16 %v1101_v8 }
  0xef   : > { %v709_v28 = vmax.f32 %v677_v19, 0.0  ;;  %v640_v30 = vadd.f32 %v608_v13, %v570_v20  ;;  %v572_v31 = vadd.f32 %v1864_v10, %v534_v21  ;;  %v535_v32 = vmul.f32 %v991_v22, %v1856_v0  ;;  %v1105_v21 = vld [vmem:[%s1831_s28 + $0x48] sm:$0xff]  }
  0xf0   : > { %v641_v34 = vadd.f32 %v609_v17, %v571_v23  ;;  %v611_v35 = vmul.f32 %v1055_v25, %v1858_v1  ;;  %v1056_v36 = vunpack.c.h.bf16 %v1116_v14  ;;  %v536_v37 = vmul.f32 %v992_v26, %v1856_v0  ;;  %v1120_v26 = vld [vmem:[%s1838_s7 + $0x48] sm:$0xff]  }
  0xf1   : > { %741 = vst [vmem:[%s1899_s29 + $0x30] sm:$0xff] %v709_v28  ;;  %v678_v38 = vadd.f32 %v1878_v29, %v640_v30  ;;  %v642_v39 = vadd.f32 %v610_v24, %v572_v31  ;;  %v573_v40 = vadd.f32 %v1864_v10, %v535_v32  ;;  %v995_v41 = vunpack.c.l.bf16 %v1102_v27 }
  0xf2   : > { %v679_v42 = vadd.f32 %v1878_v29, %v641_v34  ;;  %v574_v43 = vadd.f32 %v1864_v10, %v536_v37  ;;  %v612_v44 = vmul.f32 %v1056_v36, %v1858_v1  ;;  %v1059_v45 = vunpack.c.l.bf16 %v1117_v33 }
  0xf3   : > { %v710_v46 = vmax.f32 %v678_v38, 0.0  ;;  %v680_v47 = vadd.f32 %v1878_v29, %v642_v39  ;;  %v643_v48 = vadd.f32 %v611_v35, %v573_v40  ;;  %v537_v49 = vmul.f32 %v995_v41, %v1856_v0 }
  0xf4   : > { %v711_v52 = vmax.f32 %v679_v42, 0.0  ;;  %v644_v53 = vadd.f32 %v612_v44, %v574_v43  ;;  %v613_v54 = vmul.f32 %v1059_v45, %v1858_v1  ;;  %v996_v55 = vunpack.c.h.bf16 %v1102_v27  ;;  %v1106_v44 = vld [vmem:[%s1831_s28 + $0x50] sm:$0xff]  }
  0xf5   : > { %742 = vst [vmem:[%s1899_s29 + $0x38] sm:$0xff] %v710_v46  ;;  %v712_v56 = vmax.f32 %v680_v47, 0.0  ;;  %v681_v57 = vadd.f32 %v1878_v29, %v643_v48  ;;  %v575_v58 = vadd.f32 %v1864_v10, %v537_v49  ;;  %v1060_v59 = vunpack.c.h.bf16 %v1117_v33  ;;  %v1121_v45 = vld [vmem:[%s1838_s7 + $0x50] sm:$0xff]  }
  0xf6   : > { %743 = vst [vmem:[%s1899_s29 + $0x40] sm:$0xff] %v711_v52  ;;  %v682_v60 = vadd.f32 %v1878_v29, %v644_v53  ;;  %v538_v61 = vmul.f32 %v996_v55, %v1856_v0  ;;  %v999_v62 = vunpack.c.l.bf16 %v1103_v50  ;;  %v1063_v63 = vunpack.c.l.bf16 %v1118_v51 }
  0xf7   : > { %744 = vst [vmem:[%s1899_s29 + $0x48] sm:$0xff] %v712_v56  ;;  %v713_v3 = vmax.f32 %v681_v57, 0.0  ;;  %v645_v4 = vadd.f32 %v613_v54, %v575_v58  ;;  %v614_v5 = vmul.f32 %v1060_v59, %v1858_v1  ;;  %v1000_v6 = vunpack.c.h.bf16 %v1103_v50  ;;  %v1107_v58 = vld [vmem:[%s1831_s28 + $0x58] sm:$0xff]  }
  0xf8   : > { %v714_v8 = vmax.f32 %v682_v60, 0.0  ;;  %v576_v9 = vadd.f32 %v1864_v10, %v538_v61  ;;  %v539_v11 = vmul.f32 %v999_v62, %v1856_v0  ;;  %v615_v12 = vmul.f32 %v1063_v63, %v1858_v1  ;;  %v1122_v63 = vld [vmem:[%s1838_s7 + $0x58] sm:$0xff]  }
  0xf9   : > { %745 = vst [vmem:[%s1899_s29 + $0x50] sm:$0xff] %v713_v3  ;;  %v683_v13 = vadd.f32 %v1878_v29, %v645_v4  ;;  %v1064_v14 = vunpack.c.h.bf16 %v1118_v51  ;;  %v540_v15 = vmul.f32 %v1000_v6, %v1856_v0  ;;  %v1003_v16 = vunpack.c.l.bf16 %v1104_v2 }
  0xfa   : > { %746 = vst [vmem:[%s1899_s29 + $0x58] sm:$0xff] %v714_v8  ;;  %v646_v17 = vadd.f32 %v614_v5, %v576_v9  ;;  %v577_v18 = vadd.f32 %v1864_v10, %v539_v11  ;;  %v1067_v19 = vunpack.c.l.bf16 %v1119_v7  ;;  %v1004_v20 = vunpack.c.h.bf16 %v1104_v2 }
  0xfb   : > { %v715_v22 = vmax.f32 %v683_v13, 0.0  ;;  %v578_v23 = vadd.f32 %v1864_v10, %v540_v15  ;;  %v616_v24 = vmul.f32 %v1064_v14, %v1858_v1  ;;  %v541_v25 = vmul.f32 %v1003_v16, %v1856_v0  ;;  %v1108_v15 = vld [vmem:[%s1831_s28 + $0x60] sm:$0xff]  }
  0xfc   : > { %v684_v27 = vadd.f32 %v1878_v29, %v646_v17  ;;  %v647_v28 = vadd.f32 %v615_v12, %v577_v18  ;;  %v617_v30 = vmul.f32 %v1067_v19, %v1858_v1  ;;  %v1068_v31 = vunpack.c.h.bf16 %v1119_v7 }
  0xfd   : > { %747 = vst [vmem:[%s1899_s29 + $0x60] sm:$0xff] %v715_v22  ;;  %v648_v32 = vadd.f32 %v616_v24, %v578_v23  ;;  %v579_v33 = vadd.f32 %v1864_v10, %v541_v25  ;;  %v542_v34 = vmul.f32 %v1004_v20, %v1856_v0  ;;  %v1007_v35 = vunpack.c.l.bf16 %v1105_v21  ;;  %v1123_v20 = vld [vmem:[%s1838_s7 + $0x60] sm:$0xff]  }
  0xfe   : > { %v716_v36 = vmax.f32 %v684_v27, 0.0  ;;  %v685_v37 = vadd.f32 %v1878_v29, %v647_v28  ;;  %v618_v38 = vmul.f32 %v1068_v31, %v1858_v1  ;;  %v1071_v39 = vunpack.c.l.bf16 %v1120_v26 }
  0xff   : > { %v686_v40 = vadd.f32 %v1878_v29, %v648_v32  ;;  %v649_v41 = vadd.f32 %v617_v30, %v579_v33  ;;  %v580_v42 = vadd.f32 %v1864_v10, %v542_v34  ;;  %v543_v43 = vmul.f32 %v1007_v35, %v1856_v0 }
 0x100   : > { %748 = vst [vmem:[%s1899_s29 + $0x68] sm:$0xff] %v716_v36  ;;  %v717_v46 = vmax.f32 %v685_v37, 0.0  ;;  %v619_v47 = vmul.f32 %v1071_v39, %v1858_v1  ;;  %v1008_v48 = vunpack.c.h.bf16 %v1105_v21  ;;  %v1072_v49 = vunpack.c.h.bf16 %v1120_v26  ;;  %v1124_v39 = vld [vmem:[%s1838_s7 + $0x68] sm:$0xff]  }
 0x101   : > { %v718_v50 = vmax.f32 %v686_v40, 0.0  ;;  %v687_v51 = vadd.f32 %v1878_v29, %v649_v41  ;;  %v650_v52 = vadd.f32 %v618_v38, %v580_v42  ;;  %v581_v53 = vadd.f32 %v1864_v10, %v543_v43  ;;  %v1109_v38 = vld [vmem:[%s1831_s28 + $0x68] sm:$0xff]  }
 0x102   : > { %749 = vst [vmem:[%s1899_s29 + $0x70] sm:$0xff] %v717_v46  ;;  %v544_v54 = vmul.f32 %v1008_v48, %v1856_v0  ;;  %v620_v55 = vmul.f32 %v1072_v49, %v1858_v1  ;;  %v1011_v56 = vunpack.c.l.bf16 %v1106_v44  ;;  %v1075_v57 = vunpack.c.l.bf16 %v1121_v45 }
 0x103   : > { %750 = vst [vmem:[%s1899_s29 + $0x78] sm:$0xff] %v718_v50  ;;  %v719_v59 = vmax.f32 %v687_v51, 0.0  ;;  %v688_v60 = vadd.f32 %v1878_v29, %v650_v52  ;;  %v651_v61 = vadd.f32 %v619_v47, %v581_v53  ;;  %v1012_v62 = vunpack.c.h.bf16 %v1106_v44  ;;  %v1110_v52 = vld [vmem:[%s1831_s28 + $0x70] sm:$0xff]  }
 0x104   : > { %v582_v2 = vadd.f32 %v1864_v10, %v544_v54  ;;  %v545_v3 = vmul.f32 %v1011_v56, %v1856_v0  ;;  %v621_v4 = vmul.f32 %v1075_v57, %v1858_v1  ;;  %v1076_v5 = vunpack.c.h.bf16 %v1121_v45  ;;  %v1125_v57 = vld [vmem:[%s1838_s7 + $0x70] sm:$0xff]  }
 0x105   : > { %751 = vst [vmem:[%s1899_s29 + $0x80] sm:$0xff] %v719_v59  ;;  %v720_v6 = vmax.f32 %v688_v60, 0.0  ;;  %v689_v7 = vadd.f32 %v1878_v29, %v651_v61  ;;  %v546_v8 = vmul.f32 %v1012_v62, %v1856_v0  ;;  %v1015_v9 = vunpack.c.l.bf16 %v1107_v58 }
 0x106   : > { %v652_v11 = vadd.f32 %v620_v55, %v582_v2  ;;  %v583_v12 = vadd.f32 %v1864_v10, %v545_v3  ;;  %v622_v13 = vmul.f32 %v1076_v5, %v1858_v1  ;;  %v1079_v14 = vunpack.c.l.bf16 %v1122_v63 }
 0x107   : > { %752 = vst [vmem:[%s1899_s29 + $0x88] sm:$0xff] %v720_v6  ;;  %v721_v16 = vmax.f32 %v689_v7, 0.0  ;;  %v584_v17 = vadd.f32 %v1864_v10, %v546_v8  ;;  %v547_v18 = vmul.f32 %v1015_v9, %v1856_v0  ;;  %v1016_v19 = vunpack.c.h.bf16 %v1107_v58  ;;  %v1111_v8 = vld [vmem:[%s1831_s28 + $0x78] sm:$0xff]  }
 0x108   : > { %v690_v21 = vadd.f32 %v1878_v29, %v652_v11  ;;  %v653_v22 = vadd.f32 %v621_v4, %v583_v12  ;;  %v623_v23 = vmul.f32 %v1079_v14, %v1858_v1  ;;  %v1080_v24 = vunpack.c.h.bf16 %v1122_v63  ;;  %v1126_v14 = vld [vmem:[%s1838_s7 + $0x78] sm:$0xff]  }
 0x109   : > { %753 = vst [vmem:[%s1899_s29 + $0x90] sm:$0xff] %v721_v16  ;;  %v654_v25 = vadd.f32 %v622_v13, %v584_v17  ;;  %v585_v26 = vadd.f32 %v1864_v10, %v547_v18  ;;  %v548_v27 = vmul.f32 %v1016_v19, %v1856_v0  ;;  %v1019_v28 = vunpack.c.l.bf16 %v1108_v15 }
 0x10a   : > { %v722_v30 = vmax.f32 %v690_v21, 0.0  ;;  %v691_v31 = vadd.f32 %v1878_v29, %v653_v22  ;;  %v624_v32 = vmul.f32 %v1080_v24, %v1858_v1  ;;  %v1083_v33 = vunpack.c.l.bf16 %v1123_v20 }
 0x10b   : > { %v692_v34 = vadd.f32 %v1878_v29, %v654_v25  ;;  %v655_v35 = vadd.f32 %v623_v23, %v585_v26  ;;  %v586_v36 = vadd.f32 %v1864_v10, %v548_v27  ;;  %v549_v37 = vmul.f32 %v1019_v28, %v1856_v0 }
 0x10c   : > { %754 = vst [vmem:[%s1899_s29 + $0x98] sm:$0xff] %v722_v30  ;;  %v723_v40 = vmax.f32 %v691_v31, 0.0  ;;  %v625_v41 = vmul.f32 %v1083_v33, %v1858_v1  ;;  %v1020_v42 = vunpack.c.h.bf16 %v1108_v15  ;;  %v1084_v43 = vunpack.c.h.bf16 %v1123_v20 }
 0x10d   : > { %v724_v44 = vmax.f32 %v692_v34, 0.0  ;;  %v693_v45 = vadd.f32 %v1878_v29, %v655_v35  ;;  %v656_v46 = vadd.f32 %v624_v32, %v586_v36  ;;  %v587_v47 = vadd.f32 %v1864_v10, %v549_v37 }
 0x10e   : > { %755 = vst [vmem:[%s1899_s29 + $0xa0] sm:$0xff] %v723_v40  ;;  %v550_v48 = vmul.f32 %v1020_v42, %v1856_v0  ;;  %v626_v49 = vmul.f32 %v1084_v43, %v1858_v1  ;;  %v1023_v50 = vunpack.c.l.bf16 %v1109_v38  ;;  %v1087_v51 = vunpack.c.l.bf16 %v1124_v39 }
 0x10f   : > { %756 = vst [vmem:[%s1899_s29 + $0xa8] sm:$0xff] %v724_v44  ;;  %v725_v53 = vmax.f32 %v693_v45, 0.0  ;;  %v694_v54 = vadd.f32 %v1878_v29, %v656_v46  ;;  %v657_v55 = vadd.f32 %v625_v41, %v587_v47  ;;  %v1024_v56 = vunpack.c.h.bf16 %v1109_v38 }
 0x110   : > { %v588_v58 = vadd.f32 %v1864_v10, %v550_v48  ;;  %v551_v59 = vmul.f32 %v1023_v50, %v1856_v0  ;;  %v627_v60 = vmul.f32 %v1087_v51, %v1858_v1  ;;  %v1088_v61 = vunpack.c.h.bf16 %v1124_v39 }
 0x111   : > { %757 = vst [vmem:[%s1899_s29 + $0xb0] sm:$0xff] %v725_v53  ;;  %v726_v62 = vmax.f32 %v694_v54, 0.0  ;;  %v695_v63 = vadd.f32 %v1878_v29, %v657_v55  ;;  %v552_v2 = vmul.f32 %v1024_v56, %v1856_v0  ;;  %v1027_v3 = vunpack.c.l.bf16 %v1110_v52 }
 0x112   : > { %v658_v4 = vadd.f32 %v626_v49, %v588_v58  ;;  %v589_v5 = vadd.f32 %v1864_v10, %v551_v59  ;;  %v628_v6 = vmul.f32 %v1088_v61, %v1858_v1  ;;  %v1091_v7 = vunpack.c.l.bf16 %v1125_v57 }
 0x113   : > { %758 = vst [vmem:[%s1899_s29 + $0xb8] sm:$0xff] %v726_v62  ;;  %v727_v9 = vmax.f32 %v695_v63, 0.0  ;;  %v590_v11 = vadd.f32 %v1864_v10, %v552_v2  ;;  %v553_v12 = vmul.f32 %v1027_v3, %v1856_v0  ;;  %v1028_v13 = vunpack.c.h.bf16 %v1110_v52 }
 0x114   : > { %v696_v15 = vadd.f32 %v1878_v29, %v658_v4  ;;  %v659_v16 = vadd.f32 %v627_v60, %v589_v5  ;;  %v629_v17 = vmul.f32 %v1091_v7, %v1858_v1  ;;  %v1092_v18 = vunpack.c.h.bf16 %v1125_v57 }
 0x115   : > { %759 = vst [vmem:[%s1899_s29 + $0xc0] sm:$0xff] %v727_v9  ;;  %v660_v19 = vadd.f32 %v628_v6, %v590_v11  ;;  %v591_v20 = vadd.f32 %v1864_v10, %v553_v12  ;;  %v554_v21 = vmul.f32 %v1028_v13, %v1856_v0  ;;  %v1031_v22 = vunpack.c.l.bf16 %v1111_v8 }
 0x116   : > { %v728_v23 = vmax.f32 %v696_v15, 0.0  ;;  %v697_v24 = vadd.f32 %v1878_v29, %v659_v16  ;;  %v630_v25 = vmul.f32 %v1092_v18, %v1858_v1  ;;  %v1095_v26 = vunpack.c.l.bf16 %v1126_v14 }
 0x117   : > { %v698_v27 = vadd.f32 %v1878_v29, %v660_v19  ;;  %v661_v28 = vadd.f32 %v629_v17, %v591_v20  ;;  %v592_v30 = vadd.f32 %v1864_v10, %v554_v21  ;;  %v555_v31 = vmul.f32 %v1031_v22, %v1856_v0 }
 0x118   : > { %760 = vst [vmem:[%s1899_s29 + $0xc8] sm:$0xff] %v728_v23  ;;  %v729_v32 = vmax.f32 %v697_v24, 0.0  ;;  %v631_v33 = vmul.f32 %v1095_v26, %v1858_v1  ;;  %v1032_v34 = vunpack.c.h.bf16 %v1111_v8  ;;  %v1096_v35 = vunpack.c.h.bf16 %v1126_v14 }
 0x119   : > { %v730_v36 = vmax.f32 %v698_v27, 0.0  ;;  %v699_v37 = vadd.f32 %v1878_v29, %v661_v28  ;;  %v662_v38 = vadd.f32 %v630_v25, %v592_v30  ;;  %v593_v39 = vadd.f32 %v1864_v10, %v555_v31 }
 0x11a   : > { %761 = vst [vmem:[%s1899_s29 + $0xd0] sm:$0xff] %v729_v32  ;;  %v556_v40 = vmul.f32 %v1032_v34, %v1856_v0  ;;  %v632_v41 = vmul.f32 %v1096_v35, %v1858_v1 }
 0x11b   : > { %762 = vst [vmem:[%s1899_s29 + $0xd8] sm:$0xff] %v730_v36  ;;  %v731_v42 = vmax.f32 %v699_v37, 0.0  ;;  %v700_v43 = vadd.f32 %v1878_v29, %v662_v38  ;;  %v663_v44 = vadd.f32 %v631_v33, %v593_v39 }
 0x11c   : > { %v594_v45 = vadd.f32 %v1864_v10, %v556_v40 }
 0x11d   : > { %763 = vst [vmem:[%s1899_s29 + $0xe0] sm:$0xff] %v731_v42  ;;  %v732_v46 = vmax.f32 %v700_v43, 0.0  ;;  %v701_v47 = vadd.f32 %v1878_v29, %v663_v44 }
 0x11e   : > { %v664_v48 = vadd.f32 %v632_v41, %v594_v45 }
 0x11f   : > { %764 = vst [vmem:[%s1899_s29 + $0xe8] sm:$0xff] %v732_v46  ;;  %v733_v0 = vmax.f32 %v701_v47, 0.0 }
 0x120   : > { %v702_v1 = vadd.f32 %v1878_v29, %v664_v48 }
 0x121   : > { %765 = vst [vmem:[%s1899_s29 + $0xf0] sm:$0xff] %v733_v0 }
 0x122   : > { %v734_v10 = vmax.f32 %v702_v1, 0.0 }
 0x124   : > { %766 = vst [vmem:[%s1899_s29 + $0xf8] sm:$0xff] %v734_v10 }
 0x125   : > { %1424 = shalt.err (!%p1421_p2)
}
 0x126   : > { %s1425_s2 = scalar_lea.hbm %s2063_s16, 4096  ;;  %s1429_s28 = scalar_lea.hbm %s2121_s6, 8192 }
 0x127   : > { %p1426_p8 = scmp.ne.s32.totalorder %s2063_s16, %s1425_s2  ;;  %p1430_p10 = scmp.lt.u32.totalorder %s2063_s16, %s2121_s6 }
 0x128   : > { %p1431_p13 = scmp.lt.u32.totalorder %s1429_s28, %s1425_s2  ;;  %p1433_p7 = scmp.lt.u32.totalorder %s1425_s2, %s2063_s16 }
 0x129   : > { %p1427_p0 = pnand %p1426_p8, %p1724_p6 }
 0x12a   : > { %p1432_p9 = por %p1431_p13, %p1430_p10 }
 0x12b   : > { %p1428_p5 = pneg %p1427_p0 }
 0x12c   : > { %p1434_p12 = por %p1433_p7, %p1432_p9 }
 0x12e   : > { %p1435_p1 = pnand %p1434_p12, %p1428_p5 }
 0x130   : > { %1438 = shalt.err (!%p1435_p1)
}
 0x131   : > { %s1520_s7 = smov 128   ;;  %s1521_s27 = smov 8  }
 0x132   : > { %1147 = dma.vmem_to_hbm [thread:$0]  (%p1724_p6), %s2065_s13, 4096, %s2063_s16, %s768_s10, %s1520_s7, %s1520_s7, %s1521_s27  }
 0x133 PF: > { %s799_s29 = sand.u32 1, %s1489_s21   ;;  %p2153_p4 = scmp.ne.s32.totalorder %s2132_s30, 0 }
 0x134   : > { %p2154_p11 = scmp.ge.s32.totalorder %s1509_s26, 2  ;;  %s800_s18 = scalar_lea.sflag [#allocation4], %s799_s29 }
 0x136   : > { %p1170_p3 = pnand %p2154_p11, %p2153_p4 }
 0x138   : > { %1484 = dma.done.wait (!%p1170_p3), %s800_s18, 4096  }
 0x139   : > { %1486 = vsyncadd (!%p1170_p3), %s800_s18, 4294963200  ;;  %s27_s26 = sadd.s32 1, %s1509_s26   ;;  %s2155_s21 = smov %s1493_s22 }
 0x13a   : > { %p24_p2 = scmp.ge.s32.totalorder %s27_s26, 4   ;;  %s2156_s22 = smov %s1497_s23 }
 0x13b   : > { %s2157_s23 = smov %s1735_s9  ;;  %s2158_s24 = smov %s1505_s25 }
 0x13c   : > { %s2159_s25 = smov %s2161_s20  ;;  %26 = sbr.rel (!%p24_p2) target bundleno = 16 (0x10), region = 118 }
 0x143   :  { %805 = vsyncpa [#allocation3], 1 }
 0x144   :  { %807 = vsyncpa [#allocation3 + $0x1], 1 }
 0x145   :  { %808 = vsyncpa [#allocation6], 1 }
 0x146   :  { %810 = vsyncpa [#allocation6 + $0x1], 1 }
 0x147   :  { %811 = vsyncpa [#allocation9], 1 }
 0x148   :  { %812 = vsyncpa [#allocation12], 1 }
 0x149   :  { %813 = vsyncpa [#allocation4], 1 }
 0x14a   :  { %815 = vsyncpa [#allocation4 + $0x1], 1 }

// kernel: basic_block_forward.7
= control target key start
LH: loop header
LB: loop body
LE: loop exit
PB: predicated region body
PF: predicated region fallthrough
CT: control target
= control target key end

     0   :  { %10 = vsyncpa [#allocation3], 0  ;;  %s8235_s0 = inlined_call_operand.hbm [shape: bf16[2,18,18,128], index: 0, kind: input, shape index: {}]   ;;  %s8236_s1 = inlined_call_operand.hbm [shape: bf16[1152,128], index: 1, kind: input, shape index: {}]   ;;  %s8237_s2 = inlined_call_operand.hbm [shape: bf16[2,16,16,128], index: 2, kind: output, shape index: {0}]   ;;  %s8238_s3 = inlined_call_operand.hbm [shape: f32[2,1,128], index: 3, kind: output, shape index: {1}]   ;;  %s8239_s4 = inlined_call_operand.hbm [shape: f32[2,1,128], index: 4, kind: output, shape index: {2}]  }
   0x1   :  { %12 = vsyncpa [#allocation3 + $0x1], 0 }
   0x2   :  { %13 = vsyncpa [#allocation6], 0 }
   0x3   :  { %14 = vsyncpa [#allocation4], 0 }
   0x4   :  { %16 = vsyncpa [#allocation4 + $0x1], 0 }
   0x5   :  { %17 = vsyncpa [#allocation9], 0 }
   0x6   :  { %19 = vsyncpa [#allocation9 + $0x1], 0  ;;  %s6159_s15 = smov 0   ;;  %s6161_s16 = smov 0  }
   0x7   :  { %s6163_s17 = smov 0   ;;  %s6165_s18 = smov 0  }
   0x8   :  { %s6167_s19 = smov 0   ;;  %s6169_s20 = smov 0  }
   0x9 LB: > { %s6190_s21 = sadd.s32 4294967295, %s6122_s20   ;;  %s8243_s22 = sadd.s32 4294967294, %s6122_s20   ;;  %s6122_s20 = sphi %s6169_s20, %s25_s20   ;;  %s6118_s19 = sphi %s6167_s19, %s8276_s19   ;;  %s6114_s18 = sphi %s6165_s18, %s8275_s18   ;;  %s6110_s17 = sphi %s6163_s17, %s8274_s17   ;;  %s6106_s16 = sphi %s6161_s16, %s8273_s16   ;;  %s6102_s15 = sphi %s6159_s15, %s8272_s15  }
   0xa   : > { %p57_p0 = scmp.ne.s32.totalorder %s6106_s16, %s6102_s15  ;;  %p8240_p1 = scmp.eq.s32.totalorder %s6190_s21, 0 }
   0xb   : > { %p110_p3 = scmp.eq.s32.totalorder %s8243_s22, 1  ;;  %p4598_p5 = scmp.ge.s32.totalorder %s6122_s20, 1 }
   0xc   : > { %p6201_p4 = por %p8240_p1, %p57_p0  ;;  %p169_p7 = scmp.lt.s32.totalorder %s6122_s20, 3 }
   0xd   : > { %p6206_p6 = por %p110_p3, %p57_p0  ;;  %s6124_s26 = smov [#allocation5]  }
   0xe   : > { %s8244_s23 = scalar_select %p6201_p4, 1, 0 }
   0xf   : > { %s8245_s24 = scalar_select %p6206_p6, 1, 0 }
  0x10   : > { %p6211_p8 = pnand %p4598_p5, %p169_p7  ;;  %s181_s27 = sshll.u32 %s6124_s26, 4  ;;  %s182_s27 = int_to_ptr.vmem [resolvable:$true] %s181_s27 }
  0x11   : > { %s37_s29 = sadd.s32 1, %s6118_s19  ;;  %s5918_s6 = scalar_lea.hbm %s8236_s1, 9216 }
  0x12   : > { %s8246_s25 = scalar_select %p6211_p8, 1, 0 }
  0x13   : > { %p5715_p9 = pneg %p6211_p8  ;;  %p5919_p12 = scmp.ne.s32.totalorder %s8236_s1, %s5918_s6 }
  0x14   : > { %p5925_p5 = scmp.lt.u32.totalorder %s5918_s6, %s8236_s1 }
  0x15   : > { %p6220_p11 = pnand %p5715_p9, %p8240_p1 }
  0x17   : > { %p5920_p13 = pneg %p6220_p11 }
  0x19   : > { %p5921_p0 = pnand %p5920_p13, %p5919_p12 }
  0x1b   : > { %p5922_p3 = pneg %p5921_p0 }
  0x1d   : > { %p5927_p7 = pnand %p5925_p5, %p5922_p3 }
  0x1f   : > { %5930 = shalt.err (!%p5927_p7)
}
  0x20   : > { %s5931_s11 = scalar_lea.vmem %s182_s27, 9216  ;;  %p5939_p2 = scmp.lt.s32.totalorder %s182_s27, %s182_s27 }
  0x21   : > { %p5932_p9 = scmp.ne.s32.totalorder %s182_s27, %s5931_s11  ;;  %p5940_p6 = scmp.lt.s32.totalorder %s5931_s11, %s5931_s11 }
  0x23   : > { %p5934_p10 = pnand %p5932_p9, %p5920_p13  ;;  %p5941_p4 = por %p5940_p6, %p5939_p2 }
  0x25   : > { %p5935_p1 = pneg %p5934_p10 }
  0x27   : > { %p5942_p8 = pnand %p5941_p4, %p5935_p1 }
  0x29   : > { %5945 = shalt.err (!%p5942_p8)
}
  0x2a   : > { %s6125_s12 = smov 64   ;;  %s6126_s13 = smov 4  }
  0x2b   : > { %5718 = dma.hbm_to_vmem [thread:$0]  (!%p6220_p11), %s8236_s1, 9216, %s182_s27, [#allocation6], %s6125_s12, %s6125_s12, %s6126_s13  }
  0x2c   : > { %p39_p1 = scmp.ge.s32.totalorder %s37_s29, 2  ;;  %s44_s30 = sadd.s32 1, %s6110_s17 }
  0x2d   : > { %p51_p2 = scmp.ne.s32.totalorder %s6110_s17, %s6106_s16  ;;  %p52_p4 = scmp.eq.s32.totalorder %s6122_s20, 0 }
  0x2e   : > { %s8278_s29 = smov (%p39_p1, %s37_s29), 0  ;;  %p8248_p8 = scmp.eq.s32.totalorder %s6190_s21, 1 }
  0x2f   : > { %p53_p6 = por %p52_p4, %p51_p2  ;;  %s41_s28 = ssub.s32 %s6118_s19, %s8278_s29 }
  0x30   : > { %p6252_p10 = por %p8248_p8, %p51_p2  ;;  %p5734_p12 = scmp.lt.s32.totalorder %s6122_s20, 2 }
  0x31   : > { %p42_p13 = scmp.eq.s32.totalorder %s41_s28, 0  ;;  %s195_s6 = sand.u32 1, %s6110_s17  }
  0x32   : > { %s5700_s7 = smul.u32 216, %s195_s6  ;;  %p6264_p11 = pnand %p5734_p12, %p53_p6 }
  0x33   : > { %s6261_s8 = scalar_select %p42_p13, %s6110_s17, %s44_s30  }
  0x34   : > { %s5701_s27 = smul.u32 3456, %s6118_s19  ;;  %s199_s9 = scalar_lea.vmem [#allocation2], %s5700_s7 }
  0x35   : > { %s206_s10 = sshll.u32 %s199_s9, 4  ;;  %s6275_s30 = scalar_lea.sflag [#allocation3], %s195_s6  ;;  %s6273_s10 = int_to_ptr.vmem [resolvable:$true] %s206_s10 }
  0x36   : > { %s6271_s22 = scalar_lea.hbm %s8235_s0, %s5701_s27  ;;  %p5948_p3 = pneg %p6264_p11 }
  0x37   : > { %s5946_s28 = scalar_lea.hbm %s6271_s22, 3456  ;;  %s5951_s27 = scalar_lea.hbm %s8235_s0, 6912 }
  0x38   : > { %p5947_p0 = scmp.ne.s32.totalorder %s6271_s22, %s5946_s28  ;;  %p5952_p9 = scmp.lt.u32.totalorder %s6271_s22, %s8235_s0 }
  0x39   : > { %p5953_p1 = scmp.lt.u32.totalorder %s5951_s27, %s5946_s28  ;;  %p5955_p4 = scmp.lt.u32.totalorder %s5946_s28, %s6271_s22 }
  0x3a   : > { %p5949_p5 = pnand %p5948_p3, %p5947_p0 }
  0x3b   : > { %p5954_p2 = por %p5953_p1, %p5952_p9 }
  0x3c   : > { %p5950_p7 = pneg %p5949_p5 }
  0x3d   : > { %p5956_p6 = por %p5955_p4, %p5954_p2 }
  0x3f   : > { %p5957_p8 = pnand %p5956_p6, %p5950_p7 }
  0x41   : > { %5960 = shalt.err (!%p5957_p8)
}
  0x42   : > { %s5961_s6 = scalar_lea.vmem %s6273_s10, 3456  ;;  %s6127_s7 = smov [#allocation2]  }
  0x43   : > { %p5962_p12 = scmp.ne.s32.totalorder %s6273_s10, %s5961_s6  ;;  %s5966_s9 = sshll.u32 %s6127_s7, 4  ;;  %s5967_s9 = int_to_ptr.vmem [resolvable:$false] %s5966_s9 }
  0x44   : > { %s5968_s14 = scalar_lea.vmem %s5967_s9, 6912  ;;  %p5969_p5 = scmp.lt.s32.totalorder %s6273_s10, %s5967_s9 }
  0x45   : > { %p5964_p13 = pnand %p5962_p12, %p5948_p3  ;;  %p5970_p9 = scmp.lt.s32.totalorder %s5968_s14, %s5961_s6 }
  0x47   : > { %p5965_p0 = pneg %p5964_p13  ;;  %p5971_p1 = por %p5970_p9, %p5969_p5 }
  0x49   : > { %p5972_p2 = pnand %p5971_p1, %p5965_p0 }
  0x4b   : > { %5975 = shalt.err (!%p5972_p2)
}
  0x4c   : > { %5722 = dma.hbm_to_vmem [thread:$0]  (!%p6264_p11), %s6271_s22, 3456, %s6273_s10, %s6275_s30, %s6125_s12, %s6125_s12, %s6126_s13  }
  0x4d   : > { %p8251_p3 = scmp.ne.s32.totalorder %s8246_s25, 0 }
  0x4e   : > { %s6309_s28 = sand.u32 (!%p8251_p3), 1, %s6106_s16   ;;  %p8252_p7 = scmp.ne.s32.totalorder (!%p8251_p3), %s8244_s23, 0 }
  0x4f   : > { %218 = sbr.rel (%p8251_p3) target bundleno = 708 (0x2c4), region = 28  ;;  %s221_s26 = scalar_lea.sflag (!%p8251_p3), [#allocation3], %s6309_s28 }
  0x50   : > { %s5702_s27 = smul.u32 (!%p8251_p3), 216, %s6309_s28 }
  0x52   : > { %s6313_s6 = scalar_lea.vmem (!%p8251_p3), [#allocation2], %s5702_s27 }
  0x56   : > { %6085 = dma.done.wait (%p8252_p7), %s221_s26, 3456  }
  0x57   : > { %6087 = vsyncadd (%p8252_p7), %s221_s26, 4294963840  ;;  %p8253_p11 = scmp.eq.s32.totalorder %s6190_s21, 0 }
  0x59   : > { %6089 = dma.done.wait (%p8253_p11), [#allocation6], 9216   ;;  %p8254_p4 = pmov %p8253_p11 }
  0x5a   : > { %v5791_v0 = vld [vmem:[#allocation5 + $0x40] sm:$0xff]   ;;  %v5793_v2 = vld [vmem:[#allocation5 + $0x48] sm:$0xff]   ;;  %v5795_v4 = vld [vmem:[#allocation5 + $0x50] sm:$0xff]   ;;  %vm315_vm0 = vsmask.f32 3328  ;;  %vm766_vm3 = vcmask 1042432  }
  0x5b   : > { %6091 = vsyncadd (%p8254_p4), [#allocation6], 4294958080  ;;  %v5792_v1 = vld [vmem:[#allocation5] sm:$0xff]   ;;  %5164 = vmatprep.subr.bf16.mxu0 %v5791_v0  ;;  %5684 = vmatprep.subr.bf16.mxu1 %v5791_v0  ;;  %v5794_v3 = vld [vmem:[#allocation5 + $0x8] sm:$0xff]   ;;  %vm316_vm1 = vsmask.f32 7440 }
  0x5c   : > { %5165 = vmatpush3.bf16.msra.mxu0 %v5792_v1  ;;  %5692 = vmatpush3.bf16.msra.mxu1 %v5792_v1  ;;  %v5796_v5 = vld [vmem:[#allocation5 + $0x10] sm:$0xff]   ;;  %v5797_v6 = vld [vmem:[#allocation5 + $0x58] sm:$0xff]   ;;  %v5799_v8 = vld [vmem:[#allocation5 + $0x60] sm:$0xff]   ;;  %vm767_vm4 = vcmask 1046532   ;;  %s7973_s22 = scalar_lea.vmem [#allocation8], %s6309_s28  ;;  %s7977_s23 = scalar_lea.vmem [#allocation10], %s6309_s28 }
  0x5d   : > { %5166 = vmatprep.subr.bf16.mxu0 %v5793_v2  ;;  %5685 = vmatprep.subr.bf16.mxu1 %v5793_v2  ;;  %v5798_v7 = vld [vmem:[#allocation5 + $0x18] sm:$0xff]   ;;  %v5800_v9 = vld [vmem:[#allocation5 + $0x20] sm:$0xff]   ;;  %v5801_v10 = vld [vmem:[#allocation5 + $0x68] sm:$0xff]   ;;  %s4604_s25 = sshll.u32 %s6309_s28, 7  ;;  %s5068_s13 = sshll.u32 %s6114_s18, 11 }
  0x5e   : > { %v6324_v11 = vld [vmem:[%s6313_s6] sm:$0xf]  ;;  %v6327_v12 = vld [vmem:[%s6313_s6 + $0x4] sm:$0xf]  ;;  %v6330_v13 = vld [vmem:[%s6313_s6 + $0x8] sm:$0x1]  ;;  %s8113_s7 = scalar_lea.hbm %s8237_s2, %s5068_s13 }
  0x5f   : > { %v319_v14 = vshrl.u32 %v6324_v11, 16  ;;  %v322_v15 = vshll.u32 %v6324_v11, 16  ;;  %v328_v16 = vshll.u32 %v6327_v12, 16  ;;  %v332_v17 = vshrl.u32 %v6327_v12, 16  ;;  %v6337_v18 = vld [vmem:[%s6313_s6 + $0x90] sm:$0xf]  ;;  %vm6353_vm2 = vmor %vm315_vm0, %vm316_vm1 }
  0x60   : > { %5167 = vmatpush3.bf16.msra.mxu0 %v5794_v3  ;;  %5693 = vmatpush3.bf16.msra.mxu1 %v5794_v3  ;;  %v5802_v19 = vld [vmem:[#allocation5 + $0x28] sm:$0xff]   ;;  %v5803_v20 = vld [vmem:[#allocation5 + $0x70] sm:$0xff]   ;;  %v338_v21 = vshll.u32 %v6330_v13, 16  ;;  %v6341_v22 = vld [vmem:[%s6313_s6 + $0x94] sm:$0xf]  ;;  %v607_v23 = vshrl.u32 %v6337_v18, 16  ;;  %v4781_v61 = vcombine.low %v6324_v11, %v6327_v12 }
  0x61   : > { %5168 = vmatprep.subr.bf16.mxu0 %v5795_v4  ;;  %5686 = vmatprep.subr.bf16.mxu1 %v5795_v4  ;;  %v321_v24 = vrot.slane %v319_v14, 4  ;;  %v324_v25 = vrot.slane %v322_v15, 5  ;;  %v330_v26 = vrot.slane %v328_v16, 5  ;;  %v334_v27 = vrot.slane %v332_v17, 4  ;;  %v6345_v28 = vld [vmem:[%s6313_s6 + $0x98] sm:$0x1]  ;;  %vm6478_vm5 = vmor %vm766_vm3, %vm767_vm4 }
  0x62   : > { %v340_v29 = vrot.slane %v338_v21, 5  ;;  %v771_v30 = vrot.slane %v6327_v12, 5  ;;  %v609_v31 = vrot.slane %v607_v23, 4  ;;  %v610_v32 = vshll.u32 %v6337_v18, 16  ;;  %v5804_v33 = vld [vmem:[#allocation5 + $0x30] sm:$0xff]   ;;  %v5805_v38 = vld [vmem:[#allocation5 + $0x78] sm:$0xff]  }
  0x63   : > { %v325_v34 = vor.u32 %v324_v25, %v321_v24  ;;  %v335_v35 = vor.u32 %v334_v27, %v330_v26  ;;  %v616_v36 = vshll.u32 %v6341_v22, 16  ;;  %v620_v37 = vshrl.u32 %v6341_v22, 16  ;;  %v5806_v50 = vld [vmem:[#allocation5 + $0x38] sm:$0xff]   ;;  %v5809_v56 = vld [vmem:[#allocation5 + $0xc0] sm:$0xff]   ;;  %v6393_v15 = vld [vmem:[%s6313_s6 + $0xa0] sm:$0xf] }
  0x64   : > { %5169 = vmatpush3.bf16.msra.mxu0 %v5796_v5  ;;  %5694 = vmatpush3.bf16.msra.mxu1 %v5796_v5  ;;  %v774_v40 = vrot.slane %v6330_v13, 5  ;;  %v612_v41 = vrot.slane %v610_v32, 5  ;;  %v626_v42 = vshll.u32 %v6345_v28, 16  ;;  %v6361_v47 = vrot.slane %v771_v30, 4  ;;  %v5810_v58 = vld [vmem:[#allocation5 + $0x140] sm:$0xff]   ;;  %v5813_v23 = vld [vmem:[#allocation5 + $0xc8] sm:$0xff]  }
  0x65   : > { %5170 = vmatprep.subr.bf16.mxu0 %v5797_v6  ;;  %5687 = vmatprep.subr.bf16.mxu1 %v5797_v6  ;;  %v326_v43 = vrot.slane %v325_v34, 4  ;;  %v336_v44 = vrot.slane %v335_v35, 4  ;;  %v618_v45 = vrot.slane %v616_v36, 5  ;;  %v622_v46 = vrot.slane %v620_v37, 4  ;;  %v6368_v59 = vld [vmem:[%s6313_s6 + $0xc] sm:$0xf] }
  0x66   : > { %v613_v48 = vor.u32 %v612_v41, %v609_v31  ;;  %v628_v49 = vrot.slane %v626_v42, 5  ;;  %v6375_v62 = vld [vmem:[%s6313_s6 + $0x10] sm:$0xf]  ;;  %v6378_v63 = vld [vmem:[%s6313_s6 + $0x14] sm:$0x1]  ;;  %v343_v0 = vshrl.u32 %v6368_v59, 16 }
  0x67   : > { %v331_v51 = vsel %vm6353_vm2, %v326_v43, %v330_v26  ;;  %v341_v52 = vsel %vm6353_vm2, %v336_v44, %v340_v29  ;;  %v623_v53 = vor.u32 %v622_v46, %v618_v45  ;;  %v346_v1 = vshll.u32 %v6368_v59, 16  ;;  %v5811_v3 = vld [vmem:[#allocation5 + $0x80] sm:$0xff]   ;;  %v312_v16 = vld [vmem:[%s6313_s6 + $0xa4] sm:$0x1]  ;;  %s8051_s12 = scalar_lea.vmem [#allocation7], %s4604_s25  ;;  %s4389_s9 = scalar_lea.sflag [#allocation4], %s6309_s28 }
  0x68   : > { %5171 = vmatpush3.bf16.msra.mxu0 %v5798_v7  ;;  %5695 = vmatpush3.bf16.msra.mxu1 %v5798_v7  ;;  %v4797_v54 = vcombine.low %v331_v51, %v341_v52  ;;  %v614_v55 = vrot.slane %v613_v48, 4  ;;  %v5812_v4 = vld [vmem:[#allocation5 + $0x100] sm:$0xff]   ;;  %v352_v5 = vshll.u32 %v6375_v62, 16  ;;  %v356_v6 = vshrl.u32 %v6375_v62, 16  ;;  %v5814_v26 = vld [vmem:[#allocation5 + $0x88] sm:$0xff]   ;;  %s4413_s10 = sshll.u32 %s8051_s12, 4  ;;  %s8115_s10 = int_to_ptr.vmem [resolvable:$true] %s4413_s10 }
  0x69   : > { %5172 = vmatprep.subr.bf16.mxu0 %v5799_v8  ;;  %5688 = vmatprep.subr.bf16.mxu1 %v5799_v8  ;;  %v624_v57 = vrot.slane %v623_v53, 4  ;;  %v362_v7 = vshll.u32 %v6378_v63, 16  ;;  %v6388_v8 = vld [vmem:[%s6313_s6 + $0x9c] sm:$0xf]  ;;  %v345_v11 = vrot.slane %v343_v0, 4  ;;  %v348_v14 = vrot.slane %v346_v1, 5 }
  0x6a   : > { %v619_v60 = vsel %vm6353_vm2, %v614_v55, %v618_v45  ;;  %3337 = vmatprep.mubr.bf16.mxu0 %v4797_v54  ;;  %v354_v17 = vrot.slane %v352_v5, 5  ;;  %v631_v21 = vshrl.u32 %v6388_v8, 16  ;;  %v634_v25 = vshll.u32 %v6388_v8, 16  ;;  %v5820_v41 = vld [vmem:[#allocation5 + $0x148] sm:$0xff]   ;;  %v5819_v53 = vld [vmem:[#allocation5 + $0xd8] sm:$0xff]   ;;  %s5976_s14 = scalar_lea.vmem %s8115_s10, 2048 }
  0x6b   : > { %v629_v2 = vsel %vm6353_vm2, %v624_v57, %v628_v49  ;;  %v349_v24 = vor.u32 %v348_v14, %v345_v11  ;;  %v650_v31 = vshll.u32 %v312_v16, 16  ;;  %v4782_v48 = vcombine.low %v6368_v59, %v6375_v62  ;;  %v5818_v49 = vld [vmem:[#allocation5 + $0x90] sm:$0xff]   ;;  %v5822_v54 = vld [vmem:[#allocation5 + $0x108] sm:$0xff]   ;;  %v5821_v5 = vld [vmem:[#allocation5 + $0x98] sm:$0xff]   ;;  %p5977_p6 = scmp.ne.s32.totalorder %s8115_s10, %s5976_s14  ;;  %s6129_s27 = smov [#allocation7]  }
  0x6c   : > { %5173 = vmatpush3.bf16.msra.mxu0 %v5800_v9  ;;  %5696 = vmatpush3.bf16.msra.mxu1 %v5800_v9  ;;  %v4809_v9 = vcombine.low %v619_v60, %v629_v2  ;;  %v633_v29 = vrot.slane %v631_v21, 4  ;;  %v778_v55 = vrot.slane %v6375_v62, 5  ;;  %v6411_v57 = vld [vmem:[%s6313_s6 + $0x18] sm:$0xf]  ;;  %v6417_v59 = vld [vmem:[%s6313_s6 + $0x20] sm:$0x1] }
  0x6d   : > { %5174 = vmatprep.subr.bf16.mxu0 %v5801_v10  ;;  %5689 = vmatprep.subr.bf16.mxu1 %v5801_v10  ;;  %v4793_v10 = vcombine.low %v6337_v18, %v6341_v22  ;;  %v640_v18 = vshll.u32 %v6393_v15, 16  ;;  %v644_v22 = vshrl.u32 %v6393_v15, 16  ;;  %v350_v32 = vrot.slane %v349_v24, 4  ;;  %v6426_v2 = vld [vmem:[%s6313_s6 + $0xa8] sm:$0xf]  ;;  %p5978_p8 = pnand %p5977_p6, %p6252_p10  ;;  %s5980_s26 = sshll.u32 %s6129_s27, 4  ;;  %s5981_s26 = int_to_ptr.vmem [resolvable:$false] %s5980_s26 }
  0x6e   : > { %3433 = vmatprep.mubr.bf16.mxu1 %v4809_v9  ;;  %v652_v37 = vrot.slane %v650_v31, 5  ;;  %v367_v0 = vshrl.u32 %v6411_v57, 16  ;;  %v370_v1 = vshll.u32 %v6411_v57, 16  ;;  %v313_v9 = vld [vmem:[%s6313_s6 + $0xb0] sm:$0x1]  ;;  %v655_v14 = vshrl.u32 %v6426_v2, 16  ;;  %p5983_p13 = scmp.lt.s32.totalorder %s8115_s10, %s5981_s26 }
  0x6f   : > { %v642_v34 = vrot.slane %v640_v18, 5  ;;  %v646_v35 = vrot.slane %v644_v22, 4  ;;  %v355_v42 = vsel %vm6353_vm2, %v350_v32, %v354_v17  ;;  %v5825_v18 = vld [vmem:[#allocation5 + $0xe0] sm:$0xff]   ;;  %p5979_p12 = pneg %p5978_p8 }
  0x70   : > { %5175 = vmatpush3.bf16.msra.mxu0 %v5802_v19  ;;  %5697 = vmatpush3.bf16.msra.mxu1 %v5802_v19  ;;  %v358_v19 = vrot.slane %v356_v6, 4  ;;  %v372_v11 = vrot.slane %v370_v1, 5  ;;  %v6466_v1 = vld [vmem:[%s6313_s6 + $0xb8] sm:$0xf] }
  0x71   : > { %5176 = vmatprep.subr.bf16.mxu0 %v5803_v20  ;;  %5690 = vmatprep.subr.bf16.mxu1 %v5803_v20  ;;  %v364_v20 = vrot.slane %v362_v7, 5  ;;  %v647_v44 = vor.u32 %v646_v35, %v642_v34 }
  0x72   : > { %v359_v27 = vor.u32 %v358_v19, %v354_v17 }
  0x73   : > { %v648_v52 = vrot.slane %v647_v44, 4  ;;  %v6446_v44 = vld [vmem:[%s6313_s6 + $0x24] sm:$0xf] }
  0x74   : > { %5177 = vmatpush3.bf16.msra.mxu0 %v5804_v33  ;;  %5698 = vmatpush3.bf16.msra.mxu1 %v5804_v33  ;;  %v636_v33 = vrot.slane %v634_v25, 5  ;;  %v360_v36 = vrot.slane %v359_v27, 4  ;;  %v674_v27 = vshll.u32 %v313_v9, 16 }
  0x75   : > { %5178 = vmatprep.subr.bf16.mxu0 %v5805_v38  ;;  %5691 = vmatprep.subr.bf16.mxu1 %v5805_v38  ;;  %v5817_v38 = vld [vmem:[#allocation5 + $0xd0] sm:$0xff]  }
  0x76   : > { %v637_v43 = vor.u32 %v636_v33, %v633_v29  ;;  %v365_v46 = vsel %vm6353_vm2, %v360_v36, %v364_v20  ;;  %v5826_v36 = vld [vmem:[#allocation5 + $0xa0] sm:$0xff]  }
  0x78   : > { %5179 = vmatpush3.bf16.msra.mxu0 %v5806_v50  ;;  %5699 = vmatpush3.bf16.msra.mxu1 %v5806_v50  ;;  %v4798_v50 = vcombine.low %v355_v42, %v365_v46  ;;  %v638_v51 = vrot.slane %v637_v43, 4  ;;  %v6449_v46 = vld [vmem:[%s6313_s6 + $0x28] sm:$0xf] }
  0x79   : > { %5276 = vmatprep.subr.bf16.mxu1 %v5809_v56  ;;  %5388 = vmatprep.subr.bf16.mxu0 %v5810_v58  ;;  %v4794_v56 = vcombine.low %v6388_v8, %v6393_v15  ;;  %v6414_v58 = vld [vmem:[%s6313_s6 + $0x1c] sm:$0xf]  ;;  %v386_v8 = vshll.u32 %v6417_v59, 16  ;;  %v658_v15 = vshll.u32 %v6426_v2, 16 }
  0x7a   : > { %v643_v60 = vsel %vm6353_vm2, %v638_v51, %v642_v34  ;;  %v376_v6 = vshll.u32 %v6414_v58, 16  ;;  %v380_v7 = vshrl.u32 %v6414_v58, 16  ;;  %v676_v34 = vrot.slane %v674_v27, 5  ;;  %v6454_v51 = vld [vmem:[%s6313_s6 + $0x2c] sm:$0x1] }
  0x7b   : > { %3338 = vmatmul.mubr.bf16.vlgmr.msra.gmra.mrb[0].mxu0 %v4781_v61  ;;  %3434 = vmatmul.mubr.bf16.vlgmr.msra.gmra.mrb[0].mxu1 %v4793_v10  ;;  %v653_v61 = vsel %vm6353_vm2, %v648_v52, %v652_v37  ;;  %v369_v10 = vrot.slane %v367_v0, 4  ;;  %v388_v19 = vrot.slane %v386_v8, 5  ;;  %v660_v24 = vrot.slane %v658_v15, 5  ;;  %v5827_v37 = vld [vmem:[#allocation5 + $0xe8] sm:$0xff]   ;;  %v6463_v0 = vld [vmem:[%s6313_s6 + $0xb4] sm:$0xf] }
  0x7c   : > { %5277 = vmatpush3.bf16.msra.mxu1 %v5811_v3  ;;  %5389 = vmatpush3.bf16.msra.mxu0 %v5812_v4  ;;  %v6429_v3 = vld [vmem:[%s6313_s6 + $0xac] sm:$0xf]  ;;  %v4810_v4 = vcombine.low %v643_v60, %v653_v61  ;;  %v378_v16 = vrot.slane %v376_v6, 5  ;;  %v382_v17 = vrot.slane %v380_v7, 4  ;;  %v4783_v35 = vcombine.low %v6411_v57, %v6414_v58  ;;  %v314_v7 = vld [vmem:[%s6313_s6 + $0xbc] sm:$0x1] }
  0x7d   : > { %5278 = vmatprep.subr.bf16.mxu1 %v5813_v23  ;;  %5390 = vmatprep.subr.bf16.mxu0 %v5820_v41  ;;  %v664_v20 = vshll.u32 %v6429_v3, 16  ;;  %v373_v21 = vor.u32 %v372_v11, %v369_v10  ;;  %v657_v23 = vrot.slane %v655_v14, 4  ;;  %v668_v25 = vshrl.u32 %v6429_v3, 16  ;;  %v5834_v14 = vld [vmem:[#allocation5 + $0x110] sm:$0xff]   ;;  %v5835_v27 = vld [vmem:[#allocation5 + $0xf8] sm:$0xff]  }
  0x7e   : > { %3345 = vmatprep.mubr.bf16.mxu0 %v4798_v50  ;;  %3441 = vmatprep.mubr.bf16.mxu1 %v4810_v4  ;;  %v383_v22 = vor.u32 %v382_v17, %v378_v16  ;;  %v4795_v43 = vcombine.low %v6426_v2, %v6429_v3  ;;  %v5828_v50 = vld [vmem:[#allocation5 + $0xa8] sm:$0xff]   ;;  %v391_v52 = vshrl.u32 %v6446_v44, 16  ;;  %v404_v61 = vshrl.u32 %v6449_v46, 16  ;;  %v5831_v2 = vld [vmem:[#allocation5 + $0xf0] sm:$0xff]  }
  0x7f   : > { %v374_v29 = vrot.slane %v373_v21, 4  ;;  %v661_v31 = vor.u32 %v660_v24, %v657_v23  ;;  %v670_v32 = vrot.slane %v668_v25, 4  ;;  %v410_v6 = vshll.u32 %v6454_v51, 16  ;;  %v5833_v25 = vld [vmem:[#allocation5 + $0xb0] sm:$0xff]  }
  0x80   : > { %5279 = vmatpush3.bf16.msra.mxu1 %v5814_v26  ;;  %5391 = vmatpush3.bf16.msra.mxu0 %v5822_v54  ;;  %v666_v26 = vrot.slane %v664_v20, 5  ;;  %v384_v33 = vrot.slane %v383_v22, 4  ;;  %v400_v54 = vshll.u32 %v6449_v46, 16  ;;  %v393_v3 = vrot.slane %v391_v52, 4  ;;  %v6499_v52 = vld [vmem:[%s6313_s6 + $0x34] sm:$0xf] }
  0x81   : > { %5280 = vmatprep.subr.bf16.mxu1 %v5817_v38  ;;  %v379_v38 = vsel %vm6353_vm2, %v374_v29, %v378_v16  ;;  %v662_v41 = vrot.slane %v661_v31, 4  ;;  %v406_v9 = vrot.slane %v404_v61, 4  ;;  %v679_v10 = vshrl.u32 %v6463_v0, 16 }
  0x82   : > { %v671_v42 = vor.u32 %v670_v32, %v666_v26  ;;  %v682_v11 = vshll.u32 %v6463_v0, 16  ;;  %v412_v17 = vrot.slane %v410_v6, 5  ;;  %v692_v24 = vshrl.u32 %v6466_v1, 16 }
  0x83   : > { %3346 = vmatmul.mubr.bf16.gmra.mrb[4].mxu0 %v4782_v48  ;;  %3442 = vmatmul.mubr.bf16.gmra.mrb[4].mxu1 %v4794_v56  ;;  %v5832_v48 = vld [vmem:[#allocation5 + $0x150] sm:$0xff]   ;;  %v667_v57 = vsel %vm6353_vm2, %v662_v41, %v666_v26  ;;  %v681_v21 = vrot.slane %v679_v10, 4  ;;  %v698_v26 = vshll.u32 %v314_v7, 16  ;;  %v6517_v7 = vld [vmem:[%s6313_s6 + $0x10] sm:$0xf] }
  0x84   : > { %5281 = vmatpush3.bf16.msra.mxu1 %v5818_v49  ;;  %v389_v49 = vsel %vm6353_vm2, %v384_v33, %v388_v19  ;;  %v672_v60 = vrot.slane %v671_v42, 4  ;;  %5392 = vmatprep.subr.bf16.mxu0 %v5832_v48  ;;  %v688_v19 = vshll.u32 %v6466_v1, 16  ;;  %v684_v23 = vrot.slane %v682_v11, 5 }
  0x85   : > { %5282 = vmatprep.subr.bf16.mxu1 %v5819_v53  ;;  %v394_v53 = vshll.u32 %v6446_v44, 16  ;;  %v4799_v56 = vcombine.low %v379_v38, %v389_v49  ;;  %5393 = vmatpush3.bf16.msra.mxu0 %v5834_v14  ;;  %v694_v33 = vrot.slane %v692_v24, 4  ;;  %v4784_v42 = vcombine.low %v6446_v44, %v6449_v46  ;;  %v6504_v44 = vld [vmem:[%s6313_s6 + $0x38] sm:$0x1]  ;;  %v702_v14 = vld [vmem:[%s6313_s6] sm:$0xe] }
  0x86   : > { %v677_v8 = vsel %vm6353_vm2, %v672_v60, %v676_v34  ;;  %v690_v22 = vrot.slane %v688_v19, 5  ;;  %v685_v32 = vor.u32 %v684_v23, %v681_v21  ;;  %v6493_v48 = vsel %vm6478_vm5, %v6361_v47, %v774_v40  ;;  %v5841_v47 = vld [vmem:[#allocation5 + $0x158] sm:$0xff]  }
  0x87   : > { %v396_v4 = vrot.slane %v394_v53, 5  ;;  %3353 = vmatprep.mubr.bf16.mxu0 %v4799_v56  ;;  %v4811_v15 = vcombine.low %v667_v57, %v677_v8  ;;  %v4796_v56 = vcombine.low %v6463_v0, %v6466_v1  ;;  %v424_v57 = vshll.u32 %v6499_v52, 16  ;;  %5394 = vmatprep.subr.bf16.mxu0 %v5841_v47  ;;  %v5847_v0 = vld [vmem:[#allocation5 + $0x160] sm:$0xff]   ;;  %v5848_v47 = vld [vmem:[#allocation5 + $0x1c8] sm:$0xff]  }
  0x88   : > { %5283 = vmatpush3.bf16.msra.mxu1 %v5821_v5  ;;  %v402_v5 = vrot.slane %v400_v54, 5  ;;  %v686_v38 = vrot.slane %v685_v32, 4  ;;  %v695_v41 = vor.u32 %v694_v33, %v690_v22  ;;  %v428_v60 = vshrl.u32 %v6499_v52, 16 }
  0x89   : > { %5284 = vmatprep.subr.bf16.mxu1 %v5825_v18  ;;  %v397_v16 = vor.u32 %v396_v4, %v393_v3  ;;  %3449 = vmatprep.mubr.bf16.mxu1 %v4811_v15  ;;  %v434_v61 = vshll.u32 %v6504_v44, 16  ;;  %v5842_v3 = vld [vmem:[#allocation5 + $0x118] sm:$0xff]   ;;  %v943_v19 = vshll.u32 %v6517_v7, 16  ;;  %v947_v23 = vshrl.u32 %v6517_v7, 16 }
  0x8a   : > { %v407_v20 = vor.u32 %v406_v9, %v402_v5  ;;  %v691_v53 = vsel %vm6353_vm2, %v686_v38, %v690_v22  ;;  %v696_v54 = vrot.slane %v695_v41, 4  ;;  %v426_v9 = vrot.slane %v424_v57, 5  ;;  %5395 = vmatpush3.bf16.msra.mxu0 %v5842_v3  ;;  %v6539_v38 = vld [vmem:[%s6313_s6 + $0x3c] sm:$0xf] }
  0x8b   : > { %3354 = vmatmul.mubr.bf16.gmra.mrb[8].mxu0 %v4783_v35  ;;  %v398_v18 = vrot.slane %v397_v16, 4  ;;  %3450 = vmatmul.mubr.bf16.gmra.mrb[8].mxu1 %v4795_v43  ;;  %v700_v35 = vrot.slane %v698_v26, 5  ;;  %v5839_v43 = vld [vmem:[#allocation5 + $0x1c0] sm:$0xff]   ;;  %v430_v10 = vrot.slane %v428_v60, 4  ;;  %v436_v11 = vrot.slane %v434_v61, 5 }
  0x8c   : > { %5285 = vmatpush3.bf16.msra.mxu1 %v5826_v36  ;;  %v408_v31 = vrot.slane %v407_v20, 4  ;;  %v5836_v36 = vld [vmem:[#allocation5 + $0xb8] sm:$0xff]   ;;  %5396 = vmatprep.subr.bf16.mxu0 %v5847_v0  ;;  %v5849_v20 = vld [vmem:[#allocation5 + $0x120] sm:$0xff]   ;;  %v6523_v26 = vrot.slane %v943_v19, 5  ;;  %v949_v32 = vrot.slane %v947_v23, 4 }
  0x8d   : > { %5286 = vmatprep.subr.bf16.mxu1 %v5827_v37  ;;  %v403_v34 = vsel %vm6353_vm2, %v398_v18, %v402_v5  ;;  %v701_v4 = vsel %vm6353_vm2, %v696_v54, %v700_v35  ;;  %v431_v21 = vor.u32 %v430_v10, %v426_v9 }
  0x8e   : > { %v413_v37 = vsel %vm6353_vm2, %v408_v31, %v412_v17  ;;  %v4812_v1 = vcombine.low %v691_v53, %v701_v4  ;;  %5397 = vmatpush3.bf16.msra.mxu0 %v5849_v20  ;;  %v950_v12 = vor.u32 %v949_v32, %v6523_v26  ;;  %v442_v53 = vshll.u32 %v6539_v38, 16  ;;  %v6579_v20 = vld [vmem:[%s6313_s6 + $0x50] sm:$0x1] }
  0x8f   : > { %v4800_v49 = vcombine.low %v403_v34, %v413_v37  ;;  %v432_v31 = vrot.slane %v431_v21, 4  ;;  %v5850_v21 = vld [vmem:[#allocation5 + $0x188] sm:$0xff]   ;;  %v482_v62 = vshll.u32 %v6579_v20, 16 }
  0x90   : > { %5287 = vmatpush3.bf16.msra.mxu1 %v5828_v50  ;;  %v6496_v50 = vld [vmem:[%s6313_s6 + $0x30] sm:$0xf]  ;;  %3457 = vmatprep.mubr.bf16.mxu1 %v4812_v1  ;;  %v444_v60 = vrot.slane %v442_v53, 5 }
  0x91   : > { %5288 = vmatprep.subr.bf16.mxu1 %v5831_v2  ;;  %v415_v13 = vshrl.u32 %v6496_v50, 16  ;;  %v418_v40 = vshll.u32 %v6496_v50, 16  ;;  %3361 = vmatprep.mubr.bf16.mxu0 %v4800_v49  ;;  %v4621_v2 = vld [vmem:[%s6313_s6 + $0xc] sm:$0xf]  ;;  %v437_v41 = vsel %vm6353_vm2, %v432_v31, %v436_v11  ;;  %v439_v49 = vshrl.u32 %v6539_v38, 16 }
  0x92   : > { %v934_v8 = vshrl.u32 %v4621_v2, 16  ;;  %v937_v17 = vshll.u32 %v4621_v2, 16  ;;  %v4829_v24 = vcombine.low %v4621_v2, %v6517_v7  ;;  %v6561_v2 = vld [vmem:[%s6313_s6 + $0x1c] sm:$0xf]  ;;  %v6567_v11 = vld [vmem:[%s6313_s6 + $0x48] sm:$0xf] }
  0x93   : > { %3362 = vmatmul.mubr.bf16.gmra.mrb[12].mxu0 %v4784_v42  ;;  %v417_v5 = vrot.slane %v415_v13, 4  ;;  %v420_v6 = vrot.slane %v418_v40, 5  ;;  %3458 = vmatmul.mubr.bf16.gmra.mrb[12].mxu1 %v4796_v56  ;;  %v6545_v42 = vld [vmem:[%s6313_s6 + $0x40] sm:$0xf]  ;;  %v4623_v40 = vld [vmem:[%s6313_s6 + $0x18] sm:$0xf] }
  0x94   : > { %5289 = vmatpush3.bf16.msra.mxu1 %v5833_v25  ;;  %v936_v16 = vrot.slane %v934_v8, 4  ;;  %v4605_v25 = vrot.slane %v702_v14, 9  ;;  %v939_v22 = vrot.slane %v937_v17, 5  ;;  %3498 = vmatprep.mubr.bf16.mxu1 %v4829_v24  ;;  %v448_v54 = vshll.u32 %v6545_v42, 16  ;;  %v703_v8 = vld [vmem:[%s6313_s6 + $0xc] sm:$0xe] }
  0x95   : > { %5290 = vmatprep.subr.bf16.mxu1 %v5835_v27  ;;  %v421_v15 = vor.u32 %v420_v6, %v417_v5  ;;  %v6527_v27 = vrot.slane %v778_v55, 4  ;;  %v452_v13 = vshrl.u32 %v6545_v42, 16  ;;  %v6557_v56 = vrot.slane %v950_v12, 4  ;;  %v6570_v14 = vld [vmem:[%s6313_s6 + $0x4c] sm:$0xf]  ;;  %v5853_v12 = vld [vmem:[#allocation5 + $0x168] sm:$0xff]  }
  0x96   : > { %v772_v33 = vsel %vm6478_vm5, %v4605_v25, %v771_v30  ;;  %v940_v35 = vor.u32 %v939_v22, %v936_v16  ;;  %v5840_v30 = vld [vmem:[#allocation5 + $0x180] sm:$0xff]   ;;  %v441_v57 = vrot.slane %v439_v49, 4  ;;  %v450_v3 = vrot.slane %v448_v54, 5  ;;  %v4625_v22 = vld [vmem:[%s6313_s6 + $0x24] sm:$0xf]  ;;  %5398 = vmatprep.subr.bf16.mxu0 %v5853_v12 }
  0x97   : > { %v422_v18 = vrot.slane %v421_v15, 4  ;;  %v4813_v37 = vcombine.low %v772_v33, %v6493_v48  ;;  %v454_v4 = vrot.slane %v452_v13, 4  ;;  %v958_v5 = vshrl.u32 %v4623_v40, 16 }
  0x98   : > { %5291 = vmatpush3.bf16.msra.mxu1 %v5836_v36  ;;  %v4785_v36 = vcombine.low %v6496_v50, %v6499_v52  ;;  %v6552_v48 = vrot.slane %v940_v35, 4  ;;  %v961_v6 = vshll.u32 %v4623_v40, 16  ;;  %v445_v0 = vor.u32 %v444_v60, %v441_v57  ;;  %v6588_v35 = vld [vmem:[%s6313_s6 + $0x28] sm:$0xf]  ;;  %v6801_v57 = vld [vmem:[%s6313_s6 + $0x70] sm:$0xf] }
  0x99   : > { %5500 = vmatprep.subr.bf16.mxu1 %v5839_v43  ;;  %v427_v34 = vsel %vm6353_vm2, %v422_v18, %v426_v9  ;;  %v6548_v43 = vld [vmem:[%s6313_s6 + $0x44] sm:$0x1]  ;;  %v4830_v10 = vcombine.low %v4623_v40, %v6561_v2  ;;  %v455_v15 = vor.u32 %v454_v4, %v450_v3  ;;  %v6572_v16 = vrot.slane %v958_v5, 4 }
  0x9a   : > { %v4801_v50 = vcombine.low %v427_v34, %v437_v41  ;;  %v458_v61 = vshll.u32 %v6548_v43, 16  ;;  %v6574_v17 = vrot.slane %v961_v6, 5  ;;  %v4786_v19 = vcombine.low %v6539_v38, %v6545_v42  ;;  %v704_v41 = vld [vmem:[%s6313_s6 + $0x18] sm:$0xe]  ;;  %v6610_v6 = vld [vmem:[%s6313_s6 + $0x54] sm:$0xf] }
  0x9b   : > { %3499 = vmatmul.mubr.bf16.vlgmr.msra.gmra.mrb[16].mxu1 %v4813_v37  ;;  %v446_v23 = vrot.slane %v445_v0, 4  ;;  %v4606_v24 = vrot.slane %v703_v8, 9  ;;  %v781_v25 = vrot.slane %v6378_v63, 5  ;;  %v463_v18 = vshrl.u32 %v6567_v11, 16 }
  0x9c   : > { %3369 = vmatprep.mubr.bf16.mxu0 %v4801_v50  ;;  %v460_v1 = vrot.slane %v458_v61, 5  ;;  %5501 = vmatpush3.bf16.msra.mxu1 %v5840_v30  ;;  %v456_v31 = vrot.slane %v455_v15, 4  ;;  %v466_v32 = vshll.u32 %v6567_v11, 16  ;;  %v472_v33 = vshll.u32 %v6570_v14, 16  ;;  %v6616_v15 = vld [vmem:[%s6313_s6 + $0x58] sm:$0xf] }
  0x9d   : > { %3370 = vmatmul.mubr.bf16.gmra.mrb[16].mxu0 %v4785_v36  ;;  %3506 = vmatprep.mubr.bf16.mxu1 %v4830_v10  ;;  %v476_v34 = vshrl.u32 %v6570_v14, 16  ;;  %v451_v36 = vsel %vm6353_vm2, %v446_v23, %v450_v3  ;;  %v779_v63 = vsel %vm6478_vm5, %v4606_v24, %v778_v55  ;;  %v782_v37 = vsel %vm6478_vm5, %v6527_v27, %v781_v25  ;;  %v5854_v55 = vld [vmem:[#allocation5 + $0x128] sm:$0xff]  }
  0x9e   : > { %5502 = vmatprep.subr.bf16.mxu1 %v5848_v47  ;;  %v465_v38 = vrot.slane %v463_v18, 4  ;;  %v461_v30 = vsel %vm6353_vm2, %v456_v31, %v460_v1  ;;  %v4814_v49 = vcombine.low %v779_v63, %v782_v37  ;;  %v468_v53 = vrot.slane %v466_v32, 5  ;;  %5399 = vmatpush3.bf16.msra.mxu0 %v5854_v55  ;;  %v6620_v23 = vld [vmem:[%s6313_s6 + $0x5c] sm:$0x1]  ;;  %v4627_v31 = vld [vmem:[%s6313_s6 + $0x30] sm:$0xf] }
  0x9f   : > { %v474_v50 = vrot.slane %v472_v33, 5  ;;  %v4802_v54 = vcombine.low %v451_v36, %v461_v30  ;;  %v478_v13 = vrot.slane %v476_v34, 4  ;;  %v982_v40 = vshrl.u32 %v4625_v22, 16  ;;  %v6631_v32 = vld [vmem:[%s6313_s6 + $0x34] sm:$0xf]  ;;  %v5857_v37 = vld [vmem:[#allocation5 + $0x1d0] sm:$0xff]  }
  0xa0   : > { %5503 = vmatpush3.bf16.msra.mxu1 %v5850_v21  ;;  %v469_v47 = vor.u32 %v468_v53, %v465_v38  ;;  %v985_v27 = vshll.u32 %v4625_v22, 16  ;;  %v4831_v60 = vcombine.low %v4625_v22, %v6588_v35  ;;  %v484_v3 = vrot.slane %v482_v62, 5  ;;  %v705_v63 = vld [vmem:[%s6313_s6 + $0x24] sm:$0xe] }
  0xa1   : > { %3377 = vmatprep.mubr.bf16.mxu0 %v4802_v54  ;;  %v479_v61 = vor.u32 %v478_v13, %v474_v50  ;;  %v6605_v4 = vrot.slane %v982_v40, 4  ;;  %v4787_v5 = vcombine.low %v6567_v11, %v6570_v14  ;;  %v4607_v1 = vrot.slane %v704_v41, 9  ;;  %5504 = vmatprep.subr.bf16.mxu1 %v5857_v37 }
  0xa2   : > { %v470_v8 = vrot.slane %v469_v47, 4  ;;  %v6612_v0 = vrot.slane %v985_v27, 5  ;;  %v785_v10 = vrot.slane %v6414_v58, 5  ;;  %v788_v11 = vrot.slane %v6417_v59, 5  ;;  %v6643_v47 = vld [vmem:[%s6313_s6 + $0x60] sm:$0xf] }
  0xa3   : > { %3507 = vmatmul.mubr.bf16.gmra.mrb[20].mxu1 %v4814_v49  ;;  %v480_v21 = vrot.slane %v479_v61, 4  ;;  %v490_v24 = vshll.u32 %v6610_v6, 16  ;;  %v496_v22 = vshll.u32 %v6616_v15, 16  ;;  %v500_v36 = vshrl.u32 %v6616_v15, 16  ;;  %v5858_v27 = vld [vmem:[#allocation5 + $0x190] sm:$0xff]  }
  0xa4   : > { %3514 = vmatprep.mubr.bf16.mxu1 %v4831_v60  ;;  %v475_v25 = vsel %vm6353_vm2, %v470_v8, %v474_v50  ;;  %v786_v18 = vsel %vm6478_vm5, %v4607_v1, %v785_v10  ;;  %v787_v58 = vrot.slane %v785_v10, 4  ;;  %v506_v30 = vshll.u32 %v6620_v23, 16  ;;  %v6650_v1 = vld [vmem:[%s6313_s6 + $0x64] sm:$0xf]  ;;  %5505 = vmatpush3.bf16.msra.mxu1 %v5858_v27 }
  0xa5   : > { %3378 = vmatmul.mubr.bf16.gmra.mrb[20].mxu0 %v4786_v19  ;;  %v487_v19 = vshrl.u32 %v6610_v6, 16  ;;  %v485_v59 = vsel %vm6353_vm2, %v480_v21, %v484_v3  ;;  %v492_v34 = vrot.slane %v490_v24, 5  ;;  %v498_v12 = vrot.slane %v496_v22, 5  ;;  %v6657_v24 = vld [vmem:[%s6313_s6 + $0x68] sm:$0x1] }
  0xa6   : > { %v4803_v38 = vcombine.low %v475_v25, %v485_v59  ;;  %v789_v41 = vsel %vm6478_vm5, %v787_v58, %v788_v11  ;;  %v502_v50 = vrot.slane %v500_v36, 4  ;;  %v1006_v54 = vshrl.u32 %v4627_v31, 16  ;;  %v4629_v58 = vld [vmem:[%s6313_s6 + $0x3c] sm:$0xf]  ;;  %v6665_v22 = vld [vmem:[%s6313_s6 + $0x40] sm:$0xf] }
  0xa7   : > { %v489_v33 = vrot.slane %v487_v19, 4  ;;  %v4815_v49 = vcombine.low %v786_v18, %v789_v41  ;;  %v508_v13 = vrot.slane %v506_v30, 5  ;;  %v1009_v62 = vshll.u32 %v4627_v31, 16  ;;  %v5862_v36 = vld [vmem:[#allocation5 + $0x130] sm:$0xff]  }
  0xa8   : > { %3385 = vmatprep.mubr.bf16.mxu0 %v4803_v38  ;;  %v4832_v55 = vcombine.low %v4627_v31, %v6631_v32  ;;  %v503_v61 = vor.u32 %v502_v50, %v498_v12  ;;  %v6645_v3 = vrot.slane %v1006_v54, 4  ;;  %v4788_v8 = vcombine.low %v6610_v6, %v6616_v15  ;;  %v5861_v31 = vld [vmem:[#allocation5 + $0x170] sm:$0xff]  }
  0xa9   : > { %v493_v53 = vor.u32 %v492_v34, %v489_v33  ;;  %v6652_v10 = vrot.slane %v1009_v62, 5  ;;  %v4608_v21 = vrot.slane %v705_v63, 9  ;;  %v792_v11 = vrot.slane %v6449_v46, 5  ;;  %v706_v34 = vld [vmem:[%s6313_s6 + $0x30] sm:$0xe]  ;;  %5400 = vmatprep.subr.bf16.mxu0 %v5861_v31 }
  0xaa   : > { %v795_v19 = vrot.slane %v6454_v51, 5  ;;  %v504_v18 = vrot.slane %v503_v61, 4  ;;  %v511_v6 = vshrl.u32 %v6643_v47, 16  ;;  %v520_v59 = vshll.u32 %v6650_v1, 16  ;;  %5401 = vmatpush3.bf16.msra.mxu0 %v5862_v36  ;;  %v5866_v31 = vld [vmem:[#allocation5 + $0x198] sm:$0xff]  }
  0xab   : > { %v494_v60 = vrot.slane %v493_v53, 4  ;;  %3515 = vmatmul.mubr.bf16.gmra.mrb[24].mxu1 %v4815_v49  ;;  %v793_v46 = vsel %vm6478_vm5, %v4608_v21, %v792_v11  ;;  %v794_v51 = vrot.slane %v792_v11, 4  ;;  %v524_v33 = vshrl.u32 %v6650_v1, 16  ;;  %v6680_v11 = vld [vmem:[%s6313_s6 + $0x6c] sm:$0xf] }
  0xac   : > { %3522 = vmatprep.mubr.bf16.mxu1 %v4832_v55  ;;  %v509_v63 = vsel %vm6353_vm2, %v504_v18, %v508_v13  ;;  %v513_v37 = vrot.slane %v511_v6, 4  ;;  %v530_v41 = vshll.u32 %v6657_v24, 16  ;;  %v522_v53 = vrot.slane %v520_v59, 5 }
  0xad   : > { %3386 = vmatmul.mubr.bf16.gmra.mrb[24].mxu0 %v4787_v5  ;;  %v499_v25 = vsel %vm6353_vm2, %v494_v60, %v498_v12  ;;  %v514_v5 = vshll.u32 %v6643_v47, 16  ;;  %v5865_v12 = vld [vmem:[#allocation5 + $0x1d8] sm:$0xff]   ;;  %v796_v49 = vsel %vm6478_vm5, %v794_v51, %v795_v19  ;;  %v526_v50 = vrot.slane %v524_v33, 4 }
  0xae   : > { %v4804_v30 = vcombine.low %v499_v25, %v509_v63  ;;  %v4816_v54 = vcombine.low %v793_v46, %v796_v49  ;;  %v532_v55 = vrot.slane %v530_v41, 5  ;;  %v1030_v27 = vshrl.u32 %v4629_v58, 16  ;;  %5506 = vmatprep.subr.bf16.mxu1 %v5865_v12  ;;  %v6683_v25 = vld [vmem:[%s6313_s6 + $0x70] sm:$0xf]  ;;  %v6694_v33 = vld [vmem:[%s6313_s6 + $0x74] sm:$0x1] }
  0xaf   : > { %v516_v38 = vrot.slane %v514_v5, 5  ;;  %v527_v13 = vor.u32 %v526_v50, %v522_v53  ;;  %v1033_v60 = vshll.u32 %v4629_v58, 16  ;;  %v4833_v21 = vcombine.low %v4629_v58, %v6665_v22  ;;  %v4631_v63 = vld [vmem:[%s6313_s6 + $0x48] sm:$0xf]  ;;  %5507 = vmatpush3.bf16.msra.mxu1 %v5866_v31 }
  0xb0   : > { %3393 = vmatprep.mubr.bf16.mxu0 %v4804_v30  ;;  %v6685_v18 = vrot.slane %v1030_v27, 4  ;;  %v4789_v6 = vcombine.low %v6643_v47, %v6650_v1  ;;  %v4609_v5 = vrot.slane %v706_v34, 9  ;;  %v799_v58 = vrot.slane %v6499_v52, 5  ;;  %v5867_v52 = vld [vmem:[#allocation5 + $0x178] sm:$0xff]   ;;  %v707_v30 = vld [vmem:[%s6313_s6 + $0x3c] sm:$0xe] }
  0xb1   : > { %v517_v62 = vor.u32 %v516_v38, %v513_v37  ;;  %v528_v46 = vrot.slane %v527_v13, 4  ;;  %v6689_v51 = vrot.slane %v1033_v60, 5  ;;  %v802_v59 = vrot.slane %v6504_v44, 5  ;;  %v6703_v37 = vld [vmem:[%s6313_s6 + $0x4c] sm:$0xf]  ;;  %5402 = vmatprep.subr.bf16.mxu0 %v5867_v52 }
  0xb2   : > { %v535_v47 = vshrl.u32 %v6680_v11, 16  ;;  %v538_v34 = vshll.u32 %v6680_v11, 16  ;;  %v800_v38 = vsel %vm6478_vm5, %v4609_v5, %v799_v58  ;;  %v801_v41 = vrot.slane %v799_v58, 4  ;;  %v6716_v58 = vld [vmem:[%s6313_s6 + $0x78] sm:$0xf] }
  0xb3   : > { %v518_v19 = vrot.slane %v517_v62, 4  ;;  %3523 = vmatmul.mubr.bf16.gmra.mrb[28].mxu1 %v4816_v54  ;;  %v533_v44 = vsel %vm6353_vm2, %v528_v46, %v532_v55  ;;  %v548_v12 = vshrl.u32 %v6683_v25, 16  ;;  %v5868_v62 = vld [vmem:[#allocation5 + $0x138] sm:$0xff]   ;;  %v554_v55 = vshll.u32 %v6694_v33, 16 }
  0xb4   : > { %3530 = vmatprep.mubr.bf16.mxu1 %v4833_v21  ;;  %v540_v50 = vrot.slane %v538_v34, 5  ;;  %v803_v27 = vsel %vm6478_vm5, %v801_v41, %v802_v59  ;;  %v1054_v60 = vshrl.u32 %v4631_v63, 16  ;;  %v5872_v21 = vld [vmem:[#allocation5 + $0x1e0] sm:$0xff]   ;;  %v1057_v31 = vshll.u32 %v4631_v63, 16  ;;  %5403 = vmatpush3.bf16.msra.mxu0 %v5868_v62 }
  0xb5   : > { %3394 = vmatmul.mubr.bf16.gmra.mrb[28].mxu0 %v4788_v8  ;;  %v523_v36 = vsel %vm6353_vm2, %v518_v19, %v522_v53  ;;  %v544_v8 = vshll.u32 %v6683_v25, 16  ;;  %v537_v53 = vrot.slane %v535_v47, 4  ;;  %v550_v13 = vrot.slane %v548_v12, 4  ;;  %5508 = vmatprep.subr.bf16.mxu1 %v5872_v21  ;;  %v6728_v12 = vld [vmem:[#allocation5 + $0x200] sm:$0xff]  }
  0xb6   : > { %v4805_v49 = vcombine.low %v523_v36, %v533_v44  ;;  %v4817_v19 = vcombine.low %v800_v38, %v803_v27  ;;  %v556_v47 = vrot.slane %v554_v55, 5  ;;  %v6718_v34 = vrot.slane %v1054_v60, 4  ;;  %v6743_v55 = vld [vmem:[%s6313_s6 + $0x58] sm:$0xf]  ;;  %5636 = vmatprep.subr.bf16.mxu0 %v6728_v12 }
  0xb7   : > { %v546_v54 = vrot.slane %v544_v8, 5  ;;  %v541_v5 = vor.u32 %v540_v50, %v537_v53  ;;  %v4834_v59 = vcombine.low %v4631_v63, %v6703_v37  ;;  %v6722_v8 = vld [vmem:[%s6313_s6 + $0x7c] sm:$0xf]  ;;  %v6724_v44 = vrot.slane %v1057_v31, 5  ;;  %v6733_v50 = vld [vmem:[%s6313_s6 + $0x80] sm:$0x1] }
  0xb8   : > { %3401 = vmatprep.mubr.bf16.mxu0 %v4805_v49  ;;  %v4790_v38 = vcombine.low %v6680_v11, %v6683_v25  ;;  %v4610_v41 = vrot.slane %v707_v30, 9  ;;  %v806_v53 = vrot.slane %v6545_v42, 5  ;;  %v809_v63 = vrot.slane %v6548_v43, 5  ;;  %v5874_v42 = vld [vmem:[#allocation5 + $0x1a0] sm:$0xff]  }
  0xb9   : > { %v551_v36 = vor.u32 %v550_v13, %v546_v54  ;;  %v542_v52 = vrot.slane %v541_v5, 4  ;;  %v559_v62 = vshrl.u32 %v6716_v58, 16  ;;  %v562_v11 = vshll.u32 %v6716_v58, 16  ;;  %v4633_v13 = vld [vmem:[%s6313_s6 + $0x54] sm:$0xf]  ;;  %5509 = vmatpush3.bf16.msra.mxu1 %v5874_v42 }
  0xba   : > { %v568_v30 = vshll.u32 %v6722_v8, 16  ;;  %v807_v60 = vsel %vm6478_vm5, %v4610_v41, %v806_v53  ;;  %v578_v45 = vshll.u32 %v6733_v50, 16  ;;  %v1078_v61 = vshrl.u32 %v4633_v13, 16 }
  0xbb   : > { %3531 = vmatmul.mubr.bf16.gmra.mrb[32].mxu1 %v4817_v19  ;;  %v552_v49 = vrot.slane %v551_v36, 4  ;;  %v547_v27 = vsel %vm6353_vm2, %v542_v52, %v546_v54  ;;  %v808_v54 = vrot.slane %v806_v53, 4  ;;  %v561_v21 = vrot.slane %v559_v62, 4  ;;  %v708_v19 = vld [vmem:[%s6313_s6 + $0x48] sm:$0xe]  ;;  %v5877_v52 = vld [vmem:[#allocation5 + $0x1e8] sm:$0xff]  }
  0xbc   : > { %3538 = vmatprep.mubr.bf16.mxu1 %v4834_v59  ;;  %v564_v31 = vrot.slane %v562_v11, 5  ;;  %v570_v36 = vrot.slane %v568_v30, 5  ;;  %v1081_v40 = vshll.u32 %v4633_v13, 16  ;;  %5510 = vmatprep.subr.bf16.mxu1 %v5877_v52  ;;  %v5879_v62 = vld [vmem:[#allocation5 + $0x1a8] sm:$0xff]   ;;  %v6755_v11 = vrot.slane %v1078_v61, 4 }
  0xbd   : > { %3402 = vmatmul.mubr.bf16.gmra.mrb[32].mxu0 %v4789_v6  ;;  %v572_v6 = vshrl.u32 %v6722_v8, 16  ;;  %v557_v43 = vsel %vm6353_vm2, %v552_v49, %v556_v47  ;;  %v810_v46 = vsel %vm6478_vm5, %v808_v54, %v809_v63  ;;  %v4835_v63 = vcombine.low %v4633_v13, %v6743_v55  ;;  %v6763_v54 = vld [vmem:[%s6313_s6 + $0x84] sm:$0xf]  ;;  %5511 = vmatpush3.bf16.msra.mxu1 %v5879_v62  ;;  %v6768_v61 = vld [vmem:[%s6313_s6 + $0x88] sm:$0xf] }
  0xbe   : > { %v4806_v5 = vcombine.low %v547_v27, %v557_v43  ;;  %v4818_v47 = vcombine.low %v807_v60, %v810_v46  ;;  %v565_v41 = vor.u32 %v564_v31, %v561_v21  ;;  %v580_v27 = vrot.slane %v578_v45, 5  ;;  %v6771_v13 = vld [vmem:[%s6313_s6 + $0x8c] sm:$0x1]  ;;  %v4669_v21 = vld [vmem:[%s6313_s6 + $0xc] sm:$0xe] }
  0xbf   : > { %v574_v59 = vrot.slane %v572_v6, 4  ;;  %v6757_v30 = vrot.slane %v1081_v40, 5  ;;  %v5882_v6 = vld [vmem:[#allocation5 + $0x1f0] sm:$0xff]   ;;  %v4791_v46 = vcombine.low %v6716_v58, %v6722_v8  ;;  %v4611_v60 = vrot.slane %v708_v19, 9 }
  0xc0   : > { %3409 = vmatprep.mubr.bf16.mxu0 %v4806_v5  ;;  %v566_v42 = vrot.slane %v565_v41, 4  ;;  %v813_v45 = vrot.slane %v6570_v14, 5  ;;  %v816_v40 = vrot.slane %v6579_v20, 5  ;;  %v946_v58 = vsel %vm6353_vm2, %v6552_v48, %v6523_v26  ;;  %5512 = vmatprep.subr.bf16.mxu1 %v5882_v6  ;;  %v6798_v53 = vld [vmem:[%s6313_s6 + $0x6c] sm:$0xf] }
  0xc1   : > { %v575_v49 = vor.u32 %v574_v59, %v570_v36  ;;  %v583_v20 = vshrl.u32 %v6763_v54, 16  ;;  %v586_v19 = vshll.u32 %v6763_v54, 16  ;;  %v592_v52 = vshll.u32 %v6768_v61, 16  ;;  %v6873_v26 = vld [vmem:[%s6313_s6 + $0x84] sm:$0xf] }
  0xc2   : > { %v814_v31 = vsel %vm6478_vm5, %v4611_v60, %v813_v45  ;;  %v815_v59 = vrot.slane %v813_v45, 4  ;;  %v602_v62 = vshll.u32 %v6771_v13, 16  ;;  %v709_v60 = vld [vmem:[%s6313_s6 + $0x54] sm:$0xe]  ;;  %v5884_v45 = vld [vmem:[#allocation5 + $0x1b0] sm:$0xff]  }
  0xc3   : > { %v576_v43 = vrot.slane %v575_v49, 4  ;;  %3539 = vmatmul.mubr.bf16.gmra.mrb[36].mxu1 %v4818_v47  ;;  %v4635_v47 = vld [vmem:[%s6313_s6 + $0x60] sm:$0xf]  ;;  %v585_v41 = vrot.slane %v583_v20, 4  ;;  %v596_v49 = vshrl.u32 %v6768_v61, 16  ;;  %v594_v6 = vrot.slane %v592_v52, 5 }
  0xc4   : > { %3546 = vmatprep.mubr.bf16.mxu1 %v4835_v63  ;;  %v817_v63 = vsel %vm6478_vm5, %v815_v59, %v816_v40  ;;  %v4653_v52 = vld [vmem:[%s6313_s6 + $0x14] sm:$0x1]  ;;  %5513 = vmatpush3.bf16.msra.mxu1 %v5884_v45  ;;  %v1126_v40 = vshrl.u32 %v6798_v53, 16 }
  0xc5   : > { %3410 = vmatmul.mubr.bf16.gmra.mrb[36].mxu0 %v4790_v38  ;;  %v571_v38 = vsel %vm6353_vm2, %v566_v42, %v570_v36  ;;  %v581_v14 = vsel %vm6353_vm2, %v576_v43, %v580_v27  ;;  %v588_v36 = vrot.slane %v586_v19, 5  ;;  %v6792_v27 = vld [vmem:[%s6313_s6 + $0x64] sm:$0xf]  ;;  %v1102_v42 = vshrl.u32 %v4635_v47, 16 }
  0xc6   : > { %v4807_v5 = vcombine.low %v571_v38, %v581_v14  ;;  %v1105_v43 = vshll.u32 %v4635_v47, 16  ;;  %v4819_v38 = vcombine.low %v814_v31, %v817_v63  ;;  %v598_v20 = vrot.slane %v596_v49, 4  ;;  %v5887_v31 = vld [vmem:[#allocation5 + $0x1f8] sm:$0xff]   ;;  %v710_v63 = vld [vmem:[%s6313_s6 + $0x60] sm:$0xe] }
  0xc7   : > { %v589_v14 = vor.u32 %v588_v36, %v585_v41  ;;  %v604_v19 = vrot.slane %v602_v62, 5  ;;  %v4836_v59 = vcombine.low %v4635_v47, %v6792_v27  ;;  %v4792_v49 = vcombine.low %v6763_v54, %v6768_v61  ;;  %5514 = vmatprep.subr.bf16.mxu1 %v5887_v31 }
  0xc8   : > { %3417 = vmatprep.mubr.bf16.mxu0 %v4807_v5  ;;  %v6803_v5 = vrot.slane %v1102_v42, 4  ;;  %v6805_v9 = vrot.slane %v1105_v43, 5  ;;  %v599_v36 = vor.u32 %v598_v20, %v594_v6  ;;  %v4612_v62 = vrot.slane %v709_v60, 9 }
  0xc9   : > { %v590_v41 = vrot.slane %v589_v14, 4  ;;  %v820_v42 = vrot.slane %v6616_v15, 5  ;;  %v823_v43 = vrot.slane %v6620_v23, 5  ;;  %v1129_v47 = vshll.u32 %v6798_v53, 16 }
  0xca   : > { %v600_v14 = vrot.slane %v599_v36, 4  ;;  %v6825_v54 = vrot.slane %v1126_v40, 4  ;;  %v5889_v36 = vld [vmem:[#allocation5 + $0x1b8] sm:$0xff]   ;;  %v1386_v31 = vrot.slane %v4653_v52, 5  ;;  %v6838_v40 = vld [vmem:[%s6313_s6 + $0x7c] sm:$0xf] }
  0xcb   : > { %3547 = vmatmul.mubr.bf16.gmra.mrb[40].mxu1 %v4819_v38  ;;  %v595_v45 = vsel %vm6353_vm2, %v590_v41, %v594_v6  ;;  %v821_v15 = vsel %vm6478_vm5, %v4612_v62, %v820_v42  ;;  %v822_v23 = vrot.slane %v820_v42, 4  ;;  %v6827_v60 = vrot.slane %v1129_v47, 5  ;;  %v6835_v42 = vld [vmem:[%s6313_s6 + $0x78] sm:$0xf] }
  0xcc   : > { %3554 = vmatprep.mubr.bf16.mxu1 %v4836_v59  ;;  %v605_v6 = vsel %vm6353_vm2, %v600_v14, %v604_v19  ;;  %v953_v38 = vshll.u32 %v4653_v52, 16  ;;  %v4685_v59 = vrot.slane %v4669_v21, 9  ;;  %v1383_v41 = vrot.slane %v6517_v7, 5  ;;  %5515 = vmatpush3.bf16.msra.mxu1 %v5889_v36  ;;  %v4670_v14 = vld [vmem:[%s6313_s6 + $0x18] sm:$0xe] }
  0xcd   : > { %3418 = vmatmul.mubr.bf16.gmra.mrb[40].mxu0 %v4791_v46  ;;  %v4837_v46 = vcombine.low %v6798_v53, %v6801_v57  ;;  %v4808_v20 = vcombine.low %v595_v45, %v605_v6  ;;  %v824_v53 = vsel %vm6478_vm5, %v822_v23, %v823_v43  ;;  %v4613_v62 = vrot.slane %v710_v63, 9 }
  0xce   : > { %v4820_v47 = vcombine.low %v821_v15, %v824_v53  ;;  %v955_v19 = vrot.slane %v953_v38, 5  ;;  %v1384_v21 = vsel %vm6478_vm5, %v4685_v59, %v1383_v41  ;;  %v1385_v7 = vrot.slane %v1383_v41, 4  ;;  %v711_v38 = vld [vmem:[%s6313_s6 + $0x6c] sm:$0xe] }
  0xcf   : > { %3425 = vmatprep.mubr.bf16.mxu0 %v4808_v20  ;;  %v827_v45 = vrot.slane %v6650_v1, 5  ;;  %v830_v43 = vrot.slane %v6657_v24, 5  ;;  %v1150_v52 = vshrl.u32 %v6835_v42, 16  ;;  %v1153_v63 = vshll.u32 %v6835_v42, 16  ;;  %v4654_v1 = vld [vmem:[%s6313_s6 + $0x20] sm:$0x1] }
  0xd0   : > { %v1387_v15 = vsel %vm6478_vm5, %v1385_v7, %v1386_v31  ;;  %v956_v23 = vsel %vm6353_vm2, %v6557_v56, %v955_v19  ;;  %v1163_v6 = vshrl.u32 %v6838_v40, 16  ;;  %v4838_v20 = vcombine.low %v6835_v42, %v6838_v40  ;;  %v6879_v7 = vld [vmem:[%s6313_s6 + $0x88] sm:$0xf] }
  0xd1   : > { %v4861_v24 = vcombine.low %v1384_v21, %v1387_v15  ;;  %v828_v59 = vsel %vm6478_vm5, %v4613_v62, %v827_v45  ;;  %v829_v41 = vrot.slane %v827_v45, 4  ;;  %v4845_v56 = vcombine.low %v946_v58, %v956_v23 }
  0xd2   : > { %v6864_v36 = vrot.slane %v1150_v52, 4  ;;  %v6866_v53 = vrot.slane %v1153_v63, 5  ;;  %v1390_v31 = vrot.slane %v6561_v2, 5  ;;  %v1393_v42 = vrot.slane %v4654_v1, 5 }
  0xd3   : > { %3555 = vmatmul.mubr.bf16.gmra.mrb[44].mxu1 %v4820_v47  ;;  %v831_v62 = vsel %vm6478_vm5, %v829_v41, %v830_v43  ;;  %v4614_v47 = vrot.slane %v711_v38, 9  ;;  %v834_v19 = vrot.slane %v6683_v25, 5  ;;  %v837_v21 = vrot.slane %v6694_v33, 5 }
  0xd4   : > { %3562 = vmatprep.mubr.bf16.mxu1 %v4837_v46  ;;  %v4821_v48 = vcombine.low %v828_v59, %v831_v62  ;;  %v1392_v46 = vrot.slane %v1390_v31, 4  ;;  %v8259_v25 = vor.u32 %v6574_v17, %v6572_v16  ;;  %v967_v63 = vshll.u32 %v6561_v2, 16  ;;  %v5878_v59 = vld [vmem:[#allocation5 + $0x208] sm:$0xff]  }
  0xd5   : > { %3426 = vmatmul.mubr.bf16.gmra.mrb[44].mxu0 %v4792_v49  ;;  %v4686_v49 = vrot.slane %v4670_v14, 9  ;;  %v6883_v45 = vsel %vm6478_vm5, %v4614_v47, %v834_v19  ;;  %v836_v43 = vrot.slane %v834_v19, 4  ;;  %v8260_v33 = vshrl.u32 %v6561_v2, 16  ;;  %v4671_v17 = vld [vmem:[%s6313_s6 + $0x24] sm:$0xe] }
  0xd6   : > { %3659 = vmatprep.mubr.bf16.mxu0 %v4861_v24  ;;  %v965_v52 = vrot.slane %v8259_v25, 4  ;;  %v1394_v14 = vsel %vm6478_vm5, %v1392_v46, %v1393_v42  ;;  %v977_v23 = vshll.u32 %v4654_v1, 16  ;;  %v1174_v38 = vshrl.u32 %v6873_v26, 16  ;;  %v4655_v24 = vld [vmem:[%s6313_s6 + $0x2c] sm:$0x1] }
  0xd7   : > { %v1391_v58 = vsel %vm6478_vm5, %v4686_v49, %v1390_v31  ;;  %v973_v15 = vrot.slane %v8260_v33, 4  ;;  %v838_v49 = vsel %vm6478_vm5, %v836_v43, %v837_v21  ;;  %v969_v31 = vrot.slane %v967_v63, 5  ;;  %v712_v62 = vld [vmem:[%s6313_s6 + $0x78] sm:$0xe] }
  0xd8   : > { %v4862_v41 = vcombine.low %v1391_v58, %v1394_v14  ;;  %v1177_v16 = vshll.u32 %v6873_v26, 16  ;;  %v4822_v47 = vcombine.low %v6883_v45, %v838_v49  ;;  %v979_v42 = vrot.slane %v977_v23, 5  ;;  %v4656_v49 = vld [vmem:[%s6313_s6 + $0x38] sm:$0x1] }
  0xd9   : > { %v6901_v19 = vrot.slane %v1174_v38, 4  ;;  %v1187_v2 = vshrl.u32 %v6879_v7, 16  ;;  %v970_v1 = vsel %vm6353_vm2, %v965_v52, %v969_v31  ;;  %v974_v58 = vor.u32 %v973_v15, %v969_v31  ;;  %v6922_v38 = vld [vmem:[%s6313_s6 + $0x90] sm:$0xf] }
  0xda   : > { %v6906_v46 = vrot.slane %v1177_v16, 5  ;;  %v4839_v21 = vcombine.low %v6873_v26, %v6879_v7  ;;  %v4687_v45 = vrot.slane %v4671_v17, 9  ;;  %v1397_v43 = vrot.slane %v6588_v35, 5  ;;  %v4672_v31 = vld [vmem:[%s6313_s6 + $0x30] sm:$0xe] }
  0xdb   : > { %3563 = vmatmul.mubr.bf16.gmra.mrb[48].mxu1 %v4821_v48  ;;  %v1400_v25 = vrot.slane %v4655_v24, 5  ;;  %v4615_v48 = vrot.slane %v712_v62, 9  ;;  %v841_v52 = vrot.slane %v6722_v8, 5  ;;  %v844_v63 = vrot.slane %v6733_v50, 5  ;;  %v6925_v8 = vld [vmem:[%s6313_s6 + $0x94] sm:$0xf] }
  0xdc   : > { %3570 = vmatprep.mubr.bf16.mxu1 %v4838_v20  ;;  %v988_v26 = vor.u32 %v6612_v0, %v6605_v4  ;;  %v1398_v20 = vsel %vm6478_vm5, %v4687_v45, %v1397_v43  ;;  %v1399_v14 = vrot.slane %v1397_v43, 4  ;;  %v991_v33 = vshll.u32 %v6588_v35, 16 }
  0xdd   : > { %3660 = vmatmul.mubr.bf16.vlgmr.msra.gmra.mrb[48].mxu0 %v4845_v56  ;;  %v975_v56 = vrot.slane %v974_v58, 4  ;;  %v8261_v15 = vshrl.u32 %v6588_v35, 16  ;;  %v6931_v4 = vsel %vm6478_vm5, %v4615_v48, %v841_v52  ;;  %v843_v0 = vrot.slane %v841_v52, 4 }
  0xde   : > { %5637 = vmatpush3.bf16.msra.mxu0 %v6728_v12  ;;  %3667 = vmatprep.mubr.bf16.mxu0 %v4862_v41  ;;  %v5883_v12 = vld [vmem:[#allocation5 + $0x210] sm:$0xff]   ;;  %v989_v41 = vrot.slane %v988_v26, 4  ;;  %v1401_v35 = vsel %vm6478_vm5, %v1399_v14, %v1400_v25  ;;  %v993_v17 = vrot.slane %v991_v33, 5  ;;  %v1001_v62 = vshll.u32 %v4655_v24, 16  ;;  %v5888_v26 = vld [vmem:[#allocation5 + $0x218] sm:$0xff]  }
  0xdf   : > { %5638 = vmatprep.subr.bf16.mxu0 %v5878_v59  ;;  %v997_v23 = vrot.slane %v8261_v15, 4  ;;  %v980_v50 = vsel %vm6353_vm2, %v975_v56, %v979_v42  ;;  %v4863_v58 = vcombine.low %v1398_v20, %v1401_v35  ;;  %v845_v42 = vsel %vm6478_vm5, %v843_v0, %v844_v63  ;;  %v713_v25 = vld [vmem:[%s6313_s6 + $0x84] sm:$0xe]  ;;  %v6970_v35 = vld [vmem:[%s6313_s6 + $0xa0] sm:$0xf] }
  0xe0   : > { %v4846_v16 = vcombine.low %v970_v1, %v980_v50  ;;  %v1198_v45 = vshrl.u32 %v6922_v38, 16  ;;  %v1201_v43 = vshll.u32 %v6922_v38, 16  ;;  %v4823_v48 = vcombine.low %v6931_v4, %v845_v42 }
  0xe1   : > { %v994_v1 = vsel %vm6353_vm2, %v989_v41, %v993_v17  ;;  %v998_v56 = vor.u32 %v997_v23, %v993_v17  ;;  %v1003_v52 = vrot.slane %v1001_v62, 5  ;;  %v1211_v63 = vshrl.u32 %v6925_v8, 16  ;;  %v6973_v17 = vld [vmem:[%s6313_s6 + $0x44] sm:$0x1] }
  0xe2   : > { %5639 = vmatpush3.bf16.msra.mxu0 %v5878_v59  ;;  %v6945_v24 = vrot.slane %v1198_v45, 4  ;;  %v6947_v59 = vrot.slane %v1201_v43, 5  ;;  %v4840_v20 = vcombine.low %v6922_v38, %v6925_v8  ;;  %v4688_v33 = vrot.slane %v4672_v31, 9 }
  0xe3   : > { %5640 = vmatprep.subr.bf16.mxu0 %v5883_v12  ;;  %3571 = vmatmul.mubr.bf16.gmra.mrb[52].mxu1 %v4822_v47  ;;  %v999_v14 = vrot.slane %v998_v56, 4  ;;  %v1404_v15 = vrot.slane %v6631_v32, 5  ;;  %v1407_v23 = vrot.slane %v4656_v49, 5  ;;  %v4616_v50 = vrot.slane %v713_v25, 9  ;;  %v4673_v56 = vld [vmem:[%s6313_s6 + $0x3c] sm:$0xe] }
  0xe4   : > { %3578 = vmatprep.mubr.bf16.mxu1 %v4839_v21  ;;  %v848_v47 = vrot.slane %v6768_v61, 5  ;;  %v851_v4 = vrot.slane %v6771_v13, 5  ;;  %v1012_v0 = vor.u32 %v6652_v10, %v6645_v3  ;;  %v1015_v31 = vshll.u32 %v6631_v32, 16  ;;  %v5892_v61 = vld [vmem:[#allocation5 + $0x220] sm:$0xff]  }
  0xe5   : > { %3668 = vmatmul.mubr.bf16.gmra.mrb[52].mxu0 %v4846_v16  ;;  %v1004_v21 = vsel %vm6353_vm2, %v999_v14, %v1003_v52  ;;  %v1405_v38 = vsel %vm6478_vm5, %v4688_v33, %v1404_v15  ;;  %v1406_v41 = vrot.slane %v1404_v15, 4  ;;  %v6963_v16 = vld [vmem:[%s6313_s6 + $0x9c] sm:$0xf]  ;;  %v8262_v42 = vshrl.u32 %v6631_v32, 16  ;;  %v714_v33 = vld [vmem:[%s6313_s6 + $0x90] sm:$0xe] }
  0xe6   : > { %3675 = vmatprep.mubr.bf16.mxu0 %v4863_v58  ;;  %5641 = vmatpush3.bf16.msra.mxu0 %v5883_v12  ;;  %v4847_v13 = vcombine.low %v994_v1, %v1004_v21  ;;  %v6967_v3 = vsel %vm6478_vm5, %v4616_v50, %v848_v47  ;;  %v850_v10 = vrot.slane %v848_v47, 4  ;;  %v1013_v12 = vrot.slane %v1012_v0, 4 }
  0xe7   : > { %5642 = vmatprep.subr.bf16.mxu0 %v5888_v26  ;;  %v1408_v62 = vsel %vm6478_vm5, %v1406_v41, %v1407_v23  ;;  %v1017_v58 = vrot.slane %v1015_v31, 5  ;;  %v1021_v45 = vrot.slane %v8262_v42, 4  ;;  %v1025_v43 = vshll.u32 %v4656_v49, 16  ;;  %v5895_v49 = vld [vmem:[#allocation5 + $0x228] sm:$0xff]  }
  0xe8   : > { %v4864_v1 = vcombine.low %v1405_v38, %v1408_v62  ;;  %v852_v52 = vsel %vm6478_vm5, %v850_v10, %v851_v4  ;;  %v1222_v25 = vshrl.u32 %v6963_v16, 16  ;;  %v1225_v14 = vshll.u32 %v6963_v16, 16 }
  0xe9   : > { %v4824_v15 = vcombine.low %v6967_v3, %v852_v52  ;;  %v1018_v23 = vsel %vm6353_vm2, %v1013_v12, %v1017_v58  ;;  %v1022_v50 = vor.u32 %v1021_v45, %v1017_v58  ;;  %v1027_v32 = vrot.slane %v1025_v43, 5  ;;  %v5898_v45 = vld [vmem:[#allocation5 + $0x230] sm:$0xff]  }
  0xea   : > { %5643 = vmatpush3.bf16.msra.mxu0 %v5888_v26  ;;  %v6988_v47 = vrot.slane %v1222_v25, 4  ;;  %v6990_v4 = vrot.slane %v1225_v14, 5  ;;  %v1235_v0 = vshrl.u32 %v6970_v35, 16  ;;  %v4841_v26 = vcombine.low %v6963_v16, %v6970_v35 }
  0xeb   : > { %5644 = vmatprep.subr.bf16.mxu0 %v5892_v61  ;;  %3579 = vmatmul.mubr.bf16.gmra.mrb[56].mxu1 %v4823_v48  ;;  %v1023_v21 = vrot.slane %v1022_v50, 4  ;;  %v4689_v38 = vrot.slane %v4673_v56, 9  ;;  %v1411_v41 = vrot.slane %v6665_v22, 5  ;;  %v1414_v31 = vrot.slane %v6973_v17, 5  ;;  %v5911_v48 = vld [vmem:[%s6313_s6 + $0x94] sm:$0xf] }
  0xec   : > { %3586 = vmatprep.mubr.bf16.mxu1 %v4840_v20  ;;  %v4617_v3 = vrot.slane %v714_v33, 9  ;;  %v1036_v10 = vor.u32 %v6689_v51, %v6685_v18  ;;  %v1039_v12 = vshll.u32 %v6665_v22, 16  ;;  %v8263_v58 = vshrl.u32 %v6665_v22, 16  ;;  %v7012_v56 = vld [vmem:[%s6313_s6 + $0xa8] sm:$0xf] }
  0xed   : > { %3676 = vmatmul.mubr.bf16.gmra.mrb[56].mxu0 %v4847_v13  ;;  %v855_v13 = vrot.slane %v5911_v48, 5  ;;  %v1028_v20 = vsel %vm6353_vm2, %v1023_v21, %v1027_v32  ;;  %v1412_v16 = vsel %vm6478_vm5, %v4689_v38, %v1411_v41  ;;  %v1413_v62 = vrot.slane %v1411_v41, 4  ;;  %v4674_v33 = vld [vmem:[%s6313_s6 + $0x48] sm:$0xe]  ;;  %v4658_v41 = vld [vmem:[%s6313_s6 + $0x50] sm:$0x1] }
  0xee   : > { %3683 = vmatprep.mubr.bf16.mxu0 %v4864_v1  ;;  %5645 = vmatpush3.bf16.msra.mxu0 %v5892_v61  ;;  %v1045_v42 = vrot.slane %v8263_v58, 4  ;;  %v4848_v43 = vcombine.low %v1018_v23, %v1028_v20  ;;  %v1037_v61 = vrot.slane %v1036_v10, 4  ;;  %v7015_v1 = vld [vmem:[%s6313_s6 + $0xac] sm:$0xf]  ;;  %v1041_v22 = vrot.slane %v1039_v12, 5 }
  0xef   : > { %5646 = vmatprep.subr.bf16.mxu0 %v5895_v49  ;;  %v7009_v18 = vsel %vm6478_vm5, %v4617_v3, %v855_v13  ;;  %v857_v51 = vrot.slane %v855_v13, 4  ;;  %v1415_v52 = vsel %vm6478_vm5, %v1413_v62, %v1414_v31  ;;  %v1049_v25 = vshll.u32 %v6973_v17, 16  ;;  %v715_v3 = vld [vmem:[%s6313_s6 + $0x9c] sm:$0xe] }
  0xf0   : > { %v1246_v14 = vshrl.u32 %v7012_v56, 16  ;;  %v4865_v23 = vcombine.low %v1412_v16, %v1415_v52  ;;  %v8264_v50 = vrot.slane %v6345_v28, 5  ;;  %v1249_v21 = vshll.u32 %v7012_v56, 16  ;;  %v5901_v28 = vld [vmem:[#allocation5 + $0x238] sm:$0xff]  }
  0xf1   : > { %v1259_v38 = vshrl.u32 %v7015_v1, 16  ;;  %v1042_v17 = vsel %vm6353_vm2, %v1037_v61, %v1041_v22  ;;  %v1046_v48 = vor.u32 %v1045_v42, %v1041_v22  ;;  %v1051_v13 = vrot.slane %v1049_v25, 5 }
  0xf2   : > { %v859_v32 = vsel %vm6478_vm5, %v857_v51, %v8264_v50  ;;  %5647 = vmatpush3.bf16.msra.mxu0 %v5895_v49  ;;  %v7033_v10 = vrot.slane %v1246_v14, 4  ;;  %v7035_v12 = vrot.slane %v1249_v21, 5  ;;  %v4842_v49 = vcombine.low %v7012_v56, %v7015_v1  ;;  %v7059_v50 = vld [vmem:[%s6313_s6 + $0xb8] sm:$0xf] }
  0xf3   : > { %v4825_v31 = vcombine.low %v7009_v18, %v859_v32  ;;  %5648 = vmatprep.subr.bf16.mxu0 %v5898_v45  ;;  %3587 = vmatmul.mubr.bf16.gmra.mrb[60].mxu1 %v4824_v15  ;;  %v4690_v20 = vrot.slane %v4674_v33, 9  ;;  %v1047_v16 = vrot.slane %v1046_v48, 4  ;;  %v1418_v62 = vrot.slane %v6703_v37, 5  ;;  %v5912_v18 = vld [vmem:[%s6313_s6 + $0xa0] sm:$0xf] }
  0xf4   : > { %3594 = vmatprep.mubr.bf16.mxu1 %v4841_v26  ;;  %v1421_v58 = vrot.slane %v4658_v41, 5  ;;  %v4618_v42 = vrot.slane %v715_v3, 9  ;;  %v862_v51 = vrot.slane %v5912_v18, 5  ;;  %v5913_v15 = vld [vmem:[%s6313_s6 + $0xa4] sm:$0x1]  ;;  %v1060_v61 = vor.u32 %v6724_v44, %v6718_v34 }
  0xf5   : > { %3684 = vmatmul.mubr.bf16.gmra.mrb[60].mxu0 %v4848_v43  ;;  %v865_v43 = vrot.slane %v5913_v15, 5  ;;  %v1063_v52 = vshll.u32 %v6703_v37, 16  ;;  %v1052_v26 = vsel %vm6353_vm2, %v1047_v16, %v1051_v13  ;;  %v1419_v56 = vsel %vm6478_vm5, %v4690_v20, %v1418_v62  ;;  %v4675_v48 = vld [vmem:[%s6313_s6 + $0x54] sm:$0xe] }
  0xf6   : > { %3691 = vmatprep.mubr.bf16.mxu0 %v4865_v23  ;;  %5649 = vmatpush3.bf16.msra.mxu0 %v5898_v45  ;;  %v1420_v22 = vrot.slane %v1418_v62, 4  ;;  %v8265_v25 = vshrl.u32 %v6703_v37, 16  ;;  %v4849_v33 = vcombine.low %v1042_v17, %v1052_v26  ;;  %v7053_v34 = vsel %vm6478_vm5, %v4618_v42, %v862_v51  ;;  %v7056_v23 = vld [vmem:[%s6313_s6 + $0xb4] sm:$0xf]  ;;  %v4659_v62 = vld [vmem:[%s6313_s6 + $0x5c] sm:$0x1] }
  0xf7   : > { %5650 = vmatprep.subr.bf16.mxu0 %v5901_v28  ;;  %v864_v44 = vrot.slane %v862_v51, 4  ;;  %v1061_v45 = vrot.slane %v1060_v61, 4  ;;  %v1065_v21 = vrot.slane %v1063_v52, 5  ;;  %v1073_v37 = vshll.u32 %v4658_v41, 16  ;;  %v716_v42 = vld [vmem:[%s6313_s6 + $0xa8] sm:$0xe] }
  0xf8   : > { %v1069_v14 = vrot.slane %v8265_v25, 4  ;;  %v1422_v32 = vsel %vm6478_vm5, %v1420_v22, %v1421_v58  ;;  %v1270_v3 = vshrl.u32 %v7056_v23, 16  ;;  %v1273_v20 = vshll.u32 %v7056_v23, 16  ;;  %v5914_v25 = vld [vmem:[%s6313_s6 + $0xac] sm:$0xf] }
  0xf9   : > { %v4866_v17 = vcombine.low %v1419_v56, %v1422_v32  ;;  %v866_v13 = vsel %vm6478_vm5, %v864_v44, %v865_v43  ;;  %v1283_v16 = vshrl.u32 %v7059_v50, 16  ;;  %v1066_v41 = vsel %vm6353_vm2, %v1061_v45, %v1065_v21 }
  0xfa   : > { %5651 = vmatpush3.bf16.msra.mxu0 %v5901_v28  ;;  %v4826_v18 = vcombine.low %v7053_v34, %v866_v13  ;;  %v1070_v58 = vor.u32 %v1069_v14, %v1065_v21  ;;  %v1075_v51 = vrot.slane %v1073_v37, 5  ;;  %v7074_v15 = vrot.slane %v1270_v3, 4  ;;  %v5915_v14 = vld [vmem:[%s6313_s6 + $0xb0] sm:$0x1] }
  0xfb   : > { %3595 = vmatmul.mubr.bf16.gmra.mrb[64].mxu1 %v4825_v31  ;;  %v7076_v43 = vrot.slane %v1273_v20, 5  ;;  %v4843_v61 = vcombine.low %v7056_v23, %v7059_v50  ;;  %v4691_v52 = vrot.slane %v4675_v48, 9  ;;  %v1425_v26 = vrot.slane %v6743_v55, 5  ;;  %v7097_v48 = vld [vmem:[%s6313_s6 + $0xc0] sm:$0xf] }
  0xfc   : > { %3602 = vmatprep.mubr.bf16.mxu1 %v4842_v49  ;;  %v1071_v28 = vrot.slane %v1070_v58, 4  ;;  %v1428_v56 = vrot.slane %v4659_v62, 5  ;;  %v4619_v22 = vrot.slane %v716_v42, 9  ;;  %v869_v31 = vrot.slane %v5914_v25, 5  ;;  %v4676_v58 = vld [vmem:[%s6313_s6 + $0x60] sm:$0xe] }
  0xfd   : > { %3692 = vmatmul.mubr.bf16.gmra.mrb[64].mxu0 %v4849_v33  ;;  %v872_v33 = vrot.slane %v5915_v14, 5  ;;  %v1084_v34 = vor.u32 %v6757_v30, %v6755_v11  ;;  %v1087_v44 = vshll.u32 %v6743_v55, 16  ;;  %v1426_v45 = vsel %vm6478_vm5, %v4691_v52, %v1425_v26 }
  0xfe   : > { %3699 = vmatprep.mubr.bf16.mxu0 %v4866_v17  ;;  %v1076_v49 = vsel %vm6353_vm2, %v1071_v28, %v1075_v51  ;;  %v1427_v23 = vrot.slane %v1425_v26, 4  ;;  %v8266_v32 = vshrl.u32 %v6743_v55, 16  ;;  %v7094_v3 = vsel %vm6478_vm5, %v4619_v22, %v869_v31  ;;  %v7100_v17 = vld [vmem:[%s6313_s6 + $0xc4] sm:$0xf]  ;;  %v4660_v26 = vld [vmem:[%s6313_s6 + $0x68] sm:$0x1] }
  0xff   : > { %v4850_v37 = vcombine.low %v1066_v41, %v1076_v49  ;;  %v871_v11 = vrot.slane %v869_v31, 4  ;;  %v1085_v30 = vrot.slane %v1084_v34, 4  ;;  %v1089_v20 = vrot.slane %v1087_v44, 5  ;;  %v717_v22 = vld [vmem:[%s6313_s6 + $0xb4] sm:$0xe] }
 0x100   : > { %v1093_v21 = vrot.slane %v8266_v32, 4  ;;  %v1429_v13 = vsel %vm6478_vm5, %v1427_v23, %v1428_v56  ;;  %v1097_v42 = vshll.u32 %v4659_v62, 16  ;;  %v1294_v55 = vshrl.u32 %v7097_v48, 16  ;;  %v4677_v49 = vld [vmem:[%s6313_s6 + $0x6c] sm:$0xe] }
 0x101   : > { %v4867_v41 = vcombine.low %v1426_v45, %v1429_v13  ;;  %v873_v51 = vsel %vm6478_vm5, %v871_v11, %v872_v33  ;;  %v1297_v52 = vshll.u32 %v7097_v48, 16  ;;  %v1307_v28 = vshrl.u32 %v7100_v17, 16 }
 0x102   : > { %v4827_v25 = vcombine.low %v7094_v3, %v873_v51  ;;  %v1090_v56 = vsel %vm6353_vm2, %v1085_v30, %v1089_v20  ;;  %v1094_v62 = vor.u32 %v1093_v21, %v1089_v20  ;;  %v1099_v31 = vrot.slane %v1097_v42, 5  ;;  %v5916_v3 = vld [vmem:[%s6313_s6 + $0xb8] sm:$0xf] }
 0x103   : > { %3603 = vmatmul.mubr.bf16.gmra.mrb[68].mxu1 %v4826_v18  ;;  %v7115_v14 = vrot.slane %v1294_v55, 4  ;;  %v7117_v33 = vrot.slane %v1297_v52, 5  ;;  %v4844_v34 = vcombine.low %v7097_v48, %v7100_v17  ;;  %v4692_v44 = vrot.slane %v4676_v58, 9  ;;  %v4661_v58 = vld [vmem:[%s6313_s6 + $0x74] sm:$0x1] }
 0x104   : > { %3610 = vmatprep.mubr.bf16.mxu1 %v4843_v61  ;;  %v1095_v45 = vrot.slane %v1094_v62, 4  ;;  %v1432_v23 = vrot.slane %v6792_v27, 5  ;;  %v1435_v32 = vrot.slane %v4660_v26, 5  ;;  %v4620_v21 = vrot.slane %v717_v22, 9 }
 0x105   : > { %3700 = vmatmul.mubr.bf16.gmra.mrb[68].mxu0 %v4850_v37  ;;  %v876_v18 = vrot.slane %v5916_v3, 5  ;;  %v5917_v37 = vld [vmem:[%s6313_s6 + $0xbc] sm:$0x1]  ;;  %v1108_v30 = vor.u32 %v6805_v9, %v6803_v5  ;;  %v1111_v48 = vshll.u32 %v6792_v27, 16  ;;  %v8267_v42 = vshrl.u32 %v6792_v27, 16 }
 0x106   : > { %3707 = vmatprep.mubr.bf16.mxu0 %v4867_v41  ;;  %v879_v11 = vrot.slane %v5917_v37, 5  ;;  %v1100_v61 = vsel %vm6353_vm2, %v1095_v45, %v1099_v31  ;;  %v1433_v13 = vsel %vm6478_vm5, %v4692_v44, %v1432_v23  ;;  %v1434_v20 = vrot.slane %v1432_v23, 4  ;;  %v7140_v44 = vld [vmem:[%s6313_s6 + $0x18] sm:$0xf]  ;;  %v7146_v3 = vld [vmem:[%s6313_s6 + $0x1c] sm:$0xf] }
 0x107   : > { %v1117_v55 = vrot.slane %v8267_v42, 4  ;;  %v4851_v41 = vcombine.low %v1090_v56, %v1100_v61  ;;  %v877_v51 = vsel %vm6478_vm5, %v4620_v21, %v876_v18  ;;  %v878_v9 = vrot.slane %v876_v18, 4  ;;  %v7149_v21 = vld [vmem:[%s6313_s6 + $0x20] sm:$0x1] }
 0x108   : > { %v1109_v5 = vrot.slane %v1108_v30, 4  ;;  %v1436_v52 = vsel %vm6478_vm5, %v1434_v20, %v1435_v32  ;;  %v1113_v22 = vrot.slane %v1111_v48, 5  ;;  %v1121_v62 = vshll.u32 %v4660_v26, 16 }
 0x109   : > { %v4693_v31 = vrot.slane %v4677_v49, 9  ;;  %v4868_v45 = vcombine.low %v1433_v13, %v1436_v52  ;;  %v880_v27 = vsel %vm6478_vm5, %v878_v9, %v879_v11  ;;  %v1439_v23 = vrot.slane %v6801_v57, 5 }
 0x10a   : > { %v1442_v56 = vrot.slane %v4661_v58, 5  ;;  %v4828_v18 = vcombine.low %v877_v51, %v880_v27  ;;  %v1114_v32 = vsel %vm6353_vm2, %v1109_v5, %v1113_v22  ;;  %v1118_v37 = vor.u32 %v1117_v55, %v1113_v22  ;;  %v4678_v22 = vld [vmem:[%s6313_s6 + $0x78] sm:$0xe] }
 0x10b   : > { %v1123_v26 = vrot.slane %v1121_v62, 5  ;;  %3611 = vmatmul.mubr.bf16.gmra.mrb[72].mxu1 %v4827_v25  ;;  %v1440_v49 = vsel %vm6478_vm5, %v4693_v31, %v1439_v23  ;;  %v1441_v30 = vrot.slane %v1439_v23, 4  ;;  %v1546_v11 = vshrl.u32 %v7140_v44, 16  ;;  %v7168_v23 = vld [vmem:[%s6313_s6 + $0x80] sm:$0x1] }
 0x10c   : > { %v1549_v48 = vshll.u32 %v7140_v44, 16  ;;  %3618 = vmatprep.mubr.bf16.mxu1 %v4844_v34  ;;  %v1119_v61 = vrot.slane %v1118_v37, 4  ;;  %v1555_v13 = vshll.u32 %v7146_v3, 16  ;;  %v1559_v20 = vshrl.u32 %v7146_v3, 16 }
 0x10d   : > { %3708 = vmatmul.mubr.bf16.gmra.mrb[72].mxu0 %v4851_v41  ;;  %v1565_v25 = vshll.u32 %v7149_v21, 16  ;;  %v1443_v42 = vsel %vm6478_vm5, %v1441_v30, %v1442_v56  ;;  %v1548_v55 = vrot.slane %v1546_v11, 4  ;;  %v1132_v51 = vor.u32 %v6827_v60, %v6825_v54  ;;  %v7174_v11 = vld [vmem:[%s6313_s6 + $0x24] sm:$0xf] }
 0x10e   : > { %3715 = vmatprep.mubr.bf16.mxu0 %v4868_v45  ;;  %v1551_v41 = vrot.slane %v1549_v48, 5  ;;  %v1124_v34 = vsel %vm6353_vm2, %v1119_v61, %v1123_v26  ;;  %v4869_v9 = vcombine.low %v1440_v49, %v1443_v42  ;;  %v1557_v5 = vrot.slane %v1555_v13, 5  ;;  %v7181_v42 = vld [vmem:[%s6313_s6 + $0x28] sm:$0xf] }
 0x10f   : > { %v1561_v52 = vrot.slane %v1559_v20, 4  ;;  %v4852_v62 = vcombine.low %v1114_v32, %v1124_v34  ;;  %v1567_v45 = vrot.slane %v1565_v25, 5  ;;  %v1133_v27 = vrot.slane %v1132_v51, 4 }
 0x110   : > { %v1552_v31 = vor.u32 %v1551_v41, %v1548_v55  ;;  %v1135_v37 = vshll.u32 %v6801_v57, 16  ;;  %v8268_v30 = vshrl.u32 %v6801_v57, 16  ;;  %v1145_v60 = vshll.u32 %v4661_v58, 16 }
 0x111   : > { %v1562_v56 = vor.u32 %v1561_v52, %v1557_v5  ;;  %v4877_v49 = vcombine.low %v7140_v44, %v7146_v3  ;;  %v4694_v32 = vrot.slane %v4678_v22, 9  ;;  %v1446_v48 = vrot.slane %v6838_v40, 5  ;;  %v7193_v52 = vld [vmem:[%s6313_s6 + $0x2c] sm:$0x1] }
 0x112   : > { %v1141_v54 = vrot.slane %v8268_v30, 4  ;;  %v1553_v26 = vrot.slane %v1552_v31, 4  ;;  %v1137_v13 = vrot.slane %v1135_v37, 5  ;;  %v1147_v20 = vrot.slane %v1145_v60, 5 }
 0x113   : > { %v1563_v61 = vrot.slane %v1562_v56, 4  ;;  %v1449_v25 = vrot.slane %v7168_v23, 5  ;;  %3619 = vmatmul.mubr.bf16.gmra.mrb[76].mxu1 %v4828_v18  ;;  %v1447_v58 = vsel %vm6478_vm5, %v4694_v32, %v1446_v48  ;;  %v1448_v44 = vrot.slane %v1446_v48, 4 }
 0x114   : > { %v1558_v57 = vsel %vm6353_vm2, %v1553_v26, %v1557_v5  ;;  %v1570_v55 = vshrl.u32 %v7174_v11, 16  ;;  %v1138_v51 = vsel %vm6353_vm2, %v1133_v27, %v1137_v13  ;;  %v1142_v34 = vor.u32 %v1141_v54, %v1137_v13  ;;  %v4663_v13 = vld [vmem:[%s6313_s6 + $0x8c] sm:$0x1] }
 0x115   : > { %3716 = vmatmul.mubr.bf16.gmra.mrb[76].mxu0 %v4852_v62  ;;  %v1568_v41 = vsel %vm6353_vm2, %v1563_v61, %v1567_v45  ;;  %v1573_v18 = vshll.u32 %v7174_v11, 16  ;;  %v1450_v5 = vsel %vm6478_vm5, %v1448_v44, %v1449_v25  ;;  %v1583_v37 = vshrl.u32 %v7181_v42, 16  ;;  %v4679_v25 = vld [vmem:[%s6313_s6 + $0x84] sm:$0xe] }
 0x116   : > { %3723 = vmatprep.mubr.bf16.mxu0 %v4869_v9  ;;  %v4893_v22 = vcombine.low %v1558_v57, %v1568_v41  ;;  %v1572_v62 = vrot.slane %v1570_v55, 4  ;;  %v1579_v9 = vshll.u32 %v7181_v42, 16  ;;  %v1143_v31 = vrot.slane %v1142_v34, 4 }
 0x117   : > { %v4870_v56 = vcombine.low %v1447_v58, %v1450_v5  ;;  %v1575_v45 = vrot.slane %v1573_v18, 5  ;;  %v1589_v30 = vshll.u32 %v7193_v52, 16  ;;  %v2005_v54 = vrot.slane %v7193_v52, 5 }
 0x118   : > { %3820 = vmatprep.mubr.bf16.mxu1 %v4893_v22  ;;  %v1581_v27 = vrot.slane %v1579_v9, 5  ;;  %v1156_v60 = vor.u32 %v6866_v53, %v6864_v36  ;;  %v1148_v26 = vsel %vm6353_vm2, %v1143_v31, %v1147_v20  ;;  %v1585_v48 = vrot.slane %v1583_v37, 4  ;;  %v7213_v53 = vld [vmem:[%s6313_s6 + $0x30] sm:$0xf] }
 0x119   : > { %v1576_v32 = vor.u32 %v1575_v45, %v1572_v62  ;;  %v1159_v61 = vshll.u32 %v6838_v40, 16  ;;  %v4853_v57 = vcombine.low %v1138_v51, %v1148_v26  ;;  %v1591_v58 = vrot.slane %v1589_v30, 5  ;;  %v7219_v62 = vld [vmem:[%s6313_s6 + $0x34] sm:$0xf] }
 0x11a   : > { %v1157_v44 = vrot.slane %v1156_v60, 4  ;;  %v1165_v55 = vrot.slane %v1163_v6, 4  ;;  %v1586_v34 = vor.u32 %v1585_v48, %v1581_v27  ;;  %v1169_v36 = vshll.u32 %v7168_v23, 16 }
 0x11b   : > { %v1577_v41 = vrot.slane %v1576_v32, 4  ;;  %v1161_v18 = vrot.slane %v1159_v61, 5  ;;  %3821 = vmatmul.mubr.bf16.vlgmr.msra.gmra.mrb[80].mxu1 %v4877_v49  ;;  %v4878_v20 = vcombine.low %v7174_v11, %v7181_v42  ;;  %v4695_v22 = vrot.slane %v4679_v25, 9 }
 0x11c   : > { %v1453_v51 = vrot.slane %v6879_v7, 5  ;;  %v1456_v5 = vrot.slane %v4663_v13, 5  ;;  %v1587_v6 = vrot.slane %v1586_v34, 4  ;;  %v1171_v49 = vrot.slane %v1169_v36, 5  ;;  %v7244_v36 = vld [vmem:[%s6313_s6 + $0x98] sm:$0x1] }
 0x11d   : > { %3724 = vmatmul.mubr.bf16.gmra.mrb[80].mxu0 %v4853_v57  ;;  %v1582_v40 = vsel %vm6353_vm2, %v1577_v41, %v1581_v27  ;;  %v1162_v23 = vsel %vm6353_vm2, %v1157_v44, %v1161_v18  ;;  %v1166_v9 = vor.u32 %v1165_v55, %v1161_v18  ;;  %v1594_v45 = vshrl.u32 %v7213_v53, 16 }
 0x11e   : > { %3731 = vmatprep.mubr.bf16.mxu0 %v4870_v56  ;;  %v1454_v11 = vsel %vm6478_vm5, %v4695_v22, %v1453_v51  ;;  %v1455_v31 = vrot.slane %v1453_v51, 4  ;;  %v1592_v37 = vsel %vm6353_vm2, %v1587_v6, %v1591_v58  ;;  %v7231_v56 = vld [vmem:[%s6313_s6 + $0x38] sm:$0x1]  ;;  %v1597_v27 = vshll.u32 %v7213_v53, 16  ;;  %v4680_v22 = vld [vmem:[%s6313_s6 + $0x90] sm:$0xe] }
 0x11f   : > { %v1167_v30 = vrot.slane %v1166_v9, 4  ;;  %v1603_v60 = vshll.u32 %v7219_v62, 16  ;;  %v4894_v26 = vcombine.low %v1582_v40, %v1592_v37  ;;  %v1596_v48 = vrot.slane %v1594_v45, 4  ;;  %v7251_v9 = vld [vmem:[%s6313_s6 + $0x3c] sm:$0xf] }
 0x120   : > { %v1457_v32 = vsel %vm6478_vm5, %v1455_v31, %v1456_v5  ;;  %v1607_v61 = vshrl.u32 %v7219_v62, 16  ;;  %v1599_v58 = vrot.slane %v1597_v27, 5  ;;  %v1613_v34 = vshll.u32 %v7231_v56, 16 }
 0x121   : > { %v1172_v25 = vsel %vm6353_vm2, %v1167_v30, %v1171_v49  ;;  %v4871_v57 = vcombine.low %v1454_v11, %v1457_v32  ;;  %v1605_v44 = vrot.slane %v1603_v60, 5  ;;  %3828 = vmatprep.mubr.bf16.mxu1 %v4894_v26  ;;  %v1180_v18 = vor.u32 %v6906_v46, %v6901_v19  ;;  %v7258_v30 = vld [vmem:[%s6313_s6 + $0x40] sm:$0xf]  ;;  %v7266_v26 = vld [vmem:[%s6313_s6 + $0x44] sm:$0x1] }
 0x122   : > { %v4854_v55 = vcombine.low %v1162_v23, %v1172_v25  ;;  %v1609_v41 = vrot.slane %v1607_v61, 4  ;;  %v1600_v51 = vor.u32 %v1599_v58, %v1596_v48  ;;  %v1183_v5 = vshll.u32 %v6879_v7, 16 }
 0x123   : > { %v1189_v40 = vrot.slane %v1187_v2, 4  ;;  %v1193_v6 = vshll.u32 %v4663_v13, 16  ;;  %3829 = vmatmul.mubr.bf16.gmra.mrb[84].mxu1 %v4878_v20  ;;  %v1615_v49 = vrot.slane %v1613_v34, 5  ;;  %v1181_v11 = vrot.slane %v1180_v18, 4 }
 0x124   : > { %v1610_v23 = vor.u32 %v1609_v41, %v1605_v44  ;;  %v4879_v19 = vcombine.low %v7213_v53, %v7219_v62  ;;  %v1601_v46 = vrot.slane %v1600_v51, 4  ;;  %v1185_v31 = vrot.slane %v1183_v5, 5 }
 0x125   : > { %3732 = vmatmul.mubr.bf16.gmra.mrb[84].mxu0 %v4854_v55  ;;  %v1195_v45 = vrot.slane %v1193_v6, 5  ;;  %v4696_v37 = vrot.slane %v4680_v22, 9  ;;  %v1460_v2 = vrot.slane %v6925_v8, 5  ;;  %v1463_v13 = vrot.slane %v7244_v36, 5 }
 0x126   : > { %3739 = vmatprep.mubr.bf16.mxu0 %v4871_v57  ;;  %v1611_v7 = vrot.slane %v1610_v23, 4  ;;  %v1618_v20 = vshrl.u32 %v7251_v9, 16  ;;  %v1606_v27 = vsel %vm6353_vm2, %v1601_v46, %v1605_v44  ;;  %v1186_v53 = vsel %vm6353_vm2, %v1181_v11, %v1185_v31 }
 0x127   : > { %v1190_v60 = vor.u32 %v1189_v40, %v1185_v31  ;;  %v1621_v32 = vshll.u32 %v7251_v9, 16  ;;  %v1461_v61 = vsel %vm6478_vm5, %v4696_v37, %v1460_v2  ;;  %v1462_v25 = vrot.slane %v1460_v2, 4 }
 0x128   : > { %v1616_v48 = vsel %vm6353_vm2, %v1611_v7, %v1615_v49  ;;  %v1620_v57 = vrot.slane %v1618_v20, 4  ;;  %v1627_v41 = vshll.u32 %v7258_v30, 16  ;;  %v1631_v18 = vshrl.u32 %v7258_v30, 16  ;;  %v4681_v49 = vld [vmem:[%s6313_s6 + $0x9c] sm:$0xe] }
 0x129   : > { %v4895_v58 = vcombine.low %v1606_v27, %v1616_v48  ;;  %v1191_v55 = vrot.slane %v1190_v60, 4  ;;  %v1623_v44 = vrot.slane %v1621_v32, 5  ;;  %v1464_v34 = vsel %vm6478_vm5, %v1462_v25, %v1463_v13  ;;  %v7284_v7 = vld [vmem:[%s6313_s6 + $0xa4] sm:$0x1]  ;;  %v7291_v13 = vld [vmem:[%s6313_s6 + $0x48] sm:$0xf] }
 0x12a   : > { %v1637_v22 = vshll.u32 %v7266_v26, 16  ;;  %v1204_v51 = vor.u32 %v6947_v59, %v6945_v24  ;;  %v4872_v40 = vcombine.low %v1461_v61, %v1464_v34  ;;  %v1629_v23 = vrot.slane %v1627_v41, 5  ;;  %v7297_v60 = vld [vmem:[%s6313_s6 + $0x4c] sm:$0xf] }
 0x12b   : > { %3836 = vmatprep.mubr.bf16.mxu1 %v4895_v58  ;;  %v1196_v5 = vsel %vm6353_vm2, %v1191_v55, %v1195_v45  ;;  %v1624_v6 = vor.u32 %v1623_v44, %v1620_v57  ;;  %v1633_v46 = vrot.slane %v1631_v18, 4  ;;  %v1207_v24 = vshll.u32 %v6925_v8, 16  ;;  %v7308_v55 = vld [vmem:[%s6313_s6 + $0x50] sm:$0x1] }
 0x12c   : > { %v4855_v11 = vcombine.low %v1186_v53, %v1196_v5  ;;  %3837 = vmatmul.mubr.bf16.gmra.mrb[88].mxu1 %v4879_v19  ;;  %v1639_v31 = vrot.slane %v1637_v22, 5  ;;  %v1205_v37 = vrot.slane %v1204_v51, 4  ;;  %v1213_v59 = vrot.slane %v1211_v63, 4 }
 0x12d   : > { %v1625_v2 = vrot.slane %v1624_v6, 4  ;;  %v1217_v45 = vshll.u32 %v7244_v36, 16  ;;  %v1634_v20 = vor.u32 %v1633_v46, %v1629_v23  ;;  %v4880_v19 = vcombine.low %v7251_v9, %v7258_v30 }
 0x12e   : > { %3740 = vmatmul.mubr.bf16.gmra.mrb[88].mxu0 %v4855_v11  ;;  %v4697_v27 = vrot.slane %v4681_v49, 9  ;;  %v1467_v53 = vrot.slane %v6970_v35, 5  ;;  %v1209_v63 = vrot.slane %v1207_v24, 5  ;;  %v1470_v36 = vrot.slane %v7284_v7, 5 }
 0x12f   : > { %3747 = vmatprep.mubr.bf16.mxu0 %v4872_v40  ;;  %v1630_v8 = vsel %vm6353_vm2, %v1625_v2, %v1629_v23  ;;  %v1219_v32 = vrot.slane %v1217_v45, 5  ;;  %v1635_v48 = vrot.slane %v1634_v20, 4  ;;  %v1642_v9 = vshrl.u32 %v7291_v13, 16  ;;  %v4666_v45 = vld [vmem:[%s6313_s6 + $0xb0] sm:$0x1] }
 0x130   : > { %v1468_v61 = vsel %vm6478_vm5, %v4697_v27, %v1467_v53  ;;  %v1469_v25 = vrot.slane %v1467_v53, 4  ;;  %v1210_v57 = vsel %vm6353_vm2, %v1205_v37, %v1209_v63  ;;  %v1214_v58 = vor.u32 %v1213_v59, %v1209_v63  ;;  %v4682_v20 = vld [vmem:[%s6313_s6 + $0xa8] sm:$0xe] }
 0x131   : > { %v1645_v44 = vshll.u32 %v7291_v13, 16  ;;  %v1651_v41 = vshll.u32 %v7297_v60, 16  ;;  %v1640_v34 = vsel %vm6353_vm2, %v1635_v48, %v1639_v31  ;;  %v1644_v22 = vrot.slane %v1642_v9, 4  ;;  %v7331_v48 = vld [vmem:[%s6313_s6 + $0x54] sm:$0xf] }
 0x132   : > { %v1471_v18 = vsel %vm6478_vm5, %v1469_v25, %v1470_v36  ;;  %v1655_v51 = vshrl.u32 %v7297_v60, 16  ;;  %v4896_v5 = vcombine.low %v1630_v8, %v1640_v34  ;;  %v1215_v40 = vrot.slane %v1214_v58, 4 }
 0x133   : > { %v4873_v6 = vcombine.low %v1468_v61, %v1471_v18  ;;  %v1647_v23 = vrot.slane %v1645_v44, 5  ;;  %v1653_v49 = vrot.slane %v1651_v41, 5  ;;  %v1661_v46 = vshll.u32 %v7308_v55, 16 }
 0x134   : > { %v1657_v11 = vrot.slane %v1655_v51, 4  ;;  %v1228_v37 = vor.u32 %v6990_v4, %v6988_v47  ;;  %3844 = vmatprep.mubr.bf16.mxu1 %v4896_v5  ;;  %v1220_v31 = vsel %vm6353_vm2, %v1215_v40, %v1219_v32  ;;  %v1231_v24 = vshll.u32 %v6970_v35, 16 }
 0x135   : > { %v1648_v2 = vor.u32 %v1647_v23, %v1644_v22  ;;  %v1237_v59 = vrot.slane %v1235_v0, 4  ;;  %v4856_v27 = vcombine.low %v1210_v57, %v1220_v31  ;;  %3845 = vmatmul.mubr.bf16.gmra.mrb[92].mxu1 %v4880_v19  ;;  %v1663_v8 = vrot.slane %v1661_v46, 5  ;;  %v7335_v19 = vld [vmem:[%s6313_s6 + $0x58] sm:$0xf] }
 0x136   : > { %v1658_v53 = vor.u32 %v1657_v11, %v1653_v49  ;;  %v1229_v63 = vrot.slane %v1228_v37, 4  ;;  %v1233_v4 = vrot.slane %v1231_v24, 5  ;;  %v1241_v36 = vshll.u32 %v7284_v7, 16  ;;  %v4683_v24 = vld [vmem:[%s6313_s6 + $0xb4] sm:$0xe] }
 0x137   : > { %v1649_v47 = vrot.slane %v1648_v2, 4  ;;  %v4881_v32 = vcombine.low %v7291_v13, %v7297_v60  ;;  %3748 = vmatmul.mubr.bf16.gmra.mrb[92].mxu0 %v4856_v27  ;;  %v4698_v0 = vrot.slane %v4682_v20, 9  ;;  %v1474_v61 = vrot.slane %v7015_v1, 5  ;;  %v7342_v13 = vld [vmem:[%s6313_s6 + $0x5c] sm:$0x1] }
 0x138   : > { %v1659_v35 = vrot.slane %v1658_v53, 4  ;;  %v1477_v25 = vrot.slane %v4666_v45, 5  ;;  %3755 = vmatprep.mubr.bf16.mxu0 %v4873_v6  ;;  %v1234_v7 = vsel %vm6353_vm2, %v1229_v63, %v1233_v4  ;;  %v1238_v57 = vor.u32 %v1237_v59, %v1233_v4 }
 0x139   : > { %v1654_v9 = vsel %vm6353_vm2, %v1649_v47, %v1653_v49  ;;  %v1243_v58 = vrot.slane %v1241_v36, 5  ;;  %v1475_v41 = vsel %vm6478_vm5, %v4698_v0, %v1474_v61  ;;  %v1476_v34 = vrot.slane %v1474_v61, 4 }
 0x13a   : > { %v1664_v44 = vsel %vm6353_vm2, %v1659_v35, %v1663_v8  ;;  %v1666_v18 = vshrl.u32 %v7331_v48, 16  ;;  %v1239_v51 = vrot.slane %v1238_v57, 4  ;;  %v1669_v5 = vshll.u32 %v7331_v48, 16  ;;  %v7361_v8 = vld [vmem:[%s6313_s6 + $0xbc] sm:$0x1] }
 0x13b   : > { %v4897_v22 = vcombine.low %v1654_v9, %v1664_v44  ;;  %v1675_v40 = vshll.u32 %v7335_v19, 16  ;;  %v1478_v6 = vsel %vm6478_vm5, %v1476_v34, %v1477_v25  ;;  %v1679_v49 = vshrl.u32 %v7335_v19, 16  ;;  %v7367_v35 = vld [vmem:[%s6313_s6 + $0x60] sm:$0xf] }
 0x13c   : > { %v1668_v23 = vrot.slane %v1666_v18, 4  ;;  %v1685_v11 = vshll.u32 %v7342_v13, 16  ;;  %v1244_v46 = vsel %vm6353_vm2, %v1239_v51, %v1243_v58  ;;  %v4874_v37 = vcombine.low %v1475_v41, %v1478_v6  ;;  %v7385_v18 = vld [vmem:[%s6313_s6 + $0x68] sm:$0x1] }
 0x13d   : > { %3852 = vmatprep.mubr.bf16.mxu1 %v4897_v22  ;;  %v1671_v31 = vrot.slane %v1669_v5, 5  ;;  %v1677_v2 = vrot.slane %v1675_v40, 5  ;;  %v4857_v59 = vcombine.low %v1234_v7, %v1244_v46  ;;  %v1681_v20 = vrot.slane %v1679_v49, 4 }
 0x13e   : > { %3853 = vmatmul.mubr.bf16.gmra.mrb[96].mxu1 %v4881_v32  ;;  %v1687_v27 = vrot.slane %v1685_v11, 5  ;;  %v1252_v53 = vor.u32 %v7035_v12, %v7033_v10  ;;  %v1255_v47 = vshll.u32 %v7015_v1, 16  ;;  %v1261_v4 = vrot.slane %v1259_v38, 4 }
 0x13f   : > { %v1672_v63 = vor.u32 %v1671_v31, %v1668_v23  ;;  %v1265_v36 = vshll.u32 %v4666_v45, 16  ;;  %3756 = vmatmul.mubr.bf16.gmra.mrb[96].mxu0 %v4857_v59  ;;  %v1682_v0 = vor.u32 %v1681_v20, %v1677_v2  ;;  %v4882_v61 = vcombine.low %v7331_v48, %v7335_v19  ;;  %v7374_v45 = vld [vmem:[%s6313_s6 + $0x64] sm:$0xf] }
 0x140   : > { %v1253_v32 = vrot.slane %v1252_v53, 4  ;;  %v4699_v10 = vrot.slane %v4683_v24, 9  ;;  %3763 = vmatprep.mubr.bf16.mxu0 %v4874_v37  ;;  %v1257_v25 = vrot.slane %v1255_v47, 5  ;;  %v1481_v7 = vrot.slane %v7059_v50, 5  ;;  %v7399_v47 = vld [vmem:[%s6313_s6 + $0xc8] sm:$0x1] }
 0x141   : > { %v1673_v12 = vrot.slane %v1672_v63, 4  ;;  %v1267_v9 = vrot.slane %v1265_v36, 5  ;;  %v1683_v1 = vrot.slane %v1682_v0, 4  ;;  %v1484_v38 = vrot.slane %v7361_v8, 5 }
 0x142   : > { %v1690_v57 = vshrl.u32 %v7367_v35, 16  ;;  %v1693_v58 = vshll.u32 %v7367_v35, 16  ;;  %v1258_v44 = vsel %vm6353_vm2, %v1253_v32, %v1257_v25  ;;  %v1262_v41 = vor.u32 %v1261_v4, %v1257_v25  ;;  %v4684_v4 = vld [vmem:[%s6313_s6 + $0xc0] sm:$0xe] }
 0x143   : > { %v1678_v48 = vsel %vm6353_vm2, %v1673_v12, %v1677_v2  ;;  %v1482_v34 = vsel %vm6478_vm5, %v4699_v10, %v1481_v7  ;;  %v1688_v22 = vsel %vm6353_vm2, %v1683_v1, %v1687_v27  ;;  %v1483_v51 = vrot.slane %v1481_v7, 4 }
 0x144   : > { %v1692_v5 = vrot.slane %v1690_v57, 4  ;;  %v1695_v40 = vrot.slane %v1693_v58, 5  ;;  %v4898_v6 = vcombine.low %v1678_v48, %v1688_v22  ;;  %v1263_v23 = vrot.slane %v1262_v41, 4 }
 0x145   : > { %v1699_v49 = vshll.u32 %v7374_v45, 16  ;;  %v1703_v11 = vshrl.u32 %v7374_v45, 16  ;;  %v1485_v46 = vsel %vm6478_vm5, %v1483_v51, %v1484_v38  ;;  %v1709_v31 = vshll.u32 %v7385_v18, 16 }
 0x146   : > { %v1696_v37 = vor.u32 %v1695_v40, %v1692_v5  ;;  %v1276_v2 = vor.u32 %v7076_v43, %v7074_v15  ;;  %3860 = vmatprep.mubr.bf16.mxu1 %v4898_v6  ;;  %v1268_v24 = vsel %vm6353_vm2, %v1263_v23, %v1267_v9  ;;  %v4875_v59 = vcombine.low %v1482_v34, %v1485_v46  ;;  %v7424_v6 = vld [vmem:[%s6313_s6 + $0x70] sm:$0xf]  ;;  %v7431_v46 = vld [vmem:[%s6313_s6 + $0x74] sm:$0x1] }
 0x147   : > { %v1701_v20 = vrot.slane %v1699_v49, 5  ;;  %v1705_v27 = vrot.slane %v1703_v11, 4  ;;  %v4858_v36 = vcombine.low %v1258_v44, %v1268_v24  ;;  %3861 = vmatmul.mubr.bf16.gmra.mrb[100].mxu1 %v4882_v61  ;;  %v1711_v32 = vrot.slane %v1709_v31, 5 }
 0x148   : > { %v1697_v0 = vrot.slane %v1696_v37, 4  ;;  %v1277_v10 = vrot.slane %v1276_v2, 4  ;;  %v1279_v25 = vshll.u32 %v7059_v50, 16  ;;  %v1285_v9 = vrot.slane %v1283_v16, 4  ;;  %v7415_v16 = vld [vmem:[%s6313_s6 + $0x6c] sm:$0xf] }
 0x149   : > { %v1706_v43 = vor.u32 %v1705_v27, %v1701_v20  ;;  %v1289_v7 = vshll.u32 %v7361_v8, 16  ;;  %3764 = vmatmul.mubr.bf16.gmra.mrb[100].mxu0 %v4858_v36  ;;  %v4883_v57 = vcombine.low %v7367_v35, %v7374_v45  ;;  %v4700_v5 = vrot.slane %v4684_v4, 9 }
 0x14a   : > { %v1702_v61 = vsel %vm6353_vm2, %v1697_v0, %v1701_v20  ;;  %3771 = vmatprep.mubr.bf16.mxu0 %v4875_v59  ;;  %v1281_v41 = vrot.slane %v1279_v25, 5  ;;  %v1488_v35 = vrot.slane %v7100_v17, 5  ;;  %v1491_v40 = vrot.slane %v7399_v47, 5 }
 0x14b   : > { %v1707_v8 = vrot.slane %v1706_v43, 4  ;;  %v1291_v34 = vrot.slane %v1289_v7, 5  ;;  %v1714_v37 = vshrl.u32 %v7415_v16, 16  ;;  %v1717_v59 = vshll.u32 %v7415_v16, 16 }
 0x14c   : > { %v1282_v49 = vsel %vm6353_vm2, %v1277_v10, %v1281_v41  ;;  %v1286_v11 = vor.u32 %v1285_v9, %v1281_v41  ;;  %v1489_v2 = vsel %vm6478_vm5, %v4700_v5, %v1488_v35  ;;  %v1490_v24 = vrot.slane %v1488_v35, 4  ;;  %v7451_v35 = vld [vmem:[%s6313_s6 + $0x78] sm:$0xf] }
 0x14d   : > { %v1712_v23 = vsel %vm6353_vm2, %v1707_v8, %v1711_v32  ;;  %v1716_v27 = vrot.slane %v1714_v37, 4  ;;  %v1719_v0 = vrot.slane %v1717_v59, 5  ;;  %v1733_v32 = vshll.u32 %v7431_v46, 16 }
 0x14e   : > { %v5180_v53 = vpop.f32.mrb[0].mxu0  ;;  %v5252_v63 = vpop.f32.mrb[0].mxu1  ;;  %v4899_v31 = vcombine.low %v1702_v61, %v1712_v23  ;;  %v1287_v20 = vrot.slane %v1286_v11, 4  ;;  %v1492_v36 = vsel %vm6478_vm5, %v1490_v24, %v1491_v40  ;;  %v1300_v10 = vor.u32 %v7117_v33, %v7115_v14 }
 0x14f   : > { %v5181_v12 = vpop.f32.mrb[1].mxu0  ;;  %v5253_v15 = vpop.f32.mrb[1].mxu1  ;;  %v4876_v43 = vcombine.low %v1489_v2, %v1492_v36  ;;  %v1720_v61 = vor.u32 %v1719_v0, %v1716_v27  ;;  %v1303_v14 = vshll.u32 %v7100_v17, 16  ;;  %v1309_v33 = vrot.slane %v1307_v28, 4 }
 0x150   : > { %v5183_v1 = vpop.f32.mrb[2].mxu0  ;;  %v5255_v38 = vpop.f32.mrb[2].mxu1  ;;  %v7410_v58 = vadd.f32 %v5181_v12, %v5180_v53  ;;  %v7412_v48 = vadd.f32 %v5253_v15, %v5252_v63  ;;  %v1723_v53 = vshll.u32 %v7424_v6, 16  ;;  %v1727_v63 = vshrl.u32 %v7424_v6, 16  ;;  %3868 = vmatprep.mubr.bf16.mxu1 %v4899_v31  ;;  %v7460_v31 = vld [vmem:[%s6313_s6 + $0x7c] sm:$0xf] }
 0x151   : > { %v5184_v44 = vpop.f32.mrb[3].mxu0  ;;  %v5256_v50 = vpop.f32.mrb[3].mxu1  ;;  %v1292_v15 = vsel %vm6353_vm2, %v1287_v20, %v1291_v34  ;;  %3869 = vmatmul.mubr.bf16.gmra.mrb[104].mxu1 %v4883_v57  ;;  %v1313_v57 = vshll.u32 %v7399_v47, 16  ;;  %v1721_v40 = vrot.slane %v1720_v61, 4  ;;  %v4884_v23 = vcombine.low %v7415_v16, %v7424_v6  ;;  %v7469_v16 = vld [vmem:[%s6313_s6 + $0x80] sm:$0x1] }
 0x152   : > { %v7417_v22 = vadd.f32 %v5184_v44, %v5183_v1  ;;  %v7419_v51 = vadd.f32 %v5256_v50, %v5255_v38  ;;  %v1725_v25 = vrot.slane %v1723_v53, 5  ;;  %v1729_v9 = vrot.slane %v1727_v63, 4  ;;  %v4749_v53 = vld [vmem:[%s6313_s6 + $0x18] sm:$0xe] }
 0x153   : > { %v4859_v38 = vcombine.low %v1282_v49, %v1292_v15  ;;  %v1735_v44 = vrot.slane %v1733_v32, 5  ;;  %v1301_v50 = vrot.slane %v1300_v10, 4  ;;  %v1305_v28 = vrot.slane %v1303_v14, 5 }
 0x154   : > { %v1730_v5 = vor.u32 %v1729_v9, %v1725_v25  ;;  %v1315_v47 = vrot.slane %v1313_v57, 5  ;;  %v1726_v24 = vsel %vm6353_vm2, %v1721_v40, %v1725_v25  ;;  %v1738_v20 = vshrl.u32 %v7451_v35, 16 }
 0x155   : > { %3772 = vmatmul.mubr.bf16.gmra.mrb[104].mxu0 %v4859_v38  ;;  %v1741_v27 = vshll.u32 %v7451_v35, 16  ;;  %v1310_v36 = vor.u32 %v1309_v33, %v1305_v28  ;;  %v1747_v0 = vshll.u32 %v7460_v31, 16  ;;  %v1751_v15 = vshrl.u32 %v7460_v31, 16 }
 0x156   : > { %v5186_v4 = vpop.f32.mrb[4].mxu0  ;;  %v5258_v7 = vpop.f32.mrb[4].mxu1  ;;  %3779 = vmatprep.mubr.bf16.mxu0 %v4876_v43  ;;  %v1731_v17 = vrot.slane %v1730_v5, 4  ;;  %v1740_v10 = vrot.slane %v1738_v20, 4  ;;  %v4750_v43 = vld [vmem:[%s6313_s6 + $0x24] sm:$0xe]  ;;  %v4885_v33 = vcombine.low %v7451_v35, %v7460_v31 }
 0x157   : > { %v5187_v12 = vpop.f32.mrb[5].mxu0  ;;  %v5259_v8 = vpop.f32.mrb[5].mxu1  ;;  %v1311_v25 = vrot.slane %v1310_v36, 4  ;;  %v1749_v9 = vrot.slane %v1747_v0, 5  ;;  %v1753_v61 = vrot.slane %v1751_v15, 4  ;;  %v4766_v57 = vrot.slane %v4750_v43, 9 }
 0x158   : > { %v5189_v1 = vpop.f32.mrb[6].mxu0  ;;  %v5261_v34 = vpop.f32.mrb[6].mxu1  ;;  %v7455_v49 = vadd.f32 %v5187_v12, %v5186_v4  ;;  %v7457_v11 = vadd.f32 %v5259_v8, %v5258_v7  ;;  %v1736_v63 = vsel %vm6353_vm2, %v1731_v17, %v1735_v44  ;;  %v1306_v4 = vsel %vm6353_vm2, %v1301_v50, %v1305_v28  ;;  %v7502_v36 = vld [vmem:[%s6313_s6 + $0x88] sm:$0xf]  ;;  %v7512_v43 = vld [vmem:[%s6313_s6 + $0x8c] sm:$0x1] }
 0x159   : > { %v5190_v41 = vpop.f32.mrb[7].mxu0  ;;  %v5262_v37 = vpop.f32.mrb[7].mxu1  ;;  %v4900_v32 = vcombine.low %v1726_v24, %v1736_v63  ;;  %v1743_v12 = vrot.slane %v1741_v27, 5  ;;  %v1757_v7 = vshll.u32 %v7469_v16, 16  ;;  %v1995_v44 = vrot.slane %v7146_v3, 5 }
 0x15a   : > { %v7462_v2 = vadd.f32 %v5190_v41, %v5189_v1  ;;  %v7466_v59 = vadd.f32 %v5262_v37, %v5261_v34  ;;  %v4765_v1 = vrot.slane %v4749_v53, 9  ;;  %v1998_v50 = vrot.slane %v7149_v21, 5  ;;  %v7485_v41 = vld [vmem:[%s6313_s6 + $0x84] sm:$0xf] }
 0x15b   : > { %3876 = vmatprep.mubr.bf16.mxu1 %v4900_v32  ;;  %v1744_v38 = vor.u32 %v1743_v12, %v1740_v10  ;;  %v1316_v5 = vsel %vm6353_vm2, %v1311_v25, %v1315_v47  ;;  %v1759_v14 = vrot.slane %v1757_v7, 5  ;;  %v1754_v17 = vor.u32 %v1753_v61, %v1749_v9  ;;  %v4751_v61 = vld [vmem:[%s6313_s6 + $0x30] sm:$0xe] }
 0x15c   : > { %3877 = vmatmul.mubr.bf16.gmra.mrb[108].mxu1 %v4884_v23  ;;  %v4860_v40 = vcombine.low %v1306_v4, %v1316_v5  ;;  %v1996_v3 = vsel %vm6478_vm5, %v4765_v1, %v1995_v44  ;;  %v1997_v28 = vrot.slane %v1995_v44, 4  ;;  %v2002_v24 = vrot.slane %v7181_v42, 5 }
 0x15d   : > { %v1745_v37 = vrot.slane %v1744_v38, 4  ;;  %v1762_v35 = vshrl.u32 %v7485_v41, 16  ;;  %v1755_v53 = vrot.slane %v1754_v17, 4  ;;  %v1765_v42 = vshll.u32 %v7485_v41, 16 }
 0x15e   : > { %v5192_v8 = vpop.f32.mrb[8].mxu0  ;;  %v5264_v20 = vpop.f32.mrb[8].mxu1  ;;  %3780 = vmatmul.mubr.bf16.gmra.mrb[108].mxu0 %v4860_v40  ;;  %v1999_v0 = vsel %vm6478_vm5, %v1997_v28, %v1998_v50  ;;  %v2003_v32 = vsel %vm6478_vm5, %v4766_v57, %v2002_v24  ;;  %v2004_v10 = vrot.slane %v2002_v24, 4  ;;  %v1771_v5 = vshll.u32 %v7502_v36, 16 }
 0x15f   : > { %v5193_v34 = vpop.f32.mrb[9].mxu0  ;;  %v1750_v27 = vsel %vm6353_vm2, %v1745_v37, %v1749_v9  ;;  %v5265_v63 = vpop.f32.mrb[9].mxu1  ;;  %v1760_v25 = vsel %vm6353_vm2, %v1755_v53, %v1759_v14  ;;  %v4909_v9 = vcombine.low %v1996_v3, %v1999_v0  ;;  %v1764_v1 = vrot.slane %v1762_v35, 4  ;;  %v4752_v37 = vld [vmem:[%s6313_s6 + $0x3c] sm:$0xe] }
 0x160   : > { %v5195_v21 = vpop.f32.mrb[10].mxu0  ;;  %v7494_v23 = vadd.f32 %v5193_v34, %v5192_v8  ;;  %v7509_v12 = vadd.f32 %v5265_v63, %v5264_v20  ;;  %v5267_v15 = vpop.f32.mrb[10].mxu1  ;;  %v1767_v38 = vrot.slane %v1765_v42, 5  ;;  %v4901_v44 = vcombine.low %v1750_v27, %v1760_v25  ;;  %v7535_v0 = vld [vmem:[%s6313_s6 + $0x90] sm:$0xf] }
 0x161   : > { %v5196_v47 = vpop.f32.mrb[11].mxu0  ;;  %v5268_v7 = vpop.f32.mrb[11].mxu1  ;;  %v2006_v50 = vsel %vm6478_vm5, %v2004_v10, %v2005_v54  ;;  %5652 = vmatprep.mubr.bf16.mxu0 %v4909_v9  ;;  %v1775_v14 = vshrl.u32 %v7502_v36, 16  ;;  %v1781_v40 = vshll.u32 %v7512_v43, 16  ;;  %v1773_v17 = vrot.slane %v1771_v5, 5 }
 0x162   : > { %v7499_v4 = vadd.f32 %v5196_v47, %v5195_v21  ;;  %v7521_v8 = vadd.f32 %v5268_v7, %v5267_v15  ;;  %v4910_v57 = vcombine.low %v2003_v32, %v2006_v50  ;;  %v1768_v34 = vor.u32 %v1767_v38, %v1764_v1  ;;  %3884 = vmatprep.mubr.bf16.mxu1 %v4901_v44  ;;  %v7543_v15 = vld [vmem:[%s6313_s6 + $0x94] sm:$0xf] }
 0x163   : > { %v4767_v3 = vrot.slane %v4751_v61, 9  ;;  %v2009_v52 = vrot.slane %v7219_v62, 5  ;;  %v2012_v54 = vrot.slane %v7231_v56, 5  ;;  %v1777_v24 = vrot.slane %v1775_v14, 4 }
 0x164   : > { %3885 = vmatmul.mubr.bf16.gmra.mrb[112].mxu1 %v4885_v33  ;;  %v1769_v28 = vrot.slane %v1768_v34, 4  ;;  %v1783_v20 = vrot.slane %v1781_v40, 5  ;;  %v4886_v47 = vcombine.low %v7485_v41, %v7502_v36  ;;  %v4768_v63 = vrot.slane %v4752_v37, 9 }
 0x165   : > { %v2010_v27 = vsel %vm6478_vm5, %v4767_v3, %v2009_v52  ;;  %v2011_v53 = vrot.slane %v2009_v52, 4  ;;  %v2016_v42 = vrot.slane %v7258_v30, 5  ;;  %v1778_v33 = vor.u32 %v1777_v24, %v1773_v17  ;;  %v4754_v24 = vld [vmem:[%s6313_s6 + $0x54] sm:$0xe] }
 0x166   : > { %v5198_v21 = vpop.f32.mrb[12].mxu0  ;;  %5653 = vmatmul.mubr.bf16.vlgmr.msra.gmra.mrb[112].mxu0 %v4910_v57  ;;  %v1774_v56 = vsel %vm6353_vm2, %v1769_v28, %v1773_v17  ;;  %v2019_v32 = vrot.slane %v7266_v26, 5  ;;  %v5270_v7 = vpop.f32.mrb[12].mxu1  ;;  %v7552_v26 = vld [vmem:[%s6313_s6 + $0x98] sm:$0x1]  ;;  %v1786_v50 = vshrl.u32 %v7535_v0, 16 }
 0x167   : > { %v5199_v35 = vpop.f32.mrb[13].mxu0  ;;  %v2013_v25 = vsel %vm6478_vm5, %v2011_v53, %v2012_v54  ;;  %v2017_v30 = vsel %vm6478_vm5, %v4768_v63, %v2016_v42  ;;  %v2018_v9 = vrot.slane %v2016_v42, 4  ;;  %v1779_v38 = vrot.slane %v1778_v33, 4  ;;  %v5271_v44 = vpop.f32.mrb[13].mxu1  ;;  %v4753_v17 = vld [vmem:[%s6313_s6 + $0x48] sm:$0xe] }
 0x168   : > { %v5201_v62 = vpop.f32.mrb[14].mxu0  ;;  %v7540_v41 = vadd.f32 %v5199_v35, %v5198_v21  ;;  %v4911_v61 = vcombine.low %v2010_v27, %v2013_v25  ;;  %v1789_v5 = vshll.u32 %v7535_v0, 16  ;;  %v7558_v34 = vadd.f32 %v5271_v44, %v5270_v7  ;;  %v5273_v14 = vpop.f32.mrb[14].mxu1 }
 0x169   : > { %v5202_v10 = vpop.f32.mrb[15].mxu0  ;;  %v2020_v57 = vsel %vm6478_vm5, %v2018_v9, %v2019_v32  ;;  %v1795_v40 = vshll.u32 %v7543_v15, 16  ;;  %v1799_v37 = vshrl.u32 %v7543_v15, 16  ;;  %v1784_v3 = vsel %vm6353_vm2, %v1779_v38, %v1783_v20  ;;  %v5274_v54 = vpop.f32.mrb[15].mxu1 }
 0x16a   : > { %v7549_v1 = vadd.f32 %v5202_v10, %v5201_v62  ;;  %5656 = vmatprep.mubr.bf16.mxu0 %v4911_v61  ;;  %v4912_v52 = vcombine.low %v2017_v30, %v2020_v57  ;;  %v1788_v21 = vrot.slane %v1786_v50, 4  ;;  %v1791_v28 = vrot.slane %v1789_v5, 5  ;;  %v7571_v10 = vld [vmem:[%s6313_s6 + $0x9c] sm:$0xf] }
 0x16b   : > { %v4902_v35 = vcombine.low %v1774_v56, %v1784_v3  ;;  %v7566_v27 = vadd.f32 %v5274_v54, %v5273_v14  ;;  %v1797_v53 = vrot.slane %v1795_v40, 5  ;;  %v1801_v63 = vrot.slane %v1799_v37, 4  ;;  %v7588_v3 = vld [vmem:[%s6313_s6 + $0xa0] sm:$0xf] }
 0x16c   : > { %v1792_v42 = vor.u32 %v1791_v28, %v1788_v21  ;;  %v1805_v62 = vshll.u32 %v7552_v26, 16  ;;  %v4769_v33 = vrot.slane %v4753_v17, 9  ;;  %v2023_v32 = vrot.slane %v7297_v60, 5 }
 0x16d   : > { %3892 = vmatprep.mubr.bf16.mxu1 %v4902_v35  ;;  %v1802_v20 = vor.u32 %v1801_v63, %v1797_v53  ;;  %v2026_v25 = vrot.slane %v7308_v55, 5  ;;  %v4887_v30 = vcombine.low %v7535_v0, %v7543_v15  ;;  %v4770_v56 = vrot.slane %v4754_v24, 9  ;;  %v7596_v35 = vld [vmem:[%s6313_s6 + $0xa4] sm:$0x1] }
 0x16e   : > { %3893 = vmatmul.mubr.bf16.gmra.mrb[116].mxu1 %v4886_v47  ;;  %5657 = vmatmul.mubr.bf16.gmra.mrb[116].mxu0 %v4912_v52  ;;  %v1793_v9 = vrot.slane %v1792_v42, 4  ;;  %v1807_v7 = vrot.slane %v1805_v62, 5  ;;  %v2024_v38 = vsel %vm6478_vm5, %v4769_v33, %v2023_v32  ;;  %v2025_v61 = vrot.slane %v2023_v32, 4  ;;  %v5292_v55 = vpop.f32.mrb[16].mxu1  ;;  %v4755_v32 = vld [vmem:[%s6313_s6 + $0x60] sm:$0xe] }
 0x16f   : > { %v1803_v44 = vrot.slane %v1802_v20, 4  ;;  %v2030_v50 = vrot.slane %v7335_v19, 5  ;;  %v2033_v5 = vrot.slane %v7342_v13, 5  ;;  %v1810_v0 = vshrl.u32 %v7571_v10, 16  ;;  %v5293_v37 = vpop.f32.mrb[17].mxu1 }
 0x170   : > { %v5204_v60 = vpop.f32.mrb[16].mxu0  ;;  %v1798_v47 = vsel %vm6353_vm2, %v1793_v9, %v1797_v53  ;;  %v2027_v14 = vsel %vm6478_vm5, %v2025_v61, %v2026_v25  ;;  %v1813_v19 = vshll.u32 %v7571_v10, 16  ;;  %v5295_v28 = vpop.f32.mrb[18].mxu1  ;;  %v5294_v63 = vadd.f32 %v5293_v37, %v5292_v55  ;;  %v7616_v37 = vld [vmem:[%s6313_s6 + $0xa8] sm:$0xf] }
 0x171   : > { %v5205_v57 = vpop.f32.mrb[17].mxu0  ;;  %v1808_v13 = vsel %vm6353_vm2, %v1803_v44, %v1807_v7  ;;  %v4913_v52 = vcombine.low %v2024_v38, %v2027_v14  ;;  %v2031_v54 = vsel %vm6478_vm5, %v4770_v56, %v2030_v50  ;;  %v2032_v21 = vrot.slane %v2030_v50, 4  ;;  %v5296_v62 = vpop.f32.mrb[19].mxu1  ;;  %v4756_v44 = vld [vmem:[%s6313_s6 + $0x6c] sm:$0xe] }
 0x172   : > { %v7585_v40 = vadd.f32 %v5205_v57, %v5204_v60  ;;  %v5207_v17 = vpop.f32.mrb[18].mxu0  ;;  %v4903_v53 = vcombine.low %v1798_v47, %v1808_v13  ;;  %v1812_v33 = vrot.slane %v1810_v0, 4  ;;  %v5297_v25 = vadd.f32 %v5296_v62, %v5295_v28 }
 0x173   : > { %v5208_v24 = vpop.f32.mrb[19].mxu0  ;;  %5660 = vmatprep.mubr.bf16.mxu0 %v4913_v52  ;;  %v2034_v20 = vsel %vm6478_vm5, %v2032_v21, %v2033_v5  ;;  %v1815_v9 = vrot.slane %v1813_v19, 5  ;;  %v1819_v56 = vshll.u32 %v7588_v3, 16  ;;  %v7605_v38 = vadd.f32 %v5294_v63, %v7410_v58 }
 0x174   : > { %v7598_v42 = vadd.f32 %v5208_v24, %v5207_v17  ;;  %3900 = vmatprep.mubr.bf16.mxu1 %v4903_v53  ;;  %v4914_v7 = vcombine.low %v2031_v54, %v2034_v20  ;;  %v1823_v61 = vshrl.u32 %v7588_v3, 16  ;;  %v1829_v60 = vshll.u32 %v7596_v35, 16 }
 0x175   : > { %v7611_v50 = vadd.f32 %v5297_v25, %v7417_v22  ;;  %v1816_v55 = vor.u32 %v1815_v9, %v1812_v33  ;;  %v1821_v5 = vrot.slane %v1819_v56, 5  ;;  %v4771_v57 = vrot.slane %v4755_v32, 9  ;;  %v7633_v56 = vld [vmem:[%s6313_s6 + $0xac] sm:$0xf] }
 0x176   : > { %3901 = vmatmul.mubr.bf16.gmra.mrb[120].mxu1 %v4887_v30  ;;  %5661 = vmatmul.mubr.bf16.gmra.mrb[120].mxu0 %v4914_v7  ;;  %v1825_v0 = vrot.slane %v1823_v61, 4  ;;  %v1831_v47 = vrot.slane %v1829_v60, 5  ;;  %v2037_v14 = vrot.slane %v7374_v45, 5  ;;  %v2040_v58 = vrot.slane %v7385_v18, 5  ;;  %v5298_v54 = vpop.f32.mrb[20].mxu1 }
 0x177   : > { %v1817_v17 = vrot.slane %v1816_v55, 4  ;;  %v4888_v19 = vcombine.low %v7571_v10, %v7588_v3  ;;  %v4772_v13 = vrot.slane %v4756_v44, 9  ;;  %v2044_v22 = vrot.slane %v7424_v6, 5  ;;  %v5299_v24 = vpop.f32.mrb[21].mxu1 }
 0x178   : > { %v5210_v52 = vpop.f32.mrb[20].mxu0  ;;  %v1826_v21 = vor.u32 %v1825_v0, %v1821_v5  ;;  %v2038_v30 = vsel %vm6478_vm5, %v4771_v57, %v2037_v14  ;;  %v2039_v28 = vrot.slane %v2037_v14, 4  ;;  %v2047_v45 = vrot.slane %v7431_v46, 5  ;;  %v5301_v33 = vpop.f32.mrb[22].mxu1  ;;  %v4757_v57 = vld [vmem:[%s6313_s6 + $0x78] sm:$0xe] }
 0x179   : > { %v5211_v18 = vpop.f32.mrb[21].mxu0  ;;  %v1822_v53 = vsel %vm6353_vm2, %v1817_v17, %v1821_v5  ;;  %v2045_v10 = vsel %vm6478_vm5, %v4772_v13, %v2044_v22  ;;  %v2046_v6 = vrot.slane %v2044_v22, 4  ;;  %v5300_v46 = vadd.f32 %v5299_v24, %v5298_v54  ;;  %v5302_v9 = vpop.f32.mrb[23].mxu1  ;;  %v7641_v5 = vld [vmem:[%s6313_s6 + $0xb0] sm:$0x1] }
 0x17a   : > { %v7628_v63 = vadd.f32 %v5211_v18, %v5210_v52  ;;  %v5213_v62 = vpop.f32.mrb[22].mxu0  ;;  %v1827_v32 = vrot.slane %v1826_v21, 4  ;;  %v2041_v20 = vsel %vm6478_vm5, %v2039_v28, %v2040_v58  ;;  %v1834_v7 = vshrl.u32 %v7616_v37, 16 }
 0x17b   : > { %v5214_v25 = vpop.f32.mrb[23].mxu0  ;;  %v4915_v61 = vcombine.low %v2038_v30, %v2041_v20  ;;  %v2048_v60 = vsel %vm6478_vm5, %v2046_v6, %v2047_v45  ;;  %v5303_v55 = vadd.f32 %v5302_v9, %v5301_v33  ;;  %v7647_v58 = vadd.f32 %v5300_v46, %v7455_v49  ;;  %v4758_v49 = vld [vmem:[%s6313_s6 + $0x84] sm:$0xe] }
 0x17c   : > { %v7638_v44 = vadd.f32 %v5214_v25, %v5213_v62  ;;  %v1832_v0 = vsel %vm6353_vm2, %v1827_v32, %v1831_v47  ;;  %v4916_v14 = vcombine.low %v2045_v10, %v2048_v60  ;;  %v1836_v17 = vrot.slane %v1834_v7, 4 }
 0x17d   : > { %v4904_v13 = vcombine.low %v1822_v53, %v1832_v0  ;;  %5664 = vmatprep.mubr.bf16.mxu0 %v4915_v61  ;;  %v7650_v22 = vadd.f32 %v5303_v55, %v7462_v2  ;;  %v1837_v52 = vshll.u32 %v7616_v37, 16  ;;  %v1843_v54 = vshll.u32 %v7633_v56, 16 }
 0x17e   : > { %5665 = vmatmul.mubr.bf16.gmra.mrb[124].mxu0 %v4916_v14  ;;  %v1847_v21 = vshrl.u32 %v7633_v56, 16  ;;  %v1853_v30 = vshll.u32 %v7641_v5, 16  ;;  %v4773_v47 = vrot.slane %v4757_v57, 9  ;;  %v2051_v28 = vrot.slane %v7460_v31, 5  ;;  %v5304_v10 = vpop.f32.mrb[24].mxu1 }
 0x17f   : > { %3908 = vmatprep.mubr.bf16.mxu1 %v4904_v13  ;;  %v1839_v45 = vrot.slane %v1837_v52, 5  ;;  %v1845_v18 = vrot.slane %v1843_v54, 5  ;;  %v2054_v24 = vrot.slane %v7469_v16, 5  ;;  %v4889_v2 = vcombine.low %v7616_v37, %v7633_v56  ;;  %v5305_v20 = vpop.f32.mrb[25].mxu1  ;;  %v7670_v13 = vld [vmem:[%s6313_s6 + $0xb4] sm:$0xf] }
 0x180   : > { %v5216_v53 = vpop.f32.mrb[24].mxu0  ;;  %3909 = vmatmul.mubr.bf16.gmra.mrb[124].mxu1 %v4888_v19  ;;  %v1849_v6 = vrot.slane %v1847_v21, 4  ;;  %v1855_v62 = vrot.slane %v1853_v30, 5  ;;  %v2052_v33 = vsel %vm6478_vm5, %v4773_v47, %v2051_v28  ;;  %v2053_v32 = vrot.slane %v2051_v28, 4  ;;  %v5307_v61 = vpop.f32.mrb[26].mxu1 }
 0x181   : > { %v5217_v31 = vpop.f32.mrb[25].mxu0  ;;  %v1840_v46 = vor.u32 %v1839_v45, %v1836_v17  ;;  %v4774_v25 = vrot.slane %v4758_v49, 9  ;;  %v2058_v16 = vrot.slane %v7502_v36, 5  ;;  %v2061_v9 = vrot.slane %v7512_v43, 5  ;;  %v5308_v14 = vpop.f32.mrb[27].mxu1 }
 0x182   : > { %v5219_v7 = vpop.f32.mrb[26].mxu0  ;;  %v1850_v60 = vor.u32 %v1849_v6, %v1845_v18  ;;  %v2055_v19 = vsel %vm6478_vm5, %v2053_v32, %v2054_v24  ;;  %v7667_v55 = vadd.f32 %v5217_v31, %v5216_v53  ;;  %v5306_v57 = vadd.f32 %v5305_v20, %v5304_v10  ;;  %v7675_v54 = vld [vmem:[%s6313_s6 + $0xb8] sm:$0xf]  ;;  %v7687_v24 = vld [vmem:[%s6313_s6 + $0xbc] sm:$0x1] }
 0x183   : > { %v5220_v0 = vpop.f32.mrb[27].mxu0  ;;  %v1841_v17 = vrot.slane %v1840_v46, 4  ;;  %v4917_v52 = vcombine.low %v2052_v33, %v2055_v19  ;;  %v2059_v36 = vsel %vm6478_vm5, %v4774_v25, %v2058_v16  ;;  %v2060_v43 = vrot.slane %v2058_v16, 4  ;;  %v4759_v6 = vld [vmem:[%s6313_s6 + $0x90] sm:$0xe] }
 0x184   : > { %v1851_v21 = vrot.slane %v1850_v60, 4  ;;  %v7678_v30 = vadd.f32 %v5306_v57, %v7494_v23  ;;  %v7680_v47 = vadd.f32 %v5220_v0, %v5219_v7  ;;  %v5309_v28 = vadd.f32 %v5308_v14, %v5307_v61  ;;  %v4760_v31 = vld [vmem:[%s6313_s6 + $0x9c] sm:$0xe] }
 0x185   : > { %v1846_v49 = vsel %vm6353_vm2, %v1841_v17, %v1845_v18  ;;  %5668 = vmatprep.mubr.bf16.mxu0 %v4917_v52  ;;  %v2062_v45 = vsel %vm6478_vm5, %v2060_v43, %v2061_v9  ;;  %v1858_v53 = vshrl.u32 %v7670_v13, 16  ;;  %v1861_v10 = vshll.u32 %v7670_v13, 16 }
 0x186   : > { %v1856_v23 = vsel %vm6353_vm2, %v1851_v21, %v1855_v62  ;;  %v4918_v33 = vcombine.low %v2059_v36, %v2062_v45  ;;  %v7695_v32 = vadd.f32 %v5309_v28, %v7499_v4  ;;  %v1867_v18 = vshll.u32 %v7675_v54, 16  ;;  %v5310_v7 = vpop.f32.mrb[28].mxu1 }
 0x187   : > { %v4905_v20 = vcombine.low %v1846_v49, %v1856_v23  ;;  %v1860_v46 = vrot.slane %v1858_v53, 4  ;;  %v1863_v25 = vrot.slane %v1861_v10, 5  ;;  %v1871_v16 = vshrl.u32 %v7675_v54, 16  ;;  %v5311_v4 = vpop.f32.mrb[29].mxu1  ;;  %v7713_v23 = vld [vmem:[%s6313_s6 + $0xc0] sm:$0xf] }
 0x188   : > { %v5222_v9 = vpop.f32.mrb[28].mxu0  ;;  %5669 = vmatmul.mubr.bf16.gmra.mrb[128].mxu0 %v4918_v33  ;;  %v1869_v61 = vrot.slane %v1867_v18, 5  ;;  %v1877_v60 = vshll.u32 %v7687_v24, 16  ;;  %v4775_v19 = vrot.slane %v4759_v6, 9  ;;  %v2065_v62 = vrot.slane %v7543_v15, 5  ;;  %v5313_v43 = vpop.f32.mrb[30].mxu1 }
 0x189   : > { %v5223_v57 = vpop.f32.mrb[29].mxu0  ;;  %3916 = vmatprep.mubr.bf16.mxu1 %v4905_v20  ;;  %v1864_v0 = vor.u32 %v1863_v25, %v1860_v46  ;;  %v1873_v14 = vrot.slane %v1871_v16, 4  ;;  %v2068_v17 = vrot.slane %v7552_v26, 5  ;;  %v4890_v52 = vcombine.low %v7670_v13, %v7675_v54  ;;  %v5314_v53 = vpop.f32.mrb[31].mxu1 }
 0x18a   : > { %v5225_v36 = vpop.f32.mrb[30].mxu0  ;;  %3917 = vmatmul.mubr.bf16.gmra.mrb[128].mxu1 %v4889_v2  ;;  %v1879_v21 = vrot.slane %v1877_v60, 5  ;;  %v2066_v15 = vsel %vm6478_vm5, %v4775_v19, %v2065_v62  ;;  %v2067_v28 = vrot.slane %v2065_v62, 4  ;;  %v4776_v49 = vrot.slane %v4760_v31, 9  ;;  %v7722_v31 = vld [vmem:[%s6313_s6 + $0xc4] sm:$0xf] }
 0x18b   : > { %v5226_v45 = vpop.f32.mrb[31].mxu0  ;;  %v1865_v10 = vrot.slane %v1864_v0, 4  ;;  %v1874_v26 = vor.u32 %v1873_v14, %v1869_v61  ;;  %v2072_v13 = vrot.slane %v7588_v3, 5  ;;  %v2075_v6 = vrot.slane %v7596_v35, 5  ;;  %v7732_v60 = vld [vmem:[%s6313_s6 + $0xc8] sm:$0x1] }
 0x18c   : > { %v2069_v37 = vsel %vm6478_vm5, %v2067_v28, %v2068_v17  ;;  %v7717_v2 = vadd.f32 %v5223_v57, %v5222_v9  ;;  %v5312_v33 = vadd.f32 %v5311_v4, %v5310_v7  ;;  %v7719_v18 = vadd.f32 %v5226_v45, %v5225_v36  ;;  %v4761_v19 = vld [vmem:[%s6313_s6 + $0xa8] sm:$0xe] }
 0x18d   : > { %v1870_v20 = vsel %vm6353_vm2, %v1865_v10, %v1869_v61  ;;  %v1875_v46 = vrot.slane %v1874_v26, 4  ;;  %v4919_v3 = vcombine.low %v2066_v15, %v2069_v37  ;;  %v2073_v35 = vsel %vm6478_vm5, %v4776_v49, %v2072_v13  ;;  %v4762_v15 = vld [vmem:[%s6313_s6 + $0xb4] sm:$0xe] }
 0x18e   : > { %v2074_v25 = vrot.slane %v2072_v13, 4  ;;  %v7729_v16 = vadd.f32 %v5312_v33, %v7540_v41  ;;  %v5315_v9 = vadd.f32 %v5314_v53, %v5313_v43  ;;  %v1882_v7 = vshrl.u32 %v7713_v23, 16  ;;  %v5316_v41 = vpop.f32.mrb[32].mxu1 }
 0x18f   : > { %v1880_v62 = vsel %vm6353_vm2, %v1875_v46, %v1879_v21  ;;  %5672 = vmatprep.mubr.bf16.mxu0 %v4919_v3  ;;  %v1885_v61 = vshll.u32 %v7713_v23, 16  ;;  %v1891_v57 = vshll.u32 %v7722_v31, 16  ;;  %v1895_v4 = vshrl.u32 %v7722_v31, 16  ;;  %v5317_v21 = vpop.f32.mrb[33].mxu1 }
 0x190   : > { %v5228_v0 = vpop.f32.mrb[32].mxu0  ;;  %v4906_v14 = vcombine.low %v1870_v20, %v1880_v62  ;;  %v2076_v17 = vsel %vm6478_vm5, %v2074_v25, %v2075_v6  ;;  %v7744_v36 = vadd.f32 %v5315_v9, %v7549_v1  ;;  %v1884_v43 = vrot.slane %v1882_v7, 4  ;;  %v5319_v13 = vpop.f32.mrb[34].mxu1 }
 0x191   : > { %v5229_v28 = vpop.f32.mrb[33].mxu0  ;;  %v4920_v49 = vcombine.low %v2073_v35, %v2076_v17  ;;  %v1887_v45 = vrot.slane %v1885_v61, 5  ;;  %v1893_v53 = vrot.slane %v1891_v57, 5  ;;  %v1897_v10 = vrot.slane %v1895_v4, 4  ;;  %v5320_v46 = vpop.f32.mrb[35].mxu1 }
 0x192   : > { %v5231_v26 = vpop.f32.mrb[34].mxu0  ;;  %3924 = vmatprep.mubr.bf16.mxu1 %v4906_v14  ;;  %v1901_v37 = vshll.u32 %v7732_v60, 16  ;;  %v4777_v33 = vrot.slane %v4761_v19, 9  ;;  %v2079_v20 = vrot.slane %v7633_v56, 5  ;;  %v2082_v6 = vrot.slane %v7641_v5, 5 }
 0x193   : > { %v5232_v1 = vpop.f32.mrb[35].mxu0  ;;  %3925 = vmatmul.mubr.bf16.gmra.mrb[132].mxu1 %v4890_v52  ;;  %5673 = vmatmul.mubr.bf16.gmra.mrb[132].mxu0 %v4920_v49  ;;  %v1888_v3 = vor.u32 %v1887_v45, %v1884_v43  ;;  %v1898_v35 = vor.u32 %v1897_v10, %v1893_v53  ;;  %v4891_v25 = vcombine.low %v7713_v23, %v7722_v31  ;;  %v4778_v9 = vrot.slane %v4762_v15, 9  ;;  %v7763_v43 = vld [vmem:[%s6313_s6 + $0xcc] sm:$0xf]  ;;  %v7766_v15 = vld [vmem:[%s6313_s6 + $0xd0] sm:$0xf] }
 0x194   : > { %v1903_v7 = vrot.slane %v1901_v37, 5  ;;  %v2080_v19 = vsel %vm6478_vm5, %v4777_v33, %v2079_v20  ;;  %v2081_v62 = vrot.slane %v2079_v20, 4  ;;  %v2086_v56 = vrot.slane %v7675_v54, 5  ;;  %v7775_v49 = vld [vmem:[%s6313_s6 + $0xd4] sm:$0x1] }
 0x195   : > { %v1889_v5 = vrot.slane %v1888_v3, 4  ;;  %v1899_v52 = vrot.slane %v1898_v35, 4  ;;  %v2089_v61 = vrot.slane %v7687_v24, 5  ;;  %v7756_v57 = vadd.f32 %v5229_v28, %v5228_v0  ;;  %v4763_v45 = vld [vmem:[%s6313_s6 + $0xc0] sm:$0xe] }
 0x196   : > { %v2083_v4 = vsel %vm6478_vm5, %v2081_v62, %v2082_v6  ;;  %v2087_v23 = vsel %vm6478_vm5, %v4778_v9, %v2086_v56  ;;  %v2088_v14 = vrot.slane %v2086_v56, 4  ;;  %v5318_v17 = vadd.f32 %v5317_v21, %v5316_v41  ;;  %v5322_v37 = vpop.f32.mrb[36].mxu1 }
 0x197   : > { %v1894_v54 = vsel %vm6353_vm2, %v1889_v5, %v1893_v53  ;;  %v1904_v24 = vsel %vm6353_vm2, %v1899_v52, %v1903_v7  ;;  %v4921_v0 = vcombine.low %v2080_v19, %v2083_v4  ;;  %v7772_v28 = vadd.f32 %v5232_v1, %v5231_v26  ;;  %v4764_v53 = vld [vmem:[%s6313_s6 + $0xcc] sm:$0xe]  ;;  %v5323_v3 = vpop.f32.mrb[37].mxu1  ;;  %s5982_s6 = scalar_lea.vmem %s5981_s26, 4096 }
 0x198   : > { %v5234_v10 = vpop.f32.mrb[36].mxu0  ;;  %v4907_v33 = vcombine.low %v1894_v54, %v1904_v24  ;;  %v2090_v41 = vsel %vm6478_vm5, %v2088_v14, %v2089_v61  ;;  %v7781_v21 = vadd.f32 %v5318_v17, %v7585_v40  ;;  %v5321_v20 = vadd.f32 %v5320_v46, %v5319_v13  ;;  %v5325_v19 = vpop.f32.mrb[38].mxu1  ;;  %p5984_p0 = scmp.lt.s32.totalorder %s5982_s6, %s5976_s14 }
 0x199   : > { %v5235_v6 = vpop.f32.mrb[37].mxu0  ;;  %5676 = vmatprep.mubr.bf16.mxu0 %v4921_v0  ;;  %v4922_v35 = vcombine.low %v2087_v23, %v2090_v41  ;;  %v1906_v26 = vshrl.u32 %v7763_v43, 16  ;;  %v1909_v1 = vshll.u32 %v7763_v43, 16  ;;  %v1915_v9 = vshll.u32 %v7766_v15, 16  ;;  %v5326_v5 = vpop.f32.mrb[39].mxu1 }
 0x19a   : > { %v5237_v7 = vpop.f32.mrb[38].mxu0  ;;  %3932 = vmatprep.mubr.bf16.mxu1 %v4907_v33  ;;  %v7788_v62 = vadd.f32 %v5321_v20, %v7598_v42  ;;  %v1919_v40 = vshrl.u32 %v7766_v15, 16  ;;  %v1925_v13 = vshll.u32 %v7775_v49, 16  ;;  %v4779_v46 = vrot.slane %v4763_v45, 9  ;;  %p5985_p5 = por %p5984_p0, %p5983_p13 }
 0x19b   : > { %v5238_v56 = vpop.f32.mrb[39].mxu0  ;;  %3933 = vmatmul.mubr.bf16.gmra.mrb[136].mxu1 %v4891_v25  ;;  %5677 = vmatmul.mubr.bf16.gmra.mrb[136].mxu0 %v4922_v35  ;;  %v1908_v52 = vrot.slane %v1906_v26, 4  ;;  %v1911_v61 = vrot.slane %v1909_v1, 5  ;;  %v1917_v4 = vrot.slane %v1915_v9, 5  ;;  %v2093_v23 = vrot.slane %v7722_v31, 5 }
 0x19c   : > { %v1921_v14 = vrot.slane %v1919_v40, 4  ;;  %v1927_v17 = vrot.slane %v1925_v13, 5  ;;  %v2096_v54 = vrot.slane %v7732_v60, 5  ;;  %v4780_v33 = vrot.slane %v4764_v53, 9  ;;  %p5986_p9 = pnand %p5985_p5, %p5979_p12 }
 0x19d   : > { %v1912_v42 = vor.u32 %v1911_v61, %v1908_v52  ;;  %v2094_v24 = vsel %vm6478_vm5, %v4779_v46, %v2093_v23  ;;  %v2095_v0 = vrot.slane %v2093_v23, 4  ;;  %v2100_v41 = vrot.slane %v7766_v15, 5 }
 0x19e   : > { %v1922_v45 = vor.u32 %v1921_v14, %v1917_v4  ;;  %v2103_v25 = vrot.slane %v7775_v49, 5  ;;  %v7798_v20 = vadd.f32 %v5235_v6, %v5234_v10  ;;  %v5324_v26 = vadd.f32 %v5323_v3, %v5322_v37  ;;  %v5328_v9 = vpop.f32.mrb[40].mxu1 }
 0x19f   : > { %v1913_v35 = vrot.slane %v1912_v42, 4  ;;  %v2097_v31 = vsel %vm6478_vm5, %v2095_v0, %v2096_v54  ;;  %v7802_v1 = vadd.f32 %v5238_v56, %v5237_v7  ;;  %v2101_v53 = vsel %vm6478_vm5, %v4780_v33, %v2100_v41  ;;  %v5329_v61 = vpop.f32.mrb[41].mxu1 }
 0x1a0   : > { %v5240_v60 = vpop.f32.mrb[40].mxu0  ;;  %v1923_v40 = vrot.slane %v1922_v45, 4  ;;  %v4923_v13 = vcombine.low %v2094_v24, %v2097_v31  ;;  %v2102_v46 = vrot.slane %v2100_v41, 4  ;;  %v7809_v10 = vadd.f32 %v5324_v26, %v7628_v63  ;;  %v5331_v7 = vpop.f32.mrb[42].mxu1 }
 0x1a1   : > { %v5241_v52 = vpop.f32.mrb[41].mxu0  ;;  %v1918_v49 = vsel %vm6353_vm2, %v1913_v35, %v1917_v4  ;;  %v5327_v6 = vadd.f32 %v5326_v5, %v5325_v19  ;;  %v4892_v23 = vcombine.low %v7763_v43, %v7766_v15  ;;  %v5330_v54 = vadd.f32 %v5329_v61, %v5328_v9  ;;  %v5332_v42 = vpop.f32.mrb[43].mxu1 }
 0x1a2   : > { %v7811_v37 = vadd.f32 %v5241_v52, %v5240_v60  ;;  %v5243_v3 = vpop.f32.mrb[42].mxu0  ;;  %v1928_v56 = vsel %vm6353_vm2, %v1923_v40, %v1927_v17  ;;  %5680 = vmatprep.mubr.bf16.mxu0 %v4923_v13  ;;  %v2104_v14 = vsel %vm6478_vm5, %v2102_v46, %v2103_v25  ;;  %v5333_v17 = vadd.f32 %v5332_v42, %v5331_v7 }
 0x1a3   : > { %v5244_v4 = vpop.f32.mrb[43].mxu0  ;;  %v4908_v63 = vcombine.low %v1918_v49, %v1928_v56  ;;  %v4924_v24 = vcombine.low %v2101_v53, %v2104_v14  ;;  %v7820_v19 = vadd.f32 %v5327_v6, %v7638_v44  ;;  %v7825_v39 = vadd.f32 %v5330_v54, %v7667_v55 }
 0x1a4   : > { %v7822_v5 = vadd.f32 %v5244_v4, %v5243_v3  ;;  %v7828_v29 = vadd.f32 %v5333_v17, %v7680_v47 }
 0x1a5   : > { %3940 = vmatprep.mubr.bf16.mxu1 %v4908_v63  ;;  %5681 = vmatmul.mubr.bf16.gmra.mrb[140].mxu0 %v4924_v24 }
 0x1a6   : > { %3941 = vmatmul.mubr.bf16.gmra.mrb[140].mxu1 %v4892_v23  ;;  %v5334_v15 = vpop.f32.mrb[44].mxu1 }
 0x1a7   : > { %v5335_v33 = vpop.f32.mrb[45].mxu1 }
 0x1a8   : > { %v5246_v43 = vpop.f32.mrb[44].mxu0  ;;  %v5336_v44 = vadd.f32 %v5335_v33, %v5334_v15  ;;  %v5337_v25 = vpop.f32.mrb[46].mxu1 }
 0x1a9   : > { %v5247_v0 = vpop.f32.mrb[45].mxu0  ;;  %v5338_v31 = vpop.f32.mrb[47].mxu1 }
 0x1aa   : > { %v7830_v45 = vadd.f32 %v5247_v0, %v5246_v43  ;;  %v5249_v41 = vpop.f32.mrb[46].mxu0  ;;  %v7833_v55 = vadd.f32 %v5336_v44, %v7717_v2  ;;  %v5339_v60 = vadd.f32 %v5338_v31, %v5337_v25 }
 0x1ab   : > { %v5250_v35 = vpop.f32.mrb[47].mxu0 }
 0x1ac   : > { %v7835_v26 = vadd.f32 %v5250_v35, %v5249_v41  ;;  %v7838_v47 = vadd.f32 %v5339_v60, %v7719_v18 }
 0x1ae   : > { %v5340_v9 = vpop.f32.mrb[48].mxu1 }
 0x1af   : > { %v5341_v13 = vpop.f32.mrb[49].mxu1 }
 0x1b0   : > { %v5404_v40 = vpop.f32.mrb[48].mxu0  ;;  %v5342_v46 = vadd.f32 %v5341_v13, %v5340_v9  ;;  %v5343_v61 = vpop.f32.mrb[50].mxu1 }
 0x1b1   : > { %v5405_v53 = vpop.f32.mrb[49].mxu0  ;;  %v5344_v6 = vpop.f32.mrb[51].mxu1 }
 0x1b2   : > { %v5406_v52 = vadd.f32 %v5405_v53, %v5404_v40  ;;  %v5407_v49 = vpop.f32.mrb[50].mxu0  ;;  %v7841_v7 = vadd.f32 %v5342_v46, %v7756_v57  ;;  %v5345_v56 = vadd.f32 %v5344_v6, %v5343_v61 }
 0x1b3   : > { %v5408_v3 = vpop.f32.mrb[51].mxu0 }
 0x1b4   : > { %v7844_v2 = vadd.f32 %v5406_v52, %v7605_v38  ;;  %v5409_v23 = vadd.f32 %v5408_v3, %v5407_v49  ;;  %v7847_v18 = vadd.f32 %v5345_v56, %v7772_v28 }
 0x1b6   : > { %v7850_v14 = vadd.f32 %v5409_v23, %v7611_v50  ;;  %v5346_v54 = vpop.f32.mrb[52].mxu1 }
 0x1b7   : > { %v5347_v42 = vpop.f32.mrb[53].mxu1 }
 0x1b8   : > { %v5410_v4 = vpop.f32.mrb[52].mxu0  ;;  %v5348_v24 = vadd.f32 %v5347_v42, %v5346_v54  ;;  %v5349_v43 = vpop.f32.mrb[54].mxu1 }
 0x1b9   : > { %v5411_v63 = vpop.f32.mrb[53].mxu0  ;;  %v5350_v15 = vpop.f32.mrb[55].mxu1 }
 0x1ba   : > { %v5412_v17 = vadd.f32 %v5411_v63, %v5410_v4  ;;  %v5413_v57 = vpop.f32.mrb[54].mxu0  ;;  %v7853_v38 = vadd.f32 %v5348_v24, %v7798_v20  ;;  %v5351_v28 = vadd.f32 %v5350_v15, %v5349_v43 }
 0x1bb   : > { %v5414_v0 = vpop.f32.mrb[55].mxu0 }
 0x1bc   : > { %v7856_v33 = vadd.f32 %v5412_v17, %v7647_v58  ;;  %v5415_v44 = vadd.f32 %v5414_v0, %v5413_v57  ;;  %v7859_v50 = vadd.f32 %v5351_v28, %v7802_v1 }
 0x1be   : > { %v7862_v41 = vadd.f32 %v5415_v44, %v7650_v22  ;;  %v5352_v25 = vpop.f32.mrb[56].mxu1 }
 0x1bf   : > { %v5353_v31 = vpop.f32.mrb[57].mxu1 }
 0x1c0   : > { %v5416_v35 = vpop.f32.mrb[56].mxu0  ;;  %v5354_v9 = vadd.f32 %v5353_v31, %v5352_v25  ;;  %v5355_v13 = vpop.f32.mrb[58].mxu1 }
 0x1c1   : > { %v5417_v60 = vpop.f32.mrb[57].mxu0  ;;  %v5356_v53 = vpop.f32.mrb[59].mxu1 }
 0x1c2   : > { %v5418_v40 = vadd.f32 %v5417_v60, %v5416_v35  ;;  %v5419_v20 = vpop.f32.mrb[58].mxu0  ;;  %v7865_v58 = vadd.f32 %v5354_v9, %v7811_v37  ;;  %v5357_v1 = vadd.f32 %v5356_v53, %v5355_v13 }
 0x1c3   : > { %v5420_v46 = vpop.f32.mrb[59].mxu0 }
 0x1c4   : > { %v7868_v52 = vadd.f32 %v5418_v40, %v7678_v30  ;;  %v5421_v61 = vadd.f32 %v5420_v46, %v5419_v20  ;;  %v7871_v22 = vadd.f32 %v5357_v1, %v7822_v5 }
 0x1c6   : > { %v7874_v49 = vadd.f32 %v5421_v61, %v7695_v32  ;;  %v5358_v6 = vpop.f32.mrb[60].mxu1 }
 0x1c7   : > { %v5359_v56 = vpop.f32.mrb[61].mxu1 }
 0x1c8   : > { %v5422_v3 = vpop.f32.mrb[60].mxu0  ;;  %v5360_v54 = vadd.f32 %v5359_v56, %v5358_v6  ;;  %v5361_v42 = vpop.f32.mrb[62].mxu1 }
 0x1c9   : > { %v5423_v23 = vpop.f32.mrb[61].mxu0  ;;  %v5362_v63 = vpop.f32.mrb[63].mxu1 }
 0x1ca   : > { %v5424_v4 = vadd.f32 %v5423_v23, %v5422_v3  ;;  %v5425_v37 = vpop.f32.mrb[62].mxu0  ;;  %v7877_v30 = vadd.f32 %v5360_v54, %v7830_v45  ;;  %v5363_v5 = vadd.f32 %v5362_v63, %v5361_v42 }
 0x1cb   : > { %v5426_v24 = vpop.f32.mrb[63].mxu0 }
 0x1cc   : > { %v7880_v17 = vadd.f32 %v5424_v4, %v7729_v16  ;;  %v5427_v43 = vadd.f32 %v5426_v24, %v5425_v37  ;;  %v7883_v32 = vadd.f32 %v5363_v5, %v7835_v26 }
 0x1ce   : > { %v7886_v57 = vadd.f32 %v5427_v43, %v7744_v36  ;;  %v5364_v15 = vpop.f32.mrb[64].mxu1 }
 0x1cf   : > { %v5365_v28 = vpop.f32.mrb[65].mxu1 }
 0x1d0   : > { %v5428_v0 = vpop.f32.mrb[64].mxu0  ;;  %v5366_v25 = vadd.f32 %v5365_v28, %v5364_v15  ;;  %v5367_v31 = vpop.f32.mrb[66].mxu1 }
 0x1d1   : > { %v5429_v44 = vpop.f32.mrb[65].mxu0  ;;  %v5368_v60 = vpop.f32.mrb[67].mxu1 }
 0x1d2   : > { %v5430_v35 = vadd.f32 %v5429_v44, %v5428_v0  ;;  %v5431_v45 = vpop.f32.mrb[66].mxu0  ;;  %v7889_v16 = vadd.f32 %v5366_v25, %v7412_v48  ;;  %v5369_v26 = vadd.f32 %v5368_v60, %v5367_v31 }
 0x1d3   : > { %v5432_v9 = vpop.f32.mrb[67].mxu0 }
 0x1d4   : > { %v7892_v40 = vadd.f32 %v5430_v35, %v7781_v21  ;;  %v5433_v13 = vadd.f32 %v5432_v9, %v5431_v45  ;;  %v7895_v36 = vadd.f32 %v5369_v26, %v7419_v51 }
 0x1d6   : > { %v7898_v20 = vadd.f32 %v5433_v13, %v7788_v62  ;;  %v5370_v53 = vpop.f32.mrb[68].mxu1 }
 0x1d7   : > { %v5371_v1 = vpop.f32.mrb[69].mxu1 }
 0x1d8   : > { %v5434_v46 = vpop.f32.mrb[68].mxu0  ;;  %v5372_v6 = vadd.f32 %v5371_v1, %v5370_v53  ;;  %v5373_v56 = vpop.f32.mrb[70].mxu1 }
 0x1d9   : > { %v5435_v61 = vpop.f32.mrb[69].mxu0  ;;  %v5374_v23 = vpop.f32.mrb[71].mxu1 }
 0x1da   : > { %v5436_v3 = vadd.f32 %v5435_v61, %v5434_v46  ;;  %v5437_v48 = vpop.f32.mrb[70].mxu0  ;;  %v7901_v21 = vadd.f32 %v5372_v6, %v7457_v11  ;;  %v5375_v51 = vadd.f32 %v5374_v23, %v5373_v56 }
 0x1db   : > { %v5438_v54 = vpop.f32.mrb[71].mxu0 }
 0x1dc   : > { %v7904_v4 = vadd.f32 %v5436_v3, %v7809_v10  ;;  %v5439_v42 = vadd.f32 %v5438_v54, %v5437_v48  ;;  %v7907_v62 = vadd.f32 %v5375_v51, %v7466_v59 }
 0x1de   : > { %v7910_v37 = vadd.f32 %v5439_v42, %v7820_v19  ;;  %v5376_v63 = vpop.f32.mrb[72].mxu1 }
 0x1df   : > { %v5377_v5 = vpop.f32.mrb[73].mxu1 }
 0x1e0   : > { %v5440_v24 = vpop.f32.mrb[72].mxu0  ;;  %v5378_v15 = vadd.f32 %v5377_v5, %v5376_v63  ;;  %v5379_v28 = vpop.f32.mrb[74].mxu1 }
 0x1e1   : > { %v5441_v43 = vpop.f32.mrb[73].mxu0  ;;  %v5380_v44 = vpop.f32.mrb[75].mxu1 }
 0x1e2   : > { %v5442_v0 = vadd.f32 %v5441_v43, %v5440_v24  ;;  %v5443_v11 = vpop.f32.mrb[74].mxu0  ;;  %v7913_v10 = vadd.f32 %v5378_v15, %v7509_v12  ;;  %v5381_v59 = vadd.f32 %v5380_v44, %v5379_v28 }
 0x1e3   : > { %v5444_v25 = vpop.f32.mrb[75].mxu0 }
 0x1e4   : > { %v7916_v35 = vadd.f32 %v5442_v0, %v7825_v39  ;;  %v5445_v31 = vadd.f32 %v5444_v25, %v5443_v11  ;;  %v7919_v19 = vadd.f32 %v5381_v59, %v7521_v8 }
 0x1e6   : > { %v7922_v45 = vadd.f32 %v5445_v31, %v7828_v29  ;;  %v5382_v60 = vpop.f32.mrb[76].mxu1 }
 0x1e7   : > { %v5383_v26 = vpop.f32.mrb[77].mxu1 }
 0x1e8   : > { %v5446_v9 = vpop.f32.mrb[76].mxu0  ;;  %v5384_v53 = vadd.f32 %v5383_v26, %v5382_v60  ;;  %v5385_v1 = vpop.f32.mrb[78].mxu1 }
 0x1e9   : > { %v5447_v13 = vpop.f32.mrb[77].mxu0  ;;  %v5386_v61 = vpop.f32.mrb[79].mxu1 }
 0x1ea   : > { %v5448_v46 = vadd.f32 %v5447_v13, %v5446_v9  ;;  %v5449_v12 = vpop.f32.mrb[78].mxu0  ;;  %v7925_v39 = vadd.f32 %v5384_v53, %v7558_v34  ;;  %v5387_v8 = vadd.f32 %v5386_v61, %v5385_v1 }
 0x1eb   : > { %v5450_v6 = vpop.f32.mrb[79].mxu0 }
 0x1ec   : > { %v7928_v3 = vadd.f32 %v5448_v46, %v7833_v55  ;;  %v5451_v56 = vadd.f32 %v5450_v6, %v5449_v12  ;;  %v7931_v29 = vadd.f32 %v5387_v8, %v7566_v27 }
 0x1ee   : > { %v7934_v48 = vadd.f32 %v5451_v56, %v7838_v47  ;;  %v5516_v54 = vpop.f32.mrb[80].mxu1 }
 0x1ef   : > { %v5517_v42 = vpop.f32.mrb[81].mxu1 }
 0x1f0   : > { %v5452_v23 = vpop.f32.mrb[80].mxu0  ;;  %v5518_v24 = vadd.f32 %v5517_v42, %v5516_v54  ;;  %v5519_v34 = vpop.f32.mrb[82].mxu1 }
 0x1f1   : > { %v5453_v51 = vpop.f32.mrb[81].mxu0  ;;  %v5520_v15 = vpop.f32.mrb[83].mxu1 }
 0x1f2   : > { %v5454_v63 = vadd.f32 %v5453_v51, %v5452_v23  ;;  %v5455_v5 = vpop.f32.mrb[82].mxu0  ;;  %v5521_v28 = vadd.f32 %v5520_v15, %v5519_v34  ;;  %v7940_v27 = vadd.f32 %v5518_v24, %v7844_v2  ;;  %v6128_v15 = vmov 0.0  }
 0x1f3   : > { %v5456_v43 = vpop.f32.mrb[83].mxu0  ;;  %4274 = vst [vmem:[%s7973_s22] sm:$0x1] %v6128_v15  ;;  %4275 = vst [vmem:[%s7977_s23] sm:$0x1] %v6128_v15 }
 0x1f4   : > { %v7937_v55 = vadd.f32 %v5454_v63, %v7841_v7  ;;  %v5457_v0 = vadd.f32 %v5456_v43, %v5455_v5  ;;  %v7946_v11 = vadd.f32 %v5521_v28, %v7850_v14 }
 0x1f6   : > { %v7943_v47 = vadd.f32 %v5457_v0, %v7847_v18  ;;  %v5522_v25 = vpop.f32.mrb[84].mxu1 }
 0x1f7   : > { %v5523_v31 = vpop.f32.mrb[85].mxu1 }
 0x1f8   : > { %v5458_v44 = vpop.f32.mrb[84].mxu0  ;;  %v5524_v9 = vadd.f32 %v5523_v31, %v5522_v25  ;;  %v5525_v7 = vpop.f32.mrb[86].mxu1 }
 0x1f9   : > { %v5459_v59 = vpop.f32.mrb[85].mxu0  ;;  %v5526_v53 = vpop.f32.mrb[87].mxu1 }
 0x1fa   : > { %v5460_v60 = vadd.f32 %v5459_v59, %v5458_v44  ;;  %v5461_v26 = vpop.f32.mrb[86].mxu0  ;;  %v5527_v1 = vadd.f32 %v5526_v53, %v5525_v7  ;;  %v7952_v18 = vadd.f32 %v5524_v9, %v7856_v33 }
 0x1fb   : > { %v5462_v13 = vpop.f32.mrb[87].mxu0 }
 0x1fc   : > { %v7949_v46 = vadd.f32 %v5460_v60, %v7853_v38  ;;  %v5463_v2 = vadd.f32 %v5462_v13, %v5461_v26  ;;  %v7958_v12 = vadd.f32 %v5527_v1, %v7862_v41 }
 0x1fe   : > { %v7955_v14 = vadd.f32 %v5463_v2, %v7859_v50 }
 0x1ff   : > { %v5528_v61 = vpop.f32.mrb[88].mxu1 }
 0x200   : > { %v5529_v6 = vpop.f32.mrb[89].mxu1 }
 0x201   : > { %v5464_v8 = vpop.f32.mrb[88].mxu0  ;;  %v5530_v56 = vadd.f32 %v5529_v6, %v5528_v61  ;;  %v5531_v23 = vpop.f32.mrb[90].mxu1 }
 0x202   : > { %v5465_v54 = vpop.f32.mrb[89].mxu0  ;;  %v5532_v38 = vpop.f32.mrb[91].mxu1 }
 0x203   : > { %v5466_v51 = vadd.f32 %v5465_v54, %v5464_v8  ;;  %v5467_v42 = vpop.f32.mrb[90].mxu0  ;;  %v5533_v63 = vadd.f32 %v5532_v38, %v5531_v23  ;;  %v7961_v33 = vadd.f32 %v5530_v56, %v7868_v52 }
 0x204   : > { %v5468_v50 = vpop.f32.mrb[91].mxu0 }
 0x205   : > { %v7964_v24 = vadd.f32 %v5466_v51, %v7865_v58  ;;  %v5469_v41 = vadd.f32 %v5468_v50, %v5467_v42  ;;  %v7967_v5 = vadd.f32 %v5533_v63, %v7874_v49 }
 0x207   : > { %v7970_v34 = vadd.f32 %v5469_v41, %v7871_v22 }
 0x208   : > { %v5534_v43 = vpop.f32.mrb[92].mxu1 }
 0x209   : > { %v5535_v0 = vpop.f32.mrb[93].mxu1 }
 0x20a   : > { %v5470_v52 = vpop.f32.mrb[92].mxu0  ;;  %v5536_v28 = vadd.f32 %v5535_v0, %v5534_v43  ;;  %v5537_v44 = vpop.f32.mrb[94].mxu1 }
 0x20b   : > { %v5471_v58 = vpop.f32.mrb[93].mxu0  ;;  %v5538_v49 = vpop.f32.mrb[95].mxu1 }
 0x20c   : > { %v5472_v25 = vadd.f32 %v5471_v58, %v5470_v52  ;;  %v5473_v59 = vpop.f32.mrb[94].mxu0  ;;  %v5539_v22 = vadd.f32 %v5538_v49, %v5537_v44  ;;  %v7981_v31 = vadd.f32 %v5536_v28, %v7880_v17 }
 0x20d   : > { %v5474_v60 = vpop.f32.mrb[95].mxu0 }
 0x20e   : > { %v7984_v9 = vadd.f32 %v5472_v25, %v7877_v30  ;;  %v5475_v26 = vadd.f32 %v5474_v60, %v5473_v59  ;;  %v7987_v7 = vadd.f32 %v5539_v22, %v7886_v57 }
 0x210   : > { %v7990_v13 = vadd.f32 %v5475_v26, %v7883_v32 }
 0x211   : > { %v5540_v53 = vpop.f32.mrb[96].mxu1 }
 0x212   : > { %v5541_v2 = vpop.f32.mrb[97].mxu1  ;;  %v5476_v1 = vpop.f32.mrb[96].mxu0 }
 0x213   : > { %v5542_v61 = vadd.f32 %v5541_v2, %v5540_v53  ;;  %v5543_v6 = vpop.f32.mrb[98].mxu1  ;;  %v5477_v8 = vpop.f32.mrb[97].mxu0 }
 0x214   : > { %v5544_v56 = vpop.f32.mrb[99].mxu1  ;;  %v5478_v17 = vadd.f32 %v5477_v8, %v5476_v1  ;;  %v5479_v23 = vpop.f32.mrb[98].mxu0 }
 0x215   : > { %v5545_v54 = vadd.f32 %v5544_v56, %v5543_v6  ;;  %v7993_v30 = vadd.f32 %v5542_v61, %v7892_v40  ;;  %v5480_v38 = vpop.f32.mrb[99].mxu0 }
 0x216   : > { %v7996_v57 = vadd.f32 %v5478_v17, %v7889_v16  ;;  %v5481_v51 = vadd.f32 %v5480_v38, %v5479_v23 }
 0x217   : > { %v7999_v32 = vadd.f32 %v5545_v54, %v7898_v20 }
 0x218   : > { %v8002_v42 = vadd.f32 %v5481_v51, %v7895_v36 }
 0x21a   : > { %v5546_v63 = vpop.f32.mrb[100].mxu1 }
 0x21b   : > { %v5547_v50 = vpop.f32.mrb[101].mxu1 }
 0x21c   : > { %v5482_v41 = vpop.f32.mrb[100].mxu0  ;;  %v5548_v43 = vadd.f32 %v5547_v50, %v5546_v63  ;;  %v5549_v15 = vpop.f32.mrb[102].mxu1 }
 0x21d   : > { %v5483_v0 = vpop.f32.mrb[101].mxu0  ;;  %v5550_v52 = vpop.f32.mrb[103].mxu1 }
 0x21e   : > { %v5484_v40 = vadd.f32 %v5483_v0, %v5482_v41  ;;  %v5485_v28 = vpop.f32.mrb[102].mxu0  ;;  %v5551_v44 = vadd.f32 %v5550_v52, %v5549_v15  ;;  %v8005_v16 = vadd.f32 %v5548_v43, %v7904_v4 }
 0x21f   : > { %v5486_v58 = vpop.f32.mrb[103].mxu0 }
 0x220   : > { %v8008_v20 = vadd.f32 %v5484_v40, %v7901_v21  ;;  %v5487_v49 = vadd.f32 %v5486_v58, %v5485_v28  ;;  %v8011_v36 = vadd.f32 %v5551_v44, %v7910_v37 }
 0x222   : > { %v8014_v25 = vadd.f32 %v5487_v49, %v7907_v62 }
 0x224   : > { %v5552_v59 = vpop.f32.mrb[104].mxu1 }
 0x225   : > { %v5553_v22 = vpop.f32.mrb[105].mxu1 }
 0x226   : > { %v5554_v60 = vadd.f32 %v5553_v22, %v5552_v59  ;;  %v5555_v26 = vpop.f32.mrb[106].mxu1 }
 0x227   : > { %v5556_v2 = vpop.f32.mrb[107].mxu1 }
 0x228   : > { %v5488_v53 = vpop.f32.mrb[104].mxu0  ;;  %v5557_v4 = vadd.f32 %v5556_v2, %v5555_v26  ;;  %v8017_v61 = vadd.f32 %v5554_v60, %v7916_v35 }
 0x229   : > { %v5489_v1 = vpop.f32.mrb[105].mxu0 }
 0x22a   : > { %v5490_v21 = vadd.f32 %v5489_v1, %v5488_v53  ;;  %v5491_v6 = vpop.f32.mrb[106].mxu0  ;;  %v8020_v37 = vadd.f32 %v5557_v4, %v7922_v45 }
 0x22b   : > { %v5492_v8 = vpop.f32.mrb[107].mxu0 }
 0x22c   : > { %v8023_v62 = vadd.f32 %v5490_v21, %v7913_v10  ;;  %v5493_v56 = vadd.f32 %v5492_v8, %v5491_v6 }
 0x22e   : > { %v8026_v17 = vadd.f32 %v5493_v56, %v7919_v19 }
 0x22f   : > { %v5558_v23 = vpop.f32.mrb[108].mxu1 }
 0x230   : > { %v5559_v54 = vpop.f32.mrb[109].mxu1 }
 0x231   : > { %v5560_v38 = vadd.f32 %v5559_v54, %v5558_v23  ;;  %v5561_v51 = vpop.f32.mrb[110].mxu1  ;;  %v5494_v63 = vpop.f32.mrb[108].mxu0 }
 0x232   : > { %v5562_v35 = vpop.f32.mrb[111].mxu1  ;;  %v5495_v50 = vpop.f32.mrb[109].mxu0 }
 0x233   : > { %v5563_v41 = vadd.f32 %v5562_v35, %v5561_v51  ;;  %v8029_v43 = vadd.f32 %v5560_v38, %v7928_v3  ;;  %v5496_v45 = vadd.f32 %v5495_v50, %v5494_v63  ;;  %v5497_v15 = vpop.f32.mrb[110].mxu0 }
 0x234   : > { %v5498_v10 = vpop.f32.mrb[111].mxu0 }
 0x235   : > { %v8032_v0 = vadd.f32 %v5563_v41, %v7934_v48  ;;  %v8035_v19 = vadd.f32 %v5496_v45, %v7925_v39  ;;  %v5499_v52 = vadd.f32 %v5498_v10, %v5497_v15 }
 0x237   : > { %v8038_v40 = vadd.f32 %v5499_v52, %v7931_v29  ;;  %v5564_v28 = vpop.f32.mrb[112].mxu1 }
 0x238   : > { %v5565_v44 = vpop.f32.mrb[113].mxu1 }
 0x239   : > { %v5654_v58 = vpop.f32.mrb[112].mxu0  ;;  %v5566_v49 = vadd.f32 %v5565_v44, %v5564_v28  ;;  %v5567_v59 = vpop.f32.mrb[114].mxu1 }
 0x23a   : > { %v3992_v3 = vadd.f32 %v5654_v58, %v7952_v18  ;;  %v3983_v22 = vpop.f32.mrb[113].mxu0  ;;  %v5568_v60 = vpop.f32.mrb[115].mxu1 }
 0x23b   : > { %v3984_v48 = vadd.f32 %v3983_v22, %v7940_v27  ;;  %v5655_v26 = vpop.f32.mrb[114].mxu0  ;;  %v5569_v53 = vadd.f32 %v5568_v60, %v5567_v59  ;;  %v8044_v39 = vadd.f32 %v5566_v49, %v7937_v55 }
 0x23c   : > { %v3995_v29 = vadd.f32 %v5655_v26, %v7958_v12  ;;  %v3986_v2 = vpop.f32.mrb[115].mxu0  ;;  %v4319_v55 = vmul.f32 %v3992_v3, %v3992_v3 }
 0x23d   : > { %v3987_v1 = vadd.f32 %v3986_v2, %v7946_v11  ;;  %v8049_v4 = vadd.f32 %v5569_v53, %v7943_v47  ;;  %v4317_v18 = vmul.f32 %v3984_v48, %v3984_v48 }
 0x23e   : > { %v5077_v21 = vpack.c.bf16 %v3995_v29, %v3992_v3  ;;  %v4320_v11 = vmul.f32 %v3995_v29, %v3995_v29 }
 0x23f   : > { %v5072_v6 = vpack.c.bf16 %v3987_v1, %v3984_v48  ;;  %v4277_v8 = vadd.f32 %v3987_v1, %v3984_v48  ;;  %v4318_v56 = vmul.f32 %v3987_v1, %v3987_v1 }
 0x240   : > { %5149 = vst [vmem:[%s8051_s12 + $0x8] sm:$0xff] %v5077_v21  }
 0x241   : > { %5073 = vst [vmem:[%s8051_s12] sm:$0xff] %v5072_v6   ;;  %v4278_v27 = vadd.f32 %v4277_v8, %v3992_v3  ;;  %v4349_v12 = vadd.f32 %v4318_v56, %v4317_v18  ;;  %v5570_v23 = vpop.f32.mrb[116].mxu1  ;;  %v5658_v54 = vpop.f32.mrb[116].mxu0 }
 0x242   : > { %v4008_v47 = vadd.f32 %v5658_v54, %v7981_v31  ;;  %v5571_v38 = vpop.f32.mrb[117].mxu1  ;;  %v3999_v51 = vpop.f32.mrb[117].mxu0 }
 0x243   : > { %v4350_v63 = vadd.f32 %v4349_v12, %v4319_v55  ;;  %v5572_v35 = vadd.f32 %v5571_v38, %v5570_v23  ;;  %v4000_v50 = vadd.f32 %v3999_v51, %v7961_v33  ;;  %v4279_v41 = vadd.f32 %v4278_v27, %v3995_v29  ;;  %v5573_v45 = vpop.f32.mrb[118].mxu1  ;;  %v5659_v15 = vpop.f32.mrb[118].mxu0 }
 0x244   : > { %v4011_v10 = vadd.f32 %v5659_v15, %v7987_v7  ;;  %v5574_v52 = vpop.f32.mrb[119].mxu1  ;;  %v4002_v28 = vpop.f32.mrb[119].mxu0  ;;  %v4323_v2 = vmul.f32 %v4008_v47, %v4008_v47 }
 0x245   : > { %v4280_v44 = vadd.f32 %v4279_v41, %v4000_v50  ;;  %v4321_v58 = vmul.f32 %v4000_v50, %v4000_v50  ;;  %v4351_v49 = vadd.f32 %v4350_v63, %v4320_v11  ;;  %v5575_v59 = vadd.f32 %v5574_v52, %v5573_v45 }
 0x246   : > { %v5087_v31 = vpack.c.bf16 %v4011_v10, %v4008_v47  ;;  %v4003_v3 = vadd.f32 %v4002_v28, %v7967_v5  ;;  %v8060_v22 = vadd.f32 %v5572_v35, %v7949_v46  ;;  %v4324_v55 = vmul.f32 %v4011_v10, %v4011_v10 }
 0x247   : > { %v4352_v33 = vadd.f32 %v4351_v49, %v4321_v58  ;;  %v8063_v60 = vadd.f32 %v5575_v59, %v7955_v14 }
 0x248   : > { %5151 = vst [vmem:[%s8051_s12 + $0x18] sm:$0xff] %v5087_v31   ;;  %v5082_v48 = vpack.c.bf16 %v4003_v3, %v4000_v50  ;;  %v4281_v7 = vadd.f32 %v4280_v44, %v4003_v3  ;;  %v4322_v26 = vmul.f32 %v4003_v3, %v4003_v3 }
 0x249   : > { %v5576_v53 = vpop.f32.mrb[120].mxu1  ;;  %v5662_v29 = vpop.f32.mrb[120].mxu0 }
 0x24a   : > { %5150 = vst [vmem:[%s8051_s12 + $0x10] sm:$0xff] %v5082_v48   ;;  %v4282_v1 = vadd.f32 %v4281_v7, %v4008_v47  ;;  %v4353_v21 = vadd.f32 %v4352_v33, %v4322_v26  ;;  %v4024_v18 = vadd.f32 %v5662_v29, %v8005_v16  ;;  %v5577_v5 = vpop.f32.mrb[121].mxu1  ;;  %v4015_v6 = vpop.f32.mrb[121].mxu0 }
 0x24b   : > { %v5578_v46 = vadd.f32 %v5577_v5, %v5576_v53  ;;  %v4016_v8 = vadd.f32 %v4015_v6, %v7993_v30  ;;  %v5579_v56 = vpop.f32.mrb[122].mxu1  ;;  %v5663_v14 = vpop.f32.mrb[122].mxu0 }
 0x24c   : > { %v4354_v27 = vadd.f32 %v4353_v21, %v4323_v2  ;;  %v4283_v12 = vadd.f32 %v4282_v1, %v4011_v10  ;;  %v4027_v23 = vadd.f32 %v5663_v14, %v8011_v36  ;;  %v5580_v54 = vpop.f32.mrb[123].mxu1  ;;  %v4018_v11 = vpop.f32.mrb[123].mxu0  ;;  %v4327_v52 = vmul.f32 %v4024_v18, %v4024_v18 }
 0x24d   : > { %v4325_v47 = vmul.f32 %v4016_v8, %v4016_v8  ;;  %v5581_v38 = vadd.f32 %v5580_v54, %v5579_v56  ;;  %v4019_v16 = vadd.f32 %v4018_v11, %v7999_v32  ;;  %v8072_v51 = vadd.f32 %v5578_v46, %v7964_v24 }
 0x24e   : > { %v4284_v63 = vadd.f32 %v4283_v12, %v4016_v8  ;;  %v4355_v30 = vadd.f32 %v4354_v27, %v4324_v55  ;;  %v5097_v35 = vpack.c.bf16 %v4027_v23, %v4024_v18  ;;  %v4328_v31 = vmul.f32 %v4027_v23, %v4027_v23 }
 0x24f   : > { %v5092_v50 = vpack.c.bf16 %v4019_v16, %v4016_v8  ;;  %v4326_v41 = vmul.f32 %v4019_v16, %v4019_v16  ;;  %v8075_v45 = vadd.f32 %v5581_v38, %v7970_v34 }
 0x250   : > { %v4356_v15 = vadd.f32 %v4355_v30, %v4325_v47  ;;  %5153 = vst [vmem:[%s8051_s12 + $0x28] sm:$0xff] %v5097_v35   ;;  %v4285_v36 = vadd.f32 %v4284_v63, %v4019_v16 }
 0x251   : > { %5152 = vst [vmem:[%s8051_s12 + $0x20] sm:$0xff] %v5092_v50   ;;  %v5666_v10 = vpop.f32.mrb[124].mxu0 }
 0x252   : > { %v4286_v28 = vadd.f32 %v4285_v36, %v4024_v18  ;;  %v4357_v44 = vadd.f32 %v4356_v15, %v4326_v41  ;;  %v4040_v32 = vadd.f32 %v5666_v10, %v8029_v43  ;;  %v4031_v24 = vpop.f32.mrb[125].mxu0 }
 0x253   : > { %v5582_v58 = vpop.f32.mrb[124].mxu1  ;;  %v4032_v49 = vadd.f32 %v4031_v24, %v8017_v61  ;;  %v5667_v59 = vpop.f32.mrb[126].mxu0 }
 0x254   : > { %v4358_v3 = vadd.f32 %v4357_v44, %v4327_v52  ;;  %v5583_v33 = vpop.f32.mrb[125].mxu1  ;;  %v4287_v34 = vadd.f32 %v4286_v28, %v4027_v23  ;;  %v4043_v48 = vadd.f32 %v5667_v59, %v8032_v0  ;;  %v4034_v7 = vpop.f32.mrb[127].mxu0  ;;  %v4331_v14 = vmul.f32 %v4040_v32, %v4040_v32 }
 0x255   : > { %v5584_v26 = vadd.f32 %v5583_v33, %v5582_v58  ;;  %v4329_v53 = vmul.f32 %v4032_v49, %v4032_v49  ;;  %v5585_v29 = vpop.f32.mrb[126].mxu1  ;;  %v4035_v2 = vadd.f32 %v4034_v7, %v8020_v37 }
 0x256   : > { %v4288_v43 = vadd.f32 %v4287_v34, %v4032_v49  ;;  %v4359_v1 = vadd.f32 %v4358_v3, %v4328_v31  ;;  %v5107_v21 = vpack.c.bf16 %v4043_v48, %v4040_v32  ;;  %v5586_v18 = vpop.f32.mrb[127].mxu1  ;;  %v4332_v37 = vmul.f32 %v4043_v48, %v4043_v48 }
 0x257   : > { %v5587_v61 = vadd.f32 %v5586_v18, %v5585_v29  ;;  %v5102_v5 = vpack.c.bf16 %v4035_v2, %v4032_v49  ;;  %v4330_v6 = vmul.f32 %v4035_v2, %v4035_v2  ;;  %v3911_v46 = vadd.f32 %v5584_v26, %v7984_v9 }
 0x258   : > { %v4360_v8 = vadd.f32 %v4359_v1, %v4329_v53  ;;  %5155 = vst [vmem:[%s8051_s12 + $0x38] sm:$0xff] %v5107_v21   ;;  %v4289_v56 = vadd.f32 %v4288_v43, %v4035_v2 }
 0x259   : > { %5154 = vst [vmem:[%s8051_s12 + $0x30] sm:$0xff] %v5102_v5   ;;  %v3914_v0 = vadd.f32 %v5587_v61, %v7990_v13 }
 0x25a   : > { %v4290_v55 = vadd.f32 %v4289_v56, %v4040_v32  ;;  %v4361_v27 = vadd.f32 %v4360_v8, %v4330_v6 }
 0x25b   : > { %v5670_v12 = vpop.f32.mrb[128].mxu0 }
 0x25c   : > { %v4362_v23 = vadd.f32 %v4361_v27, %v4331_v14  ;;  %v4056_v54 = vadd.f32 %v5670_v12, %v8060_v22  ;;  %v4047_v11 = vpop.f32.mrb[129].mxu0  ;;  %v4291_v47 = vadd.f32 %v4290_v55, %v4043_v48 }
 0x25d   : > { %v5588_v38 = vpop.f32.mrb[128].mxu1  ;;  %v4048_v16 = vadd.f32 %v4047_v11, %v8044_v39  ;;  %v5671_v9 = vpop.f32.mrb[130].mxu0 }
 0x25e   : > { %v5589_v63 = vpop.f32.mrb[129].mxu1  ;;  %v4363_v30 = vadd.f32 %v4362_v23, %v4332_v37  ;;  %v4059_v35 = vadd.f32 %v5671_v9, %v8063_v60  ;;  %v4050_v13 = vpop.f32.mrb[131].mxu0  ;;  %v4335_v59 = vmul.f32 %v4056_v54, %v4056_v54 }
 0x25f   : > { %v5590_v50 = vadd.f32 %v5589_v63, %v5588_v38  ;;  %v4292_v41 = vadd.f32 %v4291_v47, %v4048_v16  ;;  %v4333_v15 = vmul.f32 %v4048_v16, %v4048_v16  ;;  %v5591_v36 = vpop.f32.mrb[130].mxu1  ;;  %v4051_v10 = vadd.f32 %v4050_v13, %v8049_v4 }
 0x260   : > { %v5117_v22 = vpack.c.bf16 %v4059_v35, %v4056_v54  ;;  %v5592_v52 = vpop.f32.mrb[131].mxu1  ;;  %v4336_v33 = vmul.f32 %v4059_v35, %v4059_v35 }
 0x261   : > { %v4364_v28 = vadd.f32 %v4363_v30, %v4333_v15  ;;  %v5593_v44 = vadd.f32 %v5592_v52, %v5591_v36  ;;  %v5112_v32 = vpack.c.bf16 %v4051_v10, %v4048_v16  ;;  %v4293_v39 = vadd.f32 %v4292_v41, %v4051_v10 }
 0x262   : > { %5157 = vst [vmem:[%s8051_s12 + $0x48] sm:$0xff] %v5117_v22   ;;  %v4334_v24 = vmul.f32 %v4051_v10, %v4051_v10  ;;  %v3919_v58 = vadd.f32 %v5590_v50, %v7996_v57 }
 0x263   : > { %5156 = vst [vmem:[%s8051_s12 + $0x40] sm:$0xff] %v5112_v32   ;;  %v4294_v60 = vadd.f32 %v4293_v39, %v4056_v54  ;;  %v3922_v49 = vadd.f32 %v5593_v44, %v8002_v42 }
 0x264   : > { %v4365_v31 = vadd.f32 %v4364_v28, %v4334_v24 }
 0x265   : > { %v4295_v3 = vadd.f32 %v4294_v60, %v4059_v35 }
 0x266   : > { %v4366_v34 = vadd.f32 %v4365_v31, %v4335_v59  ;;  %v5594_v4 = vpop.f32.mrb[132].mxu1  ;;  %v5674_v48 = vpop.f32.mrb[132].mxu0 }
 0x267   : > { %v4072_v7 = vadd.f32 %v5674_v48, %v3911_v46  ;;  %v5595_v26 = vpop.f32.mrb[133].mxu1  ;;  %v4063_v53 = vpop.f32.mrb[133].mxu0 }
 0x268   : > { %v5596_v29 = vadd.f32 %v5595_v26, %v5594_v4  ;;  %v4064_v2 = vadd.f32 %v4063_v53, %v8072_v51  ;;  %v4367_v43 = vadd.f32 %v4366_v34, %v4336_v33  ;;  %v5597_v57 = vpop.f32.mrb[134].mxu1  ;;  %v5675_v1 = vpop.f32.mrb[134].mxu0 }
 0x269   : > { %v4075_v21 = vadd.f32 %v5675_v1, %v3914_v0  ;;  %v5598_v42 = vpop.f32.mrb[135].mxu1  ;;  %v4066_v18 = vpop.f32.mrb[135].mxu0  ;;  %v4339_v37 = vmul.f32 %v4072_v7, %v4072_v7 }
 0x26a   : > { %v4296_v61 = vadd.f32 %v4295_v3, %v4064_v2  ;;  %v4337_v5 = vmul.f32 %v4064_v2, %v4064_v2  ;;  %v5599_v6 = vadd.f32 %v5598_v42, %v5597_v57  ;;  %v4067_v8 = vadd.f32 %v4066_v18, %v8075_v45 }
 0x26b   : > { %v5127_v56 = vpack.c.bf16 %v4075_v21, %v4072_v7  ;;  %v3927_v46 = vadd.f32 %v5596_v29, %v8008_v20  ;;  %v4340_v47 = vmul.f32 %v4075_v21, %v4075_v21 }
 0x26c   : > { %v4368_v14 = vadd.f32 %v4367_v43, %v4337_v5  ;;  %v5122_v55 = vpack.c.bf16 %v4067_v8, %v4064_v2  ;;  %v4297_v27 = vadd.f32 %v4296_v61, %v4067_v8  ;;  %v4338_v51 = vmul.f32 %v4067_v8, %v4067_v8 }
 0x26d   : > { %5159 = vst [vmem:[%s8051_s12 + $0x58] sm:$0xff] %v5127_v56   ;;  %v3930_v12 = vadd.f32 %v5599_v6, %v8014_v25 }
 0x26e   : > { %5158 = vst [vmem:[%s8051_s12 + $0x50] sm:$0xff] %v5122_v55   ;;  %v4298_v0 = vadd.f32 %v4297_v27, %v4072_v7  ;;  %v4369_v23 = vadd.f32 %v4368_v14, %v4338_v51  ;;  %v5600_v54 = vpop.f32.mrb[136].mxu1  ;;  %v5678_v11 = vpop.f32.mrb[136].mxu0 }
 0x26f   : > { %v4088_v38 = vadd.f32 %v5678_v11, %v3927_v46  ;;  %v5601_v16 = vpop.f32.mrb[137].mxu1  ;;  %v4079_v45 = vpop.f32.mrb[137].mxu0 }
 0x270   : > { %v4370_v9 = vadd.f32 %v4369_v23, %v4339_v37  ;;  %v5602_v63 = vadd.f32 %v5601_v16, %v5600_v54  ;;  %v4080_v20 = vadd.f32 %v4079_v45, %v3919_v58  ;;  %v4299_v30 = vadd.f32 %v4298_v0, %v4075_v21  ;;  %v5603_v35 = vpop.f32.mrb[138].mxu1  ;;  %v5679_v13 = vpop.f32.mrb[138].mxu0 }
 0x271   : > { %v4091_v50 = vadd.f32 %v5679_v13, %v3930_v12  ;;  %v5604_v41 = vpop.f32.mrb[139].mxu1  ;;  %v4082_v25 = vpop.f32.mrb[139].mxu0  ;;  %v4343_v59 = vmul.f32 %v4088_v38, %v4088_v38 }
 0x272   : > { %v4300_v15 = vadd.f32 %v4299_v30, %v4080_v20  ;;  %v4341_v36 = vmul.f32 %v4080_v20, %v4080_v20  ;;  %v4371_v10 = vadd.f32 %v4370_v9, %v4340_v47  ;;  %v5605_v22 = vadd.f32 %v5604_v41, %v5603_v35 }
 0x273   : > { %v5137_v52 = vpack.c.bf16 %v4091_v50, %v4088_v38  ;;  %v4083_v28 = vadd.f32 %v4082_v25, %v3922_v49  ;;  %v3935_v44 = vadd.f32 %v5602_v63, %v8023_v62  ;;  %v4344_v34 = vmul.f32 %v4091_v50, %v4091_v50 }
 0x274   : > { %v4372_v32 = vadd.f32 %v4371_v10, %v4341_v36  ;;  %v3938_v39 = vadd.f32 %v5605_v22, %v8026_v17 }
 0x275   : > { %5161 = vst [vmem:[%s8051_s12 + $0x68] sm:$0xff] %v5137_v52   ;;  %v5132_v24 = vpack.c.bf16 %v4083_v28, %v4080_v20  ;;  %v4301_v58 = vadd.f32 %v4300_v15, %v4083_v28  ;;  %v4342_v60 = vmul.f32 %v4083_v28, %v4083_v28 }
 0x277   : > { %5160 = vst [vmem:[%s8051_s12 + $0x60] sm:$0xff] %v5132_v24   ;;  %v4302_v31 = vadd.f32 %v4301_v58, %v4088_v38  ;;  %v4373_v3 = vadd.f32 %v4372_v32, %v4342_v60 }
 0x278   : > { %v5682_v33 = vpop.f32.mrb[140].mxu0 }
 0x279   : > { %v4374_v4 = vadd.f32 %v4373_v3, %v4343_v59  ;;  %v5606_v48 = vpop.f32.mrb[140].mxu1  ;;  %v4095_v7 = vpop.f32.mrb[141].mxu0  ;;  %v4303_v26 = vadd.f32 %v4302_v31, %v4091_v50 }
 0x27a   : > { %v5607_v49 = vpop.f32.mrb[141].mxu1  ;;  %v4096_v53 = vadd.f32 %v4095_v7, %v3935_v44  ;;  %v5683_v62 = vpop.f32.mrb[142].mxu0 }
 0x27b   : > { %v5608_v29 = vadd.f32 %v5607_v49, %v5606_v48  ;;  %v4375_v17 = vadd.f32 %v4374_v4, %v4344_v34  ;;  %v5609_v2 = vpop.f32.mrb[142].mxu1  ;;  %v4098_v43 = vpop.f32.mrb[143].mxu0 }
 0x27c   : > { %v4304_v57 = vadd.f32 %v4303_v26, %v4096_v53  ;;  %v4345_v1 = vmul.f32 %v4096_v53, %v4096_v53  ;;  %v5610_v21 = vpop.f32.mrb[143].mxu1  ;;  %v4099_v42 = vadd.f32 %v4098_v43, %v3938_v39 }
 0x27d   : > { %v3943_v18 = vadd.f32 %v5608_v29, %v8035_v19  ;;  %v5611_v61 = vadd.f32 %v5610_v21, %v5609_v2 }
 0x27e   : > { %v4376_v5 = vadd.f32 %v4375_v17, %v4345_v1  ;;  %v5142_v6 = vpack.c.bf16 %v4099_v42, %v4096_v53  ;;  %v4305_v8 = vadd.f32 %v4304_v57, %v4099_v42  ;;  %v4346_v56 = vmul.f32 %v4099_v42, %v4099_v42 }
 0x27f   : > { %v4104_v46 = vadd.f32 %v5682_v33, %v3943_v18  ;;  %v3946_v14 = vadd.f32 %v5611_v61, %v8038_v40 }
 0x280   : > { %5162 = vst [vmem:[%s8051_s12 + $0x70] sm:$0xff] %v5142_v6   ;;  %v4377_v55 = vadd.f32 %v4376_v5, %v4346_v56 }
 0x281   : > { %v4347_v27 = vmul.f32 %v4104_v46, %v4104_v46  ;;  %v4107_v51 = vadd.f32 %v5683_v62, %v3946_v14  ;;  %v4306_v12 = vadd.f32 %v4305_v8, %v4104_v46 }
 0x283   : > { %v5147_v19 = vpack.c.bf16 %v4107_v51, %v4104_v46  ;;  %v4348_v40 = vmul.f32 %v4107_v51, %v4107_v51  ;;  %v4307_v37 = vadd.f32 %v4306_v12, %v4107_v51  ;;  %v4378_v0 = vadd.f32 %v4377_v55, %v4347_v27 }
 0x285   : > { %5163 = vst [vmem:[%s8051_s12 + $0x78] sm:$0xff] %v5147_v19   ;;  %v4308_v23 = vrot.slane %v4307_v37, 4  ;;  %v4379_v54 = vadd.f32 %v4378_v0, %v4348_v40 }
 0x286   : > { %5989 = shalt.err (!%p5986_p9)
}
 0x287   : > { %s5990_s25 = scalar_lea.hbm %s8113_s7, 2048  ;;  %s5994_s11 = scalar_lea.hbm %s8237_s2, 4096 }
 0x288   : > { %p5991_p1 = scmp.ne.s32.totalorder %s8113_s7, %s5990_s25  ;;  %p5995_p7 = scmp.lt.u32.totalorder %s8113_s7, %s8237_s2 }
 0x289   : > { %p5996_p11 = scmp.lt.u32.totalorder %s5994_s11, %s5990_s25  ;;  %p5998_p6 = scmp.lt.u32.totalorder %s5990_s25, %s8113_s7 }
 0x28a   : > { %p5992_p2 = pnand %p5991_p1, %p6252_p10 }
 0x28b   : > { %p5997_p4 = por %p5996_p11, %p5995_p7 }
 0x28c   : > { %p5993_p3 = pneg %p5992_p2 }
 0x28d   : > { %p5999_p8 = por %p5998_p6, %p5997_p4 }
 0x28f   : > { %p6000_p12 = pnand %p5999_p8, %p5993_p3 }
 0x291   : > { %6003 = shalt.err (!%p6000_p12)
}
 0x292   : > { %s6130_s14 = smov 64   ;;  %s6131_s26 = smov 4   ;;  %v4309_v11 = vadd.f32 %v4308_v23, %v4307_v37  ;;  %v4380_v47 = vrot.slane %v4379_v54, 4  ;;  %v4276_v30 = vld [vmem:[%s7973_s22] sm:$0x1] }
 0x293   : > { %5709 = dma.vmem_to_hbm [thread:$0]  (%p6252_p10), %s8115_s10, 2048, %s8113_s7, %s4389_s9, %s6130_s14, %s6130_s14, %s6131_s26  }
 0x294   : > { %v4310_v38 = vrot.slane %v4309_v11, 2  ;;  %v4381_v16 = vadd.f32 %v4380_v47, %v4379_v54  ;;  %s4393_s6 = sand.u32 1, %s6190_s21   ;;  %s5032_s25 = sshll.u32 %s6114_s18, 4  ;;  %v4316_v50 = vld [vmem:[%s7977_s23] sm:$0x1] }
 0x295   : > { %s4429_s12 = sshll.u32 %s7973_s22, 4  ;;  %s4442_s28 = sshll.u32 %s7977_s23, 4  ;;  %s8153_s12 = int_to_ptr.vmem [resolvable:$true] %s4429_s12  ;;  %s8161_s28 = int_to_ptr.vmem [resolvable:$true] %s4442_s28 }
 0x296   : > { %v4311_v45 = vadd.f32 %v4310_v38, %v4309_v11  ;;  %v4382_v9 = vrot.slane %v4381_v16, 2  ;;  %s8151_s9 = scalar_lea.hbm %s8238_s3, %s5032_s25  ;;  %s8159_s13 = scalar_lea.hbm %s8239_s4, %s5032_s25 }
 0x297   : > { %s8163_s11 = scalar_lea.sflag [#allocation9], %s4393_s6  ;;  %s6004_s30 = scalar_lea.vmem %s8153_s12, 16 }
 0x298   : > { %v4312_v63 = vrot.slane %v4311_v45, 1  ;;  %v4383_v20 = vadd.f32 %v4382_v9, %v4381_v16  ;;  %p6005_p13 = scmp.ne.s32.totalorder %s8153_s12, %s6004_s30  ;;  %s6132_s27 = smov [#allocation8]  }
 0x299   : > { %s6008_s14 = sshll.u32 %s6132_s27, 4  ;;  %s6009_s14 = int_to_ptr.vmem [resolvable:$false] %s6008_s14 }
 0x29a   : > { %v4384_v35 = vrot.slane %v4383_v20, 1  ;;  %v4313_v13 = vadd.f32 %v4312_v63, %v4311_v45  ;;  %p6006_p0 = pnand %p6005_p13, %p6252_p10  ;;  %s6010_s26 = scalar_lea.vmem %s6009_s14, 32 }
 0x29b   : > { %p6011_p9 = scmp.lt.s32.totalorder %s8153_s12, %s6009_s14  ;;  %p6012_p1 = scmp.lt.s32.totalorder %s6010_s26, %s6004_s30 }
 0x29c   : > { %v4385_v41 = vadd.f32 %v4384_v35, %v4383_v20  ;;  %v4314_v25 = vadd.f32 %v4313_v13, %v4276_v30  ;;  %p6007_p5 = pneg %p6006_p0 }
 0x29d   : > { %p6013_p2 = por %p6012_p1, %p6011_p9 }
 0x29e   : > { %4315 = vst [vmem:[%s7973_s22] sm:$0x1] %v4314_v25  ;;  %v4386_v15 = vadd.f32 %v4385_v41, %v4316_v50 }
 0x29f   : > { %p6014_p3 = pnand %p6013_p2, %p6007_p5 }
 0x2a1   : > { %6017 = shalt.err (!%p6014_p3)
}
 0x2a2   : > { %s6018_s22 = scalar_lea.hbm %s8151_s9, 16  ;;  %s6022_s10 = scalar_lea.hbm %s8238_s3, 32 }
 0x2a3   : > { %p6019_p7 = scmp.ne.s32.totalorder %s8151_s9, %s6018_s22  ;;  %p6023_p6 = scmp.lt.u32.totalorder %s8151_s9, %s8238_s3 }
 0x2a4   : > { %p6024_p8 = scmp.lt.u32.totalorder %s6022_s10, %s6018_s22  ;;  %p6026_p13 = scmp.lt.u32.totalorder %s6018_s22, %s8151_s9 }
 0x2a5   : > { %p6020_p11 = pnand %p6019_p7, %p6252_p10 }
 0x2a6   : > { %p6025_p12 = por %p6024_p8, %p6023_p6 }
 0x2a7   : > { %p6021_p4 = pneg %p6020_p11 }
 0x2a8   : > { %p6027_p0 = por %p6026_p13, %p6025_p12 }
 0x2aa   : > { %p6028_p5 = pnand %p6027_p0, %p6021_p4 }
 0x2ac   : > { %6031 = shalt.err (!%p6028_p5)
}
 0x2ad   : > { %5710 = dma.vmem_to_hbm [thread:$0]  (%p6252_p10), %s8153_s12, 16, %s8151_s9, %s8163_s11   ;;  %4387 = vst [vmem:[%s7977_s23] sm:$0x1] %v4386_v15 }
 0x2ae   : > { %s6032_s21 = scalar_lea.vmem %s8161_s28, 16  ;;  %s6133_s30 = smov [#allocation10]  }
 0x2af   : > { %p6033_p9 = scmp.ne.s32.totalorder %s8161_s28, %s6032_s21  ;;  %s6036_s27 = sshll.u32 %s6133_s30, 4  ;;  %s6037_s27 = int_to_ptr.vmem [resolvable:$false] %s6036_s27 }
 0x2b0   : > { %s6038_s14 = scalar_lea.vmem %s6037_s27, 32  ;;  %p6039_p3 = scmp.lt.s32.totalorder %s8161_s28, %s6037_s27 }
 0x2b1   : > { %p6034_p1 = pnand %p6033_p9, %p6252_p10  ;;  %p6040_p7 = scmp.lt.s32.totalorder %s6038_s14, %s6032_s21 }
 0x2b3   : > { %p6035_p2 = pneg %p6034_p1  ;;  %p6041_p11 = por %p6040_p7, %p6039_p3 }
 0x2b5   : > { %p6042_p4 = pnand %p6041_p11, %p6035_p2 }
 0x2b7   : > { %6045 = shalt.err (!%p6042_p4)
}
 0x2b8   : > { %s6046_s23 = scalar_lea.hbm %s8159_s13, 16  ;;  %s6050_s26 = scalar_lea.hbm %s8239_s4, 32 }
 0x2b9   : > { %p6047_p6 = scmp.ne.s32.totalorder %s8159_s13, %s6046_s23  ;;  %p6051_p13 = scmp.lt.u32.totalorder %s8159_s13, %s8239_s4 }
 0x2ba   : > { %p6052_p0 = scmp.lt.u32.totalorder %s6050_s26, %s6046_s23  ;;  %p6054_p9 = scmp.lt.u32.totalorder %s6046_s23, %s8159_s13 }
 0x2bb   : > { %p6048_p8 = pnand %p6047_p6, %p6252_p10 }
 0x2bc   : > { %p6053_p5 = por %p6052_p0, %p6051_p13 }
 0x2bd   : > { %p6049_p12 = pneg %p6048_p8 }
 0x2be   : > { %p6055_p1 = por %p6054_p9, %p6053_p5 }
 0x2c0   : > { %p6056_p2 = pnand %p6055_p1, %p6049_p12 }
 0x2c2   : > { %6059 = shalt.err (!%p6056_p2)
}
 0x2c3   : > { %5711 = dma.vmem_to_hbm [thread:$0]  (%p6252_p10), %s8161_s28, 16, %s8159_s13, %s8163_s11  }
 0x2c4 PF: > { %s4454_s25 = sand.u32 1, %s6102_s15   ;;  %p8269_p3 = scmp.ne.s32.totalorder %s8245_s24, 0 }
 0x2c5   : > { %p8270_p7 = scmp.ge.s32.totalorder %s6122_s20, 2  ;;  %s4455_s10 = scalar_lea.sflag [#allocation4], %s4454_s25 }
 0x2c7   : > { %p5724_p11 = pnand %p8270_p7, %p8269_p3 }
 0x2c9   : > { %6093 = dma.done.wait (!%p5724_p11), %s4455_s10, 2048  }
 0x2ca   : > { %6095 = vsyncadd (!%p5724_p11), %s4455_s10, 4294965248  ;;  %s8271_s7 = sadd.s32 4294967294, %s6122_s20  }
 0x2cb   : > { %s4463_s18 = sand.u32 1, %s8271_s7  }
 0x2cc   : > { %s4464_s21 = scalar_lea.sflag [#allocation9], %s4463_s18 }
 0x2cd   : > { %6097 = dma.done.wait (!%p5724_p11), %s4464_s21, 32  }
 0x2ce   : > { %6099 = vsyncadd (!%p5724_p11), %s4464_s21, 4294967264  ;;  %s25_s20 = sadd.s32 1, %s6122_s20   ;;  %s8272_s15 = smov %s6106_s16 }
 0x2cf   : > { %p22_p10 = scmp.ge.s32.totalorder %s25_s20, 4   ;;  %s8273_s16 = smov %s6110_s17 }
 0x2d0   : > { %s8274_s17 = smov %s6261_s8  ;;  %s8275_s18 = smov %s6118_s19 }
 0x2d1   : > { %s8276_s19 = smov %s8278_s29  ;;  %24 = sbr.rel (!%p22_p10) target bundleno = 9 (0x9), region = 116 }
 0x2d8   :  { %4476 = vsyncpa [#allocation3], 1 }
 0x2d9   :  { %4478 = vsyncpa [#allocation3 + $0x1], 1 }
 0x2da   :  { %4479 = vsyncpa [#allocation6], 1 }
 0x2db   :  { %4480 = vsyncpa [#allocation4], 1 }
 0x2dc   :  { %4482 = vsyncpa [#allocation4 + $0x1], 1 }
 0x2dd   :  { %4483 = vsyncpa [#allocation9], 1 }
 0x2de   :  { %4485 = vsyncpa [#allocation9 + $0x1], 1 }

// kernel: basic_block_forward.5
= control target key start
LH: loop header
LB: loop body
LE: loop exit
PB: predicated region body
PF: predicated region fallthrough
CT: control target
= control target key end

     0   :  { %10 = vsyncpa [#allocation3], 0  ;;  %s9073_s0 = inlined_call_operand.hbm [shape: bf16[2,18,18,4], index: 0, kind: input, shape index: {}]   ;;  %s9074_s1 = inlined_call_operand.hbm [shape: bf16[9,4,128], index: 1, kind: input, shape index: {}]   ;;  %s9075_s2 = inlined_call_operand.hbm [shape: bf16[2,16,16,128], index: 2, kind: output, shape index: {0}]   ;;  %s9076_s3 = inlined_call_operand.hbm [shape: f32[2,1,128], index: 3, kind: output, shape index: {1}]   ;;  %s9077_s4 = inlined_call_operand.hbm [shape: f32[2,1,128], index: 4, kind: output, shape index: {2}]  }
   0x1   :  { %12 = vsyncpa [#allocation3 + $0x1], 0 }
   0x2   :  { %13 = vsyncpa [#allocation6], 0 }
   0x3   :  { %14 = vsyncpa [#allocation4], 0 }
   0x4   :  { %16 = vsyncpa [#allocation4 + $0x1], 0 }
   0x5   :  { %17 = vsyncpa [#allocation9], 0 }
   0x6   :  { %19 = vsyncpa [#allocation9 + $0x1], 0  ;;  %s7059_s15 = smov 0   ;;  %s7061_s16 = smov 0  }
   0x7   :  { %s7063_s17 = smov 0   ;;  %s7065_s18 = smov 0  }
   0x8   :  { %s7067_s19 = smov 0   ;;  %s7069_s20 = smov 0  }
   0x9 LB: > { %s7090_s21 = sadd.s32 4294967295, %s7020_s20   ;;  %s5223_s22 = sadd.s32 4294967294, %s7020_s20   ;;  %s7020_s20 = sphi %s7069_s20, %s25_s20   ;;  %s7016_s19 = sphi %s7067_s19, %s9159_s19   ;;  %s7012_s18 = sphi %s7065_s18, %s9158_s18   ;;  %s7008_s17 = sphi %s7063_s17, %s9157_s17   ;;  %s7004_s16 = sphi %s7061_s16, %s9156_s16   ;;  %s7000_s15 = sphi %s7059_s15, %s9155_s15  }
   0xa   : > { %p57_p0 = scmp.ne.s32.totalorder %s7004_s16, %s7000_s15  ;;  %p9078_p1 = scmp.eq.s32.totalorder %s7090_s21, 0 }
   0xb   : > { %p110_p3 = scmp.eq.s32.totalorder %s5223_s22, 1  ;;  %p5224_p5 = scmp.ge.s32.totalorder %s7020_s20, 1 }
   0xc   : > { %p7101_p4 = por %p9078_p1, %p57_p0  ;;  %p169_p7 = scmp.lt.s32.totalorder %s7020_s20, 3 }
   0xd   : > { %p7106_p6 = por %p110_p3, %p57_p0  ;;  %s7022_s26 = smov [#allocation5]  }
   0xe   : > { %s9091_s23 = scalar_select %p7101_p4, 1, 0 }
   0xf   : > { %s9092_s24 = scalar_select %p7106_p6, 1, 0 }
  0x10   : > { %p7111_p8 = pnand %p5224_p5, %p169_p7  ;;  %s181_s27 = sshll.u32 %s7022_s26, 4  ;;  %s182_s27 = int_to_ptr.vmem [resolvable:$true] %s181_s27 }
  0x11   : > { %s37_s29 = sadd.s32 1, %s7016_s19  ;;  %s6816_s6 = scalar_lea.hbm %s9074_s1, 288 }
  0x12   : > { %s9093_s25 = scalar_select %p7111_p8, 1, 0 }
  0x13   : > { %p6604_p9 = pneg %p7111_p8  ;;  %p6817_p12 = scmp.ne.s32.totalorder %s9074_s1, %s6816_s6 }
  0x14   : > { %p6823_p5 = scmp.lt.u32.totalorder %s6816_s6, %s9074_s1 }
  0x15   : > { %p7120_p11 = pnand %p6604_p9, %p9078_p1 }
  0x17   : > { %p6818_p13 = pneg %p7120_p11 }
  0x19   : > { %p6819_p0 = pnand %p6818_p13, %p6817_p12 }
  0x1b   : > { %p6820_p3 = pneg %p6819_p0 }
  0x1d   : > { %p6825_p7 = pnand %p6823_p5, %p6820_p3 }
  0x1f   : > { %6828 = shalt.err (!%p6825_p7)
}
  0x20   : > { %s6829_s11 = scalar_lea.vmem %s182_s27, 288  ;;  %p6837_p2 = scmp.lt.s32.totalorder %s182_s27, %s182_s27 }
  0x21   : > { %p6830_p9 = scmp.ne.s32.totalorder %s182_s27, %s6829_s11  ;;  %p6838_p6 = scmp.lt.s32.totalorder %s6829_s11, %s6829_s11 }
  0x23   : > { %p6832_p10 = pnand %p6830_p9, %p6818_p13  ;;  %p6839_p4 = por %p6838_p6, %p6837_p2 }
  0x25   : > { %p6833_p1 = pneg %p6832_p10 }
  0x27   : > { %p6840_p8 = pnand %p6839_p4, %p6833_p1 }
  0x29   : > { %6843 = shalt.err (!%p6840_p8)
}
  0x2a   : > { %s7023_s12 = smov 32   ;;  %s7024_s13 = smov 2  }
  0x2b   : > { %6607 = dma.hbm_to_vmem [thread:$0]  (!%p7120_p11), %s9074_s1, 288, %s182_s27, [#allocation6], %s7023_s12, %s7023_s12, %s7024_s13  }
  0x2c   : > { %p39_p1 = scmp.ge.s32.totalorder %s37_s29, 2  ;;  %s44_s30 = sadd.s32 1, %s7008_s17 }
  0x2d   : > { %p51_p2 = scmp.ne.s32.totalorder %s7008_s17, %s7004_s16  ;;  %p52_p4 = scmp.eq.s32.totalorder %s7020_s20, 0 }
  0x2e   : > { %s9161_s29 = smov (%p39_p1, %s37_s29), 0  ;;  %p9095_p8 = scmp.eq.s32.totalorder %s7090_s21, 1 }
  0x2f   : > { %p53_p6 = por %p52_p4, %p51_p2  ;;  %s41_s6 = ssub.s32 %s7016_s19, %s9161_s29 }
  0x30   : > { %p7149_p10 = por %p9095_p8, %p51_p2  ;;  %p6623_p12 = scmp.lt.s32.totalorder %s7020_s20, 2 }
  0x31   : > { %p42_p13 = scmp.eq.s32.totalorder %s41_s6, 0  ;;  %s195_s28 = sand.u32 1, %s7008_s17  }
  0x32   : > { %s6589_s7 = smul.u32 216, %s195_s28  ;;  %p7161_p11 = pnand %p6623_p12, %p53_p6 }
  0x33   : > { %s7158_s8 = scalar_select %p42_p13, %s7008_s17, %s44_s30  }
  0x34   : > { %s6590_s27 = smul.u32 3456, %s7016_s19  ;;  %s199_s9 = scalar_lea.vmem [#allocation2], %s6589_s7 }
  0x35   : > { %s206_s10 = sshll.u32 %s199_s9, 4  ;;  %s7172_s26 = scalar_lea.sflag [#allocation3], %s195_s28  ;;  %s7170_s10 = int_to_ptr.vmem [resolvable:$true] %s206_s10 }
  0x36   : > { %s7168_s14 = scalar_lea.hbm %s9073_s0, %s6590_s27  ;;  %p6846_p3 = pneg %p7161_p11 }
  0x37   : > { %s6844_s30 = scalar_lea.hbm %s7168_s14, 3456  ;;  %s6849_s27 = scalar_lea.hbm %s9073_s0, 6912 }
  0x38   : > { %p6845_p0 = scmp.ne.s32.totalorder %s7168_s14, %s6844_s30  ;;  %p6850_p9 = scmp.lt.u32.totalorder %s7168_s14, %s9073_s0 }
  0x39   : > { %p6851_p1 = scmp.lt.u32.totalorder %s6849_s27, %s6844_s30  ;;  %p6853_p4 = scmp.lt.u32.totalorder %s6844_s30, %s7168_s14 }
  0x3a   : > { %p6847_p5 = pnand %p6846_p3, %p6845_p0 }
  0x3b   : > { %p6852_p2 = por %p6851_p1, %p6850_p9 }
  0x3c   : > { %p6848_p7 = pneg %p6847_p5 }
  0x3d   : > { %p6854_p6 = por %p6853_p4, %p6852_p2 }
  0x3f   : > { %p6855_p8 = pnand %p6854_p6, %p6848_p7 }
  0x41   : > { %6858 = shalt.err (!%p6855_p8)
}
  0x42   : > { %s6859_s28 = scalar_lea.vmem %s7170_s10, 3456  ;;  %s7025_s13 = smov [#allocation2]  }
  0x43   : > { %p6860_p12 = scmp.ne.s32.totalorder %s7170_s10, %s6859_s28  ;;  %s6864_s6 = sshll.u32 %s7025_s13, 4  ;;  %s6865_s6 = int_to_ptr.vmem [resolvable:$false] %s6864_s6 }
  0x44   : > { %s6866_s7 = scalar_lea.vmem %s6865_s6, 6912  ;;  %p6867_p5 = scmp.lt.s32.totalorder %s7170_s10, %s6865_s6 }
  0x45   : > { %p6862_p13 = pnand %p6860_p12, %p6846_p3  ;;  %p6868_p9 = scmp.lt.s32.totalorder %s6866_s7, %s6859_s28 }
  0x47   : > { %p6863_p0 = pneg %p6862_p13  ;;  %p6869_p1 = por %p6868_p9, %p6867_p5 }
  0x49   : > { %p6870_p2 = pnand %p6869_p1, %p6863_p0 }
  0x4b   : > { %6873 = shalt.err (!%p6870_p2)
}
  0x4c   : > { %s7026_s30 = smov 64   ;;  %s7027_s27 = smov 4  }
  0x4d   : > { %6611 = dma.hbm_to_vmem [thread:$0]  (!%p7161_p11), %s7168_s14, 3456, %s7170_s10, %s7172_s26, %s7026_s30, %s7026_s30, %s7027_s27  }
  0x4e   : > { %p9098_p3 = scmp.ne.s32.totalorder %s9093_s25, 0 }
  0x50   : > { %218 = sbr.rel (%p9098_p3) target bundleno = 728 (0x2d8), region = 28 }
  0x57   : > { %s7203_s9 = sand.u32 1, %s7004_s16   ;;  %p9099_p7 = scmp.ne.s32.totalorder %s9091_s23, 0 }
  0x58   : > { %s6591_s12 = smul.u32 216, %s7203_s9  ;;  %s221_s28 = scalar_lea.sflag [#allocation3], %s7203_s9 }
  0x5a   : > { %s7207_s13 = scalar_lea.vmem [#allocation2], %s6591_s12 }
  0x5b   : > { %6983 = dma.done.wait (%p9099_p7), %s221_s28, 3456  }
  0x5c   : > { %6985 = vsyncadd (%p9099_p7), %s221_s28, 4294963840  ;;  %p9100_p11 = scmp.eq.s32.totalorder %s7090_s21, 0 }
  0x5e   : > { %6987 = dma.done.wait (%p9100_p11), [#allocation6], 288   ;;  %p9101_p4 = pmov %p9100_p11 }
  0x5f   : > { %vm2205_vm0 = vcmask 1041408   ;;  %vm315_vm1 = vsmask.f32 3328  ;;  %vm316_vm2 = vsmask.f32 7440  ;;  %vm2156_vm4 = vcmask 31744  }
  0x60   : > { %6989 = vsyncadd (%p9101_p4), [#allocation6], 4294967008  ;;  %v2107_v0 = vld [vmem:[#allocation5 + $0x2] sm:$0x3]  ;;  %v3251_v1 = vld [vmem:[#allocation5 + $0x8] sm:$0x3] }
  0x61   : > { %v267_v2 = vld [vmem:[%s7207_s13] sm:$0xf]  ;;  %6579 = vmatprep.subr.msk.bf16.mxu1 %vm2205_vm0, %v2107_v0  ;;  %6583 = vmatprep.subr.msk.bf16.mxu0 %vm2205_vm0, %v3251_v1  ;;  %v2207_v3 = vsel %vm2205_vm0, %v2107_v0, 0  ;;  %v7222_v4 = vsel %vm2205_vm0, %v3251_v1, 0  ;;  %v268_v5 = vld [vmem:[%s7207_s13 + $0x4] sm:$0xf]  ;;  %vm7246_vm3 = vmor %vm315_vm1, %vm316_vm2 }
  0x62   : > { %9102 = vst [vmem:[#allocation15_spill] sm:$0xff] %v7222_v4  ;;  %v299_v6 = vld [vmem:[%s7207_s13 + $0x8] sm:$0x1]  ;;  %6016 = vmatpush3.bf16.msra.mxu1 %v2207_v3  ;;  %6152 = vmatpush3.bf16.msra.mxu0 %v7222_v4  ;;  %v319_v7 = vshrl.u32 %v267_v2, 16  ;;  %v322_v8 = vshll.u32 %v267_v2, 16  ;;  %v328_v9 = vshll.u32 %v268_v5, 16 }
  0x63   : > { %v332_v10 = vshrl.u32 %v268_v5, 16  ;;  %v2105_v11 = vld [vmem:[#allocation5] sm:$0x3]  ;;  %v338_v12 = vshll.u32 %v299_v6, 16  ;;  %v5247_v13 = vld [vmem:[%s7207_s13 + $0xc] sm:$0xf] }
  0x64   : > { %6580 = vmatprep.subr.msk.bf16.mxu1 %vm2205_vm0, %v2105_v11  ;;  %v7230_v14 = vld [vmem:[%s7207_s13 + $0x10] sm:$0xf]  ;;  %v321_v15 = vrot.slane %v319_v7, 4  ;;  %v324_v16 = vrot.slane %v322_v8, 5  ;;  %v330_v17 = vrot.slane %v328_v9, 5  ;;  %v934_v21 = vshrl.u32 %v5247_v13, 16 }
  0x65   : > { %v334_v18 = vrot.slane %v332_v10, 4  ;;  %v7233_v19 = vld [vmem:[%s7207_s13 + $0x14] sm:$0x1]  ;;  %v340_v20 = vrot.slane %v338_v12, 5  ;;  %v937_v22 = vshll.u32 %v5247_v13, 16  ;;  %v943_v23 = vshll.u32 %v7230_v14, 16 }
  0x66   : > { %v7236_v24 = vld [vmem:[#allocation5 + $0xa] sm:$0x3]  ;;  %v325_v25 = vor.u32 %v324_v16, %v321_v15  ;;  %v947_v27 = vshrl.u32 %v7230_v14, 16  ;;  %v953_v28 = vshll.u32 %v7233_v19, 16  ;;  %v269_v29 = vld [vmem:[%s7207_s13 + $0xc] sm:$0xf] }
  0x67   : > { %v335_v26 = vor.u32 %v334_v18, %v330_v17  ;;  %6585 = vmatprep.subr.msk.bf16.mxu0 %vm2205_vm0, %v7236_v24  ;;  %v270_v30 = vld [vmem:[%s7207_s13 + $0x10] sm:$0xf]  ;;  %v936_v32 = vrot.slane %v934_v21, 4  ;;  %v939_v33 = vrot.slane %v937_v22, 5  ;;  %v945_v34 = vrot.slane %v943_v23, 5  ;;  %s8909_s23 = scalar_lea.vmem [#allocation8], %s7203_s9 }
  0x68   : > { %v326_v35 = vrot.slane %v325_v25, 4  ;;  %v949_v37 = vrot.slane %v947_v27, 4  ;;  %v955_v38 = vrot.slane %v953_v28, 5  ;;  %v300_v40 = vld [vmem:[%s7207_s13 + $0x14] sm:$0x1]  ;;  %v343_v41 = vshrl.u32 %v269_v29, 16 }
  0x69   : > { %v336_v36 = vrot.slane %v335_v26, 4  ;;  %v940_v39 = vor.u32 %v939_v33, %v936_v32  ;;  %v346_v42 = vshll.u32 %v269_v29, 16  ;;  %v352_v43 = vshll.u32 %v270_v30, 16  ;;  %v5249_v56 = vld [vmem:[%s7207_s13 + $0x18] sm:$0xf]  ;;  %s8913_s25 = scalar_lea.vmem [#allocation10], %s7203_s9 }
  0x6a   : > { %v331_v44 = vsel %vm7246_vm3, %v326_v35, %v330_v17  ;;  %v950_v46 = vor.u32 %v949_v37, %v945_v34  ;;  %v356_v47 = vshrl.u32 %v270_v30, 16  ;;  %v345_v50 = vrot.slane %v343_v41, 4  ;;  %v7261_v60 = vld [vmem:[%s7207_s13 + $0x1c] sm:$0xf]  ;;  %v7264_v61 = vld [vmem:[%s7207_s13 + $0x20] sm:$0x1] }
  0x6b   : > { %v341_v45 = vsel %vm7246_vm3, %v336_v36, %v340_v20  ;;  %v941_v49 = vrot.slane %v940_v39, 4  ;;  %v348_v51 = vrot.slane %v346_v42, 5  ;;  %v354_v53 = vrot.slane %v352_v43, 5  ;;  %v271_v7 = vld [vmem:[%s7207_s13 + $0x18] sm:$0xf]  ;;  %s5230_s10 = sshll.u32 %s7203_s9, 7 }
  0x6c   : > { %v5407_v48 = vcombine.low %v331_v44, %v341_v45  ;;  %v951_v52 = vrot.slane %v950_v46, 4  ;;  %v358_v54 = vrot.slane %v356_v47, 4  ;;  %v362_v55 = vshll.u32 %v300_v40, 16  ;;  %v272_v13 = vld [vmem:[%s7207_s13 + $0x1c] sm:$0xf]  ;;  %s8925_s11 = scalar_lea.vmem [#allocation7], %s5230_s10 }
  0x6d   : > { %v946_v57 = vsel %vm7246_vm3, %v941_v49, %v945_v34  ;;  %v1386_v58 = vrot.slane %v7233_v19, 5  ;;  %v349_v59 = vor.u32 %v348_v51, %v345_v50  ;;  %v2483_v1 = vsel %vm2205_vm0, %v2105_v11, 0  ;;  %v301_v18 = vld [vmem:[%s7207_s13 + $0x20] sm:$0x1]  ;;  %v5251_v25 = vld [vmem:[%s7207_s13 + $0x24] sm:$0xf] }
  0x6e   : > { %6017 = vmatprep.mubr.msk.bf16.mxu1 %vm2156_vm4, %v5407_v48  ;;  %v956_v62 = vsel %vm7246_vm3, %v951_v52, %v955_v38  ;;  %v359_v63 = vor.u32 %v358_v54, %v354_v53  ;;  %v364_v0 = vrot.slane %v362_v55, 5  ;;  %v958_v5 = vshrl.u32 %v5249_v56, 16  ;;  %v7287_v38 = vld [vmem:[%s7207_s13 + $0x28] sm:$0xf]  ;;  %v7290_v43 = vld [vmem:[%s7207_s13 + $0x2c] sm:$0x1] }
  0x6f   : > { %v5535_v2 = vcombine.low %v946_v57, %v956_v62  ;;  %v350_v3 = vrot.slane %v349_v59, 4  ;;  %v961_v6 = vshll.u32 %v5249_v56, 16  ;;  %v967_v9 = vshll.u32 %v7261_v60, 16  ;;  %v273_v48 = vld [vmem:[%s7207_s13 + $0x24] sm:$0xf]  ;;  %s5766_s14 = sshll.u32 %s7012_s18, 11 }
  0x70   : > { %v360_v8 = vrot.slane %v359_v63, 4  ;;  %v971_v10 = vshrl.u32 %v7261_v60, 16  ;;  %v977_v12 = vshll.u32 %v7264_v61, 16  ;;  %v960_v15 = vrot.slane %v958_v5, 4  ;;  %v274_v57 = vld [vmem:[%s7207_s13 + $0x28] sm:$0xf]  ;;  %s8950_s30 = scalar_lea.hbm %s9075_s2, %s5766_s14 }
  0x71   : > { %6153 = vmatprep.mubr.msk.bf16.mxu0 %vm2156_vm4, %v5535_v2  ;;  %v355_v11 = vsel %vm7246_vm3, %v350_v3, %v354_v53  ;;  %v963_v16 = vrot.slane %v961_v6, 5  ;;  %v1390_v17 = vrot.slane %v7261_v60, 5  ;;  %v969_v21 = vrot.slane %v967_v9, 5  ;;  %v302_v5 = vld [vmem:[%s7207_s13 + $0x2c] sm:$0x1]  ;;  %s5039_s26 = sshll.u32 %s8925_s11, 4  ;;  %s8952_s26 = int_to_ptr.vmem [resolvable:$true] %s5039_s26 }
  0x72   : > { %v365_v20 = vsel %vm7246_vm3, %v360_v8, %v364_v0  ;;  %v973_v22 = vrot.slane %v971_v10, 4  ;;  %v979_v23 = vrot.slane %v977_v12, 5  ;;  %v1393_v28 = vrot.slane %v7264_v61, 5  ;;  %v5253_v12 = vld [vmem:[%s7207_s13 + $0x30] sm:$0xf]  ;;  %s5015_s27 = scalar_lea.sflag [#allocation4], %s7203_s9 }
  0x73   : > { %v5408_v26 = vcombine.low %v355_v11, %v365_v20  ;;  %v964_v27 = vor.u32 %v963_v16, %v960_v15  ;;  %v3643_v29 = vsel %vm2205_vm0, %v7236_v24, 0  ;;  %v367_v32 = vshrl.u32 %v271_v7, 16  ;;  %v6746_v4 = vld [vmem:[%s7207_s13 + $0x4c] sm:$0xf]  ;;  %s6874_s12 = scalar_lea.vmem %s8952_s26, 2048  ;;  %s7029_s28 = smov [#allocation7]  }
  0x74   : > { %v974_v30 = vor.u32 %v973_v22, %v969_v21  ;;  %v370_v33 = vshll.u32 %v271_v7, 16  ;;  %v376_v34 = vshll.u32 %v272_v13, 16  ;;  %v380_v36 = vshrl.u32 %v272_v13, 16  ;;  %p6875_p6 = scmp.ne.s32.totalorder %s8952_s26, %s6874_s12 }
  0x75   : > { %6018 = vmatmul.mubr.msk.bf16.vlgmr.msra.gmra.mrb[0].mxu1 %vm2156_vm4, %v5408_v26  ;;  %v965_v35 = vrot.slane %v964_v27, 4  ;;  %v386_v37 = vshll.u32 %v301_v18, 16  ;;  %v982_v39 = vshrl.u32 %v5251_v25, 16  ;;  %v369_v41 = vrot.slane %v367_v32, 4  ;;  %v7309_v18 = vld [vmem:[%s7207_s13 + $0x34] sm:$0xf] }
  0x76   : > { %6050 = vmatpush3.bf16.msra.mxu1 %v2483_v1  ;;  %v975_v40 = vrot.slane %v974_v30, 4  ;;  %v372_v42 = vrot.slane %v370_v33, 5  ;;  %v378_v24 = vrot.slane %v376_v34, 5  ;;  %v382_v45 = vrot.slane %v380_v36, 4  ;;  %v275_v36 = vld [vmem:[%s7207_s13 + $0x30] sm:$0xf]  ;;  %p6876_p8 = pnand %p6875_p6, %p7149_p10 }
  0x77   : > { %v970_v44 = vsel %vm7246_vm3, %v965_v35, %v969_v21  ;;  %v388_v46 = vrot.slane %v386_v37, 5  ;;  %v984_v47 = vrot.slane %v982_v39, 4  ;;  %v985_v51 = vshll.u32 %v5251_v25, 16 }
  0x78   : > { %v980_v49 = vsel %vm7246_vm3, %v975_v40, %v979_v23  ;;  %v373_v50 = vor.u32 %v372_v42, %v369_v41  ;;  %v991_v52 = vshll.u32 %v7287_v38, 16  ;;  %v383_v54 = vor.u32 %v382_v45, %v378_v24  ;;  %v7322_v42 = vld [vmem:[%s7207_s13 + $0x34] sm:$0xf]  ;;  %p6877_p12 = pneg %p6876_p8 }
  0x79   : > { %v5536_v53 = vcombine.low %v970_v44, %v980_v49  ;;  %v995_v55 = vshrl.u32 %v7287_v38, 16  ;;  %v1001_v56 = vshll.u32 %v7290_v43, 16  ;;  %v987_v62 = vrot.slane %v985_v51, 5 }
  0x7a   : > { %v374_v59 = vrot.slane %v373_v50, 4  ;;  %v993_v63 = vrot.slane %v991_v52, 5  ;;  %v391_v0 = vshrl.u32 %v273_v48, 16  ;;  %v384_v1 = vrot.slane %v383_v54, 4  ;;  %v303_v50 = vld [vmem:[%s7207_s13 + $0x38] sm:$0x1] }
  0x7b   : > { %6154 = vmatmul.mubr.msk.bf16.vlgmr.msra.gmra.mrb[0].mxu0 %vm2156_vm4, %v5536_v53  ;;  %v997_v2 = vrot.slane %v995_v55, 4  ;;  %v1003_v3 = vrot.slane %v1001_v56, 5  ;;  %v394_v6 = vshll.u32 %v273_v48, 16  ;;  %v988_v8 = vor.u32 %v987_v62, %v984_v47  ;;  %v5255_v56 = vld [vmem:[%s7207_s13 + $0x3c] sm:$0xf] }
  0x7c   : > { %6186 = vmatpush3.bf16.msra.mxu0 %v3643_v29  ;;  %v379_v7 = vsel %vm7246_vm3, %v374_v59, %v378_v24  ;;  %v393_v9 = vrot.slane %v391_v0, 4  ;;  %v400_v10 = vshll.u32 %v274_v57, 16  ;;  %v389_v13 = vsel %vm7246_vm3, %v384_v1, %v388_v46  ;;  %v7312_v29 = vld [vmem:[%s7207_s13 + $0x38] sm:$0x1] }
  0x7d   : > { %v998_v11 = vor.u32 %v997_v2, %v993_v63  ;;  %v396_v15 = vrot.slane %v394_v6, 5  ;;  %v404_v16 = vshrl.u32 %v274_v57, 16  ;;  %v5409_v20 = vcombine.low %v379_v7, %v389_v13 }
  0x7e   : > { %v989_v21 = vrot.slane %v988_v8, 4  ;;  %v402_v22 = vrot.slane %v400_v10, 5  ;;  %v410_v23 = vshll.u32 %v302_v5, 16  ;;  %v1006_v30 = vshrl.u32 %v5253_v12, 16  ;;  %v7336_v5 = vld [vmem:[%s7207_s13 + $0x40] sm:$0xf] }
  0x7f   : > { %v999_v25 = vrot.slane %v998_v11, 4  ;;  %v397_v26 = vor.u32 %v396_v15, %v393_v9  ;;  %v406_v27 = vrot.slane %v404_v16, 4  ;;  %6021 = vmatprep.mubr.msk.bf16.mxu1 %vm2156_vm4, %v5409_v20  ;;  %v1009_v34 = vshll.u32 %v5253_v12, 16  ;;  %v7342_v11 = vld [vmem:[%s7207_s13 + $0x44] sm:$0x1] }
  0x80   : > { %v994_v32 = vsel %vm7246_vm3, %v989_v21, %v993_v63  ;;  %v412_v33 = vrot.slane %v410_v23, 5  ;;  %v1015_v35 = vshll.u32 %v7309_v18, 16  ;;  %v1008_v41 = vrot.slane %v1006_v30, 4  ;;  %v7344_v16 = vld [vmem:[#allocation5 + $0xc] sm:$0x3] }
  0x81   : > { %v1004_v37 = vsel %vm7246_vm3, %v999_v25, %v1003_v3  ;;  %v398_v39 = vrot.slane %v397_v26, 4  ;;  %v407_v40 = vor.u32 %v406_v27, %v402_v22  ;;  %v1011_v44 = vrot.slane %v1009_v34, 5  ;;  %v7348_v25 = vld [vmem:[%s7207_s13 + $0x3c] sm:$0xf]  ;;  %6586 = vmatprep.subr.msk.bf16.mxu0 %vm2205_vm0, %v7344_v16 }
  0x82   : > { %v5537_v24 = vcombine.low %v994_v32, %v1004_v37  ;;  %v1017_v45 = vrot.slane %v1015_v35, 5  ;;  %v1019_v46 = vshrl.u32 %v7309_v18, 16  ;;  %v1025_v49 = vshll.u32 %v7312_v29, 16 }
  0x83   : > { %v403_v47 = vsel %vm7246_vm3, %v398_v39, %v402_v22  ;;  %v408_v48 = vrot.slane %v407_v40, 4  ;;  %v415_v51 = vshrl.u32 %v275_v36, 16  ;;  %v1012_v52 = vor.u32 %v1011_v44, %v1008_v41 }
  0x84   : > { %6157 = vmatprep.mubr.msk.bf16.mxu0 %vm2156_vm4, %v5537_v24  ;;  %v1021_v53 = vrot.slane %v1019_v46, 4  ;;  %v418_v54 = vshll.u32 %v275_v36, 16  ;;  %v424_v55 = vshll.u32 %v7322_v42, 16  ;;  %v1027_v59 = vrot.slane %v1025_v49, 5  ;;  %v304_v24 = vld [vmem:[%s7207_s13 + $0x44] sm:$0x1] }
  0x85   : > { %v413_v57 = vsel %vm7246_vm3, %v408_v48, %v412_v33  ;;  %v417_v62 = vrot.slane %v415_v51, 4  ;;  %v428_v63 = vshrl.u32 %v7322_v42, 16  ;;  %v1013_v1 = vrot.slane %v1012_v52, 4  ;;  %v7356_v33 = vld [vmem:[%s7207_s13 + $0x40] sm:$0xf] }
  0x86   : > { %v5410_v0 = vcombine.low %v403_v47, %v413_v57  ;;  %v1022_v2 = vor.u32 %v1021_v53, %v1017_v45  ;;  %v420_v3 = vrot.slane %v418_v54, 5  ;;  %v426_v6 = vrot.slane %v424_v55, 5  ;;  %v5257_v49 = vld [vmem:[%s7207_s13 + $0x48] sm:$0xf]  ;;  %v7370_v54 = vld [vmem:[%s7207_s13 + $0x4c] sm:$0xf] }
  0x87   : > { %v430_v7 = vrot.slane %v428_v63, 4  ;;  %v434_v8 = vshll.u32 %v303_v50, 16  ;;  %v1030_v9 = vshrl.u32 %v5255_v56, 16  ;;  %v1018_v10 = vsel %vm7246_vm3, %v1013_v1, %v1017_v45 }
  0x88   : > { %6022 = vmatmul.mubr.msk.bf16.gmra.mrb[4].mxu1 %vm2156_vm4, %v5410_v0  ;;  %v1023_v12 = vrot.slane %v1022_v2, 4  ;;  %v421_v13 = vor.u32 %v420_v3, %v417_v62  ;;  %v1033_v15 = vshll.u32 %v5255_v56, 16  ;;  %v1039_v23 = vshll.u32 %v7336_v5, 16  ;;  %v7377_v0 = vld [vmem:[%s7207_s13 + $0x50] sm:$0x1] }
  0x89   : > { %v431_v20 = vor.u32 %v430_v7, %v426_v6  ;;  %v436_v21 = vrot.slane %v434_v8, 5  ;;  %v1032_v22 = vrot.slane %v1030_v9, 4  ;;  %v1043_v32 = vshrl.u32 %v7336_v5, 16  ;;  %v7381_v9 = vld [vmem:[%s7207_s13 + $0x48] sm:$0xf] }
  0x8a   : > { %v1028_v26 = vsel %vm7246_vm3, %v1023_v12, %v1027_v59  ;;  %v422_v27 = vrot.slane %v421_v13, 4  ;;  %v1035_v30 = vrot.slane %v1033_v15, 5  ;;  %v1041_v36 = vrot.slane %v1039_v23, 5 }
  0x8b   : > { %v5538_v34 = vcombine.low %v1018_v10, %v1028_v26  ;;  %v432_v35 = vrot.slane %v431_v20, 4  ;;  %v1049_v37 = vshll.u32 %v7342_v11, 16  ;;  %v1045_v41 = vrot.slane %v1043_v32, 4  ;;  %v7387_v20 = vld [vmem:[%s7207_s13 + $0x4c] sm:$0xf] }
  0x8c   : > { %v427_v39 = vsel %vm7246_vm3, %v422_v27, %v426_v6  ;;  %v1036_v40 = vor.u32 %v1035_v30, %v1032_v22  ;;  %v439_v44 = vshrl.u32 %v7348_v25, 16  ;;  %v442_v47 = vshll.u32 %v7348_v25, 16 }
  0x8d   : > { %6158 = vmatmul.mubr.msk.bf16.gmra.mrb[4].mxu0 %vm2156_vm4, %v5538_v34  ;;  %v437_v45 = vsel %vm7246_vm3, %v432_v35, %v436_v21  ;;  %v1051_v46 = vrot.slane %v1049_v37, 5  ;;  %v448_v48 = vshll.u32 %v7356_v33, 16  ;;  %v1046_v52 = vor.u32 %v1045_v41, %v1041_v36  ;;  %v305_v37 = vld [vmem:[%s7207_s13 + $0x50] sm:$0x1] }
  0x8e   : > { %v5411_v50 = vcombine.low %v427_v39, %v437_v45  ;;  %v1037_v51 = vrot.slane %v1036_v40, 4  ;;  %v441_v53 = vrot.slane %v439_v44, 4  ;;  %v444_v55 = vrot.slane %v442_v47, 5 }
  0x8f   : > { %v450_v56 = vrot.slane %v448_v48, 5  ;;  %v452_v57 = vshrl.u32 %v7356_v33, 16  ;;  %v458_v59 = vshll.u32 %v304_v24, 16  ;;  %v1047_v63 = vrot.slane %v1046_v52, 4 }
  0x90   : > { %6025 = vmatprep.mubr.msk.bf16.mxu1 %vm2156_vm4, %v5411_v50  ;;  %v1042_v62 = vsel %vm7246_vm3, %v1037_v51, %v1041_v36  ;;  %v1054_v1 = vshrl.u32 %v5257_v49, 16  ;;  %v1057_v2 = vshll.u32 %v5257_v49, 16  ;;  %v445_v3 = vor.u32 %v444_v55, %v441_v53  ;;  %v7402_v51 = vld [vmem:[%s7207_s13 + $0x58] sm:$0xf] }
  0x91   : > { %v454_v6 = vrot.slane %v452_v57, 4  ;;  %v460_v7 = vrot.slane %v458_v59, 5  ;;  %v1063_v8 = vshll.u32 %v7370_v54, 16  ;;  %v1052_v10 = vsel %vm7246_vm3, %v1047_v63, %v1051_v46  ;;  %v5259_v46 = vld [vmem:[%s7207_s13 + $0x54] sm:$0xf] }
  0x92   : > { %v1056_v12 = vrot.slane %v1054_v1, 4  ;;  %v1059_v13 = vrot.slane %v1057_v2, 5  ;;  %v1067_v15 = vshrl.u32 %v7370_v54, 16  ;;  %v5539_v21 = vcombine.low %v1042_v62, %v1052_v10  ;;  %v7407_v62 = vld [vmem:[%s7207_s13 + $0x5c] sm:$0x1] }
  0x93   : > { %v446_v22 = vrot.slane %v445_v3, 4  ;;  %v455_v23 = vor.u32 %v454_v6, %v450_v56  ;;  %v1065_v26 = vrot.slane %v1063_v8, 5  ;;  %v1073_v32 = vshll.u32 %v7377_v0, 16  ;;  %v7415_v8 = vld [vmem:[%s7207_s13 + $0x54] sm:$0xf] }
  0x94   : > { %v1060_v27 = vor.u32 %v1059_v13, %v1056_v12  ;;  %v1069_v30 = vrot.slane %v1067_v15, 4  ;;  %v463_v34 = vshrl.u32 %v7381_v9, 16  ;;  %6161 = vmatprep.mubr.msk.bf16.mxu0 %vm2156_vm4, %v5539_v21  ;;  %v466_v39 = vshll.u32 %v7381_v9, 16  ;;  %v7418_v21 = vld [vmem:[%s7207_s13 + $0x58] sm:$0xf] }
  0x95   : > { %v451_v35 = vsel %vm7246_vm3, %v446_v22, %v450_v56  ;;  %v456_v36 = vrot.slane %v455_v23, 4  ;;  %v472_v40 = vshll.u32 %v7387_v20, 16  ;;  %v1075_v44 = vrot.slane %v1073_v32, 5 }
  0x96   : > { %v1061_v41 = vrot.slane %v1060_v27, 4  ;;  %v1070_v24 = vor.u32 %v1069_v30, %v1065_v26  ;;  %v465_v45 = vrot.slane %v463_v34, 4  ;;  %v468_v48 = vrot.slane %v466_v39, 5  ;;  %v306_v34 = vld [vmem:[%s7207_s13 + $0x5c] sm:$0x1] }
  0x97   : > { %v461_v47 = vsel %vm7246_vm3, %v456_v36, %v460_v7  ;;  %v474_v49 = vrot.slane %v472_v40, 5  ;;  %v476_v50 = vshrl.u32 %v7387_v20, 16  ;;  %v482_v56 = vshll.u32 %v305_v37, 16 }
  0x98   : > { %v5412_v52 = vcombine.low %v451_v35, %v461_v47  ;;  %v1066_v53 = vsel %vm7246_vm3, %v1061_v41, %v1065_v26  ;;  %v1071_v55 = vrot.slane %v1070_v24, 4  ;;  %v469_v57 = vor.u32 %v468_v48, %v465_v45  ;;  %v5261_v24 = vld [vmem:[%s7207_s13 + $0x60] sm:$0xf] }
  0x99   : > { %v478_v59 = vrot.slane %v476_v50, 4  ;;  %v1078_v63 = vshrl.u32 %v5259_v46, 16  ;;  %v1081_v1 = vshll.u32 %v5259_v46, 16  ;;  %v484_v3 = vrot.slane %v482_v56, 5 }
  0x9a   : > { %6026 = vmatmul.mubr.msk.bf16.gmra.mrb[8].mxu1 %vm2156_vm4, %v5412_v52  ;;  %v1076_v2 = vsel %vm7246_vm3, %v1071_v55, %v1075_v44  ;;  %v1087_v6 = vshll.u32 %v7402_v51, 16  ;;  %v1091_v7 = vshrl.u32 %v7402_v51, 16  ;;  %v470_v12 = vrot.slane %v469_v57, 4  ;;  %v7430_v44 = vld [vmem:[%s7207_s13 + $0x64] sm:$0xf] }
  0x9b   : > { %v5540_v10 = vcombine.low %v1066_v53, %v1076_v2  ;;  %v479_v13 = vor.u32 %v478_v59, %v474_v49  ;;  %v1080_v15 = vrot.slane %v1078_v63, 4  ;;  %v1083_v22 = vrot.slane %v1081_v1, 5 }
  0x9c   : > { %v1089_v23 = vrot.slane %v1087_v6, 5  ;;  %v1093_v26 = vrot.slane %v1091_v7, 4  ;;  %v1097_v27 = vshll.u32 %v7407_v62, 16  ;;  %v475_v30 = vsel %vm7246_vm3, %v470_v12, %v474_v49  ;;  %v7435_v49 = vld [vmem:[#allocation5 + $0x4] sm:$0x3] }
  0x9d   : > { %6162 = vmatmul.mubr.msk.bf16.gmra.mrb[8].mxu0 %vm2156_vm4, %v5540_v10  ;;  %v480_v32 = vrot.slane %v479_v13, 4  ;;  %v487_v35 = vshrl.u32 %v7415_v8, 16  ;;  %v490_v36 = vshll.u32 %v7415_v8, 16  ;;  %v1084_v37 = vor.u32 %v1083_v22, %v1080_v15  ;;  %6581 = vmatprep.subr.msk.bf16.mxu1 %vm2205_vm0, %v7435_v49  ;;  %v7449_v10 = vld [vmem:[%s7207_s13 + $0x60] sm:$0xf] }
  0x9e   : > { %v1094_v39 = vor.u32 %v1093_v26, %v1089_v23  ;;  %v1099_v40 = vrot.slane %v1097_v27, 5  ;;  %v496_v41 = vshll.u32 %v7418_v21, 16  ;;  %vm766_vm5 = vcmask 1042432   ;;  %v7452_v26 = vld [vmem:[%s7207_s13 + $0x64] sm:$0xf] }
  0x9f   : > { %vm767_vm6 = vcmask 1046532   ;;  %v485_v45 = vsel %vm7246_vm3, %v480_v32, %v484_v3  ;;  %v489_v46 = vrot.slane %v487_v35, 4  ;;  %v492_v47 = vrot.slane %v490_v36, 5  ;;  %v7445_v3 = vld [vmem:[%s7207_s13 + $0x68] sm:$0x1] }
  0xa0   : > { %v500_v48 = vshrl.u32 %v7418_v21, 16  ;;  %v5413_v50 = vcombine.low %v475_v30, %v485_v45  ;;  %v1085_v52 = vrot.slane %v1084_v37, 4  ;;  %v1095_v53 = vrot.slane %v1094_v39, 4  ;;  %v307_v37 = vld [vmem:[%s7207_s13 + $0x68] sm:$0x1]  ;;  %vm7472_vm7 = vmor %vm766_vm5, %vm767_vm6 }
  0xa1   : > { %v498_v55 = vrot.slane %v496_v41, 5  ;;  %v493_v56 = vor.u32 %v492_v47, %v489_v46  ;;  %v506_v59 = vshll.u32 %v306_v34, 16  ;;  %v1102_v63 = vshrl.u32 %v5261_v24, 16  ;;  %v5295_v46 = vld [vmem:[%s7207_s13 + $0xc] sm:$0xe] }
  0xa2   : > { %v502_v57 = vrot.slane %v500_v48, 4  ;;  %6029 = vmatprep.mubr.msk.bf16.mxu1 %vm2156_vm4, %v5413_v50  ;;  %v1090_v1 = vsel %vm7246_vm3, %v1085_v52, %v1089_v23  ;;  %v1100_v2 = vsel %vm7246_vm3, %v1095_v53, %v1099_v40  ;;  %v1105_v6 = vshll.u32 %v5261_v24, 16 }
  0xa3   : > { %v1111_v7 = vshll.u32 %v7430_v44, 16  ;;  %v5541_v12 = vcombine.low %v1090_v1, %v1100_v2  ;;  %v494_v13 = vrot.slane %v493_v56, 4  ;;  %v508_v22 = vrot.slane %v506_v59, 5  ;;  %v7468_v59 = vld [vmem:[%s7207_s13 + $0x6c] sm:$0xf] }
  0xa4   : > { %v503_v15 = vor.u32 %v502_v57, %v498_v55  ;;  %v1104_v27 = vrot.slane %v1102_v63, 4  ;;  %v1107_v23 = vrot.slane %v1105_v6, 5  ;;  %v1115_v32 = vshrl.u32 %v7430_v44, 16 }
  0xa5   : > { %v1113_v30 = vrot.slane %v1111_v7, 5  ;;  %6165 = vmatprep.mubr.msk.bf16.mxu0 %vm2156_vm4, %v5541_v12  ;;  %v499_v34 = vsel %vm7246_vm3, %v494_v13, %v498_v55  ;;  %v1121_v36 = vshll.u32 %v7445_v3, 16  ;;  %v511_v39 = vshrl.u32 %v7449_v10, 16 }
  0xa6   : > { %v504_v35 = vrot.slane %v503_v15, 4  ;;  %v1108_v40 = vor.u32 %v1107_v23, %v1104_v27  ;;  %v1117_v41 = vrot.slane %v1115_v32, 4  ;;  %v514_v24 = vshll.u32 %v7449_v10, 16  ;;  %v7481_v32 = vld [vmem:[%s7207_s13 + $0x70] sm:$0xf] }
  0xa7   : > { %v520_v45 = vshll.u32 %v7452_v26, 16  ;;  %v1123_v48 = vrot.slane %v1121_v36, 5  ;;  %v513_v50 = vrot.slane %v511_v39, 4  ;;  %v524_v52 = vshrl.u32 %v7452_v26, 16 }
  0xa8   : > { %v509_v47 = vsel %vm7246_vm3, %v504_v35, %v508_v22  ;;  %v1109_v55 = vrot.slane %v1108_v40, 4  ;;  %v1118_v56 = vor.u32 %v1117_v41, %v1113_v30  ;;  %v516_v57 = vrot.slane %v514_v24, 5  ;;  %v308_v40 = vld [vmem:[%s7207_s13 + $0x74] sm:$0x1] }
  0xa9   : > { %v5414_v53 = vcombine.low %v499_v34, %v509_v47  ;;  %v522_v63 = vrot.slane %v520_v45, 5  ;;  %v526_v1 = vrot.slane %v524_v52, 4  ;;  %v530_v2 = vshll.u32 %v307_v37, 16 }
  0xaa   : > { %v5311_v7 = vrot.slane %v5295_v46, 9  ;;  %v1114_v12 = vsel %vm7246_vm3, %v1109_v55, %v1113_v30  ;;  %v1119_v13 = vrot.slane %v1118_v56, 4  ;;  %v517_v15 = vor.u32 %v516_v57, %v513_v50  ;;  %v5296_v46 = vld [vmem:[%s7207_s13 + $0x18] sm:$0xe] }
  0xab   : > { %6030 = vmatmul.mubr.msk.bf16.gmra.mrb[12].mxu1 %vm2156_vm4, %v5414_v53  ;;  %v1383_v22 = vrot.slane %v7230_v14, 5  ;;  %v527_v27 = vor.u32 %v526_v1, %v522_v63  ;;  %v532_v23 = vrot.slane %v530_v2, 5  ;;  %v535_v34 = vshrl.u32 %v7468_v59, 16  ;;  %v7503_v1 = vld [vmem:[%s7207_s13 + $0x78] sm:$0xf] }
  0xac   : > { %v538_v35 = vshll.u32 %v7468_v59, 16  ;;  %v1124_v36 = vsel %vm7246_vm3, %v1119_v13, %v1123_v48  ;;  %v518_v37 = vrot.slane %v517_v15, 4  ;;  %v544_v50 = vshll.u32 %v7481_v32, 16 }
  0xad   : > { %v1384_v30 = vsel %vm7472_vm7, %v5311_v7, %v1383_v22  ;;  %v1385_v39 = vrot.slane %v1383_v22, 4  ;;  %v5542_v41 = vcombine.low %v1114_v12, %v1124_v36  ;;  %v528_v14 = vrot.slane %v527_v27, 4  ;;  %v7506_v7 = vld [vmem:[%s7207_s13 + $0x7c] sm:$0xf] }
  0xae   : > { %v537_v24 = vrot.slane %v535_v34, 4  ;;  %v540_v45 = vrot.slane %v538_v35, 5  ;;  %v523_v47 = vsel %vm7246_vm3, %v518_v37, %v522_v63  ;;  %v548_v52 = vshrl.u32 %v7481_v32, 16  ;;  %v309_v34 = vld [vmem:[%s7207_s13 + $0x80] sm:$0x1] }
  0xaf   : > { %v1387_v48 = vsel %vm7472_vm7, %v1385_v39, %v1386_v58  ;;  %6166 = vmatmul.mubr.msk.bf16.gmra.mrb[12].mxu0 %vm2156_vm4, %v5542_v41  ;;  %v533_v53 = vsel %vm7246_vm3, %v528_v14, %v532_v23  ;;  %v554_v57 = vshll.u32 %v308_v40, 16  ;;  %v546_v19 = vrot.slane %v544_v50, 5  ;;  %v5297_v37 = vld [vmem:[%s7207_s13 + $0x24] sm:$0xe] }
  0xb0   : > { %v5567_v55 = vcombine.low %v1384_v30, %v1387_v48  ;;  %v541_v56 = vor.u32 %v540_v45, %v537_v24  ;;  %v5415_v63 = vcombine.low %v523_v47, %v533_v53  ;;  %v550_v2 = vrot.slane %v548_v52, 4  ;;  %v7531_v24 = vld [vmem:[%s7207_s13 + $0x84] sm:$0xf]  ;;  %v7538_v53 = vld [vmem:[%s7207_s13 + $0x88] sm:$0xf] }
  0xb1   : > { %v5312_v58 = vrot.slane %v5296_v46, 9  ;;  %v556_v13 = vrot.slane %v554_v57, 5  ;;  %v1392_v15 = vrot.slane %v1390_v17, 4  ;;  %v3953_v22 = vsel %vm2205_vm0, %v7344_v16, 0 }
  0xb2   : > { %6187 = vmatprep.mubr.msk.bf16.mxu0 %vm2156_vm4, %v5567_v55  ;;  %v542_v12 = vrot.slane %v541_v56, 4  ;;  %6033 = vmatprep.mubr.msk.bf16.mxu1 %vm2156_vm4, %v5415_v63  ;;  %v551_v27 = vor.u32 %v550_v2, %v546_v19  ;;  %v559_v35 = vshrl.u32 %v7503_v1, 16  ;;  %v562_v36 = vshll.u32 %v7503_v1, 16  ;;  %v7540_v55 = vld [vmem:[#allocation5 + $0xe] sm:$0x3] }
  0xb3   : > { %v1391_v23 = vsel %vm7472_vm7, %v5312_v58, %v1390_v17  ;;  %v1394_v16 = vsel %vm7472_vm7, %v1392_v15, %v1393_v28  ;;  %v568_v60 = vshll.u32 %v7506_v7, 16  ;;  %v572_v39 = vshrl.u32 %v7506_v7, 16 }
  0xb4   : > { %v547_v30 = vsel %vm7246_vm3, %v542_v12, %v546_v19  ;;  %v552_v17 = vrot.slane %v551_v27, 4  ;;  %v5568_v40 = vcombine.low %v1391_v23, %v1394_v16  ;;  %v561_v41 = vrot.slane %v559_v35, 4  ;;  %v310_v19 = vld [vmem:[%s7207_s13 + $0x8c] sm:$0x1] }
  0xb5   : > { %v564_v14 = vrot.slane %v562_v36, 5  ;;  %v570_v45 = vrot.slane %v568_v60, 5  ;;  %v574_v46 = vrot.slane %v572_v39, 4  ;;  %v578_v47 = vshll.u32 %v309_v34, 16  ;;  %v5298_v34 = vld [vmem:[%s7207_s13 + $0x30] sm:$0xe] }
  0xb6   : > { %v5313_v48 = vrot.slane %v5297_v37, 9  ;;  %v557_v61 = vsel %vm7246_vm3, %v552_v17, %v556_v13  ;;  %v1397_v50 = vrot.slane %v7287_v38, 5  ;;  %v1400_v52 = vrot.slane %v7290_v43, 5 }
  0xb7   : > { %v565_v28 = vor.u32 %v564_v14, %v561_v41  ;;  %v5416_v56 = vcombine.low %v547_v30, %v557_v61  ;;  %6188 = vmatmul.mubr.msk.bf16.vlgmr.msra.gmra.mrb[0].mxu0 %vm2156_vm4, %v5568_v40  ;;  %v575_v57 = vor.u32 %v574_v46, %v570_v45  ;;  %v580_v63 = vrot.slane %v578_v47, 5  ;;  %v7559_v30 = vld [vmem:[%s7207_s13 + $0x90] sm:$0xf]  ;;  %v7564_v40 = vld [vmem:[%s7207_s13 + $0x94] sm:$0xf] }
  0xb8   : > { %v583_v2 = vshrl.u32 %v7531_v24, 16  ;;  %6220 = vmatpush3.bf16.msra.mxu0 %v3953_v22  ;;  %v1398_v38 = vsel %vm7472_vm7, %v5313_v48, %v1397_v50  ;;  %v1399_v43 = vrot.slane %v1397_v50, 4  ;;  %v586_v12 = vshll.u32 %v7531_v24, 16 }
  0xb9   : > { %v566_v58 = vrot.slane %v565_v28, 4  ;;  %6034 = vmatmul.mubr.msk.bf16.gmra.mrb[16].mxu1 %vm2156_vm4, %v5416_v56  ;;  %v576_v13 = vrot.slane %v575_v57, 4  ;;  %v592_v27 = vshll.u32 %v7538_v53, 16  ;;  %v596_v23 = vshrl.u32 %v7538_v53, 16  ;;  %6587 = vmatprep.subr.msk.bf16.mxu0 %vm2205_vm0, %v7540_v55  ;;  %v311_v28 = vld [vmem:[%s7207_s13 + $0x98] sm:$0x1] }
  0xba   : > { %v585_v15 = vrot.slane %v583_v2, 4  ;;  %v1401_v35 = vsel %vm7472_vm7, %v1399_v43, %v1400_v52  ;;  %v588_v36 = vrot.slane %v586_v12, 5  ;;  %v602_v37 = vshll.u32 %v310_v19, 16  ;;  %v5299_v19 = vld [vmem:[%s7207_s13 + $0x3c] sm:$0xe] }
  0xbb   : > { %v571_v22 = vsel %vm7246_vm3, %v566_v58, %v570_v45  ;;  %v581_v16 = vsel %vm7246_vm3, %v576_v13, %v580_v63  ;;  %v5569_v60 = vcombine.low %v1398_v38, %v1401_v35  ;;  %v594_v39 = vrot.slane %v592_v27, 5  ;;  %v7588_v35 = vld [vmem:[%s7207_s13 + $0xa0] sm:$0xf] }
  0xbc   : > { %v598_v17 = vrot.slane %v596_v23, 4  ;;  %v5417_v41 = vcombine.low %v571_v22, %v581_v16  ;;  %v589_v14 = vor.u32 %v588_v36, %v585_v15  ;;  %v604_v45 = vrot.slane %v602_v37, 5  ;;  %v7581_v15 = vld [vmem:[%s7207_s13 + $0x9c] sm:$0xf] }
  0xbd   : > { %v5314_v46 = vrot.slane %v5298_v34, 9  ;;  %6191 = vmatprep.mubr.msk.bf16.mxu0 %vm2156_vm4, %v5569_v60  ;;  %v1404_v48 = vrot.slane %v7309_v18, 5  ;;  %v1407_v61 = vrot.slane %v7312_v29, 5  ;;  %v607_v50 = vshrl.u32 %v7559_v30, 16 }
  0xbe   : > { %v599_v47 = vor.u32 %v598_v17, %v594_v39  ;;  %6037 = vmatprep.mubr.msk.bf16.mxu1 %vm2156_vm4, %v5417_v41  ;;  %v590_v52 = vrot.slane %v589_v14, 4  ;;  %v610_v56 = vshll.u32 %v7559_v30, 16  ;;  %v616_v57 = vshll.u32 %v7564_v40, 16 }
  0xbf   : > { %v620_v63 = vshrl.u32 %v7564_v40, 16  ;;  %v1405_v18 = vsel %vm7472_vm7, %v5314_v46, %v1404_v48  ;;  %v1406_v29 = vrot.slane %v1404_v48, 4  ;;  %v609_v58 = vrot.slane %v607_v50, 4 }
  0xc0   : > { %v600_v2 = vrot.slane %v599_v47, 4  ;;  %v595_v38 = vsel %vm7246_vm3, %v590_v52, %v594_v39  ;;  %v612_v43 = vrot.slane %v610_v56, 5  ;;  %v618_v12 = vrot.slane %v616_v57, 5  ;;  %v312_v47 = vld [vmem:[%s7207_s13 + $0xa4] sm:$0x1] }
  0xc1   : > { %v622_v13 = vrot.slane %v620_v63, 4  ;;  %v1408_v23 = vsel %vm7472_vm7, %v1406_v29, %v1407_v61  ;;  %v626_v34 = vshll.u32 %v311_v28, 16  ;;  %v5315_v22 = vrot.slane %v5299_v19, 9  ;;  %v5300_v52 = vld [vmem:[%s7207_s13 + $0x48] sm:$0xe] }
  0xc2   : > { %v605_v27 = vsel %vm7246_vm3, %v600_v2, %v604_v45  ;;  %v5570_v37 = vcombine.low %v1405_v18, %v1408_v23  ;;  %v613_v16 = vor.u32 %v612_v43, %v609_v58  ;;  %v1411_v17 = vrot.slane %v7336_v5, 5  ;;  %v7607_v2 = vld [vmem:[%s7207_s13 + $0xa8] sm:$0xf] }
  0xc3   : > { %v5418_v36 = vcombine.low %v595_v38, %v605_v27  ;;  %v623_v60 = vor.u32 %v622_v13, %v618_v12  ;;  %v628_v39 = vrot.slane %v626_v34, 5  ;;  %v1414_v41 = vrot.slane %v7342_v11, 5 }
  0xc4   : > { %v631_v14 = vshrl.u32 %v7581_v15, 16  ;;  %6192 = vmatmul.mubr.msk.bf16.gmra.mrb[4].mxu0 %vm2156_vm4, %v5570_v37  ;;  %v614_v45 = vrot.slane %v613_v16, 4  ;;  %v634_v48 = vshll.u32 %v7581_v15, 16  ;;  %v640_v61 = vshll.u32 %v7588_v35, 16  ;;  %v313_v37 = vld [vmem:[%s7207_s13 + $0xb0] sm:$0x1] }
  0xc5   : > { %6038 = vmatmul.mubr.msk.bf16.gmra.mrb[20].mxu1 %vm2156_vm4, %v5418_v36  ;;  %v624_v46 = vrot.slane %v623_v60, 4  ;;  %v1412_v28 = vsel %vm7472_vm7, %v5315_v22, %v1411_v17  ;;  %v1413_v5 = vrot.slane %v1411_v17, 4  ;;  %v644_v11 = vshrl.u32 %v7588_v35, 16 }
  0xc6   : > { %v633_v50 = vrot.slane %v631_v14, 4  ;;  %v619_v56 = vsel %vm7246_vm3, %v614_v45, %v618_v12  ;;  %v636_v63 = vrot.slane %v634_v48, 5  ;;  %v642_v19 = vrot.slane %v640_v61, 5  ;;  %v7613_v12 = vld [vmem:[%s7207_s13 + $0xac] sm:$0xf] }
  0xc7   : > { %v629_v57 = vsel %vm7246_vm3, %v624_v46, %v628_v39  ;;  %v1415_v29 = vsel %vm7472_vm7, %v1413_v5, %v1414_v41  ;;  %v646_v58 = vrot.slane %v644_v11, 4  ;;  %v650_v38 = vshll.u32 %v312_v47, 16  ;;  %v5301_v46 = vld [vmem:[%s7207_s13 + $0x54] sm:$0xe] }
  0xc8   : > { %v5419_v18 = vcombine.low %v619_v56, %v629_v57  ;;  %v5571_v43 = vcombine.low %v1412_v28, %v1415_v29  ;;  %v637_v13 = vor.u32 %v636_v63, %v633_v50  ;;  %v5316_v27 = vrot.slane %v5300_v52, 9  ;;  %v7631_v5 = vld [vmem:[%s7207_s13 + $0xb4] sm:$0xf]  ;;  %v7636_v57 = vld [vmem:[%s7207_s13 + $0xb8] sm:$0xf] }
  0xc9   : > { %v1418_v23 = vrot.slane %v7370_v54, 5  ;;  %v647_v34 = vor.u32 %v646_v58, %v642_v19  ;;  %v652_v22 = vrot.slane %v650_v38, 5  ;;  %v1421_v36 = vrot.slane %v7377_v0, 5 }
  0xca   : > { %6041 = vmatprep.mubr.msk.bf16.mxu1 %vm2156_vm4, %v5419_v18  ;;  %v655_v16 = vshrl.u32 %v7607_v2, 16  ;;  %6195 = vmatprep.mubr.msk.bf16.mxu0 %vm2156_vm4, %v5571_v43  ;;  %v638_v60 = vrot.slane %v637_v13, 4  ;;  %v658_v17 = vshll.u32 %v7607_v2, 16  ;;  %v664_v45 = vshll.u32 %v7613_v12, 16  ;;  %v314_v13 = vld [vmem:[%s7207_s13 + $0xbc] sm:$0x1] }
  0xcb   : > { %v1419_v39 = vsel %vm7472_vm7, %v5316_v27, %v1418_v23  ;;  %v1420_v54 = vrot.slane %v1418_v23, 4  ;;  %v648_v41 = vrot.slane %v647_v34, 4  ;;  %v668_v0 = vshrl.u32 %v7613_v12, 16 }
  0xcc   : > { %v657_v14 = vrot.slane %v655_v16, 4  ;;  %v643_v47 = vsel %vm7246_vm3, %v638_v60, %v642_v19  ;;  %v660_v61 = vrot.slane %v658_v17, 5  ;;  %v674_v28 = vshll.u32 %v313_v37, 16  ;;  %v5302_v37 = vld [vmem:[%s7207_s13 + $0x60] sm:$0xe] }
  0xcd   : > { %v1422_v48 = vsel %vm7472_vm7, %v1420_v54, %v1421_v36  ;;  %v653_v50 = vsel %vm7246_vm3, %v648_v41, %v652_v22  ;;  %v666_v52 = vrot.slane %v664_v45, 5  ;;  %v670_v56 = vrot.slane %v668_v0, 4 }
  0xce   : > { %v5572_v11 = vcombine.low %v1419_v39, %v1422_v48  ;;  %v5420_v63 = vcombine.low %v643_v47, %v653_v50  ;;  %v661_v18 = vor.u32 %v660_v61, %v657_v14  ;;  %v676_v19 = vrot.slane %v674_v28, 5  ;;  %v5303_v14 = vld [vmem:[%s7207_s13 + $0x6c] sm:$0xe]  ;;  %v5264_v48 = vld [vmem:[%s7207_s13 + $0x70] sm:$0xf] }
  0xcf   : > { %v5317_v29 = vrot.slane %v5301_v46, 9  ;;  %v671_v58 = vor.u32 %v670_v56, %v666_v52  ;;  %v1425_v38 = vrot.slane %v7402_v51, 5  ;;  %v1428_v43 = vrot.slane %v7407_v62, 5  ;;  %v5287_v61 = vld [vmem:[%s7207_s13 + $0x74] sm:$0x1] }
  0xd0   : > { %6196 = vmatmul.mubr.msk.bf16.gmra.mrb[8].mxu0 %vm2156_vm4, %v5572_v11  ;;  %v679_v27 = vshrl.u32 %v7631_v5, 16  ;;  %6042 = vmatmul.mubr.msk.bf16.gmra.mrb[24].mxu1 %vm2156_vm4, %v5420_v63  ;;  %v662_v23 = vrot.slane %v661_v18, 4  ;;  %v682_v34 = vshll.u32 %v7631_v5, 16  ;;  %v688_v22 = vshll.u32 %v7636_v57, 16 }
  0xd1   : > { %v692_v36 = vshrl.u32 %v7636_v57, 16  ;;  %v672_v16 = vrot.slane %v671_v58, 4  ;;  %v1426_v51 = vsel %vm7472_vm7, %v5317_v29, %v1425_v38  ;;  %v1427_v62 = vrot.slane %v1425_v38, 4 }
  0xd2   : > { %v681_v60 = vrot.slane %v679_v27, 4  ;;  %v667_v39 = vsel %vm7246_vm3, %v662_v23, %v666_v52  ;;  %v684_v54 = vrot.slane %v682_v34, 5  ;;  %v690_v17 = vrot.slane %v688_v22, 5  ;;  %v6730_v23 = vld [vmem:[%s7207_s13] sm:$0xf] }
  0xd3   : > { %v694_v41 = vrot.slane %v692_v36, 4  ;;  %v677_v45 = vsel %vm7246_vm3, %v672_v16, %v676_v19  ;;  %v1429_v0 = vsel %vm7472_vm7, %v1427_v62, %v1428_v43  ;;  %v698_v46 = vshll.u32 %v314_v13, 16  ;;  %v5304_v34 = vld [vmem:[%s7207_s13 + $0x78] sm:$0xe] }
  0xd4   : > { %v5318_v47 = vrot.slane %v5302_v37, 9  ;;  %v5421_v28 = vcombine.low %v667_v39, %v677_v45  ;;  %v5573_v50 = vcombine.low %v1426_v51, %v1429_v0  ;;  %v685_v11 = vor.u32 %v684_v54, %v681_v60  ;;  %v5266_v51 = vld [vmem:[%s7207_s13 + $0x7c] sm:$0xf]  ;;  %v5288_v39 = vld [vmem:[%s7207_s13 + $0x80] sm:$0x1] }
  0xd5   : > { %v695_v52 = vor.u32 %v694_v41, %v690_v17  ;;  %v700_v56 = vrot.slane %v698_v46, 5  ;;  %v1432_v63 = vrot.slane %v7430_v44, 5  ;;  %v1435_v18 = vrot.slane %v7445_v3, 5  ;;  %v7667_v44 = vld [vmem:[%s7207_s13 + $0x4] sm:$0xf] }
  0xd6   : > { %v5319_v19 = vrot.slane %v5303_v14, 9  ;;  %6045 = vmatprep.mubr.msk.bf16.mxu1 %vm2156_vm4, %v5421_v28  ;;  %6199 = vmatprep.mubr.msk.bf16.mxu0 %vm2156_vm4, %v5573_v50  ;;  %v686_v29 = vrot.slane %v685_v11, 4  ;;  %v1439_v38 = vrot.slane %v5264_v48, 5  ;;  %v1442_v43 = vrot.slane %v5287_v61, 5  ;;  %v5305_v54 = vld [vmem:[%s7207_s13 + $0x84] sm:$0xe] }
  0xd7   : > { %v696_v58 = vrot.slane %v695_v52, 4  ;;  %v1433_v13 = vsel %vm7472_vm7, %v5318_v47, %v1432_v63  ;;  %v1434_v27 = vrot.slane %v1432_v63, 4  ;;  %v5439_v3 = vcombine.low %v6730_v23, %v7667_v44  ;;  %v5268_v45 = vld [vmem:[%s7207_s13 + $0x88] sm:$0xf]  ;;  %v5289_v0 = vld [vmem:[%s7207_s13 + $0x8c] sm:$0x1] }
  0xd8   : > { %v691_v22 = vsel %vm7246_vm3, %v686_v29, %v690_v17  ;;  %v1440_v37 = vsel %vm7472_vm7, %v5319_v19, %v1439_v38  ;;  %v1441_v16 = vrot.slane %v1439_v38, 4  ;;  %v5320_v17 = vrot.slane %v5304_v34, 9  ;;  %v5270_v48 = vld [vmem:[%s7207_s13 + $0x94] sm:$0xf]  ;;  %v5306_v63 = vld [vmem:[%s7207_s13 + $0x90] sm:$0xe] }
  0xd9   : > { %v701_v36 = vsel %vm7246_vm3, %v696_v58, %v700_v56  ;;  %v1436_v60 = vsel %vm7472_vm7, %v1434_v27, %v1435_v18  ;;  %v1446_v47 = vrot.slane %v5266_v51, 5  ;;  %v1449_v61 = vrot.slane %v5288_v39, 5  ;;  %v5290_v18 = vld [vmem:[%s7207_s13 + $0x98] sm:$0x1]  ;;  %v5272_v29 = vld [vmem:[%s7207_s13 + $0xa0] sm:$0xf] }
  0xda   : > { %v5422_v62 = vcombine.low %v691_v22, %v701_v36  ;;  %v5574_v41 = vcombine.low %v1433_v13, %v1436_v60  ;;  %v1443_v14 = vsel %vm7472_vm7, %v1441_v16, %v1442_v43  ;;  %v5321_v28 = vrot.slane %v5305_v54, 9  ;;  %v6732_v58 = vld [vmem:[%s7207_s13 + $0xc] sm:$0xf]  ;;  %v7698_v38 = vld [vmem:[%s7207_s13 + $0x10] sm:$0xf] }
  0xdb   : > { %v5575_v46 = vcombine.low %v1440_v37, %v1443_v14  ;;  %v1447_v50 = vsel %vm7472_vm7, %v5320_v17, %v1446_v47  ;;  %v1448_v11 = vrot.slane %v1446_v47, 4  ;;  %v1453_v52 = vrot.slane %v5268_v45, 5  ;;  %v5307_v34 = vld [vmem:[%s7207_s13 + $0x9c] sm:$0xe]  ;;  %v6734_v37 = vld [vmem:[%s7207_s13 + $0x18] sm:$0xf] }
  0xdc   : > { %6046 = vmatmul.mubr.msk.bf16.gmra.mrb[28].mxu1 %vm2156_vm4, %v5422_v62  ;;  %6200 = vmatmul.mubr.msk.bf16.gmra.mrb[12].mxu0 %vm2156_vm4, %v5574_v41  ;;  %v1456_v56 = vrot.slane %v5289_v0, 5  ;;  %v1460_v19 = vrot.slane %v5270_v48, 5  ;;  %v5440_v43 = vcombine.low %v6732_v58, %v7698_v38  ;;  %v2745_v22 = vsel %vm2205_vm0, %v7435_v49, 0  ;;  %v7711_v16 = vld [vmem:[%s7207_s13 + $0x1c] sm:$0xf] }
  0xdd   : > { %6051 = vmatprep.mubr.msk.bf16.mxu1 %vm2156_vm4, %v5439_v3  ;;  %6203 = vmatprep.mubr.msk.bf16.mxu0 %vm2156_vm4, %v5575_v46  ;;  %v1450_v13 = vsel %vm7472_vm7, %v1448_v11, %v1449_v61  ;;  %v1454_v27 = vsel %vm7472_vm7, %v5321_v28, %v1453_v52  ;;  %v1455_v23 = vrot.slane %v1453_v52, 4  ;;  %v5291_v3 = vld [vmem:[%s7207_s13 + $0xa4] sm:$0x1]  ;;  %v5441_v51 = vcombine.low %v6734_v37, %v7711_v16  ;;  %v5274_v49 = vld [vmem:[%s7207_s13 + $0xac] sm:$0xf] }
  0xde   : > { %v5576_v36 = vcombine.low %v1447_v50, %v1450_v13  ;;  %v5322_v62 = vrot.slane %v5306_v63, 9  ;;  %v1462_v39 = vrot.slane %v1460_v19, 4  ;;  %v1463_v54 = vrot.slane %v5290_v18, 5  ;;  %v5276_v46 = vld [vmem:[%s7207_s13 + $0xb8] sm:$0xf] }
  0xdf   : > { %v1457_v60 = vsel %vm7472_vm7, %v1455_v23, %v1456_v56  ;;  %v1467_v41 = vrot.slane %v5272_v29, 5  ;;  %v5323_v17 = vrot.slane %v5307_v34, 9  ;;  %v1470_v45 = vrot.slane %v5291_v3, 5  ;;  %v7719_v47 = vld [vmem:[#allocation5 + $0x6] sm:$0x3] }
  0xe0   : > { %v5577_v14 = vcombine.low %v1454_v27, %v1457_v60  ;;  %v1461_v48 = vsel %vm7472_vm7, %v5322_v62, %v1460_v19  ;;  %v1464_v61 = vsel %vm7472_vm7, %v1462_v39, %v1463_v54  ;;  %v1474_v28 = vrot.slane %v5274_v49, 5  ;;  %v5292_v52 = vld [vmem:[%s7207_s13 + $0xb0] sm:$0x1]  ;;  %v5308_v56 = vld [vmem:[%s7207_s13 + $0xa8] sm:$0xe] }
  0xe1   : > { %v1469_v0 = vrot.slane %v1467_v41, 4  ;;  %v1468_v50 = vsel %vm7472_vm7, %v5323_v17, %v1467_v41  ;;  %v1481_v63 = vrot.slane %v5276_v46, 5  ;;  %v6736_v18 = vld [vmem:[%s7207_s13 + $0x24] sm:$0xf]  ;;  %v7738_v29 = vld [vmem:[%s7207_s13 + $0x28] sm:$0xf]  ;;  %v5578_v13 = vcombine.low %v1461_v48, %v1464_v61 }
  0xe2   : > { %v5442_v19 = vcombine.low %v6736_v18, %v7738_v29  ;;  %v5293_v58 = vld [vmem:[%s7207_s13 + $0xbc] sm:$0x1]  ;;  %v6738_v27 = vld [vmem:[%s7207_s13 + $0x30] sm:$0xf]  ;;  %v5324_v34 = vrot.slane %v5308_v56, 9  ;;  %v5444_v49 = vcombine.low %v7348_v25, %v7356_v33  ;;  %v5445_v46 = vcombine.low %v7381_v9, %v7387_v20 }
  0xe3   : > { %v1471_v11 = vsel %vm7472_vm7, %v1469_v0, %v1470_v45  ;;  %v5443_v23 = vcombine.low %v6738_v27, %v7322_v42  ;;  %v1484_v62 = vrot.slane %v5293_v58, 5  ;;  %v5278_v60 = vld [vmem:[%s7207_s13 + $0xc4] sm:$0xf]  ;;  %v5294_v17 = vld [vmem:[%s7207_s13 + $0xc8] sm:$0x1]  ;;  %v5447_v56 = vcombine.low %v7449_v10, %v7452_v26 }
  0xe4   : > { %6052 = vmatmul.mubr.msk.bf16.vlgmr.msra.gmra.mrb[0].mxu1 %vm2156_vm4, %v5440_v43  ;;  %6204 = vmatmul.mubr.msk.bf16.gmra.mrb[16].mxu0 %vm2156_vm4, %v5576_v36  ;;  %v5309_v43 = vld [vmem:[%s7207_s13 + $0xb4] sm:$0xe]  ;;  %v5579_v3 = vcombine.low %v1468_v50, %v1471_v11  ;;  %v1477_v36 = vrot.slane %v5292_v52, 5  ;;  %v1475_v42 = vsel %vm7472_vm7, %v5324_v34, %v1474_v28  ;;  %v1488_v54 = vrot.slane %v5278_v60, 5  ;;  %v5310_v45 = vld [vmem:[%s7207_s13 + $0xc0] sm:$0xe] }
  0xe5   : > { %6084 = vmatpush3.bf16.msra.mxu1 %v2745_v22  ;;  %6055 = vmatprep.mubr.msk.bf16.mxu1 %vm2156_vm4, %v5441_v51  ;;  %v1476_v22 = vrot.slane %v1474_v28, 4  ;;  %v5325_v37 = vrot.slane %v5309_v43, 9  ;;  %v1483_v51 = vrot.slane %v1481_v63, 4  ;;  %v5326_v61 = vrot.slane %v5310_v45, 9  ;;  %v5327_v9 = vld [vmem:[%s7207_s13 + $0x18] sm:$0xf] }
  0xe6   : > { %6207 = vmatprep.mubr.msk.bf16.mxu0 %vm2156_vm4, %v5577_v14  ;;  %6582 = vmatprep.subr.msk.bf16.mxu1 %vm2205_vm0, %v7719_v47  ;;  %v1490_v28 = vrot.slane %v1488_v54, 4  ;;  %v1491_v50 = vrot.slane %v5294_v17, 5  ;;  %v7774_v20 = vld [vmem:[%s7207_s13 + $0x1c] sm:$0xf]  ;;  %v5446_v11 = vcombine.low %v7415_v8, %v7418_v21  ;;  %v5329_v18 = vld [vmem:[%s7207_s13 + $0x24] sm:$0xf]  ;;  %v5448_v10 = vcombine.low %v7468_v59, %v7481_v32 }
  0xe7   : > { %v1478_v39 = vsel %vm7472_vm7, %v1476_v22, %v1477_v36  ;;  %v1482_v41 = vsel %vm7472_vm7, %v5325_v37, %v1481_v63  ;;  %v1485_v14 = vsel %vm7472_vm7, %v1483_v51, %v1484_v62  ;;  %v1489_v25 = vsel %vm7472_vm7, %v5326_v61, %v1488_v54  ;;  %v5331_v8 = vld [vmem:[%s7207_s13 + $0x30] sm:$0xf]  ;;  %v7791_v21 = vld [vmem:[%s7207_s13 + $0x34] sm:$0xf]  ;;  %v7802_v27 = vld [vmem:[#allocation5 + $0x10] sm:$0x3] }
  0xe8   : > { %v5580_v0 = vcombine.low %v1475_v42, %v1478_v39  ;;  %v5581_v48 = vcombine.low %v1482_v41, %v1485_v14  ;;  %v1492_v33 = vsel %vm7472_vm7, %v1490_v28, %v1491_v50  ;;  %v5599_v63 = vcombine.low %v5327_v9, %v7774_v20  ;;  %v5333_v59 = vld [vmem:[%s7207_s13 + $0x3c] sm:$0xf]  ;;  %v7809_v32 = vld [vmem:[%s7207_s13 + $0x40] sm:$0xf]  ;;  %v7824_v42 = vld [vmem:[%s7207_s13 + $0x8] sm:$0x1] }
  0xe9   : > { %v5582_v52 = vcombine.low %v1489_v25, %v1492_v33  ;;  %v5449_v58 = vcombine.low %v7503_v1, %v7506_v7  ;;  %v5601_v43 = vcombine.low %v5331_v8, %v7791_v21  ;;  %v5335_v1 = vld [vmem:[%s7207_s13 + $0x48] sm:$0xf]  ;;  %v7813_v7 = vld [vmem:[%s7207_s13 + $0x4c] sm:$0xf]  ;;  %v1570_v34 = vshrl.u32 %v5329_v18, 16 }
  0xea   : > { %v1573_v22 = vshll.u32 %v5329_v18, 16  ;;  %v5602_v36 = vcombine.low %v5333_v59, %v7809_v32  ;;  %v5451_v37 = vcombine.low %v7559_v30, %v7564_v40  ;;  %v1594_v51 = vshrl.u32 %v5331_v8, 16  ;;  %v5337_v45 = vld [vmem:[%s7207_s13 + $0x54] sm:$0xf]  ;;  %v5339_v28 = vld [vmem:[%s7207_s13 + $0x60] sm:$0xf] }
  0xeb   : > { %v1597_v62 = vshll.u32 %v5331_v8, 16  ;;  %v5603_v60 = vcombine.low %v5335_v1, %v7813_v7  ;;  %v774_v39 = vrot.slane %v7824_v42, 5  ;;  %v778_v54 = vrot.slane %v7698_v38, 5  ;;  %v702_v8 = vld [vmem:[%s7207_s13] sm:$0xe] }
  0xec   : > { %6056 = vmatmul.mubr.msk.bf16.gmra.mrb[4].mxu1 %vm2156_vm4, %v5442_v19  ;;  %6208 = vmatmul.mubr.msk.bf16.gmra.mrb[20].mxu0 %vm2156_vm4, %v5578_v13  ;;  %v7787_v19 = vld [vmem:[%s7207_s13 + $0x28] sm:$0xf]  ;;  %v4247_v13 = vsel %vm2205_vm0, %v7540_v55, 0  ;;  %v1546_v55 = vshrl.u32 %v5327_v9, 16  ;;  %v1618_v41 = vshrl.u32 %v5333_v59, 16  ;;  %v1621_v17 = vshll.u32 %v5333_v59, 16 }
  0xed   : > { %6059 = vmatprep.mubr.msk.bf16.mxu1 %vm2156_vm4, %v5443_v23  ;;  %6211 = vmatprep.mubr.msk.bf16.mxu0 %vm2156_vm4, %v5579_v3  ;;  %v5600_v26 = vcombine.low %v5329_v18, %v7787_v19  ;;  %v1549_v23 = vshll.u32 %v5327_v9, 16  ;;  %v5450_v3 = vcombine.low %v7531_v24, %v7538_v53  ;;  %v7829_v24 = vld [vmem:[%s7207_s13 + $0x14] sm:$0x1]  ;;  %v7851_v50 = vrot.slane %v1594_v51, 4  ;;  %v7857_v9 = vld [vmem:[%s7207_s13 + $0x64] sm:$0xf] }
  0xee   : > { %v781_v53 = vrot.slane %v7829_v24, 5  ;;  %v7832_v14 = vrot.slane %v1546_v55, 4  ;;  %v7853_v25 = vrot.slane %v1597_v62, 5  ;;  %v1642_v33 = vshrl.u32 %v5335_v1, 16  ;;  %v6741_v38 = vld [vmem:[%s7207_s13 + $0x20] sm:$0x1] }
  0xef   : > { %v7834_v30 = vrot.slane %v1549_v23, 5  ;;  %v1666_v18 = vshrl.u32 %v5337_v45, 16  ;;  %v1690_v59 = vshrl.u32 %v5339_v28, 16  ;;  %v1693_v55 = vshll.u32 %v5339_v28, 16  ;;  %v7873_v23 = vld [vmem:[%s7207_s13 + $0x6c] sm:$0xf] }
  0xf0   : > { %v785_v42 = vrot.slane %v7711_v16, 5  ;;  %v7935_v16 = vsel %vm2205_vm0, %v7719_v47, 0  ;;  %v7952_v47 = vld [vmem:[%s7207_s13 + $0x90] sm:$0xf]  ;;  %v6745_v61 = vld [vmem:[%s7207_s13 + $0x40] sm:$0xf] }
  0xf1   : > { %v1786_v24 = vshrl.u32 %v7952_v47, 16 }
  0xf4   : > { %6060 = vmatmul.mubr.msk.bf16.gmra.mrb[8].mxu1 %vm2156_vm4, %v5444_v49  ;;  %6212 = vmatmul.mubr.msk.bf16.gmra.mrb[24].mxu0 %vm2156_vm4, %v5580_v0  ;;  %v7840_v49 = vld [vmem:[%s7207_s13 + $0x58] sm:$0xf]  ;;  %v7842_v0 = vrot.slane %v1570_v34, 4  ;;  %v7879_v34 = vld [vmem:[%s7207_s13 + $0x70] sm:$0xf] }
  0xf5   : > { %6063 = vmatprep.mubr.msk.bf16.mxu1 %vm2156_vm4, %v5445_v46  ;;  %6215 = vmatprep.mubr.msk.bf16.mxu0 %vm2156_vm4, %v5581_v48  ;;  %v7844_v46 = vrot.slane %v1573_v22, 5  ;;  %v5231_v22 = vrot.slane %v702_v8, 9  ;;  %v806_v48 = vrot.slane %v6745_v61, 5 }
  0xfc   : > { %6064 = vmatmul.mubr.msk.bf16.gmra.mrb[12].mxu1 %vm2156_vm4, %v5446_v11  ;;  %6216 = vmatmul.mubr.msk.bf16.gmra.mrb[28].mxu0 %vm2156_vm4, %v5582_v52  ;;  %v771_v11 = vrot.slane %v7667_v44, 5  ;;  %v7860_v52 = vrot.slane %v1618_v41, 4  ;;  %v5453_v44 = vcombine.low %v7607_v2, %v7613_v12  ;;  %v1714_v12 = vshrl.u32 %v7873_v23, 16 }
  0xfd   : > { %6067 = vmatprep.mubr.msk.bf16.mxu1 %vm2156_vm4, %v5447_v56  ;;  %6221 = vmatprep.mubr.msk.bf16.mxu0 %vm2156_vm4, %v5599_v63  ;;  %v1645_v63 = vshll.u32 %v5335_v1, 16  ;;  %v7875_v1 = vrot.slane %v1642_v33, 4  ;;  %v1717_v41 = vshll.u32 %v7873_v23, 16  ;;  %v7903_v33 = vld [vmem:[%s7207_s13 + $0x7c] sm:$0xf]  ;;  %v1789_v2 = vshll.u32 %v7952_v47, 16 }
 0x104   : > { %6068 = vmatmul.mubr.msk.bf16.gmra.mrb[16].mxu1 %vm2156_vm4, %v5448_v10  ;;  %6222 = vmatmul.mubr.msk.bf16.vlgmr.msra.gmra.mrb[0].mxu0 %vm2156_vm4, %v5600_v26  ;;  %v7864_v10 = vrot.slane %v1621_v17, 5  ;;  %v5343_v17 = vld [vmem:[%s7207_s13 + $0x78] sm:$0xf]  ;;  %v706_v26 = vld [vmem:[%s7207_s13 + $0x30] sm:$0xe] }
 0x105   : > { %6071 = vmatprep.mubr.msk.bf16.mxu1 %vm2156_vm4, %v5449_v58  ;;  %6254 = vmatpush3.bf16.msra.mxu0 %v4247_v13  ;;  %v5452_v58 = vcombine.low %v7581_v15, %v7588_v35  ;;  %v5604_v13 = vcombine.low %v5337_v45, %v7840_v49  ;;  %v773_v15 = vrot.slane %v771_v11, 4  ;;  %v7881_v35 = vrot.slane %v1645_v63, 5 }
 0x106   : > { %6225 = vmatprep.mubr.msk.bf16.mxu0 %vm2156_vm4, %v5601_v43  ;;  %6588 = vmatprep.subr.msk.bf16.mxu0 %vm2205_vm0, %v7802_v27  ;;  %v1669_v43 = vshll.u32 %v5337_v45, 16  ;;  %v7898_v45 = vrot.slane %v1690_v59, 4  ;;  %v1738_v63 = vshrl.u32 %v5343_v17, 16  ;;  %v7920_v59 = vld [vmem:[%s7207_s13 + $0x84] sm:$0xf] }
 0x108   : > { %v7889_v51 = vrot.slane %v1669_v43, 5  ;;  %v7914_v43 = vrot.slane %v1714_v12, 4  ;;  %v7929_v12 = vrot.slane %v1738_v63, 4  ;;  %v1762_v63 = vshrl.u32 %v7920_v59, 16 }
 0x10c   : > { %6072 = vmatmul.mubr.msk.bf16.gmra.mrb[20].mxu1 %vm2156_vm4, %v5450_v3  ;;  %6226 = vmatmul.mubr.msk.bf16.gmra.mrb[4].mxu0 %vm2156_vm4, %v5602_v36  ;;  %v5605_v3 = vcombine.low %v5339_v28, %v7857_v9  ;;  %v7883_v36 = vrot.slane %v1666_v18, 4  ;;  %v7900_v28 = vrot.slane %v1693_v55, 5  ;;  %v1741_v18 = vshll.u32 %v5343_v17, 16 }
 0x10d   : > { %6075 = vmatprep.mubr.msk.bf16.mxu1 %vm2156_vm4, %v5451_v37  ;;  %6229 = vmatprep.mubr.msk.bf16.mxu0 %vm2156_vm4, %v5603_v60  ;;  %v703_v37 = vld [vmem:[%s7207_s13 + $0xc] sm:$0xe]  ;;  %v5454_v60 = vcombine.low %v7631_v5, %v7636_v57  ;;  %v772_v5 = vsel %vm7472_vm7, %v5231_v22, %v771_v11  ;;  %v775_v57 = vsel %vm7472_vm7, %v773_v15, %v774_v39  ;;  %v7923_v11 = vrot.slane %v1717_v41, 5 }
 0x10e   : > { %v5232_v8 = vrot.slane %v703_v37, 9  ;;  %v5607_v55 = vcombine.low %v5343_v17, %v7903_v33  ;;  %v792_v22 = vrot.slane %v7738_v29, 5  ;;  %v5471_v15 = vcombine.low %v772_v5, %v775_v57  ;;  %v705_v37 = vld [vmem:[%s7207_s13 + $0x24] sm:$0xe]  ;;  %v7947_v17 = vld [vmem:[%s7207_s13 + $0x88] sm:$0xf] }
 0x10f   : > { %v787_v57 = vrot.slane %v785_v42, 4 }
 0x110   : > { %v779_v41 = vsel %vm7472_vm7, %v5232_v8, %v778_v54  ;;  %v7956_v8 = vld [vmem:[%s7207_s13 + $0x94] sm:$0xf]  ;;  %v794_v39 = vrot.slane %v792_v22, 4 }
 0x114   : > { %6076 = vmatmul.mubr.msk.bf16.gmra.mrb[24].mxu1 %vm2156_vm4, %v5452_v58  ;;  %6230 = vmatmul.mubr.msk.bf16.gmra.mrb[8].mxu0 %vm2156_vm4, %v5604_v13  ;;  %v780_v58 = vrot.slane %v778_v54, 4  ;;  %v788_v54 = vrot.slane %v6741_v38, 5  ;;  %v6742_v13 = vld [vmem:[%s7207_s13 + $0x2c] sm:$0x1]  ;;  %v5608_v38 = vcombine.low %v7920_v59, %v7947_v17 }
 0x115   : > { %6079 = vmatprep.mubr.msk.bf16.mxu1 %vm2156_vm4, %v5453_v44  ;;  %6233 = vmatprep.mubr.msk.bf16.mxu0 %vm2156_vm4, %v5605_v3  ;;  %v5606_v44 = vcombine.low %v7873_v23, %v7879_v34  ;;  %v704_v3 = vld [vmem:[%s7207_s13 + $0x18] sm:$0xe]  ;;  %v7931_v23 = vrot.slane %v1741_v18, 5  ;;  %v1765_v18 = vshll.u32 %v7920_v59, 16  ;;  %v795_v62 = vrot.slane %v6742_v13, 5 }
 0x116   : > { %v782_v29 = vsel %vm7472_vm7, %v780_v58, %v781_v53  ;;  %v5233_v5 = vrot.slane %v704_v3, 9  ;;  %v5234_v58 = vrot.slane %v705_v37, 9  ;;  %v7970_v37 = vrot.slane %v1762_v63, 4  ;;  %v7978_v59 = vld [vmem:[%s7207_s13 + $0x9c] sm:$0xf] }
 0x117   : > { %v5472_v3 = vcombine.low %v779_v41, %v782_v29  ;;  %v7972_v13 = vrot.slane %v1765_v18, 5  ;;  %v7984_v29 = vrot.slane %v1786_v24, 4  ;;  %v7987_v63 = vld [vmem:[%s7207_s13 + $0xa0] sm:$0xf]  ;;  %v1810_v18 = vshrl.u32 %v7978_v59, 16 }
 0x118   : > { %9107 = vst [vmem:[#allocation16_spill] sm:$0xff] %v7970_v37  ;;  %v786_v41 = vsel %vm7472_vm7, %v5233_v5, %v785_v42  ;;  %v1813_v42 = vshll.u32 %v7978_v59, 16  ;;  %v5235_v5 = vrot.slane %v706_v26, 9  ;;  %v6744_v24 = vld [vmem:[%s7207_s13 + $0x38] sm:$0x1]  ;;  %v813_v26 = vrot.slane %v6746_v4, 5 }
 0x119   : > { %9108 = vst [vmem:[#allocation17_spill] sm:$0xff] %v7972_v13  ;;  %9109 = vst [vmem:[#allocation18_spill] sm:$0xff] %v7984_v29  ;;  %v707_v53 = vld [vmem:[%s7207_s13 + $0x3c] sm:$0xe]  ;;  %v6751_v29 = vld [vmem:[#allocation5 + $0x8] sm:$0x3]  ;;  %v1552_v13 = vor.u32 %v7834_v30, %v7832_v14 }
 0x11a   : > { %v5236_v4 = vrot.slane %v707_v53, 9 }
 0x11c   : > { %6080 = vmatmul.mubr.msk.bf16.gmra.mrb[28].mxu1 %vm2156_vm4, %v5454_v60  ;;  %6234 = vmatmul.mubr.msk.bf16.gmra.mrb[12].mxu0 %vm2156_vm4, %v5606_v44  ;;  %v6743_v60 = vld [vmem:[%s7207_s13 + $0x34] sm:$0xf]  ;;  %v802_v44 = vrot.slane %v6744_v24, 5  ;;  %v8014_v24 = vrot.slane %v1810_v18, 4  ;;  %v808_v18 = vrot.slane %v806_v48, 4 }
 0x11d   : > { %6085 = vmatprep.mubr.msk.bf16.mxu1 %vm2156_vm4, %v5471_v15  ;;  %v799_v56 = vrot.slane %v6743_v60, 5  ;;  %6237 = vmatprep.mubr.msk.bf16.mxu0 %vm2156_vm4, %v5607_v55  ;;  %v5609_v15 = vcombine.low %v7952_v47, %v7956_v8  ;;  %v789_v55 = vsel %vm7472_vm7, %v787_v57, %v788_v54  ;;  %v7992_v47 = vsel %vm7472_vm7, %v5234_v58, %v792_v22  ;;  %v8024_v58 = vld [vmem:[%s7207_s13 + $0xac] sm:$0xf] }
 0x11e   : > { %v7996_v60 = vsel %vm7472_vm7, %v794_v39, %v795_v62  ;;  %v7999_v57 = vrot.slane %v1789_v2, 5  ;;  %v5473_v40 = vcombine.low %v786_v41, %v789_v55  ;;  %v8008_v62 = vld [vmem:[%s7207_s13 + $0xa8] sm:$0xf]  ;;  %9111 = vst [vmem:[#allocation20_spill] sm:$0xff] %v8014_v24  ;;  %v8019_v55 = vrot.slane %v1813_v42, 5  ;;  %9113 = vst [vmem:[#allocation22_spill] sm:$0xff] %v8024_v58 }
 0x11f   : > { %v801_v54 = vrot.slane %v799_v56, 4  ;;  %v708_v39 = vld [vmem:[%s7207_s13 + $0x48] sm:$0xe]  ;;  %v5474_v2 = vcombine.low %v7992_v47, %v7996_v60  ;;  %v1834_v61 = vshrl.u32 %v8008_v62, 16  ;;  %v1837_v41 = vshll.u32 %v8008_v62, 16 }
 0x120   : > { %9110 = vst [vmem:[#allocation19_spill] sm:$0xff] %v7999_v57  ;;  %9112 = vst [vmem:[#allocation21_spill] sm:$0xff] %v8019_v55  ;;  %v800_v22 = vsel %vm7472_vm7, %v5235_v5, %v799_v56  ;;  %v1555_v47 = vshll.u32 %v7774_v20, 16  ;;  %v6747_v60 = vld [vmem:[%s7207_s13 + $0x44] sm:$0x1]  ;;  %v5237_v5 = vrot.slane %v708_v39, 9 }
 0x121   : > { %v809_v42 = vrot.slane %v6747_v60, 5  ;;  %v8033_v56 = vld [vmem:[%s7207_s13 + $0xb4] sm:$0xf]  ;;  %v6748_v55 = vld [vmem:[%s7207_s13 + $0x50] sm:$0x1]  ;;  %v8043_v57 = vrot.slane %v1834_v61, 4  ;;  %v8054_v61 = vsel %vm7472_vm7, %v5236_v4, %v806_v48 }
 0x122   : > { %v8045_v60 = vrot.slane %v1837_v41, 5  ;;  %v6750_v39 = vld [vmem:[%s7207_s13 + $0x64] sm:$0xf]  ;;  %v8057_v41 = vrot.slane %v1555_v47, 5  ;;  %v8072_v48 = vld [vmem:[%s7207_s13 + $0xc0] sm:$0xf] }
 0x123   : > { %9114 = vst [vmem:[#allocation23_spill] sm:$0xff] %v8043_v57  ;;  %v827_v53 = vrot.slane %v6750_v39, 5  ;;  %v8063_v57 = vsel %vm7472_vm7, %v808_v18, %v809_v42  ;;  %9117 = vst [vmem:[#allocation25_spill] sm:$0xff] %v8072_v48  ;;  %v8075_v4 = vld [vmem:[%s7207_s13 + $0x20] sm:$0x1]  ;;  %v1579_v47 = vshll.u32 %v7787_v19, 16 }
 0x124   : > { %6086 = vmatmul.mubr.msk.bf16.vlgmr.msra.gmra.mrb[0].mxu1 %vm2156_vm4, %v5472_v3  ;;  %6238 = vmatmul.mubr.msk.bf16.gmra.mrb[16].mxu0 %vm2156_vm4, %v5608_v38  ;;  %v803_v3 = vsel %vm7472_vm7, %v801_v54, %v802_v44  ;;  %v815_v38 = vrot.slane %v813_v26, 4  ;;  %v816_v44 = vrot.slane %v6748_v55, 5  ;;  %v6749_v54 = vld [vmem:[%s7207_s13 + $0x58] sm:$0xf]  ;;  %9115 = vst [vmem:[#allocation24_spill] sm:$0xff] %v8045_v60  ;;  %v9116_v60 = vshrl.u32 %v7774_v20, 16 }
 0x125   : > { %6118 = vmatpush3.bf16.msra.mxu1 %v7935_v16  ;;  %6089 = vmatprep.mubr.msk.bf16.mxu1 %vm2156_vm4, %v5473_v40  ;;  %v8039_v16 = vld [vmem:[%s7207_s13 + $0xb8] sm:$0xf]  ;;  %v820_v24 = vrot.slane %v6749_v54, 5  ;;  %v5611_v40 = vcombine.low %v8008_v62, %v8024_v58  ;;  %v5475_v55 = vcombine.low %v800_v22, %v803_v3  ;;  %v710_v54 = vld [vmem:[%s7207_s13 + $0x60] sm:$0xe]  ;;  %v8069_v22 = vsel %vm7472_vm7, %v5237_v5, %v813_v26 }
 0x126   : > { %6241 = vmatprep.mubr.msk.bf16.mxu0 %vm2156_vm4, %v5609_v15  ;;  %v709_v15 = vld [vmem:[%s7207_s13 + $0x54] sm:$0xe]  ;;  %6584 = vmatprep.subr.msk.bf16.mxu1 %vm2205_vm0, %v6751_v29  ;;  %v1561_v62 = vrot.slane %v9116_v60, 4  ;;  %9118 = vst [vmem:[#allocation26_spill] sm:$0xff] %v8075_v4  ;;  %v8080_v20 = vsel %vm7472_vm7, %v815_v38, %v816_v44  ;;  %v8083_v3 = vld [vmem:[%s7207_s13 + $0xc4] sm:$0xf]  ;;  %v5476_v38 = vcombine.low %v8054_v61, %v8063_v57 }
 0x127   : > { %9119 = vst [vmem:[#allocation27_spill] sm:$0xff] %v8083_v3  ;;  %v5238_v18 = vrot.slane %v709_v15, 9  ;;  %v822_v42 = vrot.slane %v820_v24, 4  ;;  %v6752_v60 = vld [vmem:[%s7207_s13 + $0x5c] sm:$0x1]  ;;  %v5239_v26 = vrot.slane %v710_v54, 9  ;;  %v5477_v14 = vcombine.low %v8069_v22, %v8080_v20 }
 0x128   : > { %v823_v39 = vrot.slane %v6752_v60, 5  ;;  %v829_v5 = vrot.slane %v827_v53, 4  ;;  %v6753_v29 = vld [vmem:[%s7207_s13 + $0x68] sm:$0x1]  ;;  %v1562_v44 = vor.u32 %v1561_v62, %v8057_v41  ;;  %v1565_v15 = vshll.u32 %v8075_v4, 16 }
 0x129   : > { %v830_v58 = vrot.slane %v6753_v29, 5  ;;  %v711_v60 = vld [vmem:[%s7207_s13 + $0x6c] sm:$0xe]  ;;  %v6754_v54 = vld [vmem:[%s7207_s13 + $0x70] sm:$0xf]  ;;  %v9120_v29 = vcombine.low %v7978_v59, %v7987_v63  ;;  %v5613_v30 = vcombine.low %v8072_v48, %v8083_v3  ;;  %v9121_v61 = vshrl.u32 %v7787_v19, 16 }
 0x12a   : > { %v834_v37 = vrot.slane %v6754_v54, 5  ;;  %v8106_v57 = vld [vmem:[%s7207_s13 + $0xcc] sm:$0xf]  ;;  %v8115_v59 = vsel %vm7472_vm7, %v5238_v18, %v820_v24  ;;  %v8122_v22 = vld [vmem:[%s7207_s13 + $0xd0] sm:$0xf]  ;;  %v1576_v19 = vor.u32 %v7844_v46, %v7842_v0  ;;  %v1553_v18 = vrot.slane %v1552_v13, 4 }
 0x12b   : > { %v1585_v62 = vrot.slane %v9121_v61, 4  ;;  %v8125_v20 = vld [vmem:[%s7207_s13 + $0x2c] sm:$0x1]  ;;  %v8136_v24 = vsel %vm7472_vm7, %v829_v5, %v830_v58  ;;  %v1567_v54 = vrot.slane %v1565_v15, 5  ;;  %v6755_v61 = vld [vmem:[%s7207_s13 + $0x74] sm:$0x1]  ;;  %v1624_v3 = vor.u32 %v7864_v10, %v7860_v52 }
 0x12c   : > { %6090 = vmatmul.mubr.msk.bf16.gmra.mrb[4].mxu1 %vm2156_vm4, %v5474_v2  ;;  %6242 = vmatmul.mubr.msk.bf16.gmra.mrb[20].mxu0 %vm2156_vm4, %v9120_v29  ;;  %v8108_v2 = vrot.slane %v1579_v47, 5  ;;  %9122 = vst [vmem:[#allocation28_spill] sm:$0xff] %v8125_v20  ;;  %v1603_v47 = vshll.u32 %v7791_v21, 16  ;;  %v836_v29 = vrot.slane %v834_v37, 4  ;;  %v837_v4 = vrot.slane %v6755_v61, 5 }
 0x12d   : > { %6093 = vmatprep.mubr.msk.bf16.mxu1 %vm2156_vm4, %v5475_v55  ;;  %6245 = vmatprep.mubr.msk.bf16.mxu0 %vm2156_vm4, %v5611_v40  ;;  %v8119_v55 = vsel %vm7472_vm7, %v822_v42, %v823_v39  ;;  %v8132_v40 = vsel %vm7472_vm7, %v5239_v26, %v827_v53  ;;  %v5240_v42 = vrot.slane %v711_v60, 9  ;;  %v1563_v39 = vrot.slane %v1562_v44, 4  ;;  %v712_v0 = vld [vmem:[%s7207_s13 + $0x78] sm:$0xe]  ;;  %v8149_v44 = vld [vmem:[%s7207_s13 + $0x38] sm:$0x1] }
 0x12e   : > { %v5478_v46 = vcombine.low %v8115_v59, %v8119_v55  ;;  %v1586_v26 = vor.u32 %v1585_v62, %v8108_v2  ;;  %v1589_v58 = vshll.u32 %v8125_v20, 16  ;;  %v5479_v13 = vcombine.low %v8132_v40, %v8136_v24  ;;  %9123 = vst [vmem:[#allocation29_spill] sm:$0xff] %v8149_v44  ;;  %v6756_v53 = vld [vmem:[%s7207_s13 + $0x7c] sm:$0xf] }
 0x12f   : > { %v1577_v5 = vrot.slane %v1576_v19, 4  ;;  %v8151_v15 = vrot.slane %v1603_v47, 5  ;;  %v9124_v60 = vshrl.u32 %v7791_v21, 16  ;;  %v1558_v59 = vsel %vm7246_vm3, %v1553_v18, %v8057_v41 }
 0x130   : > { %v8160_v62 = vsel %vm7472_vm7, %v5240_v42, %v834_v37  ;;  %v5241_v55 = vrot.slane %v712_v0, 9  ;;  %v841_v40 = vrot.slane %v6756_v53, 5  ;;  %v1568_v19 = vsel %vm7246_vm3, %v1563_v39, %v1567_v54  ;;  %v6757_v39 = vld [vmem:[%s7207_s13 + $0x88] sm:$0xf]  ;;  %v8198_v53 = vld [vmem:[%s7207_s13 + $0x44] sm:$0x1] }
 0x131   : > { %v1609_v61 = vrot.slane %v9124_v60, 4  ;;  %v8168_v21 = vsel %vm7472_vm7, %v836_v29, %v837_v4  ;;  %v8172_v41 = vsel %vm2205_vm0, %v7802_v27, 0  ;;  %v1627_v37 = vshll.u32 %v7809_v32, 16 }
 0x132   : > { %v9125_v47 = vcombine.low %v8033_v56, %v8039_v16  ;;  %v1591_v24 = vrot.slane %v1589_v58, 5  ;;  %v1600_v4 = vor.u32 %v7853_v25, %v7851_v50  ;;  %v1613_v18 = vshll.u32 %v8149_v44, 16 }
 0x133   : > { %v1582_v27 = vsel %vm7246_vm3, %v1577_v5, %v8108_v2  ;;  %v1610_v42 = vor.u32 %v1609_v61, %v8151_v15  ;;  %v848_v54 = vrot.slane %v6757_v39, 5  ;;  %v1651_v29 = vshll.u32 %v7813_v7, 16  ;;  %v6758_v2 = vld [vmem:[%s7207_s13 + $0x80] sm:$0x1]  ;;  %v714_v61 = vld [vmem:[%s7207_s13 + $0x90] sm:$0xe] }
 0x134   : > { %6094 = vmatmul.mubr.msk.bf16.gmra.mrb[8].mxu1 %vm2156_vm4, %v5476_v38  ;;  %6246 = vmatmul.mubr.msk.bf16.gmra.mrb[24].mxu0 %vm2156_vm4, %v9125_v47  ;;  %v1587_v38 = vrot.slane %v1586_v26, 4  ;;  %v5631_v0 = vcombine.low %v1558_v59, %v1568_v19  ;;  %v8195_v25 = vsel %vm7472_vm7, %v5241_v55, %v841_v40  ;;  %v844_v26 = vrot.slane %v6758_v2, 5  ;;  %v6759_v59 = vld [vmem:[%s7207_s13 + $0x94] sm:$0xf] }
 0x135   : > { %6097 = vmatprep.mubr.msk.bf16.mxu1 %vm2156_vm4, %v5477_v14  ;;  %6249 = vmatprep.mubr.msk.bf16.mxu0 %vm2156_vm4, %v5613_v30  ;;  %v713_v14 = vld [vmem:[%s7207_s13 + $0x84] sm:$0xe]  ;;  %v843_v30 = vrot.slane %v841_v40, 4  ;;  %v8201_v58 = vrot.slane %v1627_v37, 5  ;;  %v9126_v5 = vshrl.u32 %v7809_v32, 16  ;;  %v855_v19 = vrot.slane %v6759_v59, 5 }
 0x136   : > { %v1592_v47 = vsel %vm7246_vm3, %v1587_v38, %v1591_v24  ;;  %v1601_v55 = vrot.slane %v1600_v4, 4  ;;  %v1615_v40 = vrot.slane %v1613_v18, 5  ;;  %v5242_v39 = vrot.slane %v713_v14, 9  ;;  %v6760_v32 = vld [vmem:[%s7207_s13 + $0x8c] sm:$0x1] }
 0x137   : > { %v1633_v60 = vrot.slane %v9126_v5, 4  ;;  %v1611_v50 = vrot.slane %v1610_v42, 4  ;;  %v850_v44 = vrot.slane %v848_v54, 4  ;;  %v8209_v20 = vrot.slane %v1651_v29, 5  ;;  %v8218_v38 = vld [vmem:[%s7207_s13 + $0x50] sm:$0x1] }
 0x138   : > { %v9127_v37 = vshrl.u32 %v7813_v7, 16  ;;  %v851_v5 = vrot.slane %v6760_v32, 5  ;;  %v1637_v59 = vshll.u32 %v8198_v53, 16  ;;  %v5243_v48 = vrot.slane %v714_v61, 9  ;;  %v6761_v18 = vld [vmem:[%s7207_s13 + $0x98] sm:$0x1] }
 0x139   : > { %v1634_v24 = vor.u32 %v1633_v60, %v8201_v58  ;;  %v857_v4 = vrot.slane %v855_v19, 4  ;;  %v858_v42 = vrot.slane %v6761_v18, 5  ;;  %v1648_v7 = vor.u32 %v7881_v35, %v7875_v1  ;;  %v8280_v18 = vld [vmem:[%s7207_s13 + $0x68] sm:$0x1] }
 0x13a   : > { %v1657_v2 = vrot.slane %v9127_v37, 4  ;;  %v9128_v14 = vcombine.low %v8106_v57, %v8122_v22  ;;  %v5632_v52 = vcombine.low %v1582_v27, %v1592_v47  ;;  %v845_v10 = vsel %vm7472_vm7, %v843_v30, %v844_v26 }
 0x13b   : > { %v1675_v29 = vshll.u32 %v7840_v49, 16  ;;  %v1616_v1 = vsel %vm7246_vm3, %v1611_v50, %v1615_v40  ;;  %v1699_v27 = vshll.u32 %v7857_v9, 16  ;;  %v8244_v30 = vsel %vm7472_vm7, %v5242_v39, %v848_v54  ;;  %v715_v40 = vld [vmem:[%s7207_s13 + $0x9c] sm:$0xe] }
 0x13c   : > { %6098 = vmatmul.mubr.msk.bf16.gmra.mrb[12].mxu1 %vm2156_vm4, %v5478_v46  ;;  %6250 = vmatmul.mubr.msk.bf16.gmra.mrb[28].mxu0 %vm2156_vm4, %v9128_v14  ;;  %v1606_v46 = vsel %vm7246_vm3, %v1601_v55, %v8151_v15  ;;  %v1658_v35 = vor.u32 %v1657_v2, %v8209_v20  ;;  %v8248_v15 = vsel %vm7472_vm7, %v850_v44, %v851_v5  ;;  %v1625_v26 = vrot.slane %v1624_v3, 4  ;;  %v6763_v14 = vld [vmem:[%s7207_s13 + $0xac] sm:$0xf] }
 0x13d   : > { %6101 = vmatprep.mubr.msk.bf16.mxu1 %vm2156_vm4, %v5479_v13  ;;  %6255 = vmatprep.mubr.msk.bf16.mxu0 %vm2156_vm4, %v5631_v0  ;;  %v1661_v13 = vshll.u32 %v8218_v38, 16  ;;  %v1639_v0 = vrot.slane %v1637_v59, 5  ;;  %v1635_v60 = vrot.slane %v1634_v24, 4  ;;  %v8252_v50 = vsel %vm7472_vm7, %v5243_v48, %v855_v19  ;;  %v8265_v19 = vld [vmem:[%s7207_s13 + $0x5c] sm:$0x1] }
 0x13e   : > { %v8256_v61 = vsel %vm7472_vm7, %v857_v4, %v858_v42  ;;  %v1649_v47 = vrot.slane %v1648_v7, 4  ;;  %v5481_v54 = vcombine.low %v8195_v25, %v845_v10  ;;  %v5633_v55 = vcombine.low %v1606_v46, %v1616_v1  ;;  %v6762_v24 = vld [vmem:[%s7207_s13 + $0xa0] sm:$0xf] }
 0x13f   : > { %v8260_v44 = vrot.slane %v1675_v29, 5  ;;  %v9129_v3 = vshrl.u32 %v7840_v49, 16  ;;  %v1659_v37 = vrot.slane %v1658_v35, 4  ;;  %v1663_v48 = vrot.slane %v1661_v13, 5  ;;  %v716_v29 = vld [vmem:[%s7207_s13 + $0xa8] sm:$0xe] }
 0x140   : > { %v8267_v2 = vrot.slane %v1699_v27, 5  ;;  %v9130_v32 = vshrl.u32 %v7857_v9, 16  ;;  %v5482_v25 = vcombine.low %v8244_v30, %v8248_v15  ;;  %v1630_v59 = vsel %vm7246_vm3, %v1625_v26, %v8201_v58  ;;  %v6764_v27 = vld [vmem:[%s7207_s13 + $0xa4] sm:$0x1]  ;;  %v6765_v26 = vld [vmem:[%s7207_s13 + $0xb0] sm:$0x1] }
 0x141   : > { %v1681_v39 = vrot.slane %v9129_v3, 4  ;;  %v5483_v49 = vcombine.low %v8252_v50, %v8256_v61  ;;  %v862_v4 = vrot.slane %v6762_v24, 5  ;;  %v9131_v42 = vcombine.low %v8160_v62, %v8168_v21 }
 0x142   : > { %v1705_v5 = vrot.slane %v9130_v32, 4  ;;  %v1640_v9 = vsel %vm7246_vm3, %v1635_v60, %v1639_v0  ;;  %v1654_v58 = vsel %vm7246_vm3, %v1649_v47, %v8209_v20  ;;  %v1672_v7 = vor.u32 %v7889_v51, %v7883_v36 }
 0x143   : > { %v869_v10 = vrot.slane %v6763_v14, 5  ;;  %v5244_v62 = vrot.slane %v715_v40, 9  ;;  %v1682_v21 = vor.u32 %v1681_v39, %v8260_v44  ;;  %v1685_v46 = vshll.u32 %v8265_v19, 16  ;;  %v8312_v40 = vld [vmem:[%s7207_s13 + $0x74] sm:$0x1] }
 0x144   : > { %6102 = vmatmul.mubr.msk.bf16.gmra.mrb[16].mxu1 %vm2156_vm4, %v9131_v42  ;;  %6256 = vmatmul.mubr.msk.bf16.vlgmr.msra.gmra.mrb[0].mxu0 %vm2156_vm4, %v5632_v52  ;;  %v1696_v20 = vor.u32 %v7900_v28, %v7898_v45  ;;  %v1664_v36 = vsel %vm7246_vm3, %v1659_v37, %v1663_v48  ;;  %v1706_v51 = vor.u32 %v1705_v5, %v8267_v2  ;;  %v1709_v52 = vshll.u32 %v8280_v18, 16 }
 0x145   : > { %6105 = vmatprep.mubr.msk.bf16.mxu1 %vm2156_vm4, %v5481_v54  ;;  %6288 = vmatpush3.bf16.msra.mxu0 %v8172_v41  ;;  %v1723_v1 = vshll.u32 %v7879_v34, 16  ;;  %v5634_v35 = vcombine.low %v1630_v59, %v1640_v9  ;;  %v864_v13 = vrot.slane %v862_v4, 4  ;;  %v865_v30 = vrot.slane %v6764_v27, 5  ;;  %v6766_v9 = vld [vmem:[%s7207_s13 + $0xb8] sm:$0xf] }
 0x146   : > { %6259 = vmatprep.mubr.msk.bf16.mxu0 %vm2156_vm4, %v5633_v55  ;;  %v1747_v45 = vshll.u32 %v7903_v33, 16  ;;  %v1673_v28 = vrot.slane %v1672_v7, 4  ;;  %v5245_v41 = vrot.slane %v716_v29, 9  ;;  %v871_v15 = vrot.slane %v869_v10, 4  ;;  %v8336_v7 = vld [vmem:[%s7207_s13 + $0x80] sm:$0x1] }
 0x147   : > { %v872_v0 = vrot.slane %v6765_v26, 5  ;;  %v5635_v60 = vcombine.low %v1654_v58, %v1664_v36  ;;  %v1683_v50 = vrot.slane %v1682_v21, 4  ;;  %v1687_v61 = vrot.slane %v1685_v46, 5 }
 0x148   : > { %v1697_v47 = vrot.slane %v1696_v20, 4  ;;  %v1707_v54 = vrot.slane %v1706_v51, 4  ;;  %v1711_v55 = vrot.slane %v1709_v52, 5  ;;  %v8314_v3 = vrot.slane %v1723_v1, 5  ;;  %v6767_v52 = vld [vmem:[%s7207_s13 + $0xbc] sm:$0x1] }
 0x149   : > { %v9132_v39 = vshrl.u32 %v7879_v34, 16  ;;  %v863_v48 = vsel %vm7472_vm7, %v5244_v62, %v862_v4  ;;  %v866_v32 = vsel %vm7472_vm7, %v864_v13, %v865_v30  ;;  %v8322_v5 = vrot.slane %v1747_v45, 5  ;;  %v8361_v45 = vld [vmem:[%s7207_s13 + $0x8c] sm:$0x1] }
 0x14a   : > { %v9133_v59 = vshrl.u32 %v7903_v33, 16  ;;  %v1678_v42 = vsel %vm7246_vm3, %v1673_v28, %v8260_v44  ;;  %v870_v34 = vsel %vm7472_vm7, %v5245_v41, %v869_v10  ;;  %v873_v4 = vsel %vm7472_vm7, %v871_v15, %v872_v0 }
 0x14b   : > { %v1729_v37 = vrot.slane %v9132_v39, 4  ;;  %v876_v58 = vrot.slane %v6766_v9, 5  ;;  %v1688_v33 = vsel %vm7246_vm3, %v1683_v50, %v1687_v61  ;;  %v1702_v44 = vsel %vm7246_vm3, %v1697_v47, %v8267_v2  ;;  %v8379_v39 = vld [vmem:[%s7207_s13 + $0x98] sm:$0x1] }
 0x14c   : > { %v1753_v24 = vrot.slane %v9133_v59, 4  ;;  %6106 = vmatmul.mubr.msk.bf16.gmra.mrb[20].mxu1 %vm2156_vm4, %v5482_v25  ;;  %6260 = vmatmul.mubr.msk.bf16.gmra.mrb[4].mxu0 %vm2156_vm4, %v5634_v35  ;;  %v717_v25 = vld [vmem:[%s7207_s13 + $0xb4] sm:$0xe]  ;;  %v1720_v14 = vor.u32 %v7923_v11, %v7914_v43  ;;  %v1733_v10 = vshll.u32 %v8312_v40, 16  ;;  %v1712_v62 = vsel %vm7246_vm3, %v1707_v54, %v1711_v55  ;;  %v9138_v59 = vld [vmem:[#allocation18_spill] sm:$0xff] }
 0x14d   : > { %6109 = vmatprep.mubr.msk.bf16.mxu1 %vm2156_vm4, %v5483_v49  ;;  %6263 = vmatprep.mubr.msk.bf16.mxu0 %vm2156_vm4, %v5635_v60  ;;  %v1730_v49 = vor.u32 %v1729_v37, %v8314_v3  ;;  %v1744_v21 = vor.u32 %v7931_v23, %v7929_v12  ;;  %v1771_v46 = vshll.u32 %v7947_v17, 16  ;;  %v5484_v2 = vcombine.low %v863_v48, %v866_v32  ;;  %v9136_v37 = vld [vmem:[#allocation16_spill] sm:$0xff] }
 0x14e   : > { %v1754_v29 = vor.u32 %v1753_v24, %v8322_v5  ;;  %v1757_v43 = vshll.u32 %v8336_v7, 16  ;;  %v1795_v11 = vshll.u32 %v7956_v8, 16  ;;  %v5485_v20 = vcombine.low %v870_v34, %v873_v4  ;;  %v9139_v24 = vld [vmem:[#allocation19_spill] sm:$0xff] }
 0x14f   : > { %v5246_v36 = vrot.slane %v717_v25, 9  ;;  %v878_v51 = vrot.slane %v876_v58, 4  ;;  %v879_v1 = vrot.slane %v6767_v52, 5  ;;  %v5636_v35 = vcombine.low %v1678_v42, %v1688_v33  ;;  %v9140_v25 = vld [vmem:[#allocation22_spill] sm:$0xff] }
 0x150   : > { %v5637_v13 = vcombine.low %v1702_v44, %v1712_v62  ;;  %v1721_v27 = vrot.slane %v1720_v14, 4  ;;  %v1735_v12 = vrot.slane %v1733_v10, 5  ;;  %v1731_v23 = vrot.slane %v1730_v49, 4 }
 0x151   : > { %v1745_v30 = vrot.slane %v1744_v21, 4  ;;  %v8363_v28 = vrot.slane %v1771_v46, 5  ;;  %v9134_v41 = vshrl.u32 %v7947_v17, 16  ;;  %v1755_v26 = vrot.slane %v1754_v29, 4  ;;  %v6769_v21 = vld [vmem:[%s7207_s13 + $0x10] sm:$0xf] }
 0x152   : > { %v1759_v0 = vrot.slane %v1757_v43, 5  ;;  %v8367_v60 = vrot.slane %v1795_v11, 5  ;;  %v9135_v50 = vshrl.u32 %v7956_v8, 16  ;;  %v1858_v47 = vshrl.u32 %v8033_v56, 16 }
 0x153   : > { %v1777_v15 = vrot.slane %v9134_v41, 4  ;;  %v1861_v54 = vshll.u32 %v8033_v56, 16  ;;  %v877_v55 = vsel %vm7472_vm7, %v5246_v36, %v876_v58  ;;  %v880_v17 = vsel %vm7472_vm7, %v878_v51, %v879_v1  ;;  %v9137_v56 = vld [vmem:[#allocation17_spill] sm:$0xff] }
 0x154   : > { %v1801_v61 = vrot.slane %v9135_v50, 4  ;;  %6110 = vmatmul.mubr.msk.bf16.gmra.mrb[24].mxu1 %vm2156_vm4, %v5484_v2  ;;  %6264 = vmatmul.mubr.msk.bf16.gmra.mrb[8].mxu0 %vm2156_vm4, %v5636_v35  ;;  %v1726_v8 = vsel %vm7246_vm3, %v1721_v27, %v8314_v3  ;;  %v1768_v48 = vor.u32 %v9137_v56, %v9136_v37  ;;  %v1781_v32 = vshll.u32 %v8361_v45, 16  ;;  %v8410_v51 = vld [vmem:[%s7207_s13 + $0xa4] sm:$0x1]  ;;  %v9144_v50 = vld [vmem:[#allocation27_spill] sm:$0xff]  ;;  %v9148_v56 = vld [vmem:[#allocation24_spill] sm:$0xff] }
 0x155   : > { %6113 = vmatprep.mubr.msk.bf16.mxu1 %vm2156_vm4, %v5485_v20  ;;  %v1792_v42 = vor.u32 %v9139_v24, %v9138_v59  ;;  %6267 = vmatprep.mubr.msk.bf16.mxu0 %vm2156_vm4, %v5637_v13  ;;  %v1736_v34 = vsel %vm7246_vm3, %v1731_v23, %v1735_v12  ;;  %v1750_v4 = vsel %vm7246_vm3, %v1745_v30, %v8322_v5  ;;  %v1819_v9 = vshll.u32 %v7987_v63, 16  ;;  %v6768_v5 = vld [vmem:[%s7207_s13 + $0xc] sm:$0xf] }
 0x156   : > { %v1778_v3 = vor.u32 %v1777_v15, %v8363_v28  ;;  %v1760_v58 = vsel %vm7246_vm3, %v1755_v26, %v1759_v0  ;;  %v1802_v33 = vor.u32 %v1801_v61, %v8367_v60  ;;  %v1805_v44 = vshll.u32 %v8379_v39, 16  ;;  %v9143_v15 = vld [vmem:[#allocation25_spill] sm:$0xff]  ;;  %v9147_v37 = vld [vmem:[#allocation23_spill] sm:$0xff] }
 0x157   : > { %v1843_v14 = vshll.u32 %v9140_v25, 16  ;;  %v8404_v10 = vrot.slane %v1858_v47, 4  ;;  %v1871_v62 = vshrl.u32 %v8039_v16, 16  ;;  %v5486_v49 = vcombine.low %v877_v55, %v880_v17  ;;  %v8427_v47 = vld [vmem:[%s7207_s13 + $0xb0] sm:$0x1]  ;;  %v9146_v55 = vld [vmem:[#allocation21_spill] sm:$0xff] }
 0x158   : > { %v5503_v46 = vcombine.low %v6768_v5, %v6769_v21  ;;  %v5638_v2 = vcombine.low %v1726_v8, %v1736_v34  ;;  %v1769_v29 = vrot.slane %v1768_v48, 4  ;;  %v1783_v43 = vrot.slane %v1781_v32, 5 }
 0x159   : > { %v1793_v11 = vrot.slane %v1792_v42, 4  ;;  %v5639_v20 = vcombine.low %v1750_v4, %v1760_v58  ;;  %v1779_v36 = vrot.slane %v1778_v3, 4  ;;  %v8412_v52 = vrot.slane %v1819_v9, 5 }
 0x15a   : > { %v9141_v1 = vshrl.u32 %v7987_v63, 16  ;;  %v1803_v13 = vrot.slane %v1802_v33, 4  ;;  %v1807_v27 = vrot.slane %v1805_v44, 5  ;;  %v8416_v12 = vrot.slane %v1843_v14, 5  ;;  %v6770_v33 = vld [vmem:[%s7207_s13 + $0x18] sm:$0xf] }
 0x15b   : > { %v9142_v23 = vshrl.u32 %v9140_v25, 16  ;;  %v8420_v41 = vrot.slane %v1861_v54, 5  ;;  %v1882_v26 = vshrl.u32 %v9143_v15, 16  ;;  %v1885_v0 = vshll.u32 %v9143_v15, 16  ;;  %v9145_v54 = vld [vmem:[#allocation20_spill] sm:$0xff] }
 0x15c   : > { %v1825_v35 = vrot.slane %v9141_v1, 4  ;;  %v1895_v61 = vshrl.u32 %v9144_v50, 16  ;;  %6114 = vmatmul.mubr.msk.bf16.gmra.mrb[28].mxu1 %vm2156_vm4, %v5486_v49  ;;  %6268 = vmatmul.mubr.msk.bf16.gmra.mrb[12].mxu0 %vm2156_vm4, %v5638_v2  ;;  %v1774_v63 = vsel %vm7246_vm3, %v1769_v29, %v8363_v28  ;;  %v1816_v17 = vor.u32 %v9146_v55, %v9145_v54  ;;  %v6771_v44 = vld [vmem:[%s7207_s13 + $0x1c] sm:$0xf]  ;;  %v6773_v14 = vld [vmem:[%s7207_s13 + $0x28] sm:$0xf] }
 0x15d   : > { %v1849_v30 = vrot.slane %v9142_v23, 4  ;;  %6119 = vmatprep.mubr.msk.bf16.mxu1 %vm2156_vm4, %v5503_v46  ;;  %v1829_v8 = vshll.u32 %v8410_v51, 16  ;;  %v1840_v48 = vor.u32 %v9148_v56, %v9147_v37  ;;  %6271 = vmatprep.mubr.msk.bf16.mxu0 %vm2156_vm4, %v5639_v20  ;;  %v1784_v32 = vsel %vm7246_vm3, %v1779_v36, %v1783_v43  ;;  %v8457_v43 = vld [vmem:[%s7207_s13 + $0xbc] sm:$0x1]  ;;  %v6774_v37 = vld [vmem:[%s7207_s13 + $0x30] sm:$0xf] }
 0x15e   : > { %v1798_v28 = vsel %vm7246_vm3, %v1793_v11, %v8367_v60  ;;  %v1826_v59 = vor.u32 %v1825_v35, %v8412_v52  ;;  %v1867_v24 = vshll.u32 %v8039_v16, 16  ;;  %v1808_v42 = vsel %vm7246_vm3, %v1803_v13, %v1807_v27  ;;  %v6772_v60 = vld [vmem:[%s7207_s13 + $0x24] sm:$0xf]  ;;  %v6775_v56 = vld [vmem:[%s7207_s13 + $0x34] sm:$0xf] }
 0x15f   : > { %v1850_v34 = vor.u32 %v1849_v30, %v8416_v12  ;;  %v1853_v4 = vshll.u32 %v8427_v47, 16  ;;  %v1891_v3 = vshll.u32 %v9144_v50, 16  ;;  %v1884_v9 = vrot.slane %v1882_v26, 4  ;;  %v8467_v30 = vld [vmem:[%s7207_s13 + $0xc8] sm:$0x1] }
 0x160   : > { %v1887_v58 = vrot.slane %v1885_v0, 5  ;;  %v5504_v25 = vcombine.low %v6770_v33, %v6771_v44  ;;  %v5505_v49 = vcombine.low %v6772_v60, %v6773_v14  ;;  %v5640_v5 = vcombine.low %v1774_v63, %v1784_v32  ;;  %v9149_v26 = vld [vmem:[#allocation15_spill] sm:$0xff] }
 0x161   : > { %v1817_v16 = vrot.slane %v1816_v17, 4  ;;  %v1831_v21 = vrot.slane %v1829_v8, 5  ;;  %v1841_v46 = vrot.slane %v1840_v48, 4  ;;  %v5641_v2 = vcombine.low %v1798_v28, %v1808_v42  ;;  %v6777_v28 = vld [vmem:[%s7207_s13 + $0x40] sm:$0xf] }
 0x162   : > { %v1827_v29 = vrot.slane %v1826_v59, 4  ;;  %v8459_v11 = vrot.slane %v1867_v24, 5  ;;  %v1873_v20 = vrot.slane %v1871_v62, 4  ;;  %v1851_v36 = vrot.slane %v1850_v34, 4  ;;  %v8498_v44 = vld [vmem:[%s7207_s13 + $0xd4] sm:$0x1] }
 0x163   : > { %v1855_v1 = vrot.slane %v1853_v4, 5  ;;  %v8461_v35 = vrot.slane %v1891_v3, 5  ;;  %v1897_v13 = vrot.slane %v1895_v61, 4  ;;  %v1906_v27 = vshrl.u32 %v8106_v57, 16 }
 0x164   : > { %v1909_v23 = vshll.u32 %v8106_v57, 16  ;;  %6120 = vmatmul.mubr.msk.bf16.vlgmr.msra.gmra.mrb[0].mxu1 %vm2156_vm4, %v5504_v25  ;;  %v1919_v15 = vshrl.u32 %v8122_v22, 16  ;;  %6272 = vmatmul.mubr.msk.bf16.gmra.mrb[16].mxu0 %vm2156_vm4, %v5640_v5  ;;  %v1822_v62 = vsel %vm7246_vm3, %v1817_v16, %v8412_v52  ;;  %v1864_v0 = vor.u32 %v8420_v41, %v8404_v10  ;;  %v8512_v16 = vld [vmem:[%s7207_s13 + $0x7c] sm:$0xf] }
 0x165   : > { %6322 = vmatpush3.bf16.msra.mxu1 %v9149_v26  ;;  %v1877_v57 = vshll.u32 %v8457_v43, 16  ;;  %6123 = vmatprep.mubr.msk.bf16.mxu1 %vm2156_vm4, %v5505_v49  ;;  %v1832_v50 = vsel %vm7246_vm3, %v1827_v29, %v1831_v21  ;;  %v1846_v61 = vsel %vm7246_vm3, %v1841_v46, %v8416_v12  ;;  %v1874_v52 = vor.u32 %v1873_v20, %v8459_v11  ;;  %v6776_v12 = vld [vmem:[%s7207_s13 + $0x3c] sm:$0xf]  ;;  %v8527_v26 = vld [vmem:[%s7207_s13 + $0x78] sm:$0xf] }
 0x166   : > { %6275 = vmatprep.mubr.msk.bf16.mxu0 %vm2156_vm4, %v5641_v2  ;;  %v1915_v63 = vshll.u32 %v8122_v22, 16  ;;  %v1856_v10 = vsel %vm7246_vm3, %v1851_v36, %v1855_v1  ;;  %v1888_v41 = vor.u32 %v1887_v58, %v1884_v9  ;;  %v1898_v54 = vor.u32 %v1897_v13, %v8461_v35  ;;  %v6779_v29 = vld [vmem:[%s7207_s13 + $0x1c] sm:$0xf]  ;;  %v6780_v36 = vld [vmem:[%s7207_s13 + $0x80] sm:$0x1] }
 0x167   : > { %v1901_v55 = vshll.u32 %v8467_v30, 16  ;;  %v1908_v17 = vrot.slane %v1906_v27, 4  ;;  %v1911_v8 = vrot.slane %v1909_v23, 5  ;;  %v5506_v48 = vcombine.low %v6774_v37, %v6775_v56  ;;  %v6781_v13 = vld [vmem:[%s7207_s13 + $0x48] sm:$0xf] }
 0x168   : > { %v5642_v32 = vcombine.low %v1822_v62, %v1832_v50  ;;  %v5507_v59 = vcombine.low %v6776_v12, %v6777_v28  ;;  %v1865_v24 = vrot.slane %v1864_v0, 4  ;;  %v1879_v22 = vrot.slane %v1877_v57, 5  ;;  %v6782_v27 = vld [vmem:[%s7207_s13 + $0x4c] sm:$0xf]  ;;  %v6783_v0 = vld [vmem:[%s7207_s13 + $0x54] sm:$0xf] }
 0x169   : > { %v5643_v42 = vcombine.low %v1846_v61, %v1856_v10  ;;  %v1875_v34 = vrot.slane %v1874_v52, 4  ;;  %v8495_v4 = vrot.slane %v1915_v63, 5  ;;  %v1921_v3 = vrot.slane %v1919_v15, 4  ;;  %v5375_v15 = vld [vmem:[%s7207_s13 + $0x18] sm:$0xe] }
 0x16a   : > { %v1889_v9 = vrot.slane %v1888_v41, 4  ;;  %v1899_v58 = vrot.slane %v1898_v54, 4  ;;  %v1903_v33 = vrot.slane %v1901_v55, 5  ;;  %v1870_v25 = vsel %vm7246_vm3, %v1865_v24, %v8459_v11  ;;  %v6784_v57 = vld [vmem:[%s7207_s13 + $0x58] sm:$0xf] }
 0x16b   : > { %v1880_v60 = vsel %vm7246_vm3, %v1875_v34, %v1879_v22  ;;  %v1912_v14 = vor.u32 %v1911_v8, %v1908_v17  ;;  %v1922_v49 = vor.u32 %v1921_v3, %v8495_v4  ;;  %v1925_v5 = vshll.u32 %v8498_v44, 16  ;;  %v5263_v54 = vld [vmem:[%s7207_s13 + $0x6c] sm:$0xf]  ;;  %v5376_v12 = vld [vmem:[%s7207_s13 + $0x24] sm:$0xe] }
 0x16c   : > { %6124 = vmatmul.mubr.msk.bf16.gmra.mrb[4].mxu1 %vm2156_vm4, %v5506_v48  ;;  %6276 = vmatmul.mubr.msk.bf16.gmra.mrb[20].mxu0 %vm2156_vm4, %v5642_v32  ;;  %v1159_v21 = vshll.u32 %v8512_v16, 16  ;;  %v1894_v46 = vsel %vm7246_vm3, %v1889_v9, %v8461_v35  ;;  %v1904_v2 = vsel %vm7246_vm3, %v1899_v58, %v1903_v33  ;;  %v1995_v11 = vrot.slane %v6779_v29, 5  ;;  %v9150_v8 = vld [vmem:[#allocation26_spill] sm:$0xff] }
 0x16d   : > { %6127 = vmatprep.mubr.msk.bf16.mxu1 %vm2156_vm4, %v5507_v59  ;;  %6279 = vmatprep.mubr.msk.bf16.mxu0 %vm2156_vm4, %v5643_v42  ;;  %v1163_v20 = vshrl.u32 %v8512_v16, 16  ;;  %v1169_v1 = vshll.u32 %v6780_v36, 16  ;;  %v5508_v23 = vcombine.low %v6781_v13, %v6782_v27  ;;  %v5644_v62 = vcombine.low %v1870_v25, %v1880_v60  ;;  %v6785_v28 = vld [vmem:[%s7207_s13 + $0x28] sm:$0xf]  ;;  %v6786_v3 = vld [vmem:[%s7207_s13 + $0x60] sm:$0xf] }
 0x16e   : > { %v5509_v35 = vcombine.low %v6783_v0, %v6784_v57  ;;  %v1150_v50 = vshrl.u32 %v8527_v26, 16  ;;  %v1153_v61 = vshll.u32 %v8527_v26, 16  ;;  %v5645_v52 = vcombine.low %v1894_v46, %v1904_v2  ;;  %v6787_v9 = vld [vmem:[%s7207_s13 + $0x64] sm:$0xf]  ;;  %v5377_v60 = vld [vmem:[%s7207_s13 + $0x30] sm:$0xe] }
 0x16f   : > { %v1913_v63 = vrot.slane %v1912_v14, 4  ;;  %v1923_v10 = vrot.slane %v1922_v49, 4  ;;  %v1927_v41 = vrot.slane %v1925_v5, 5  ;;  %v5391_v55 = vrot.slane %v5375_v15, 9  ;;  %v6788_v14 = vld [vmem:[%s7207_s13 + $0x34] sm:$0xf] }
 0x170   : > { %v1997_v17 = vrot.slane %v1995_v11, 4  ;;  %v1998_v37 = vrot.slane %v9150_v8, 5  ;;  %v8535_v56 = vrot.slane %v1159_v21, 5  ;;  %v8537_v48 = vrot.slane %v1163_v20, 4  ;;  %v8557_v5 = vld [vmem:[%s7207_s13 + $0x70] sm:$0xf] }
 0x171   : > { %v1126_v32 = vshrl.u32 %v5263_v54, 16  ;;  %v2002_v59 = vrot.slane %v6785_v28, 5  ;;  %v8542_v24 = vrot.slane %v1169_v1, 5  ;;  %v1129_v22 = vshll.u32 %v5263_v54, 16  ;;  %v9151_v1 = vld [vmem:[#allocation28_spill] sm:$0xff] }
 0x172   : > { %v1152_v42 = vrot.slane %v1150_v50, 4  ;;  %v1155_v34 = vrot.slane %v1153_v61, 5  ;;  %v5510_v58 = vcombine.low %v6786_v3, %v6787_v9  ;;  %v1918_v33 = vsel %vm7246_vm3, %v1913_v63, %v8495_v4  ;;  %v8565_v4 = vld [vmem:[%s7207_s13 + $0x84] sm:$0xf]  ;;  %v5378_v61 = vld [vmem:[%s7207_s13 + $0x3c] sm:$0xe] }
 0x173   : > { %v1928_v25 = vsel %vm7246_vm3, %v1923_v10, %v1927_v41  ;;  %v2009_v49 = vrot.slane %v6788_v14, 5  ;;  %v5511_v21 = vcombine.low %v5263_v54, %v8557_v5  ;;  %v1996_v46 = vsel %vm7472_vm7, %v5391_v55, %v1995_v11  ;;  %v8582_v55 = vld [vmem:[%s7207_s13 + $0x88] sm:$0xf]  ;;  %v8587_v8 = vld [vmem:[%s7207_s13 + $0x90] sm:$0xf] }
 0x174   : > { %6128 = vmatmul.mubr.msk.bf16.gmra.mrb[8].mxu1 %vm2156_vm4, %v5508_v23  ;;  %6280 = vmatmul.mubr.msk.bf16.gmra.mrb[24].mxu0 %vm2156_vm4, %v5644_v62  ;;  %v1999_v2 = vsel %vm7472_vm7, %v1997_v17, %v1998_v37  ;;  %v5392_v29 = vrot.slane %v5376_v12, 9  ;;  %v8567_v20 = vrot.slane %v1126_v32, 4  ;;  %v2004_v36 = vrot.slane %v2002_v59, 4  ;;  %v6792_v12 = vld [vmem:[%s7207_s13 + $0x4c] sm:$0xf] }
 0x175   : > { %6131 = vmatprep.mubr.msk.bf16.mxu1 %vm2156_vm4, %v5509_v35  ;;  %6283 = vmatprep.mubr.msk.bf16.mxu0 %vm2156_vm4, %v5645_v52  ;;  %v2005_v13 = vrot.slane %v9151_v1, 5  ;;  %v1174_v27 = vshrl.u32 %v8565_v4, 16  ;;  %v5646_v23 = vcombine.low %v1918_v33, %v1928_v25  ;;  %v8571_v15 = vrot.slane %v1129_v22, 5  ;;  %v9152_v35 = vld [vmem:[#allocation29_spill] sm:$0xff] }
 0x176   : > { %v1156_v11 = vor.u32 %v1155_v34, %v1152_v42  ;;  %v5393_v62 = vrot.slane %v5377_v60, 9  ;;  %v5663_v0 = vcombine.low %v1996_v46, %v1999_v2  ;;  %v2011_v57 = vrot.slane %v2009_v49, 4  ;;  %v6790_v52 = vld [vmem:[%s7207_s13 + $0x40] sm:$0xf]  ;;  %v8605_v3 = vld [vmem:[%s7207_s13 + $0x9c] sm:$0xf] }
 0x177   : > { %v2012_v50 = vrot.slane %v9152_v35, 5  ;;  %v2016_v63 = vrot.slane %v6790_v52, 5  ;;  %v5512_v10 = vcombine.low %v8527_v26, %v8512_v16  ;;  %v2003_v41 = vsel %vm7472_vm7, %v5392_v29, %v2002_v59  ;;  %v5379_v26 = vld [vmem:[%s7207_s13 + $0x48] sm:$0xe]  ;;  %v6794_v1 = vld [vmem:[%s7207_s13 + $0x58] sm:$0xf] }
 0x178   : > { %v1177_v54 = vshll.u32 %v8565_v4, 16  ;;  %v5513_v17 = vcombine.low %v8565_v4, %v8582_v55  ;;  %v2006_v37 = vsel %vm7472_vm7, %v2004_v36, %v2005_v13  ;;  %v8592_v32 = vrot.slane %v1174_v27, 4  ;;  %v8620_v2 = vld [vmem:[%s7207_s13 + $0xa8] sm:$0xf]  ;;  %v5380_v36 = vld [vmem:[%s7207_s13 + $0x54] sm:$0xe] }
 0x179   : > { %v1198_v16 = vshrl.u32 %v8587_v8, 16  ;;  %v2023_v28 = vrot.slane %v6792_v12, 5  ;;  %v8599_v59 = vrot.slane %v1156_v11, 4  ;;  %v2010_v22 = vsel %vm7472_vm7, %v5393_v62, %v2009_v49  ;;  %v8615_v49 = vld [vmem:[%s7207_s13 + $0x94] sm:$0xf] }
 0x17a   : > { %v1201_v42 = vshll.u32 %v8587_v8, 16  ;;  %v5394_v34 = vrot.slane %v5378_v61, 9  ;;  %v2013_v9 = vsel %vm7472_vm7, %v2011_v57, %v2012_v50  ;;  %v2019_v33 = vrot.slane %v8198_v53, 5  ;;  %v8639_v50 = vld [vmem:[%s7207_s13 + $0xb4] sm:$0xf] }
 0x17b   : > { %v1222_v25 = vshrl.u32 %v8605_v3, 16  ;;  %v5664_v60 = vcombine.low %v2003_v41, %v2006_v37  ;;  %v8612_v14 = vrot.slane %v1177_v54, 5  ;;  %v5395_v46 = vrot.slane %v5379_v26, 9  ;;  %v8642_v61 = vld [vmem:[%s7207_s13 + $0xa0] sm:$0xf] }
 0x17c   : > { %6132 = vmatmul.mubr.msk.bf16.gmra.mrb[12].mxu1 %vm2156_vm4, %v5510_v58  ;;  %6284 = vmatmul.mubr.msk.bf16.gmra.mrb[28].mxu0 %vm2156_vm4, %v5646_v23  ;;  %v2018_v58 = vrot.slane %v2016_v63, 4  ;;  %v8622_v29 = vrot.slane %v1198_v16, 4  ;;  %v2025_v4 = vrot.slane %v2023_v28, 4  ;;  %v2026_v53 = vrot.slane %v8218_v38, 5  ;;  %v6796_v12 = vld [vmem:[%s7207_s13 + $0x64] sm:$0xf] }
 0x17d   : > { %6135 = vmatprep.mubr.msk.bf16.mxu1 %vm2156_vm4, %v5511_v21  ;;  %6289 = vmatprep.mubr.msk.bf16.mxu0 %vm2156_vm4, %v5663_v0  ;;  %v5514_v21 = vcombine.low %v8587_v8, %v8615_v49  ;;  %v2030_v13 = vrot.slane %v6794_v1, 5  ;;  %v5665_v27 = vcombine.low %v2010_v22, %v2013_v9  ;;  %v8627_v23 = vrot.slane %v1201_v42, 5 }
 0x17e   : > { %v1225_v11 = vshll.u32 %v8605_v3, 16  ;;  %v1246_v62 = vshrl.u32 %v8620_v2, 16  ;;  %v2017_v0 = vsel %vm7472_vm7, %v5394_v34, %v2016_v63  ;;  %v2020_v57 = vsel %vm7472_vm7, %v2018_v58, %v2019_v33 }
 0x17f   : > { %v8635_v35 = vrot.slane %v1222_v25, 4  ;;  %v1249_v38 = vshll.u32 %v8620_v2, 16  ;;  %v5515_v52 = vcombine.low %v8605_v3, %v8642_v61  ;;  %v2024_v41 = vsel %vm7472_vm7, %v5395_v46, %v2023_v28  ;;  %v6797_v3 = vld [vmem:[%s7207_s13 + $0x70] sm:$0xf]  ;;  %v5382_v25 = vld [vmem:[%s7207_s13 + $0x6c] sm:$0xe] }
 0x180   : > { %v5396_v63 = vrot.slane %v5380_v36, 9  ;;  %v1270_v54 = vshrl.u32 %v8639_v50, 16  ;;  %v2027_v37 = vsel %vm7472_vm7, %v2025_v4, %v2026_v53  ;;  %v2032_v16 = vrot.slane %v2030_v13, 4 }
 0x181   : > { %v2033_v26 = vrot.slane %v8265_v19, 5  ;;  %v2037_v22 = vrot.slane %v6796_v12, 5  ;;  %v5666_v28 = vcombine.low %v2017_v0, %v2020_v57  ;;  %v8656_v42 = vrot.slane %v1225_v11, 5  ;;  %v8666_v19 = vld [vmem:[%s7207_s13 + $0xac] sm:$0xf] }
 0x182   : > { %v8658_v34 = vrot.slane %v1246_v62, 4  ;;  %v2044_v9 = vrot.slane %v6797_v3, 5  ;;  %v8663_v58 = vrot.slane %v1249_v38, 5  ;;  %v5516_v33 = vcombine.low %v8620_v2, %v8666_v19  ;;  %v5383_v3 = vld [vmem:[%s7207_s13 + $0x78] sm:$0xe] }
 0x183   : > { %v5667_v46 = vcombine.low %v2024_v41, %v2027_v37  ;;  %v8675_v4 = vsel %vm7472_vm7, %v5396_v63, %v2030_v13  ;;  %v8677_v53 = vrot.slane %v1270_v54, 4  ;;  %v1273_v36 = vshll.u32 %v8639_v50, 16  ;;  %v8691_v41 = vld [vmem:[%s7207_s13 + $0xb8] sm:$0xf] }
 0x184   : > { %6136 = vmatmul.mubr.msk.bf16.gmra.mrb[16].mxu1 %vm2156_vm4, %v5512_v10  ;;  %6290 = vmatmul.mubr.msk.bf16.vlgmr.msra.gmra.mrb[0].mxu0 %vm2156_vm4, %v5664_v60  ;;  %v5381_v10 = vld [vmem:[%s7207_s13 + $0x60] sm:$0xe]  ;;  %v1139_v60 = vshrl.u32 %v8557_v5, 16  ;;  %v8682_v1 = vsel %vm7472_vm7, %v2032_v16, %v2033_v26  ;;  %v2039_v11 = vrot.slane %v2037_v22, 4  ;;  %v2040_v62 = vrot.slane %v8280_v18, 5 }
 0x185   : > { %6139 = vmatprep.mubr.msk.bf16.mxu1 %vm2156_vm4, %v5513_v17  ;;  %6293 = vmatprep.mubr.msk.bf16.mxu0 %vm2156_vm4, %v5665_v27  ;;  %v1135_v17 = vshll.u32 %v8557_v5, 16  ;;  %v5397_v27 = vrot.slane %v5381_v10, 9  ;;  %v8686_v5 = vld [vmem:[%s7207_s13 + $0xc0] sm:$0xf]  ;;  %v5398_v13 = vrot.slane %v5382_v25, 9  ;;  %v2046_v57 = vrot.slane %v2044_v9, 4 }
 0x186   : > { %v1294_v0 = vshrl.u32 %v8686_v5, 16  ;;  %v2047_v38 = vrot.slane %v8312_v40, 5  ;;  %v5517_v63 = vcombine.low %v8639_v50, %v8691_v41  ;;  %v1141_v37 = vrot.slane %v1139_v60, 4  ;;  %v6800_v16 = vld [vmem:[%s7207_s13 + $0x7c] sm:$0xf] }
 0x187   : > { %v8695_v54 = vrot.slane %v1135_v17, 5  ;;  %v2051_v26 = vrot.slane %v6800_v16, 5  ;;  %v5668_v18 = vcombine.low %v8675_v4, %v8682_v1  ;;  %v8700_v12 = vrot.slane %v1273_v36, 5 }
 0x188   : > { %v1297_v10 = vshll.u32 %v8686_v5, 16  ;;  %v1132_v40 = vor.u32 %v8571_v15, %v8567_v20  ;;  %v2038_v50 = vsel %vm7472_vm7, %v5397_v27, %v2037_v22  ;;  %v2041_v25 = vsel %vm7472_vm7, %v2039_v11, %v2040_v62 }
 0x189   : > { %v1183_v17 = vshll.u32 %v8582_v55, 16  ;;  %v1187_v60 = vshrl.u32 %v8582_v55, 16  ;;  %v8718_v20 = vrot.slane %v1294_v0, 4  ;;  %v8722_v15 = vsel %vm7472_vm7, %v5398_v13, %v2044_v9  ;;  %v8735_v9 = vld [vmem:[%s7207_s13 + $0xc4] sm:$0xf] }
 0x18a   : > { %v8726_v8 = vsel %vm7472_vm7, %v2046_v57, %v2047_v38  ;;  %v1142_v55 = vor.u32 %v1141_v37, %v8695_v54  ;;  %v2054_v4 = vrot.slane %v8336_v7, 5  ;;  %v5669_v36 = vcombine.low %v2038_v50, %v2041_v25  ;;  %v5384_v0 = vld [vmem:[%s7207_s13 + $0x84] sm:$0xe]  ;;  %v6803_v38 = vld [vmem:[%s7207_s13 + $0x88] sm:$0xf] }
 0x18b   : > { %v8732_v1 = vrot.slane %v1297_v10, 5  ;;  %v5518_v27 = vcombine.low %v8686_v5, %v8735_v9  ;;  %v1133_v11 = vrot.slane %v1132_v40, 4  ;;  %v5670_v62 = vcombine.low %v8722_v15, %v8726_v8 }
 0x18c   : > { %6140 = vmatmul.mubr.msk.bf16.gmra.mrb[20].mxu1 %vm2156_vm4, %v5514_v21  ;;  %6294 = vmatmul.mubr.msk.bf16.gmra.mrb[4].mxu0 %vm2156_vm4, %v5666_v28  ;;  %v6801_v21 = vld [vmem:[%s7207_s13 + $0x74] sm:$0x1]  ;;  %v5399_v28 = vrot.slane %v5383_v3, 9  ;;  %v8744_v13 = vrot.slane %v1183_v17, 5  ;;  %v1189_v7 = vrot.slane %v1187_v60, 4  ;;  %v2058_v37 = vrot.slane %v6803_v38, 5 }
 0x18d   : > { %6143 = vmatprep.mubr.msk.bf16.mxu1 %vm2156_vm4, %v5515_v52  ;;  %v1145_v22 = vshll.u32 %v6801_v21, 16  ;;  %6297 = vmatprep.mubr.msk.bf16.mxu0 %vm2156_vm4, %v5667_v46  ;;  %v2053_v52 = vrot.slane %v2051_v26, 4  ;;  %v1166_v46 = vor.u32 %v8537_v48, %v8535_v56  ;;  %v1207_v16 = vshll.u32 %v8615_v49, 16  ;;  %v6804_v17 = vld [vmem:[%s7207_s13 + $0x94] sm:$0xf] }
 0x18e   : > { %v1211_v5 = vshrl.u32 %v8615_v49, 16  ;;  %v1143_v10 = vrot.slane %v1142_v55, 4  ;;  %v2052_v40 = vsel %vm7472_vm7, %v5399_v28, %v2051_v26  ;;  %v1180_v3 = vor.u32 %v8612_v14, %v8592_v32  ;;  %v6805_v21 = vld [vmem:[%s7207_s13 + $0x8c] sm:$0x1] }
 0x18f   : > { %v1147_v57 = vrot.slane %v1145_v22, 5  ;;  %v2055_v48 = vsel %vm7472_vm7, %v2053_v52, %v2054_v4  ;;  %v1138_v50 = vsel %vm7246_vm3, %v1133_v11, %v8695_v54  ;;  %v1162_v49 = vsel %vm7246_vm3, %v8599_v59, %v8535_v56  ;;  %v5385_v22 = vld [vmem:[%s7207_s13 + $0x90] sm:$0xe] }
 0x190   : > { %v5400_v25 = vrot.slane %v5384_v0, 9  ;;  %v2065_v60 = vrot.slane %v6804_v17, 5  ;;  %v1167_v26 = vrot.slane %v1166_v46, 4  ;;  %v2061_v32 = vrot.slane %v8361_v45, 5 }
 0x191   : > { %v1190_v14 = vor.u32 %v1189_v7, %v8744_v13  ;;  %v1193_v54 = vshll.u32 %v6805_v21, 16  ;;  %v5671_v56 = vcombine.low %v2052_v40, %v2055_v48  ;;  %v2060_v59 = vrot.slane %v2058_v37, 4  ;;  %v6806_v7 = vld [vmem:[%s7207_s13 + $0x98] sm:$0x1]  ;;  %v6808_v21 = vld [vmem:[%s7207_s13 + $0xa4] sm:$0x1] }
 0x192   : > { %v8773_v55 = vrot.slane %v1207_v16, 5  ;;  %v1213_v2 = vrot.slane %v1211_v5, 4  ;;  %v1148_v45 = vsel %vm7246_vm3, %v1143_v10, %v1147_v57  ;;  %v1231_v28 = vshll.u32 %v8642_v61, 16  ;;  %v6807_v16 = vld [vmem:[%s7207_s13 + $0xa0] sm:$0xf] }
 0x193   : > { %v5401_v52 = vrot.slane %v5385_v22, 9  ;;  %v2068_v4 = vrot.slane %v8379_v39, 5  ;;  %v1204_v11 = vor.u32 %v8627_v23, %v8622_v29  ;;  %v1191_v46 = vrot.slane %v1190_v14, 4 }
 0x194   : > { %6144 = vmatmul.mubr.msk.bf16.gmra.mrb[24].mxu1 %vm2156_vm4, %v5516_v33  ;;  %6298 = vmatmul.mubr.msk.bf16.gmra.mrb[8].mxu0 %vm2156_vm4, %v5668_v18  ;;  %v1181_v33 = vrot.slane %v1180_v3, 4  ;;  %v1235_v18 = vshrl.u32 %v8642_v61, 16  ;;  %v1195_v0 = vrot.slane %v1193_v54, 5  ;;  %v1217_v38 = vshll.u32 %v6806_v7, 16 }
 0x195   : > { %6147 = vmatprep.mubr.msk.bf16.mxu1 %vm2156_vm4, %v5517_v63  ;;  %6301 = vmatprep.mubr.msk.bf16.mxu0 %vm2156_vm4, %v5669_v36  ;;  %v2067_v63 = vrot.slane %v2065_v60, 4  ;;  %v5386_v36 = vld [vmem:[%s7207_s13 + $0x9c] sm:$0xe]  ;;  %v2072_v5 = vrot.slane %v6807_v16, 5  ;;  %v5543_v57 = vcombine.low %v1138_v50, %v1148_v45  ;;  %v1172_v10 = vsel %vm7246_vm3, %v1167_v26, %v8542_v24  ;;  %v6810_v16 = vld [vmem:[%s7207_s13 + $0xb0] sm:$0x1] }
 0x196   : > { %v2059_v61 = vsel %vm7472_vm7, %v5400_v25, %v2058_v37  ;;  %v1214_v39 = vor.u32 %v1213_v2, %v8773_v55  ;;  %v2062_v29 = vsel %vm7472_vm7, %v2060_v59, %v2061_v32  ;;  %v1186_v23 = vsel %vm7246_vm3, %v1181_v33, %v8744_v13  ;;  %v6809_v2 = vld [vmem:[%s7207_s13 + $0xac] sm:$0xf]  ;;  %v5387_v33 = vld [vmem:[%s7207_s13 + $0xa8] sm:$0xe] }
 0x197   : > { %v8797_v40 = vrot.slane %v1231_v28, 5  ;;  %v1237_v48 = vrot.slane %v1235_v18, 4  ;;  %v2066_v3 = vsel %vm7472_vm7, %v5401_v52, %v2065_v60  ;;  %v2069_v24 = vsel %vm7472_vm7, %v2067_v63, %v2068_v4 }
 0x198   : > { %v1205_v37 = vrot.slane %v1204_v11, 4  ;;  %v5402_v50 = vrot.slane %v5386_v36, 9  ;;  %v1196_v25 = vsel %vm7246_vm3, %v1191_v46, %v1195_v0  ;;  %v1219_v17 = vrot.slane %v1217_v38, 5 }
 0x199   : > { %v2074_v26 = vrot.slane %v2072_v5, 4  ;;  %v2075_v13 = vrot.slane %v8410_v51, 5  ;;  %v1215_v60 = vrot.slane %v1214_v39, 4  ;;  %v1228_v32 = vor.u32 %v8656_v42, %v8635_v35 }
 0x19a   : > { %v1259_v14 = vshrl.u32 %v8666_v19, 16  ;;  %v1238_v51 = vor.u32 %v1237_v48, %v8797_v40  ;;  %v1241_v15 = vshll.u32 %v6808_v21, 16  ;;  %v1279_v8 = vshll.u32 %v8691_v41, 16 }
 0x19b   : > { %v5544_v54 = vcombine.low %v1162_v49, %v1172_v10  ;;  %v5672_v22 = vcombine.low %v2059_v61, %v2062_v29  ;;  %v5673_v59 = vcombine.low %v2066_v3, %v2069_v24  ;;  %v2079_v35 = vrot.slane %v6809_v2, 5  ;;  %v6811_v10 = vld [vmem:[%s7207_s13 + $0xb8] sm:$0xf]  ;;  %v6812_v3 = vld [vmem:[%s7207_s13 + $0xbc] sm:$0x1] }
 0x19c   : > { %6148 = vmatmul.mubr.msk.bf16.gmra.mrb[28].mxu1 %vm2156_vm4, %v5518_v27  ;;  %6302 = vmatmul.mubr.msk.bf16.gmra.mrb[12].mxu0 %vm2156_vm4, %v5670_v62  ;;  %v1255_v27 = vshll.u32 %v8666_v19, 16  ;;  %v1283_v62 = vshrl.u32 %v8691_v41, 16  ;;  %v5545_v42 = vcombine.low %v1186_v23, %v1196_v25  ;;  %v1210_v19 = vsel %vm7246_vm3, %v1205_v37, %v8773_v55 }
 0x19d   : > { %6169 = vmatprep.mubr.msk.bf16.mxu1 %vm2156_vm4, %v5543_v57  ;;  %6305 = vmatprep.mubr.msk.bf16.mxu0 %vm2156_vm4, %v5671_v56  ;;  %v2073_v56 = vsel %vm7472_vm7, %v5402_v50, %v2072_v5  ;;  %v2076_v45 = vsel %vm7472_vm7, %v2074_v26, %v2075_v13  ;;  %v1220_v41 = vsel %vm7246_vm3, %v1215_v60, %v1219_v17  ;;  %v1229_v49 = vrot.slane %v1228_v32, 4  ;;  %v5388_v57 = vld [vmem:[%s7207_s13 + $0xb4] sm:$0xe]  ;;  %v6813_v50 = vld [vmem:[%s7207_s13 + $0xc4] sm:$0xf] }
 0x19e   : > { %v8832_v28 = vrot.slane %v1255_v27, 5  ;;  %v1261_v18 = vrot.slane %v1259_v14, 4  ;;  %v1239_v52 = vrot.slane %v1238_v51, 4  ;;  %v1243_v63 = vrot.slane %v1241_v15, 5  ;;  %v5389_v32 = vld [vmem:[%s7207_s13 + $0xc0] sm:$0xe] }
 0x19f   : > { %v8834_v55 = vrot.slane %v1279_v8, 5  ;;  %v1285_v4 = vrot.slane %v1283_v62, 4  ;;  %v5674_v11 = vcombine.low %v2073_v56, %v2076_v45  ;;  %v5403_v46 = vrot.slane %v5387_v33, 9 }
 0x1a0   : > { %v2081_v0 = vrot.slane %v2079_v35, 4  ;;  %v2082_v7 = vrot.slane %v8427_v47, 5  ;;  %v5546_v38 = vcombine.low %v1210_v19, %v1220_v41  ;;  %v1252_v36 = vor.u32 %v8663_v58, %v8658_v34  ;;  %v6814_v19 = vld [vmem:[%s7207_s13 + $0xc8] sm:$0x1]  ;;  %v6815_v41 = vld [vmem:[%s7207_s13 + $0xd0] sm:$0xf] }
 0x1a1   : > { %v1265_v5 = vshll.u32 %v6810_v16, 16  ;;  %v2086_v61 = vrot.slane %v6811_v10, 5  ;;  %v1234_v47 = vsel %vm7246_vm3, %v1229_v49, %v8797_v40  ;;  %v1262_v39 = vor.u32 %v1261_v18, %v8832_v28 }
 0x1a2   : > { %v1303_v29 = vshll.u32 %v8735_v9, 16  ;;  %v1307_v34 = vshrl.u32 %v8735_v9, 16  ;;  %v1244_v58 = vsel %vm7246_vm3, %v1239_v52, %v1243_v63  ;;  %v1276_v23 = vor.u32 %v8700_v12, %v8677_v53 }
 0x1a3   : > { %v1286_v48 = vor.u32 %v1285_v4, %v8834_v55  ;;  %v1289_v24 = vshll.u32 %v6812_v3, 16  ;;  %v2080_v40 = vsel %vm7472_vm7, %v5403_v46, %v2079_v35  ;;  %v2083_v37 = vsel %vm7472_vm7, %v2081_v0, %v2082_v7 }
 0x1a4   : > { %6170 = vmatmul.mubr.msk.bf16.vlgmr.msra.gmra.mrb[16].mxu1 %vm2156_vm4, %v5544_v54  ;;  %6306 = vmatmul.mubr.msk.bf16.gmra.mrb[16].mxu0 %vm2156_vm4, %v5672_v22  ;;  %v5404_v9 = vrot.slane %v5388_v57, 9  ;;  %v2093_v25 = vrot.slane %v6813_v50, 5  ;;  %v1253_v17 = vrot.slane %v1252_v36, 4  ;;  %v1267_v26 = vrot.slane %v1265_v5, 5 }
 0x1a5   : > { %6173 = vmatprep.mubr.msk.bf16.mxu1 %vm2156_vm4, %v5545_v42  ;;  %6309 = vmatprep.mubr.msk.bf16.mxu0 %vm2156_vm4, %v5673_v59  ;;  %v2088_v13 = vrot.slane %v2086_v61, 4  ;;  %v2089_v60 = vrot.slane %v8457_v43, 5  ;;  %v5547_v53 = vcombine.low %v1234_v47, %v1244_v58  ;;  %v1263_v12 = vrot.slane %v1262_v39, 4 }
 0x1a6   : > { %v1305_v27 = vrot.slane %v1303_v29, 5  ;;  %v1309_v14 = vrot.slane %v1307_v34, 4  ;;  %v5675_v51 = vcombine.low %v2080_v40, %v2083_v37  ;;  %v1277_v21 = vrot.slane %v1276_v23, 4 }
 0x1a7   : > { %v1287_v15 = vrot.slane %v1286_v48, 4  ;;  %v1291_v8 = vrot.slane %v1289_v24, 5  ;;  %v5405_v62 = vrot.slane %v5389_v32, 9  ;;  %v2095_v54 = vrot.slane %v2093_v25, 4 }
 0x1a8   : > { %v2096_v22 = vrot.slane %v8467_v30, 5  ;;  %v1258_v43 = vsel %vm7246_vm3, %v1253_v17, %v8832_v28  ;;  %v2087_v59 = vsel %vm7472_vm7, %v5404_v9, %v2086_v61  ;;  %v2090_v2 = vsel %vm7472_vm7, %v2088_v13, %v2089_v60 }
 0x1a9   : > { %v1268_v30 = vsel %vm7246_vm3, %v1263_v12, %v1267_v26  ;;  %v1300_v35 = vor.u32 %v8732_v1, %v8718_v20  ;;  %v1310_v42 = vor.u32 %v1309_v14, %v1305_v27  ;;  %v1313_v56 = vshll.u32 %v6814_v19, 16  ;;  %v5390_v1 = vld [vmem:[%s7207_s13 + $0xcc] sm:$0xe]  ;;  %s6878_s13 = sshll.u32 %s7029_s28, 4  ;;  %s6879_s13 = int_to_ptr.vmem [resolvable:$false] %s6878_s13 }
 0x1aa   : > { %v1282_v45 = vsel %vm7246_vm3, %v1277_v21, %v8834_v55  ;;  %v1292_v33 = vsel %vm7246_vm3, %v1287_v15, %v1291_v8  ;;  %v2100_v49 = vrot.slane %v6815_v41, 5  ;;  %v2094_v28 = vsel %vm7472_vm7, %v5405_v62, %v2093_v25  ;;  %s6880_s10 = scalar_lea.vmem %s6879_s13, 4096  ;;  %p6881_p13 = scmp.lt.s32.totalorder %s8952_s26, %s6879_s13 }
 0x1ab   : > { %v2097_v20 = vsel %vm7472_vm7, %v2095_v54, %v2096_v22  ;;  %v5548_v18 = vcombine.low %v1258_v43, %v1268_v30  ;;  %v5676_v52 = vcombine.low %v2087_v59, %v2090_v2  ;;  %v5549_v63 = vcombine.low %v1282_v45, %v1292_v33  ;;  %p6882_p0 = scmp.lt.s32.totalorder %s6880_s10, %s6874_s12 }
 0x1ac   : > { %6174 = vmatmul.mubr.msk.bf16.gmra.mrb[20].mxu1 %vm2156_vm4, %v5546_v38  ;;  %6310 = vmatmul.mubr.msk.bf16.gmra.mrb[20].mxu0 %vm2156_vm4, %v5674_v11  ;;  %v1301_v4 = vrot.slane %v1300_v35, 4  ;;  %v1311_v11 = vrot.slane %v1310_v42, 4  ;;  %v1315_v46 = vrot.slane %v1313_v56, 5  ;;  %v5677_v0 = vcombine.low %v2094_v28, %v2097_v20 }
 0x1ad   : > { %6177 = vmatprep.mubr.msk.bf16.mxu1 %vm2156_vm4, %v5547_v53  ;;  %6313 = vmatprep.mubr.msk.bf16.mxu0 %vm2156_vm4, %v5675_v51  ;;  %v5406_v55 = vrot.slane %v5390_v1, 9  ;;  %v2102_v7 = vrot.slane %v2100_v49, 4  ;;  %v2103_v38 = vrot.slane %v8498_v44, 5  ;;  %v7028_v61 = vmov 0.0   ;;  %p6883_p5 = por %p6882_p0, %p6881_p13 }
 0x1ae   : > { %v1306_v36 = vsel %vm7246_vm3, %v1301_v4, %v1305_v27  ;;  %v1316_v16 = vsel %vm7246_vm3, %v1311_v11, %v1315_v46  ;;  %4900 = vst [vmem:[%s8909_s23] sm:$0x1] %v7028_v61  ;;  %4901 = vst [vmem:[%s8913_s25] sm:$0x1] %v7028_v61 }
 0x1af   : > { %v2101_v5 = vsel %vm7472_vm7, %v5406_v55, %v2100_v49  ;;  %v2104_v44 = vsel %vm7472_vm7, %v2102_v7, %v2103_v38  ;;  %v5550_v57 = vcombine.low %v1306_v36, %v1316_v16  ;;  %p6884_p9 = pnand %p6883_p5, %p6877_p12 }
 0x1b0   : > { %v5678_v10 = vcombine.low %v2101_v5, %v2104_v44 }
 0x1b4   : > { %6178 = vmatmul.mubr.msk.bf16.gmra.mrb[24].mxu1 %vm2156_vm4, %v5548_v18  ;;  %6314 = vmatmul.mubr.msk.bf16.gmra.mrb[24].mxu0 %vm2156_vm4, %v5676_v52 }
 0x1b5   : > { %6181 = vmatprep.mubr.msk.bf16.mxu1 %vm2156_vm4, %v5549_v63  ;;  %6317 = vmatprep.mubr.msk.bf16.mxu0 %vm2156_vm4, %v5677_v0 }
 0x1bc   : > { %6182 = vmatmul.mubr.msk.bf16.gmra.mrb[28].mxu1 %vm2156_vm4, %v5550_v57  ;;  %6318 = vmatmul.mubr.msk.bf16.gmra.mrb[28].mxu0 %vm2156_vm4, %v5678_v10 }
 0x237   : > { %v6121_v31 = vpop.f32.mrb[0].mxu1 }
 0x238   : > { %v3091_v47 = vpop.f32.mrb[1].mxu1 }
 0x239   : > { %v6122_v39 = vpop.f32.mrb[2].mxu1 }
 0x23a   : > { %v3094_v6 = vpop.f32.mrb[3].mxu1 }
 0x23f   : > { %v6125_v29 = vpop.f32.mrb[4].mxu1 }
 0x240   : > { %v3107_v34 = vpop.f32.mrb[5].mxu1 }
 0x241   : > { %v6126_v58 = vpop.f32.mrb[6].mxu1 }
 0x242   : > { %v3110_v23 = vpop.f32.mrb[7].mxu1 }
 0x247   : > { %v6129_v48 = vpop.f32.mrb[8].mxu1 }
 0x248   : > { %v3123_v3 = vpop.f32.mrb[9].mxu1 }
 0x249   : > { %v6130_v24 = vpop.f32.mrb[10].mxu1 }
 0x24a   : > { %v3126_v40 = vpop.f32.mrb[11].mxu1 }
 0x24f   : > { %v8916_v37 = vpop.f32.mrb[12].mxu1 }
 0x250   : > { %v8918_v9 = vpop.f32.mrb[13].mxu1 }
 0x251   : > { %v8920_v50 = vpop.f32.mrb[14].mxu1 }
 0x252   : > { %v8922_v25 = vpop.f32.mrb[15].mxu1 }
 0x257   : > { %v6291_v17 = vpop.f32.mrb[0].mxu0 }
 0x258   : > { %v6323_v26 = vadd.f32 %v6291_v17, %v6121_v31  ;;  %v4577_v13 = vpop.f32.mrb[1].mxu0 }
 0x259   : > { %v6324_v60 = vadd.f32 %v4577_v13, %v3091_v47  ;;  %v6292_v32 = vpop.f32.mrb[2].mxu0 }
 0x25a   : > { %v6325_v53 = vadd.f32 %v6292_v32, %v6122_v39  ;;  %v4580_v12 = vpop.f32.mrb[3].mxu0  ;;  %v4945_v62 = vmul.f32 %v6323_v26, %v6323_v26 }
 0x25b   : > { %v6326_v27 = vadd.f32 %v4580_v12, %v3094_v6  ;;  %v4943_v51 = vmul.f32 %v6324_v60, %v6324_v60 }
 0x25c   : > { %v5775_v14 = vpack.c.bf16 %v6325_v53, %v6323_v26  ;;  %v4946_v30 = vmul.f32 %v6325_v53, %v6325_v53 }
 0x25d   : > { %v5770_v21 = vpack.c.bf16 %v6326_v27, %v6324_v60  ;;  %v4903_v15 = vadd.f32 %v6326_v27, %v6324_v60  ;;  %v4944_v8 = vmul.f32 %v6326_v27, %v6326_v27 }
 0x25e   : > { %5847 = vst [vmem:[%s8925_s11 + $0x8] sm:$0xff] %v5775_v14  }
 0x25f   : > { %5771 = vst [vmem:[%s8925_s11] sm:$0xff] %v5770_v21   ;;  %v4904_v54 = vadd.f32 %v6323_v26, %v4903_v15  ;;  %v4975_v22 = vadd.f32 %v4944_v8, %v4943_v51  ;;  %v6295_v43 = vpop.f32.mrb[4].mxu0 }
 0x260   : > { %v6327_v59 = vadd.f32 %v6295_v43, %v6125_v29  ;;  %v4593_v2 = vpop.f32.mrb[5].mxu0 }
 0x261   : > { %v4976_v35 = vadd.f32 %v4975_v22, %v4945_v62  ;;  %v6328_v42 = vadd.f32 %v4593_v2, %v3107_v34  ;;  %v4905_v19 = vadd.f32 %v6325_v53, %v4904_v54  ;;  %v6296_v56 = vpop.f32.mrb[6].mxu0 }
 0x262   : > { %v6329_v45 = vadd.f32 %v6296_v56, %v6126_v58  ;;  %v4596_v33 = vpop.f32.mrb[7].mxu0  ;;  %v4949_v11 = vmul.f32 %v6327_v59, %v6327_v59 }
 0x263   : > { %v4906_v41 = vadd.f32 %v6328_v42, %v4905_v19  ;;  %v4947_v49 = vmul.f32 %v6328_v42, %v6328_v42  ;;  %v4977_v28 = vadd.f32 %v4976_v35, %v4946_v30  ;;  %v6330_v20 = vadd.f32 %v4596_v33, %v3110_v23 }
 0x264   : > { %v5785_v1 = vpack.c.bf16 %v6329_v45, %v6327_v59  ;;  %v4950_v36 = vmul.f32 %v6329_v45, %v6329_v45 }
 0x265   : > { %v4978_v18 = vadd.f32 %v4977_v28, %v4947_v49  ;;  %v5780_v52 = vpack.c.bf16 %v6330_v20, %v6328_v42  ;;  %v4907_v63 = vadd.f32 %v6330_v20, %v4906_v41  ;;  %v4948_v4 = vmul.f32 %v6330_v20, %v6330_v20 }
 0x266   : > { %5849 = vst [vmem:[%s8925_s11 + $0x18] sm:$0xff] %v5785_v1  }
 0x267   : > { %5848 = vst [vmem:[%s8925_s11 + $0x10] sm:$0xff] %v5780_v52   ;;  %v4908_v46 = vadd.f32 %v6327_v59, %v4907_v63  ;;  %v4979_v0 = vadd.f32 %v4978_v18, %v4948_v4  ;;  %v6299_v55 = vpop.f32.mrb[8].mxu0 }
 0x268   : > { %v6331_v7 = vadd.f32 %v6299_v55, %v6129_v48  ;;  %v4609_v38 = vpop.f32.mrb[9].mxu0 }
 0x269   : > { %v4980_v16 = vadd.f32 %v4979_v0, %v4949_v11  ;;  %v6332_v5 = vadd.f32 %v4609_v38, %v3123_v3  ;;  %v4909_v44 = vadd.f32 %v6329_v45, %v4908_v46  ;;  %v6300_v57 = vpop.f32.mrb[10].mxu0 }
 0x26a   : > { %v6333_v10 = vadd.f32 %v6300_v57, %v6130_v24  ;;  %v4612_v61 = vpop.f32.mrb[11].mxu0  ;;  %v4953_v48 = vmul.f32 %v6331_v7, %v6331_v7 }
 0x26b   : > { %v4910_v31 = vadd.f32 %v6332_v5, %v4909_v44  ;;  %v4951_v47 = vmul.f32 %v6332_v5, %v6332_v5  ;;  %v4981_v39 = vadd.f32 %v4980_v16, %v4950_v36  ;;  %v6334_v6 = vadd.f32 %v4612_v61, %v3126_v40 }
 0x26c   : > { %v5795_v29 = vpack.c.bf16 %v6333_v10, %v6331_v7  ;;  %v4954_v24 = vmul.f32 %v6333_v10, %v6333_v10 }
 0x26d   : > { %v4982_v34 = vadd.f32 %v4981_v39, %v4951_v47  ;;  %v5790_v58 = vpack.c.bf16 %v6334_v6, %v6332_v5  ;;  %v4911_v23 = vadd.f32 %v6334_v6, %v4910_v31  ;;  %v4952_v17 = vmul.f32 %v6334_v6, %v6334_v6 }
 0x26e   : > { %5851 = vst [vmem:[%s8925_s11 + $0x28] sm:$0xff] %v5795_v29  }
 0x26f   : > { %5850 = vst [vmem:[%s8925_s11 + $0x20] sm:$0xff] %v5790_v58   ;;  %v4912_v26 = vadd.f32 %v6331_v7, %v4911_v23  ;;  %v4983_v13 = vadd.f32 %v4982_v34, %v4952_v17  ;;  %v6303_v3 = vpop.f32.mrb[12].mxu0 }
 0x270   : > { %v6335_v60 = vadd.f32 %v6303_v3, %v8916_v37  ;;  %v4625_v32 = vpop.f32.mrb[13].mxu0 }
 0x271   : > { %v4984_v53 = vadd.f32 %v4983_v13, %v4953_v48  ;;  %v6336_v12 = vadd.f32 %v4625_v32, %v8918_v9  ;;  %v4913_v40 = vadd.f32 %v6333_v10, %v4912_v26  ;;  %v6304_v27 = vpop.f32.mrb[14].mxu0 }
 0x272   : > { %v6337_v14 = vadd.f32 %v6304_v27, %v8920_v50  ;;  %v4628_v51 = vpop.f32.mrb[15].mxu0  ;;  %v4957_v30 = vmul.f32 %v6335_v60, %v6335_v60 }
 0x273   : > { %v4914_v21 = vadd.f32 %v6336_v12, %v4913_v40  ;;  %v4955_v15 = vmul.f32 %v6336_v12, %v6336_v12  ;;  %v4985_v8 = vadd.f32 %v4984_v53, %v4954_v24  ;;  %v6338_v62 = vadd.f32 %v4628_v51, %v8922_v25 }
 0x274   : > { %v5805_v54 = vpack.c.bf16 %v6337_v14, %v6335_v60  ;;  %v4958_v33 = vmul.f32 %v6337_v14, %v6337_v14 }
 0x275   : > { %v4986_v22 = vadd.f32 %v4985_v8, %v4955_v15  ;;  %v5800_v37 = vpack.c.bf16 %v6338_v62, %v6336_v12  ;;  %v4915_v43 = vadd.f32 %v6338_v62, %v4914_v21  ;;  %v4956_v59 = vmul.f32 %v6338_v62, %v6338_v62 }
 0x276   : > { %5853 = vst [vmem:[%s8925_s11 + $0x38] sm:$0xff] %v5805_v54  }
 0x277   : > { %v6171_v2 = vpop.f32.mrb[16].mxu1  ;;  %5852 = vst [vmem:[%s8925_s11 + $0x30] sm:$0xff] %v5800_v37   ;;  %v4916_v9 = vadd.f32 %v6335_v60, %v4915_v43  ;;  %v4987_v35 = vadd.f32 %v4986_v22, %v4956_v59  ;;  %v6307_v42 = vpop.f32.mrb[16].mxu0 }
 0x278   : > { %v3449_v19 = vpop.f32.mrb[17].mxu1  ;;  %v6339_v50 = vadd.f32 %v6307_v42, %v6171_v2  ;;  %v4641_v56 = vpop.f32.mrb[17].mxu0 }
 0x279   : > { %v6172_v45 = vpop.f32.mrb[18].mxu1  ;;  %v4988_v41 = vadd.f32 %v4987_v35, %v4957_v30  ;;  %v6340_v25 = vadd.f32 %v4641_v56, %v3449_v19  ;;  %v4917_v49 = vadd.f32 %v6337_v14, %v4916_v9  ;;  %v6308_v28 = vpop.f32.mrb[18].mxu0 }
 0x27a   : > { %v3452_v20 = vpop.f32.mrb[19].mxu1  ;;  %v6341_v1 = vadd.f32 %v6308_v28, %v6172_v45  ;;  %v4644_v18 = vpop.f32.mrb[19].mxu0  ;;  %v4961_v16 = vmul.f32 %v6339_v50, %v6339_v50 }
 0x27b   : > { %v4918_v52 = vadd.f32 %v6340_v25, %v4917_v49  ;;  %v4959_v63 = vmul.f32 %v6340_v25, %v6340_v25  ;;  %v4989_v4 = vadd.f32 %v4988_v41, %v4958_v33  ;;  %v6342_v11 = vadd.f32 %v4644_v18, %v3452_v20 }
 0x27c   : > { %v5815_v46 = vpack.c.bf16 %v6341_v1, %v6339_v50  ;;  %v4962_v39 = vmul.f32 %v6341_v1, %v6341_v1 }
 0x27d   : > { %v4990_v0 = vadd.f32 %v4989_v4, %v4959_v63  ;;  %v5810_v55 = vpack.c.bf16 %v6342_v11, %v6340_v25  ;;  %v4919_v7 = vadd.f32 %v6342_v11, %v4918_v52  ;;  %v4960_v38 = vmul.f32 %v6342_v11, %v6342_v11 }
 0x27e   : > { %5855 = vst [vmem:[%s8925_s11 + $0x48] sm:$0xff] %v5815_v46  }
 0x27f   : > { %v6175_v36 = vpop.f32.mrb[20].mxu1  ;;  %5854 = vst [vmem:[%s8925_s11 + $0x40] sm:$0xff] %v5810_v55   ;;  %v4920_v5 = vadd.f32 %v6339_v50, %v4919_v7  ;;  %v4991_v44 = vadd.f32 %v4990_v0, %v4960_v38  ;;  %v6311_v57 = vpop.f32.mrb[20].mxu0 }
 0x280   : > { %v3465_v10 = vpop.f32.mrb[21].mxu1  ;;  %v6343_v61 = vadd.f32 %v6311_v57, %v6175_v36  ;;  %v4657_v31 = vpop.f32.mrb[21].mxu0 }
 0x281   : > { %v6176_v47 = vpop.f32.mrb[22].mxu1  ;;  %v4992_v6 = vadd.f32 %v4991_v44, %v4961_v16  ;;  %v6344_v29 = vadd.f32 %v4657_v31, %v3465_v10  ;;  %v4921_v34 = vadd.f32 %v6341_v1, %v4920_v5  ;;  %v6312_v58 = vpop.f32.mrb[22].mxu0 }
 0x282   : > { %v3468_v23 = vpop.f32.mrb[23].mxu1  ;;  %v6345_v17 = vadd.f32 %v6312_v58, %v6176_v47  ;;  %v4660_v48 = vpop.f32.mrb[23].mxu0  ;;  %v4965_v14 = vmul.f32 %v6343_v61, %v6343_v61 }
 0x283   : > { %v4922_v26 = vadd.f32 %v6344_v29, %v4921_v34  ;;  %v4963_v13 = vmul.f32 %v6344_v29, %v6344_v29  ;;  %v4993_v3 = vadd.f32 %v4992_v6, %v4962_v39  ;;  %v6346_v60 = vadd.f32 %v4660_v48, %v3468_v23 }
 0x284   : > { %v5825_v32 = vpack.c.bf16 %v6345_v17, %v6343_v61  ;;  %v4966_v37 = vmul.f32 %v6345_v17, %v6345_v17 }
 0x285   : > { %v4994_v24 = vadd.f32 %v4993_v3, %v4963_v13  ;;  %v5820_v53 = vpack.c.bf16 %v6346_v60, %v6344_v29  ;;  %v4923_v12 = vadd.f32 %v6346_v60, %v4922_v26  ;;  %v4964_v40 = vmul.f32 %v6346_v60, %v6346_v60 }
 0x286   : > { %5857 = vst [vmem:[%s8925_s11 + $0x58] sm:$0xff] %v5825_v32  }
 0x287   : > { %v6179_v27 = vpop.f32.mrb[24].mxu1  ;;  %5856 = vst [vmem:[%s8925_s11 + $0x50] sm:$0xff] %v5820_v53   ;;  %v4924_v51 = vadd.f32 %v6343_v61, %v4923_v12  ;;  %v4995_v21 = vadd.f32 %v4994_v24, %v4964_v40  ;;  %v6315_v15 = vpop.f32.mrb[24].mxu0 }
 0x288   : > { %v3481_v8 = vpop.f32.mrb[25].mxu1  ;;  %v6347_v62 = vadd.f32 %v6315_v15, %v6179_v27  ;;  %v4673_v54 = vpop.f32.mrb[25].mxu0 }
 0x289   : > { %v6180_v22 = vpop.f32.mrb[26].mxu1  ;;  %v4996_v43 = vadd.f32 %v4995_v21, %v4965_v14  ;;  %v6348_v59 = vadd.f32 %v4673_v54, %v3481_v8  ;;  %v4925_v2 = vadd.f32 %v6345_v17, %v4924_v51  ;;  %v6316_v30 = vpop.f32.mrb[26].mxu0 }
 0x28a   : > { %v3484_v9 = vpop.f32.mrb[27].mxu1  ;;  %v6349_v35 = vadd.f32 %v6316_v30, %v6180_v22  ;;  %v4676_v42 = vpop.f32.mrb[27].mxu0  ;;  %v4969_v1 = vmul.f32 %v6347_v62, %v6347_v62 }
 0x28b   : > { %v4926_v19 = vadd.f32 %v6348_v59, %v4925_v2  ;;  %v4967_v50 = vmul.f32 %v6348_v59, %v6348_v59  ;;  %v4997_v56 = vadd.f32 %v4996_v43, %v4966_v37  ;;  %v6350_v45 = vadd.f32 %v4676_v42, %v3484_v9 }
 0x28c   : > { %v5835_v33 = vpack.c.bf16 %v6349_v35, %v6347_v62  ;;  %v4970_v55 = vmul.f32 %v6349_v35, %v6349_v35 }
 0x28d   : > { %v4998_v41 = vadd.f32 %v4997_v56, %v4967_v50  ;;  %v5830_v25 = vpack.c.bf16 %v6350_v45, %v6348_v59  ;;  %v4927_v49 = vadd.f32 %v6350_v45, %v4926_v19  ;;  %v4968_v28 = vmul.f32 %v6350_v45, %v6350_v45 }
 0x28e   : > { %5859 = vst [vmem:[%s8925_s11 + $0x68] sm:$0xff] %v5835_v33  }
 0x28f   : > { %v6183_v20 = vpop.f32.mrb[28].mxu1  ;;  %5858 = vst [vmem:[%s8925_s11 + $0x60] sm:$0xff] %v5830_v25   ;;  %v4928_v18 = vadd.f32 %v6347_v62, %v4927_v49  ;;  %v4999_v52 = vadd.f32 %v4998_v41, %v4968_v28  ;;  %v6319_v63 = vpop.f32.mrb[28].mxu0 }
 0x290   : > { %v3497_v4 = vpop.f32.mrb[29].mxu1  ;;  %v6351_v11 = vadd.f32 %v6319_v63, %v6183_v20  ;;  %v4689_v46 = vpop.f32.mrb[29].mxu0 }
 0x291   : > { %v6184_v0 = vpop.f32.mrb[30].mxu1  ;;  %v5000_v7 = vadd.f32 %v4999_v52, %v4969_v1  ;;  %v6352_v38 = vadd.f32 %v4689_v46, %v3497_v4  ;;  %v4929_v36 = vadd.f32 %v6349_v35, %v4928_v18  ;;  %v6320_v16 = vpop.f32.mrb[30].mxu0 }
 0x292   : > { %v3500_v5 = vpop.f32.mrb[31].mxu1  ;;  %v6353_v44 = vadd.f32 %v6320_v16, %v6184_v0  ;;  %v4692_v57 = vpop.f32.mrb[31].mxu0  ;;  %v4973_v23 = vmul.f32 %v6351_v11, %v6351_v11 }
 0x293   : > { %v4930_v10 = vadd.f32 %v6352_v38, %v4929_v36  ;;  %v4971_v61 = vmul.f32 %v6352_v38, %v6352_v38  ;;  %v5001_v31 = vadd.f32 %v5000_v7, %v4970_v55  ;;  %v6354_v47 = vadd.f32 %v4692_v57, %v3500_v5 }
 0x294   : > { %v5845_v39 = vpack.c.bf16 %v6353_v44, %v6351_v11 }
 0x295   : > { %v5002_v6 = vadd.f32 %v5001_v31, %v4971_v61  ;;  %v5840_v29 = vpack.c.bf16 %v6354_v47, %v6352_v38  ;;  %v4931_v34 = vadd.f32 %v6354_v47, %v4930_v10  ;;  %v4972_v58 = vmul.f32 %v6354_v47, %v6354_v47 }
 0x296   : > { %5861 = vst [vmem:[%s8925_s11 + $0x78] sm:$0xff] %v5845_v39  }
 0x297   : > { %5860 = vst [vmem:[%s8925_s11 + $0x70] sm:$0xff] %v5840_v29   ;;  %v4932_v17 = vadd.f32 %v6351_v11, %v4931_v34  ;;  %v5003_v48 = vadd.f32 %v5002_v6, %v4972_v58 }
 0x298   : > { %6887 = shalt.err (!%p6884_p9)
}
 0x299   : > { %s6888_s11 = scalar_lea.hbm %s8950_s30, 2048  ;;  %s6892_s7 = scalar_lea.hbm %s9075_s2, 4096 }
 0x29a   : > { %p6889_p1 = scmp.ne.s32.totalorder %s8950_s30, %s6888_s11  ;;  %p6893_p7 = scmp.lt.u32.totalorder %s8950_s30, %s9075_s2 }
 0x29b   : > { %p6894_p11 = scmp.lt.u32.totalorder %s6892_s7, %s6888_s11  ;;  %p6896_p6 = scmp.lt.u32.totalorder %s6888_s11, %s8950_s30 }
 0x29c   : > { %p6890_p2 = pnand %p6889_p1, %p7149_p10 }
 0x29d   : > { %p6895_p4 = por %p6894_p11, %p6893_p7 }
 0x29e   : > { %p6891_p3 = pneg %p6890_p2 }
 0x29f   : > { %p6897_p8 = por %p6896_p6, %p6895_p4 }
 0x2a1   : > { %p6898_p12 = pnand %p6897_p8, %p6891_p3 }
 0x2a3   : > { %6901 = shalt.err (!%p6898_p12)
}
 0x2a4   : > { %s7030_s12 = smov 64   ;;  %s7031_s10 = smov 4   ;;  %v4974_v26 = vmul.f32 %v6353_v44, %v6353_v44  ;;  %v4933_v13 = vadd.f32 %v6353_v44, %v4932_v17  ;;  %v5004_v3 = vadd.f32 %v5003_v48, %v4973_v23  ;;  %v4902_v15 = vld [vmem:[%s8909_s23] sm:$0x1] }
 0x2a5   : > { %6598 = dma.vmem_to_hbm [thread:$0]  (%p7149_p10), %s8952_s26, 2048, %s8950_s30, %s5015_s27, %s7030_s12, %s7030_s12, %s7031_s10  }
 0x2a6   : > { %v4934_v60 = vrot.slane %v4933_v13, 4  ;;  %v5005_v32 = vadd.f32 %v5004_v3, %v4974_v26  ;;  %s5019_s9 = sand.u32 1, %s7090_s21   ;;  %s5730_s26 = sshll.u32 %s7012_s18, 4  ;;  %v4942_v54 = vld [vmem:[%s8913_s25] sm:$0x1] }
 0x2a7   : > { %s5055_s30 = sshll.u32 %s8909_s23, 4  ;;  %s5068_s27 = sshll.u32 %s8913_s25, 4  ;;  %s8991_s30 = int_to_ptr.vmem [resolvable:$true] %s5055_s30  ;;  %s8999_s27 = int_to_ptr.vmem [resolvable:$true] %s5068_s27 }
 0x2a8   : > { %v4935_v24 = vadd.f32 %v4934_v60, %v4933_v13  ;;  %v5006_v53 = vrot.slane %v5005_v32, 4  ;;  %s8989_s6 = scalar_lea.hbm %s9076_s3, %s5730_s26  ;;  %s8997_s7 = scalar_lea.hbm %s9077_s4, %s5730_s26 }
 0x2a9   : > { %s9001_s28 = scalar_lea.sflag [#allocation9], %s5019_s9  ;;  %s6902_s13 = scalar_lea.vmem %s8991_s30, 16 }
 0x2aa   : > { %v4936_v12 = vrot.slane %v4935_v24, 2  ;;  %v5007_v40 = vadd.f32 %v5006_v53, %v5005_v32  ;;  %p6903_p13 = scmp.ne.s32.totalorder %s8991_s30, %s6902_s13  ;;  %s7032_s12 = smov [#allocation8]  }
 0x2ab   : > { %s6906_s10 = sshll.u32 %s7032_s12, 4  ;;  %s6907_s10 = int_to_ptr.vmem [resolvable:$false] %s6906_s10 }
 0x2ac   : > { %v4937_v27 = vadd.f32 %v4936_v12, %v4935_v24  ;;  %v5008_v14 = vrot.slane %v5007_v40, 2  ;;  %p6904_p0 = pnand %p6903_p13, %p7149_p10  ;;  %s6908_s11 = scalar_lea.vmem %s6907_s10, 32 }
 0x2ad   : > { %p6909_p9 = scmp.lt.s32.totalorder %s8991_s30, %s6907_s10  ;;  %p6910_p1 = scmp.lt.s32.totalorder %s6908_s11, %s6902_s13 }
 0x2ae   : > { %v4938_v51 = vrot.slane %v4937_v27, 1  ;;  %v5009_v21 = vadd.f32 %v5008_v14, %v5007_v40  ;;  %p6905_p5 = pneg %p6904_p0 }
 0x2af   : > { %p6911_p2 = por %p6910_p1, %p6909_p9 }
 0x2b0   : > { %v5010_v8 = vrot.slane %v5009_v21, 1  ;;  %v4939_v62 = vadd.f32 %v4938_v51, %v4937_v27 }
 0x2b1   : > { %p6912_p3 = pnand %p6911_p2, %p6905_p5 }
 0x2b2   : > { %v5011_v22 = vadd.f32 %v5010_v8, %v5009_v21  ;;  %v4940_v37 = vadd.f32 %v4939_v62, %v4902_v15 }
 0x2b4   : > { %4941 = vst [vmem:[%s8909_s23] sm:$0x1] %v4940_v37  ;;  %v5012_v43 = vadd.f32 %v5011_v22, %v4942_v54 }
 0x2b5   : > { %6915 = shalt.err (!%p6912_p3)
}
 0x2b6   : > { %s6916_s23 = scalar_lea.hbm %s8989_s6, 16  ;;  %s6920_s14 = scalar_lea.hbm %s9076_s3, 32 }
 0x2b7   : > { %p6917_p7 = scmp.ne.s32.totalorder %s8989_s6, %s6916_s23  ;;  %p6921_p6 = scmp.lt.u32.totalorder %s8989_s6, %s9076_s3 }
 0x2b8   : > { %p6922_p8 = scmp.lt.u32.totalorder %s6920_s14, %s6916_s23  ;;  %p6924_p13 = scmp.lt.u32.totalorder %s6916_s23, %s8989_s6 }
 0x2b9   : > { %p6918_p11 = pnand %p6917_p7, %p7149_p10 }
 0x2ba   : > { %p6923_p12 = por %p6922_p8, %p6921_p6 }
 0x2bb   : > { %p6919_p4 = pneg %p6918_p11 }
 0x2bc   : > { %p6925_p0 = por %p6924_p13, %p6923_p12 }
 0x2be   : > { %p6926_p5 = pnand %p6925_p0, %p6919_p4 }
 0x2c0   : > { %6929 = shalt.err (!%p6926_p5)
}
 0x2c1   : > { %6599 = dma.vmem_to_hbm [thread:$0]  (%p7149_p10), %s8991_s30, 16, %s8989_s6, %s9001_s28   ;;  %5013 = vst [vmem:[%s8913_s25] sm:$0x1] %v5012_v43 }
 0x2c2   : > { %s6930_s13 = scalar_lea.vmem %s8999_s27, 16  ;;  %s7033_s12 = smov [#allocation10]  }
 0x2c3   : > { %p6931_p9 = scmp.ne.s32.totalorder %s8999_s27, %s6930_s13  ;;  %s6934_s10 = sshll.u32 %s7033_s12, 4  ;;  %s6935_s10 = int_to_ptr.vmem [resolvable:$false] %s6934_s10 }
 0x2c4   : > { %s6936_s11 = scalar_lea.vmem %s6935_s10, 32  ;;  %p6937_p3 = scmp.lt.s32.totalorder %s8999_s27, %s6935_s10 }
 0x2c5   : > { %p6932_p1 = pnand %p6931_p9, %p7149_p10  ;;  %p6938_p7 = scmp.lt.s32.totalorder %s6936_s11, %s6930_s13 }
 0x2c7   : > { %p6933_p2 = pneg %p6932_p1  ;;  %p6939_p11 = por %p6938_p7, %p6937_p3 }
 0x2c9   : > { %p6940_p4 = pnand %p6939_p11, %p6933_p2 }
 0x2cb   : > { %6943 = shalt.err (!%p6940_p4)
}
 0x2cc   : > { %s6944_s25 = scalar_lea.hbm %s8997_s7, 16  ;;  %s6948_s23 = scalar_lea.hbm %s9077_s4, 32 }
 0x2cd   : > { %p6945_p6 = scmp.ne.s32.totalorder %s8997_s7, %s6944_s25  ;;  %p6949_p13 = scmp.lt.u32.totalorder %s8997_s7, %s9077_s4 }
 0x2ce   : > { %p6950_p0 = scmp.lt.u32.totalorder %s6948_s23, %s6944_s25  ;;  %p6952_p9 = scmp.lt.u32.totalorder %s6944_s25, %s8997_s7 }
 0x2cf   : > { %p6946_p8 = pnand %p6945_p6, %p7149_p10 }
 0x2d0   : > { %p6951_p5 = por %p6950_p0, %p6949_p13 }
 0x2d1   : > { %p6947_p12 = pneg %p6946_p8 }
 0x2d2   : > { %p6953_p1 = por %p6952_p9, %p6951_p5 }
 0x2d4   : > { %p6954_p2 = pnand %p6953_p1, %p6947_p12 }
 0x2d6   : > { %6957 = shalt.err (!%p6954_p2)
}
 0x2d7   : > { %6600 = dma.vmem_to_hbm [thread:$0]  (%p7149_p10), %s8999_s27, 16, %s8997_s7, %s9001_s28  }
 0x2d8 PF: > { %s5080_s14 = sand.u32 1, %s7000_s15   ;;  %p9153_p3 = scmp.ne.s32.totalorder %s9092_s24, 0 }
 0x2d9   : > { %p9154_p7 = scmp.ge.s32.totalorder %s7020_s20, 2  ;;  %s5081_s18 = scalar_lea.sflag [#allocation4], %s5080_s14 }
 0x2db   : > { %p6613_p11 = pnand %p9154_p7, %p9153_p3 }
 0x2dd   : > { %6991 = dma.done.wait (!%p6613_p11), %s5081_s18, 2048  }
 0x2de   : > { %6993 = vsyncadd (!%p6613_p11), %s5081_s18, 4294965248  ;;  %s5089_s21 = sand.u32 1, %s5223_s22  }
 0x2df   : > { %s5090_s13 = scalar_lea.sflag [#allocation9], %s5089_s21 }
 0x2e0   : > { %6995 = dma.done.wait (!%p6613_p11), %s5090_s13, 32  }
 0x2e1   : > { %6997 = vsyncadd (!%p6613_p11), %s5090_s13, 4294967264  ;;  %s25_s20 = sadd.s32 1, %s7020_s20   ;;  %s9155_s15 = smov %s7004_s16 }
 0x2e2   : > { %p22_p10 = scmp.ge.s32.totalorder %s25_s20, 4   ;;  %s9156_s16 = smov %s7008_s17 }
 0x2e3   : > { %s9157_s17 = smov %s7158_s8  ;;  %s9158_s18 = smov %s7016_s19 }
 0x2e4   : > { %s9159_s19 = smov %s9161_s29  ;;  %24 = sbr.rel (!%p22_p10) target bundleno = 9 (0x9), region = 124 }
 0x2eb   :  { %5102 = vsyncpa [#allocation3], 1 }
 0x2ec   :  { %5104 = vsyncpa [#allocation3 + $0x1], 1 }
 0x2ed   :  { %5105 = vsyncpa [#allocation6], 1 }
 0x2ee   :  { %5106 = vsyncpa [#allocation4], 1 }
 0x2ef   :  { %5108 = vsyncpa [#allocation4 + $0x1], 1 }
 0x2f0   :  { %5109 = vsyncpa [#allocation9], 1 }
 0x2f1   :  { %5111 = vsyncpa [#allocation9 + $0x1], 1 }

</bundles_post_ra>
